<compile_context>
chip_gen: v6e
topology: v6e:2x2x1
jax: 0.10.0
libtpu: 0.0.40
codegen_flags: <defaults>
</compile_context>

<pallas_src>
import functools

import jax
import jax.numpy as jnp
from jax.experimental import pallas as pl
from jax.experimental.pallas import tpu as pltpu


# ----------------------------------------------------------------------------
# Pallas kernels
# ----------------------------------------------------------------------------
def _mm_kernel(apply_relu, has_residual, *refs):
    # (tm, K)bf16 @ (K, N)bf16 -> f32 acc on the MXU, then bias (+residual) (+relu),
    # epilogue in f32, store in out dtype (bf16 for conv layers).
    if has_residual:
        x_ref, w_ref, b_ref, r_ref, o_ref = refs
    else:
        x_ref, w_ref, b_ref, o_ref = refs
        r_ref = None
    y = jnp.dot(x_ref[...], w_ref[...], preferred_element_type=jnp.float32)
    y = y + b_ref[...]
    if r_ref is not None:
        y = y + r_ref[...].astype(jnp.float32)
    if apply_relu:
        y = jnp.maximum(y, 0.0)
    o_ref[...] = y.astype(o_ref.dtype)


def fused_conv_matmul(x, w, bias, residual=None, relu=False, out_dtype=jnp.bfloat16):
    """y = act((x @ w) + bias [+ residual]); x:(M,K) bf16, w:(K,N) bf16 (BN scale folded)."""
    M, K = x.shape
    N = w.shape[1]
    bias = bias.reshape(1, N).astype(jnp.float32)

    # One grid step per conv (largest working set << VMEM).  For the big 32x32-stage
    # convs (M == 2048 at B=2) split M 2-way so both v7x TensorCores get a tile;
    # harmless (still a tiny grid) on single-TC v5e/v6e.
    if M > 1024 and M % 1024 == 0:
        tm = 1024
    else:
        tm = M
    grid = (M // tm,)

    kernel = functools.partial(_mm_kernel, relu, residual is not None)
    in_specs = [
        pl.BlockSpec((tm, K), lambda i: (i, 0)),   # patches tile (bf16)
        pl.BlockSpec((K, N), lambda i: (0, 0)),    # scale-folded weights (resident)
        pl.BlockSpec((1, N), lambda i: (0, 0)),    # folded bn bias (f32)
    ]
    args = [x, w, bias]
    if residual is not None:
        in_specs.append(pl.BlockSpec((tm, N), lambda i: (i, 0)))  # residual tile
        args.append(residual)

    return pl.pallas_call(
        kernel,
        out_shape=jax.ShapeDtypeStruct((M, N), out_dtype),
        grid=grid,
        in_specs=in_specs,
        out_specs=pl.BlockSpec((tm, N), lambda i: (i, 0)),
        compiler_params=pltpu.CompilerParams(dimension_semantics=("parallel",)),
    )(*args)


def _pool_fc_kernel(x_ref, w_ref, b_ref, o_ref):
    # global average pool over H*W, then tiny FC: (B,HW,C) -> (B,num_classes)
    pooled = jnp.mean(x_ref[...].astype(jnp.float32), axis=1)            # (B, C)
    y = jnp.dot(pooled, w_ref[...], preferred_element_type=jnp.float32)  # (B, N)
    o_ref[...] = (y + b_ref[...]).astype(o_ref.dtype)


def pool_and_fc(x_nhwc, fc_w, fc_b):
    """AvgPool2d(kernel_size=H) + Linear fused in one kernel. x:(B,H,W,C) -> (B,num_classes)."""
    B, H, W, C = x_nhwc.shape
    N = fc_b.shape[0]
    x = x_nhwc.reshape(B, H * W, C)
    wm = fc_w.T.astype(jnp.float32)            # (C, N)
    b = fc_b.reshape(1, N).astype(jnp.float32)
    return pl.pallas_call(
        _pool_fc_kernel,
        out_shape=jax.ShapeDtypeStruct((B, N), jnp.float32),
        grid=(1,),
        in_specs=[
            pl.BlockSpec((B, H * W, C), lambda i: (0, 0, 0)),
            pl.BlockSpec((C, N), lambda i: (0, 0)),
            pl.BlockSpec((1, N), lambda i: (0, 0)),
        ],
        out_specs=pl.BlockSpec((B, N), lambda i: (0, 0)),
    )(x, wm, b)


# ----------------------------------------------------------------------------
# JAX glue: im2col + conv wrapper
# ----------------------------------------------------------------------------
def im2col(x, kh, kw, stride, pad):
    # x: (B, H, W, C) -> (B*Ho*Wo, C*kh*kw), K flattened with C slowest, then kh, kw
    # (matches PyTorch weight.reshape(Cout, Cin*kh*kw) ordering).
    B, H, W, C = x.shape
    xp = jnp.pad(x, ((0, 0), (pad, pad), (pad, pad), (0, 0)))
    Ho = (H + 2 * pad - kh) // stride + 1
    Wo = (W + 2 * pad - kw) // stride + 1
    cols = []
    for i in range(kh):
        for j in range(kw):
            cols.append(xp[:, i:i + stride * Ho:stride, j:j + stride * Wo:stride, :])
    p = jnp.stack(cols, axis=0).reshape(kh, kw, B, Ho, Wo, C)
    p = p.transpose(2, 3, 4, 5, 0, 1).reshape(B * Ho * Wo, C * kh * kw)
    return p, Ho, Wo


def conv_bn_act(x, w, bn_scale, bn_bias, stride, pad, relu, residual=None):
    # w: (Cout, Cin, kh, kw) PyTorch layout, conv bias=False.  BN scale folded into w.
    Cout, Cin, kh, kw = w.shape
    B = x.shape[0]
    patches, Ho, Wo = im2col(x, kh, kw, stride, pad)                    # bf16 (M, K)
    wm = (w.reshape(Cout, Cin * kh * kw).T
          * bn_scale[None, :]).astype(jnp.bfloat16)                     # constant-folded
    res = residual.reshape(B * Ho * Wo, Cout) if residual is not None else None
    y = fused_conv_matmul(patches, wm, bn_bias, res, relu)
    return y.reshape(B, Ho, Wo, Cout)


# ----------------------------------------------------------------------------
# Deterministic parameter initialization (synthetic; no checkpoint load)
# ----------------------------------------------------------------------------
def fold_bn(key, c, eps=1e-5):
    k1, k2, k3, k4 = jax.random.split(key, 4)
    gamma = jax.random.uniform(k1, (c,), minval=0.5, maxval=1.5)
    beta = 0.1 * jax.random.normal(k2, (c,))
    mean = 0.1 * jax.random.normal(k3, (c,))
    var = jax.random.uniform(k4, (c,), minval=0.5, maxval=1.5)
    scale = gamma / jnp.sqrt(var + eps)
    bias = beta - mean * scale
    return scale.astype(jnp.float32), bias.astype(jnp.float32)


def conv_w(key, cout, cin, k):
    fan_in = cin * k * k
    return (jax.random.normal(key, (cout, cin, k, k)) *
            jnp.sqrt(2.0 / fan_in)).astype(jnp.float32)


def init_params(key, depth=8, width_multiplier=1, num_classes=10):
    assert (depth - 2) % 6 == 0, "depth should be 6n+2"
    n = (depth - 2) // 6
    keys = iter(jax.random.split(key, 256))

    params = {"conv1_w": conv_w(next(keys), 16, 3, 3), "bn1": fold_bn(next(keys), 16)}
    in_planes = 16
    layers = []
    for planes, stride in ((16 * width_multiplier, 1),
                           (32 * width_multiplier, 2),
                           (64 * width_multiplier, 2)):
        blocks = []
        for b in range(n):
            s = stride if b == 0 else 1
            blk = {
                "conv1_w": conv_w(next(keys), planes, in_planes, 3),
                "bn1": fold_bn(next(keys), planes),
                "conv2_w": conv_w(next(keys), planes, planes, 3),
                "bn2": fold_bn(next(keys), planes),
            }
            if s != 1 or in_planes != planes:  # down_type='conv'
                blk["down_w"] = conv_w(next(keys), planes, in_planes, 1)
                blk["down_bn"] = fold_bn(next(keys), planes)
            blocks.append(blk)
            in_planes = planes
        layers.append(blocks)
    params["layers"] = layers

    num_features = 64 * width_multiplier  # BasicBlock.expansion == 1
    kf1, kf2 = jax.random.split(next(keys))
    params["fc_w"] = (jax.random.normal(kf1, (num_classes, num_features)) /
                      jnp.sqrt(num_features)).astype(jnp.float32)
    params["fc_b"] = (0.01 * jax.random.normal(kf2, (num_classes,))).astype(jnp.float32)
    return params


# ----------------------------------------------------------------------------
# Forward pass
# ----------------------------------------------------------------------------
def basic_block_forward(x, blk, stride):
    out = conv_bn_act(x, blk["conv1_w"], *blk["bn1"], stride=stride, pad=1, relu=True)
    if "down_w" in blk:
        shortcut = conv_bn_act(x, blk["down_w"], *blk["down_bn"],
                               stride=stride, pad=0, relu=False)
    else:
        shortcut = x
    # out = relu(bn2(conv2(out)) + shortcut) — residual + relu fused in the kernel
    out = conv_bn_act(out, blk["conv2_w"], *blk["bn2"],
                      stride=1, pad=1, relu=True, residual=shortcut)
    return out


def resnet_cifar_forward(params, x_nchw):
    # NCHW -> NHWC, activations kept in bf16 between layers (dot operands bf16,
    # accumulation/epilogue f32 inside the kernels).
    x = jnp.transpose(x_nchw, (0, 2, 3, 1)).astype(jnp.bfloat16)
    out = conv_bn_act(x, params["conv1_w"], *params["bn1"], stride=1, pad=1, relu=True)
    for layer, layer_stride in zip(params["layers"], (1, 2, 2)):
        for b, blk in enumerate(layer):
            out = basic_block_forward(out, blk, layer_stride if b == 0 else 1)
    # fused global average pool + Linear (x @ W.T + b), f32 logits
    logits = pool_and_fc(out, params["fc_w"], params["fc_b"])
    return logits


if __name__ == "__main__":
    key = jax.random.PRNGKey(0)
    kp, kx = jax.random.split(key)
    params = init_params(kp, depth=8, width_multiplier=1, num_classes=10)
    # CIFAR-shaped input (NCHW like PyTorch); 32x32 required so AvgPool2d(8) is global.
    x = jax.random.normal(kx, (2, 3, 32, 32), jnp.float32)

    fwd = jax.jit(lambda inp: resnet_cifar_forward(params, inp))
    out = jax.block_until_ready(fwd(x))
    assert out.shape == (2, 10) and out.dtype == jnp.float32
    print("KERNEL_OK")
</pallas_src>

<mosaic_0001>
module attributes {stable_mosaic.version = 11 : i64} {
  func.func @_mm_kernel(%arg0: i32, %arg1: memref<1024x27xbf16, #tpu.memory_space<vmem>>, %arg2: memref<27x16xbf16, #tpu.memory_space<vmem>>, %arg3: memref<1x16xf32, #tpu.memory_space<vmem>>, %arg4: memref<1024x16xbf16, #tpu.memory_space<vmem>>) attributes {dimension_semantics = [#tpu.dimension_semantics<parallel>], iteration_bounds = array<i64: 2>, scalar_prefetch = 0 : i64, scratch_operands = 0 : i64, tpu.core_type = #tpu.core_type<tc>, window_params = [{transform_indices = @transform_0, window_bounds = array<i64: 1024, 27>}, {pipeline_mode = #tpu.pipeline_mode<synchronous>, transform_indices = @transform_1, window_bounds = array<i64: 27, 16>}, {pipeline_mode = #tpu.pipeline_mode<synchronous>, transform_indices = @transform_2, window_bounds = array<i64: 1, 16>}, {transform_indices = @transform_3, window_bounds = array<i64: 1024, 16>}]} {
    %c0 = arith.constant 0 : index
    %c0_0 = arith.constant 0 : index
    %0 = vector.load %arg1[%c0, %c0_0] : memref<1024x27xbf16, #tpu.memory_space<vmem>>, vector<1024x27xbf16>
    %c0_1 = arith.constant 0 : index
    %c0_2 = arith.constant 0 : index
    %1 = vector.load %arg2[%c0_1, %c0_2] : memref<27x16xbf16, #tpu.memory_space<vmem>>, vector<27x16xbf16>
    %cst = arith.constant dense<0.000000e+00> : vector<1024x16xf32>
    %2 = tpu.matmul %0, %1, %cst {dimension_numbers = #tpu.dot_dimension_numbers<[1], [0], [0], [1], [0, 0, 1, 1], [], []>} : vector<1024x27xbf16>, vector<27x16xbf16>, vector<1024x16xf32> -> vector<1024x16xf32>
    %c0_3 = arith.constant 0 : index
    %c0_4 = arith.constant 0 : index
    %3 = vector.load %arg3[%c0_3, %c0_4] : memref<1x16xf32, #tpu.memory_space<vmem>>, vector<1x16xf32>
    %4 = vector.broadcast %3 : vector<1x16xf32> to vector<1024x16xf32>
    %5 = arith.addf %2, %4 : vector<1024x16xf32>
    %cst_5 = arith.constant 0.000000e+00 : f32
    %6 = vector.broadcast %cst_5 : f32 to vector<1024x16xf32>
    %7 = arith.maximumf %5, %6 : vector<1024x16xf32>
    %8 = arith.truncf %7 : vector<1024x16xf32> to vector<1024x16xbf16>
    %c0_6 = arith.constant 0 : index
    %c0_7 = arith.constant 0 : index
    %9 = vector.load %arg4[%c0_6, %c0_7] : memref<1024x16xbf16, #tpu.memory_space<vmem>>, vector<1024x16xbf16>
    tpu.vector_store %arg4[%c0_6, %c0_7], %8 {strides = array<i32>} : memref<1024x16xbf16, #tpu.memory_space<vmem>>, vector<1024x16xbf16>,
    return
  }
  func.func @transform_0(%arg0: i32) -> (i32, i32) {
    %c0_i32 = arith.constant 0 : i32
    %c0_i32_0 = arith.constant 0 : i32
    return %arg0, %c0_i32 : i32, i32
  }
  func.func @transform_1(%arg0: i32) -> (i32, i32) {
    %c0_i32 = arith.constant 0 : i32
    %c0_i32_0 = arith.constant 0 : i32
    %c0_i32_1 = arith.constant 0 : i32
    return %c0_i32, %c0_i32_0 : i32, i32
  }
  func.func @transform_2(%arg0: i32) -> (i32, i32) {
    %c0_i32 = arith.constant 0 : i32
    %c0_i32_0 = arith.constant 0 : i32
    %c0_i32_1 = arith.constant 0 : i32
    return %c0_i32, %c0_i32_0 : i32, i32
  }
  func.func @transform_3(%arg0: i32) -> (i32, i32) {
    %c0_i32 = arith.constant 0 : i32
    %c0_i32_0 = arith.constant 0 : i32
    return %arg0, %c0_i32 : i32, i32
  }
}

module attributes {stable_mosaic.version = 11 : i64} {
  func.func @_mm_kernel(%arg0: i32, %arg1: memref<1024x144xbf16, #tpu.memory_space<vmem>>, %arg2: memref<144x16xbf16, #tpu.memory_space<vmem>>, %arg3: memref<1x16xf32, #tpu.memory_space<vmem>>, %arg4: memref<1024x16xbf16, #tpu.memory_space<vmem>>) attributes {dimension_semantics = [#tpu.dimension_semantics<parallel>], iteration_bounds = array<i64: 2>, scalar_prefetch = 0 : i64, scratch_operands = 0 : i64, tpu.core_type = #tpu.core_type<tc>, window_params = [{transform_indices = @transform_0, window_bounds = array<i64: 1024, 144>}, {pipeline_mode = #tpu.pipeline_mode<synchronous>, transform_indices = @transform_1, window_bounds = array<i64: 144, 16>}, {pipeline_mode = #tpu.pipeline_mode<synchronous>, transform_indices = @transform_2, window_bounds = array<i64: 1, 16>}, {transform_indices = @transform_3, window_bounds = array<i64: 1024, 16>}]} {
    %c0 = arith.constant 0 : index
    %c0_0 = arith.constant 0 : index
    %0 = vector.load %arg1[%c0, %c0_0] : memref<1024x144xbf16, #tpu.memory_space<vmem>>, vector<1024x144xbf16>
    %c0_1 = arith.constant 0 : index
    %c0_2 = arith.constant 0 : index
    %1 = vector.load %arg2[%c0_1, %c0_2] : memref<144x16xbf16, #tpu.memory_space<vmem>>, vector<144x16xbf16>
    %cst = arith.constant dense<0.000000e+00> : vector<1024x16xf32>
    %2 = tpu.matmul %0, %1, %cst {dimension_numbers = #tpu.dot_dimension_numbers<[1], [0], [0], [1], [0, 0, 1, 1], [], []>} : vector<1024x144xbf16>, vector<144x16xbf16>, vector<1024x16xf32> -> vector<1024x16xf32>
    %c0_3 = arith.constant 0 : index
    %c0_4 = arith.constant 0 : index
    %3 = vector.load %arg3[%c0_3, %c0_4] : memref<1x16xf32, #tpu.memory_space<vmem>>, vector<1x16xf32>
    %4 = vector.broadcast %3 : vector<1x16xf32> to vector<1024x16xf32>
    %5 = arith.addf %2, %4 : vector<1024x16xf32>
    %cst_5 = arith.constant 0.000000e+00 : f32
    %6 = vector.broadcast %cst_5 : f32 to vector<1024x16xf32>
    %7 = arith.maximumf %5, %6 : vector<1024x16xf32>
    %8 = arith.truncf %7 : vector<1024x16xf32> to vector<1024x16xbf16>
    %c0_6 = arith.constant 0 : index
    %c0_7 = arith.constant 0 : index
    %9 = vector.load %arg4[%c0_6, %c0_7] : memref<1024x16xbf16, #tpu.memory_space<vmem>>, vector<1024x16xbf16>
    tpu.vector_store %arg4[%c0_6, %c0_7], %8 {strides = array<i32>} : memref<1024x16xbf16, #tpu.memory_space<vmem>>, vector<1024x16xbf16>,
    return
  }
  func.func @transform_0(%arg0: i32) -> (i32, i32) {
    %c0_i32 = arith.constant 0 : i32
    %c0_i32_0 = arith.constant 0 : i32
    return %arg0, %c0_i32 : i32, i32
  }
  func.func @transform_1(%arg0: i32) -> (i32, i32) {
    %c0_i32 = arith.constant 0 : i32
    %c0_i32_0 = arith.constant 0 : i32
    %c0_i32_1 = arith.constant 0 : i32
    return %c0_i32, %c0_i32_0 : i32, i32
  }
  func.func @transform_2(%arg0: i32) -> (i32, i32) {
    %c0_i32 = arith.constant 0 : i32
    %c0_i32_0 = arith.constant 0 : i32
    %c0_i32_1 = arith.constant 0 : i32
    return %c0_i32, %c0_i32_0 : i32, i32
  }
  func.func @transform_3(%arg0: i32) -> (i32, i32) {
    %c0_i32 = arith.constant 0 : i32
    %c0_i32_0 = arith.constant 0 : i32
    return %arg0, %c0_i32 : i32, i32
  }
}

module attributes {stable_mosaic.version = 11 : i64} {
  func.func @_mm_kernel(%arg0: i32, %arg1: memref<1024x144xbf16, #tpu.memory_space<vmem>>, %arg2: memref<144x16xbf16, #tpu.memory_space<vmem>>, %arg3: memref<1x16xf32, #tpu.memory_space<vmem>>, %arg4: memref<1024x16xbf16, #tpu.memory_space<vmem>>, %arg5: memref<1024x16xbf16, #tpu.memory_space<vmem>>) attributes {dimension_semantics = [#tpu.dimension_semantics<parallel>], iteration_bounds = array<i64: 2>, scalar_prefetch = 0 : i64, scratch_operands = 0 : i64, tpu.core_type = #tpu.core_type<tc>, window_params = [{transform_indices = @transform_0, window_bounds = array<i64: 1024, 144>}, {pipeline_mode = #tpu.pipeline_mode<synchronous>, transform_indices = @transform_1, window_bounds = array<i64: 144, 16>}, {pipeline_mode = #tpu.pipeline_mode<synchronous>, transform_indices = @transform_2, window_bounds = array<i64: 1, 16>}, {transform_indices = @transform_3, window_bounds = array<i64: 1024, 16>}, {transform_indices = @transform_4, window_bounds = array<i64: 1024, 16>}]} {
    %c0 = arith.constant 0 : index
    %c0_0 = arith.constant 0 : index
    %0 = vector.load %arg1[%c0, %c0_0] : memref<1024x144xbf16, #tpu.memory_space<vmem>>, vector<1024x144xbf16>
    %c0_1 = arith.constant 0 : index
    %c0_2 = arith.constant 0 : index
    %1 = vector.load %arg2[%c0_1, %c0_2] : memref<144x16xbf16, #tpu.memory_space<vmem>>, vector<144x16xbf16>
    %cst = arith.constant dense<0.000000e+00> : vector<1024x16xf32>
    %2 = tpu.matmul %0, %1, %cst {dimension_numbers = #tpu.dot_dimension_numbers<[1], [0], [0], [1], [0, 0, 1, 1], [], []>} : vector<1024x144xbf16>, vector<144x16xbf16>, vector<1024x16xf32> -> vector<1024x16xf32>
    %c0_3 = arith.constant 0 : index
    %c0_4 = arith.constant 0 : index
    %3 = vector.load %arg3[%c0_3, %c0_4] : memref<1x16xf32, #tpu.memory_space<vmem>>, vector<1x16xf32>
    %4 = vector.broadcast %3 : vector<1x16xf32> to vector<1024x16xf32>
    %5 = arith.addf %2, %4 : vector<1024x16xf32>
    %c0_5 = arith.constant 0 : index
    %c0_6 = arith.constant 0 : index
    %6 = vector.load %arg4[%c0_5, %c0_6] : memref<1024x16xbf16, #tpu.memory_space<vmem>>, vector<1024x16xbf16>
    %7 = arith.extf %6 : vector<1024x16xbf16> to vector<1024x16xf32>
    %8 = arith.addf %5, %7 : vector<1024x16xf32>
    %cst_7 = arith.constant 0.000000e+00 : f32
    %9 = vector.broadcast %cst_7 : f32 to vector<1024x16xf32>
    %10 = arith.maximumf %8, %9 : vector<1024x16xf32>
    %11 = arith.truncf %10 : vector<1024x16xf32> to vector<1024x16xbf16>
    %c0_8 = arith.constant 0 : index
    %c0_9 = arith.constant 0 : index
    %12 = vector.load %arg5[%c0_8, %c0_9] : memref<1024x16xbf16, #tpu.memory_space<vmem>>, vector<1024x16xbf16>
    tpu.vector_store %arg5[%c0_8, %c0_9], %11 {strides = array<i32>} : memref<1024x16xbf16, #tpu.memory_space<vmem>>, vector<1024x16xbf16>,
    return
  }
  func.func @transform_0(%arg0: i32) -> (i32, i32) {
    %c0_i32 = arith.constant 0 : i32
    %c0_i32_0 = arith.constant 0 : i32
    return %arg0, %c0_i32 : i32, i32
  }
  func.func @transform_1(%arg0: i32) -> (i32, i32) {
    %c0_i32 = arith.constant 0 : i32
    %c0_i32_0 = arith.constant 0 : i32
    %c0_i32_1 = arith.constant 0 : i32
    return %c0_i32, %c0_i32_0 : i32, i32
  }
  func.func @transform_2(%arg0: i32) -> (i32, i32) {
    %c0_i32 = arith.constant 0 : i32
    %c0_i32_0 = arith.constant 0 : i32
    %c0_i32_1 = arith.constant 0 : i32
    return %c0_i32, %c0_i32_0 : i32, i32
  }
  func.func @transform_3(%arg0: i32) -> (i32, i32) {
    %c0_i32 = arith.constant 0 : i32
    %c0_i32_0 = arith.constant 0 : i32
    return %arg0, %c0_i32 : i32, i32
  }
  func.func @transform_4(%arg0: i32) -> (i32, i32) {
    %c0_i32 = arith.constant 0 : i32
    %c0_i32_0 = arith.constant 0 : i32
    return %arg0, %c0_i32 : i32, i32
  }
}

module attributes {stable_mosaic.version = 11 : i64} {
  func.func @_mm_kernel(%arg0: i32, %arg1: memref<512x16xbf16, #tpu.memory_space<vmem>>, %arg2: memref<16x32xbf16, #tpu.memory_space<vmem>>, %arg3: memref<1x32xf32, #tpu.memory_space<vmem>>, %arg4: memref<512x32xbf16, #tpu.memory_space<vmem>>) attributes {dimension_semantics = [#tpu.dimension_semantics<parallel>], iteration_bounds = array<i64: 1>, scalar_prefetch = 0 : i64, scratch_operands = 0 : i64, tpu.core_type = #tpu.core_type<tc>, window_params = [{transform_indices = @transform_0, window_bounds = array<i64: 512, 16>}, {pipeline_mode = #tpu.pipeline_mode<synchronous>, transform_indices = @transform_1, window_bounds = array<i64: 16, 32>}, {pipeline_mode = #tpu.pipeline_mode<synchronous>, transform_indices = @transform_2, window_bounds = array<i64: 1, 32>}, {transform_indices = @transform_3, window_bounds = array<i64: 512, 32>}]} {
    %c0 = arith.constant 0 : index
    %c0_0 = arith.constant 0 : index
    %0 = vector.load %arg1[%c0, %c0_0] : memref<512x16xbf16, #tpu.memory_space<vmem>>, vector<512x16xbf16>
    %c0_1 = arith.constant 0 : index
    %c0_2 = arith.constant 0 : index
    %1 = vector.load %arg2[%c0_1, %c0_2] : memref<16x32xbf16, #tpu.memory_space<vmem>>, vector<16x32xbf16>
    %cst = arith.constant dense<0.000000e+00> : vector<512x32xf32>
    %2 = tpu.matmul %0, %1, %cst {dimension_numbers = #tpu.dot_dimension_numbers<[1], [0], [0], [1], [0, 0, 1, 1], [], []>} : vector<512x16xbf16>, vector<16x32xbf16>, vector<512x32xf32> -> vector<512x32xf32>
    %c0_3 = arith.constant 0 : index
    %c0_4 = arith.constant 0 : index
    %3 = vector.load %arg3[%c0_3, %c0_4] : memref<1x32xf32, #tpu.memory_space<vmem>>, vector<1x32xf32>
    %4 = vector.broadcast %3 : vector<1x32xf32> to vector<512x32xf32>
    %5 = arith.addf %2, %4 : vector<512x32xf32>
    %6 = arith.truncf %5 : vector<512x32xf32> to vector<512x32xbf16>
    %c0_5 = arith.constant 0 : index
    %c0_6 = arith.constant 0 : index
    %7 = vector.load %arg4[%c0_5, %c0_6] : memref<512x32xbf16, #tpu.memory_space<vmem>>, vector<512x32xbf16>
    tpu.vector_store %arg4[%c0_5, %c0_6], %6 {strides = array<i32>} : memref<512x32xbf16, #tpu.memory_space<vmem>>, vector<512x32xbf16>,
    return
  }
  func.func @transform_0(%arg0: i32) -> (i32, i32) {
    %c0_i32 = arith.constant 0 : i32
    %c0_i32_0 = arith.constant 0 : i32
    return %arg0, %c0_i32 : i32, i32
  }
  func.func @transform_1(%arg0: i32) -> (i32, i32) {
    %c0_i32 = arith.constant 0 : i32
    %c0_i32_0 = arith.constant 0 : i32
    %c0_i32_1 = arith.constant 0 : i32
    return %c0_i32, %c0_i32_0 : i32, i32
  }
  func.func @transform_2(%arg0: i32) -> (i32, i32) {
    %c0_i32 = arith.constant 0 : i32
    %c0_i32_0 = arith.constant 0 : i32
    %c0_i32_1 = arith.constant 0 : i32
    return %c0_i32, %c0_i32_0 : i32, i32
  }
  func.func @transform_3(%arg0: i32) -> (i32, i32) {
    %c0_i32 = arith.constant 0 : i32
    %c0_i32_0 = arith.constant 0 : i32
    return %arg0, %c0_i32 : i32, i32
  }
}

module attributes {stable_mosaic.version = 11 : i64} {
  func.func @_mm_kernel(%arg0: i32, %arg1: memref<512x144xbf16, #tpu.memory_space<vmem>>, %arg2: memref<144x32xbf16, #tpu.memory_space<vmem>>, %arg3: memref<1x32xf32, #tpu.memory_space<vmem>>, %arg4: memref<512x32xbf16, #tpu.memory_space<vmem>>) attributes {dimension_semantics = [#tpu.dimension_semantics<parallel>], iteration_bounds = array<i64: 1>, scalar_prefetch = 0 : i64, scratch_operands = 0 : i64, tpu.core_type = #tpu.core_type<tc>, window_params = [{transform_indices = @transform_0, window_bounds = array<i64: 512, 144>}, {pipeline_mode = #tpu.pipeline_mode<synchronous>, transform_indices = @transform_1, window_bounds = array<i64: 144, 32>}, {pipeline_mode = #tpu.pipeline_mode<synchronous>, transform_indices = @transform_2, window_bounds = array<i64: 1, 32>}, {transform_indices = @transform_3, window_bounds = array<i64: 512, 32>}]} {
    %c0 = arith.constant 0 : index
    %c0_0 = arith.constant 0 : index
    %0 = vector.load %arg1[%c0, %c0_0] : memref<512x144xbf16, #tpu.memory_space<vmem>>, vector<512x144xbf16>
    %c0_1 = arith.constant 0 : index
    %c0_2 = arith.constant 0 : index
    %1 = vector.load %arg2[%c0_1, %c0_2] : memref<144x32xbf16, #tpu.memory_space<vmem>>, vector<144x32xbf16>
    %cst = arith.constant dense<0.000000e+00> : vector<512x32xf32>
    %2 = tpu.matmul %0, %1, %cst {dimension_numbers = #tpu.dot_dimension_numbers<[1], [0], [0], [1], [0, 0, 1, 1], [], []>} : vector<512x144xbf16>, vector<144x32xbf16>, vector<512x32xf32> -> vector<512x32xf32>
    %c0_3 = arith.constant 0 : index
    %c0_4 = arith.constant 0 : index
    %3 = vector.load %arg3[%c0_3, %c0_4] : memref<1x32xf32, #tpu.memory_space<vmem>>, vector<1x32xf32>
    %4 = vector.broadcast %3 : vector<1x32xf32> to vector<512x32xf32>
    %5 = arith.addf %2, %4 : vector<512x32xf32>
    %cst_5 = arith.constant 0.000000e+00 : f32
    %6 = vector.broadcast %cst_5 : f32 to vector<512x32xf32>
    %7 = arith.maximumf %5, %6 : vector<512x32xf32>
    %8 = arith.truncf %7 : vector<512x32xf32> to vector<512x32xbf16>
    %c0_6 = arith.constant 0 : index
    %c0_7 = arith.constant 0 : index
    %9 = vector.load %arg4[%c0_6, %c0_7] : memref<512x32xbf16, #tpu.memory_space<vmem>>, vector<512x32xbf16>
    tpu.vector_store %arg4[%c0_6, %c0_7], %8 {strides = array<i32>} : memref<512x32xbf16, #tpu.memory_space<vmem>>, vector<512x32xbf16>,
    return
  }
  func.func @transform_0(%arg0: i32) -> (i32, i32) {
    %c0_i32 = arith.constant 0 : i32
    %c0_i32_0 = arith.constant 0 : i32
    return %arg0, %c0_i32 : i32, i32
  }
  func.func @transform_1(%arg0: i32) -> (i32, i32) {
    %c0_i32 = arith.constant 0 : i32
    %c0_i32_0 = arith.constant 0 : i32
    %c0_i32_1 = arith.constant 0 : i32
    return %c0_i32, %c0_i32_0 : i32, i32
  }
  func.func @transform_2(%arg0: i32) -> (i32, i32) {
    %c0_i32 = arith.constant 0 : i32
    %c0_i32_0 = arith.constant 0 : i32
    %c0_i32_1 = arith.constant 0 : i32
    return %c0_i32, %c0_i32_0 : i32, i32
  }
  func.func @transform_3(%arg0: i32) -> (i32, i32) {
    %c0_i32 = arith.constant 0 : i32
    %c0_i32_0 = arith.constant 0 : i32
    return %arg0, %c0_i32 : i32, i32
  }
}

module attributes {stable_mosaic.version = 11 : i64} {
  func.func @_mm_kernel(%arg0: i32, %arg1: memref<512x288xbf16, #tpu.memory_space<vmem>>, %arg2: memref<288x32xbf16, #tpu.memory_space<vmem>>, %arg3: memref<1x32xf32, #tpu.memory_space<vmem>>, %arg4: memref<512x32xbf16, #tpu.memory_space<vmem>>, %arg5: memref<512x32xbf16, #tpu.memory_space<vmem>>) attributes {dimension_semantics = [#tpu.dimension_semantics<parallel>], iteration_bounds = array<i64: 1>, scalar_prefetch = 0 : i64, scratch_operands = 0 : i64, tpu.core_type = #tpu.core_type<tc>, window_params = [{transform_indices = @transform_0, window_bounds = array<i64: 512, 288>}, {pipeline_mode = #tpu.pipeline_mode<synchronous>, transform_indices = @transform_1, window_bounds = array<i64: 288, 32>}, {pipeline_mode = #tpu.pipeline_mode<synchronous>, transform_indices = @transform_2, window_bounds = array<i64: 1, 32>}, {transform_indices = @transform_3, window_bounds = array<i64: 512, 32>}, {transform_indices = @transform_4, window_bounds = array<i64: 512, 32>}]} {
    %c0 = arith.constant 0 : index
    %c0_0 = arith.constant 0 : index
    %0 = vector.load %arg1[%c0, %c0_0] : memref<512x288xbf16, #tpu.memory_space<vmem>>, vector<512x288xbf16>
    %c0_1 = arith.constant 0 : index
    %c0_2 = arith.constant 0 : index
    %1 = vector.load %arg2[%c0_1, %c0_2] : memref<288x32xbf16, #tpu.memory_space<vmem>>, vector<288x32xbf16>
    %cst = arith.constant dense<0.000000e+00> : vector<512x32xf32>
    %2 = tpu.matmul %0, %1, %cst {dimension_numbers = #tpu.dot_dimension_numbers<[1], [0], [0], [1], [0, 0, 1, 1], [], []>} : vector<512x288xbf16>, vector<288x32xbf16>, vector<512x32xf32> -> vector<512x32xf32>
    %c0_3 = arith.constant 0 : index
    %c0_4 = arith.constant 0 : index
    %3 = vector.load %arg3[%c0_3, %c0_4] : memref<1x32xf32, #tpu.memory_space<vmem>>, vector<1x32xf32>
    %4 = vector.broadcast %3 : vector<1x32xf32> to vector<512x32xf32>
    %5 = arith.addf %2, %4 : vector<512x32xf32>
    %c0_5 = arith.constant 0 : index
    %c0_6 = arith.constant 0 : index
    %6 = vector.load %arg4[%c0_5, %c0_6] : memref<512x32xbf16, #tpu.memory_space<vmem>>, vector<512x32xbf16>
    %7 = arith.extf %6 : vector<512x32xbf16> to vector<512x32xf32>
    %8 = arith.addf %5, %7 : vector<512x32xf32>
    %cst_7 = arith.constant 0.000000e+00 : f32
    %9 = vector.broadcast %cst_7 : f32 to vector<512x32xf32>
    %10 = arith.maximumf %8, %9 : vector<512x32xf32>
    %11 = arith.truncf %10 : vector<512x32xf32> to vector<512x32xbf16>
    %c0_8 = arith.constant 0 : index
    %c0_9 = arith.constant 0 : index
    %12 = vector.load %arg5[%c0_8, %c0_9] : memref<512x32xbf16, #tpu.memory_space<vmem>>, vector<512x32xbf16>
    tpu.vector_store %arg5[%c0_8, %c0_9], %11 {strides = array<i32>} : memref<512x32xbf16, #tpu.memory_space<vmem>>, vector<512x32xbf16>,
    return
  }
  func.func @transform_0(%arg0: i32) -> (i32, i32) {
    %c0_i32 = arith.constant 0 : i32
    %c0_i32_0 = arith.constant 0 : i32
    return %arg0, %c0_i32 : i32, i32
  }
  func.func @transform_1(%arg0: i32) -> (i32, i32) {
    %c0_i32 = arith.constant 0 : i32
    %c0_i32_0 = arith.constant 0 : i32
    %c0_i32_1 = arith.constant 0 : i32
    return %c0_i32, %c0_i32_0 : i32, i32
  }
  func.func @transform_2(%arg0: i32) -> (i32, i32) {
    %c0_i32 = arith.constant 0 : i32
    %c0_i32_0 = arith.constant 0 : i32
    %c0_i32_1 = arith.constant 0 : i32
    return %c0_i32, %c0_i32_0 : i32, i32
  }
  func.func @transform_3(%arg0: i32) -> (i32, i32) {
    %c0_i32 = arith.constant 0 : i32
    %c0_i32_0 = arith.constant 0 : i32
    return %arg0, %c0_i32 : i32, i32
  }
  func.func @transform_4(%arg0: i32) -> (i32, i32) {
    %c0_i32 = arith.constant 0 : i32
    %c0_i32_0 = arith.constant 0 : i32
    return %arg0, %c0_i32 : i32, i32
  }
}

module attributes {stable_mosaic.version = 11 : i64} {
  func.func @_mm_kernel(%arg0: i32, %arg1: memref<128x32xbf16, #tpu.memory_space<vmem>>, %arg2: memref<32x64xbf16, #tpu.memory_space<vmem>>, %arg3: memref<1x64xf32, #tpu.memory_space<vmem>>, %arg4: memref<128x64xbf16, #tpu.memory_space<vmem>>) attributes {dimension_semantics = [#tpu.dimension_semantics<parallel>], iteration_bounds = array<i64: 1>, scalar_prefetch = 0 : i64, scratch_operands = 0 : i64, tpu.core_type = #tpu.core_type<tc>, window_params = [{transform_indices = @transform_0, window_bounds = array<i64: 128, 32>}, {pipeline_mode = #tpu.pipeline_mode<synchronous>, transform_indices = @transform_1, window_bounds = array<i64: 32, 64>}, {pipeline_mode = #tpu.pipeline_mode<synchronous>, transform_indices = @transform_2, window_bounds = array<i64: 1, 64>}, {transform_indices = @transform_3, window_bounds = array<i64: 128, 64>}]} {
    %c0 = arith.constant 0 : index
    %c0_0 = arith.constant 0 : index
    %0 = vector.load %arg1[%c0, %c0_0] : memref<128x32xbf16, #tpu.memory_space<vmem>>, vector<128x32xbf16>
    %c0_1 = arith.constant 0 : index
    %c0_2 = arith.constant 0 : index
    %1 = vector.load %arg2[%c0_1, %c0_2] : memref<32x64xbf16, #tpu.memory_space<vmem>>, vector<32x64xbf16>
    %cst = arith.constant dense<0.000000e+00> : vector<128x64xf32>
    %2 = tpu.matmul %0, %1, %cst {dimension_numbers = #tpu.dot_dimension_numbers<[1], [0], [0], [1], [0, 0, 1, 1], [], []>} : vector<128x32xbf16>, vector<32x64xbf16>, vector<128x64xf32> -> vector<128x64xf32>
    %c0_3 = arith.constant 0 : index
    %c0_4 = arith.constant 0 : index
    %3 = vector.load %arg3[%c0_3, %c0_4] : memref<1x64xf32, #tpu.memory_space<vmem>>, vector<1x64xf32>
    %4 = vector.broadcast %3 : vector<1x64xf32> to vector<128x64xf32>
    %5 = arith.addf %2, %4 : vector<128x64xf32>
    %6 = arith.truncf %5 : vector<128x64xf32> to vector<128x64xbf16>
    %c0_5 = arith.constant 0 : index
    %c0_6 = arith.constant 0 : index
    %7 = vector.load %arg4[%c0_5, %c0_6] : memref<128x64xbf16, #tpu.memory_space<vmem>>, vector<128x64xbf16>
    tpu.vector_store %arg4[%c0_5, %c0_6], %6 {strides = array<i32>} : memref<128x64xbf16, #tpu.memory_space<vmem>>, vector<128x64xbf16>,
    return
  }
  func.func @transform_0(%arg0: i32) -> (i32, i32) {
    %c0_i32 = arith.constant 0 : i32
    %c0_i32_0 = arith.constant 0 : i32
    return %arg0, %c0_i32 : i32, i32
  }
  func.func @transform_1(%arg0: i32) -> (i32, i32) {
    %c0_i32 = arith.constant 0 : i32
    %c0_i32_0 = arith.constant 0 : i32
    %c0_i32_1 = arith.constant 0 : i32
    return %c0_i32, %c0_i32_0 : i32, i32
  }
  func.func @transform_2(%arg0: i32) -> (i32, i32) {
    %c0_i32 = arith.constant 0 : i32
    %c0_i32_0 = arith.constant 0 : i32
    %c0_i32_1 = arith.constant 0 : i32
    return %c0_i32, %c0_i32_0 : i32, i32
  }
  func.func @transform_3(%arg0: i32) -> (i32, i32) {
    %c0_i32 = arith.constant 0 : i32
    %c0_i32_0 = arith.constant 0 : i32
    return %arg0, %c0_i32 : i32, i32
  }
}

module attributes {stable_mosaic.version = 11 : i64} {
  func.func @_mm_kernel(%arg0: i32, %arg1: memref<128x288xbf16, #tpu.memory_space<vmem>>, %arg2: memref<288x64xbf16, #tpu.memory_space<vmem>>, %arg3: memref<1x64xf32, #tpu.memory_space<vmem>>, %arg4: memref<128x64xbf16, #tpu.memory_space<vmem>>) attributes {dimension_semantics = [#tpu.dimension_semantics<parallel>], iteration_bounds = array<i64: 1>, scalar_prefetch = 0 : i64, scratch_operands = 0 : i64, tpu.core_type = #tpu.core_type<tc>, window_params = [{transform_indices = @transform_0, window_bounds = array<i64: 128, 288>}, {pipeline_mode = #tpu.pipeline_mode<synchronous>, transform_indices = @transform_1, window_bounds = array<i64: 288, 64>}, {pipeline_mode = #tpu.pipeline_mode<synchronous>, transform_indices = @transform_2, window_bounds = array<i64: 1, 64>}, {transform_indices = @transform_3, window_bounds = array<i64: 128, 64>}]} {
    %c0 = arith.constant 0 : index
    %c0_0 = arith.constant 0 : index
    %0 = vector.load %arg1[%c0, %c0_0] : memref<128x288xbf16, #tpu.memory_space<vmem>>, vector<128x288xbf16>
    %c0_1 = arith.constant 0 : index
    %c0_2 = arith.constant 0 : index
    %1 = vector.load %arg2[%c0_1, %c0_2] : memref<288x64xbf16, #tpu.memory_space<vmem>>, vector<288x64xbf16>
    %cst = arith.constant dense<0.000000e+00> : vector<128x64xf32>
    %2 = tpu.matmul %0, %1, %cst {dimension_numbers = #tpu.dot_dimension_numbers<[1], [0], [0], [1], [0, 0, 1, 1], [], []>} : vector<128x288xbf16>, vector<288x64xbf16>, vector<128x64xf32> -> vector<128x64xf32>
    %c0_3 = arith.constant 0 : index
    %c0_4 = arith.constant 0 : index
    %3 = vector.load %arg3[%c0_3, %c0_4] : memref<1x64xf32, #tpu.memory_space<vmem>>, vector<1x64xf32>
    %4 = vector.broadcast %3 : vector<1x64xf32> to vector<128x64xf32>
    %5 = arith.addf %2, %4 : vector<128x64xf32>
    %cst_5 = arith.constant 0.000000e+00 : f32
    %6 = vector.broadcast %cst_5 : f32 to vector<128x64xf32>
    %7 = arith.maximumf %5, %6 : vector<128x64xf32>
    %8 = arith.truncf %7 : vector<128x64xf32> to vector<128x64xbf16>
    %c0_6 = arith.constant 0 : index
    %c0_7 = arith.constant 0 : index
    %9 = vector.load %arg4[%c0_6, %c0_7] : memref<128x64xbf16, #tpu.memory_space<vmem>>, vector<128x64xbf16>
    tpu.vector_store %arg4[%c0_6, %c0_7], %8 {strides = array<i32>} : memref<128x64xbf16, #tpu.memory_space<vmem>>, vector<128x64xbf16>,
    return
  }
  func.func @transform_0(%arg0: i32) -> (i32, i32) {
    %c0_i32 = arith.constant 0 : i32
    %c0_i32_0 = arith.constant 0 : i32
    return %arg0, %c0_i32 : i32, i32
  }
  func.func @transform_1(%arg0: i32) -> (i32, i32) {
    %c0_i32 = arith.constant 0 : i32
    %c0_i32_0 = arith.constant 0 : i32
    %c0_i32_1 = arith.constant 0 : i32
    return %c0_i32, %c0_i32_0 : i32, i32
  }
  func.func @transform_2(%arg0: i32) -> (i32, i32) {
    %c0_i32 = arith.constant 0 : i32
    %c0_i32_0 = arith.constant 0 : i32
    %c0_i32_1 = arith.constant 0 : i32
    return %c0_i32, %c0_i32_0 : i32, i32
  }
  func.func @transform_3(%arg0: i32) -> (i32, i32) {
    %c0_i32 = arith.constant 0 : i32
    %c0_i32_0 = arith.constant 0 : i32
    return %arg0, %c0_i32 : i32, i32
  }
}

module attributes {stable_mosaic.version = 11 : i64} {
  func.func @_mm_kernel(%arg0: i32, %arg1: memref<128x576xbf16, #tpu.memory_space<vmem>>, %arg2: memref<576x64xbf16, #tpu.memory_space<vmem>>, %arg3: memref<1x64xf32, #tpu.memory_space<vmem>>, %arg4: memref<128x64xbf16, #tpu.memory_space<vmem>>, %arg5: memref<128x64xbf16, #tpu.memory_space<vmem>>) attributes {dimension_semantics = [#tpu.dimension_semantics<parallel>], iteration_bounds = array<i64: 1>, scalar_prefetch = 0 : i64, scratch_operands = 0 : i64, tpu.core_type = #tpu.core_type<tc>, window_params = [{transform_indices = @transform_0, window_bounds = array<i64: 128, 576>}, {pipeline_mode = #tpu.pipeline_mode<synchronous>, transform_indices = @transform_1, window_bounds = array<i64: 576, 64>}, {pipeline_mode = #tpu.pipeline_mode<synchronous>, transform_indices = @transform_2, window_bounds = array<i64: 1, 64>}, {transform_indices = @transform_3, window_bounds = array<i64: 128, 64>}, {transform_indices = @transform_4, window_bounds = array<i64: 128, 64>}]} {
    %c0 = arith.constant 0 : index
    %c0_0 = arith.constant 0 : index
    %0 = vector.load %arg1[%c0, %c0_0] : memref<128x576xbf16, #tpu.memory_space<vmem>>, vector<128x576xbf16>
    %c0_1 = arith.constant 0 : index
    %c0_2 = arith.constant 0 : index
    %1 = vector.load %arg2[%c0_1, %c0_2] : memref<576x64xbf16, #tpu.memory_space<vmem>>, vector<576x64xbf16>
    %cst = arith.constant dense<0.000000e+00> : vector<128x64xf32>
    %2 = tpu.matmul %0, %1, %cst {dimension_numbers = #tpu.dot_dimension_numbers<[1], [0], [0], [1], [0, 0, 1, 1], [], []>} : vector<128x576xbf16>, vector<576x64xbf16>, vector<128x64xf32> -> vector<128x64xf32>
    %c0_3 = arith.constant 0 : index
    %c0_4 = arith.constant 0 : index
    %3 = vector.load %arg3[%c0_3, %c0_4] : memref<1x64xf32, #tpu.memory_space<vmem>>, vector<1x64xf32>
    %4 = vector.broadcast %3 : vector<1x64xf32> to vector<128x64xf32>
    %5 = arith.addf %2, %4 : vector<128x64xf32>
    %c0_5 = arith.constant 0 : index
    %c0_6 = arith.constant 0 : index
    %6 = vector.load %arg4[%c0_5, %c0_6] : memref<128x64xbf16, #tpu.memory_space<vmem>>, vector<128x64xbf16>
    %7 = arith.extf %6 : vector<128x64xbf16> to vector<128x64xf32>
    %8 = arith.addf %5, %7 : vector<128x64xf32>
    %cst_7 = arith.constant 0.000000e+00 : f32
    %9 = vector.broadcast %cst_7 : f32 to vector<128x64xf32>
    %10 = arith.maximumf %8, %9 : vector<128x64xf32>
    %11 = arith.truncf %10 : vector<128x64xf32> to vector<128x64xbf16>
    %c0_8 = arith.constant 0 : index
    %c0_9 = arith.constant 0 : index
    %12 = vector.load %arg5[%c0_8, %c0_9] : memref<128x64xbf16, #tpu.memory_space<vmem>>, vector<128x64xbf16>
    tpu.vector_store %arg5[%c0_8, %c0_9], %11 {strides = array<i32>} : memref<128x64xbf16, #tpu.memory_space<vmem>>, vector<128x64xbf16>,
    return
  }
  func.func @transform_0(%arg0: i32) -> (i32, i32) {
    %c0_i32 = arith.constant 0 : i32
    %c0_i32_0 = arith.constant 0 : i32
    return %arg0, %c0_i32 : i32, i32
  }
  func.func @transform_1(%arg0: i32) -> (i32, i32) {
    %c0_i32 = arith.constant 0 : i32
    %c0_i32_0 = arith.constant 0 : i32
    %c0_i32_1 = arith.constant 0 : i32
    return %c0_i32, %c0_i32_0 : i32, i32
  }
  func.func @transform_2(%arg0: i32) -> (i32, i32) {
    %c0_i32 = arith.constant 0 : i32
    %c0_i32_0 = arith.constant 0 : i32
    %c0_i32_1 = arith.constant 0 : i32
    return %c0_i32, %c0_i32_0 : i32, i32
  }
  func.func @transform_3(%arg0: i32) -> (i32, i32) {
    %c0_i32 = arith.constant 0 : i32
    %c0_i32_0 = arith.constant 0 : i32
    return %arg0, %c0_i32 : i32, i32
  }
  func.func @transform_4(%arg0: i32) -> (i32, i32) {
    %c0_i32 = arith.constant 0 : i32
    %c0_i32_0 = arith.constant 0 : i32
    return %arg0, %c0_i32 : i32, i32
  }
}

module attributes {stable_mosaic.version = 11 : i64} {
  func.func @_pool_fc_kernel(%arg0: i32, %arg1: memref<2x64x64xbf16, #tpu.memory_space<vmem>>, %arg2: memref<64x10xf32, #tpu.memory_space<vmem>>, %arg3: memref<1x10xf32, #tpu.memory_space<vmem>>, %arg4: memref<2x10xf32, #tpu.memory_space<vmem>>) attributes {dimension_semantics = [#tpu.dimension_semantics<arbitrary>], iteration_bounds = array<i64: 1>, scalar_prefetch = 0 : i64, scratch_operands = 0 : i64, tpu.core_type = #tpu.core_type<tc>, window_params = [{pipeline_mode = #tpu.pipeline_mode<synchronous>, transform_indices = @transform_0, window_bounds = array<i64: 2, 64, 64>}, {pipeline_mode = #tpu.pipeline_mode<synchronous>, transform_indices = @transform_1, window_bounds = array<i64: 64, 10>}, {pipeline_mode = #tpu.pipeline_mode<synchronous>, transform_indices = @transform_2, window_bounds = array<i64: 1, 10>}, {pipeline_mode = #tpu.pipeline_mode<synchronous>, transform_indices = @transform_3, window_bounds = array<i64: 2, 10>}]} {
    %c0 = arith.constant 0 : index
    %c0_0 = arith.constant 0 : index
    %c0_1 = arith.constant 0 : index
    %0 = vector.load %arg1[%c0, %c0_0, %c0_1] : memref<2x64x64xbf16, #tpu.memory_space<vmem>>, vector<2x64x64xbf16>
    %1 = arith.extf %0 : vector<2x64x64xbf16> to vector<2x64x64xf32>
    %cst = arith.constant dense<0.000000e+00> : vector<2x64xf32>
    %2 = vector.multi_reduction <add>, %1, %cst [1] : vector<2x64x64xf32> to vector<2x64xf32>
    %cst_2 = arith.constant 6.400000e+01 : f32
    %3 = vector.broadcast %cst_2 : f32 to vector<2x64xf32>
    %4 = arith.divf %2, %3 : vector<2x64xf32>
    %c0_3 = arith.constant 0 : index
    %c0_4 = arith.constant 0 : index
    %5 = vector.load %arg2[%c0_3, %c0_4] : memref<64x10xf32, #tpu.memory_space<vmem>>, vector<64x10xf32>
    %cst_5 = arith.constant dense<0.000000e+00> : vector<2x10xf32>
    %6 = tpu.matmul %4, %5, %cst_5 {dimension_numbers = #tpu.dot_dimension_numbers<[1], [0], [0], [1], [0, 0, 1, 1], [], []>} : vector<2x64xf32>, vector<64x10xf32>, vector<2x10xf32> -> vector<2x10xf32>
    %c0_6 = arith.constant 0 : index
    %c0_7 = arith.constant 0 : index
    %7 = vector.load %arg3[%c0_6, %c0_7] : memref<1x10xf32, #tpu.memory_space<vmem>>, vector<1x10xf32>
    %8 = vector.broadcast %7 : vector<1x10xf32> to vector<2x10xf32>
    %9 = arith.addf %6, %8 : vector<2x10xf32>
    %c0_8 = arith.constant 0 : index
    %c0_9 = arith.constant 0 : index
    %10 = vector.load %arg4[%c0_8, %c0_9] : memref<2x10xf32, #tpu.memory_space<vmem>>, vector<2x10xf32>
    tpu.vector_store %arg4[%c0_8, %c0_9], %9 {strides = array<i32>} : memref<2x10xf32, #tpu.memory_space<vmem>>, vector<2x10xf32>,
    return
  }
  func.func @transform_0(%arg0: i32) -> (i32, i32, i32) {
    %c0_i32 = arith.constant 0 : i32
    %c0_i32_0 = arith.constant 0 : i32
    %c0_i32_1 = arith.constant 0 : i32
    %c0_i32_2 = arith.constant 0 : i32
    return %c0_i32, %c0_i32_0, %c0_i32_1 : i32, i32, i32
  }
  func.func @transform_1(%arg0: i32) -> (i32, i32) {
    %c0_i32 = arith.constant 0 : i32
    %c0_i32_0 = arith.constant 0 : i32
    %c0_i32_1 = arith.constant 0 : i32
    return %c0_i32, %c0_i32_0 : i32, i32
  }
  func.func @transform_2(%arg0: i32) -> (i32, i32) {
    %c0_i32 = arith.constant 0 : i32
    %c0_i32_0 = arith.constant 0 : i32
    %c0_i32_1 = arith.constant 0 : i32
    return %c0_i32, %c0_i32_0 : i32, i32
  }
  func.func @transform_3(%arg0: i32) -> (i32, i32) {
    %c0_i32 = arith.constant 0 : i32
    %c0_i32_0 = arith.constant 0 : i32
    %c0_i32_1 = arith.constant 0 : i32
    return %c0_i32, %c0_i32_0 : i32, i32
  }
}

</mosaic_0001>

<bundles_post_ra>
// kernel: _lambda_.10
= control target key start
LH: loop header
LB: loop body
LE: loop exit
PB: predicated region body
PF: predicated region fallthrough
CT: control target
= control target key end

     0   :  { %s2920_s12 = smov 0   ;;  %s3476_s0 = inlined_call_operand.vmem [shape: bf16[2048,27], index: 0, kind: input, shape index: {}]   ;;  %s3477_s1 = inlined_call_operand.vmem [shape: bf16[27,16], index: 1, kind: input, shape index: {}]   ;;  %s3478_s2 = inlined_call_operand.vmem [shape: f32[1,16], index: 2, kind: input, shape index: {}]   ;;  %s3479_s3 = inlined_call_operand.vmem [shape: bf16[2048,16], index: 3, kind: output, shape index: {}]  }
   0x1 LB: > { %s2215_s13 = sadd.s32 4294967295, %s2897_s12   ;;  %p2219_p0 = scmp.ge.s32.totalorder %s2897_s12, 1  ;;  %s2897_s12 = sphi %s2920_s12, %s13_s12  }
   0x2   : > { %p138_p1 = scmp.lt.s32.totalorder %s2897_s12, 3 }
   0x4   : > { %p139_p2 = pnand %p2219_p0, %p138_p1 }
   0x5   : > { %s2220_s16 = sshll.u32 (!%p139_p2), %s2215_s13, 7 }
   0x6   : > { %142 = sbr.rel (%p139_p2) target bundleno = 351 (0x15f), region = 32  ;;  %p163_p3 = scmp.lt.s32.totalorder (!%p139_p2), %s2220_s16, 255 }
   0xb   : > { %v2824_v0 = vld [vmem:[%s3477_s1 + $0x8] sm:$0x3f]   ;;  %vm838_vm0 = vcmask 1044480   ;;  %vm839_vm1 = vcmask 1045504   ;;  %v2899_v1 = vmov 65535   ;;  %v2825_v5 = vld [vmem:[%s3477_s1] sm:$0xff]  }
   0xc   : > { %v840_v2 = vsel %vm838_vm0, 4294967295, %v2899_v1  ;;  %s3481_s16 = smov (!%p163_p3, %s2220_s16), 255  ;;  %vm645_vm2 = vcmask 220160   ;;  %vm2030_vm3 = vcmask 125952  }
   0xd   : > { %v841_v3 = vsel %vm839_vm1, %v840_v2, 0  ;;  %s2221_s19 = sshll.u32 %s3481_s16, 2 }
   0xe   : > { %v843_v4 = vand.u32 %v2824_v0, %v841_v3  ;;  %s2942_s22 = scalar_lea.vmem %s3476_s0, %s2221_s19  ;;  %s3086_s27 = scalar_lea.vmem %s3479_s3, %s2221_s19 }
   0xf   : > { %v2826_v6 = vld [vmem:[%s2942_s22] sm:$0xff]   ;;  %v2828_v8 = vld [vmem:[%s2942_s22 + $0x8] sm:$0xff]   ;;  %v2830_v10 = vld [vmem:[%s2942_s22 + $0x10] sm:$0xff]  }
  0x10   : > { %2679 = vmatprep.subr.bf16.mxu0 %v843_v4  ;;  %2811 = vmatprep.subr.bf16.mxu1 %v843_v4  ;;  %v2827_v7 = vld [vmem:[%s2942_s22 + $0x100] sm:$0xff]   ;;  %v2829_v9 = vld [vmem:[%s2942_s22 + $0x108] sm:$0xff]   ;;  %v2831_v11 = vld [vmem:[%s2942_s22 + $0x110] sm:$0xff]  }
  0x11   : > { %2680 = vmatpush3.bf16.msra.mxu0 %v843_v4  ;;  %2813 = vmatpush3.bf16.msra.mxu1 %v843_v4  ;;  %v2832_v12 = vld [vmem:[%s2942_s22 + $0x18] sm:$0xff]   ;;  %v2834_v14 = vld [vmem:[%s2942_s22 + $0x20] sm:$0xff]   ;;  %v2836_v16 = vld [vmem:[%s2942_s22 + $0x28] sm:$0xff]  }
  0x12   : > { %2681 = vmatprep.subr.bf16.mxu0 %v2825_v5  ;;  %2812 = vmatprep.subr.bf16.mxu1 %v2825_v5  ;;  %v2833_v13 = vld [vmem:[%s2942_s22 + $0x118] sm:$0xff]   ;;  %v2835_v15 = vld [vmem:[%s2942_s22 + $0x120] sm:$0xff]   ;;  %v2837_v17 = vld [vmem:[%s2942_s22 + $0x128] sm:$0xff]  }
  0x13   : > { %2683 = vmatprep.mubr.msk.bf16.mxu0 %vm645_vm2, %v2826_v6  ;;  %2747 = vmatprep.mubr.msk.bf16.mxu1 %vm645_vm2, %v2827_v7  ;;  %v2838_v18 = vld [vmem:[%s2942_s22 + $0x30] sm:$0xff]   ;;  %v2840_v20 = vld [vmem:[%s2942_s22 + $0x38] sm:$0xff]   ;;  %v2842_v22 = vld [vmem:[%s2942_s22 + $0x40] sm:$0xff]  }
  0x14   : > { %v2839_v19 = vld [vmem:[%s2942_s22 + $0x130] sm:$0xff]   ;;  %v2841_v21 = vld [vmem:[%s2942_s22 + $0x138] sm:$0xff]   ;;  %v2843_v23 = vld [vmem:[%s2942_s22 + $0x140] sm:$0xff]  }
  0x15   : > { %2682 = vmatpush3.bf16.msra.mxu0 %v2825_v5  ;;  %2814 = vmatpush3.bf16.msra.mxu1 %v2825_v5  ;;  %v2844_v24 = vld [vmem:[%s2942_s22 + $0x48] sm:$0xff]   ;;  %v2846_v26 = vld [vmem:[%s2942_s22 + $0x50] sm:$0xff]   ;;  %v2848_v28 = vld [vmem:[%s2942_s22 + $0x58] sm:$0xff]  }
  0x16   : > { %v2845_v25 = vld [vmem:[%s2942_s22 + $0x148] sm:$0xff]   ;;  %v2847_v27 = vld [vmem:[%s2942_s22 + $0x150] sm:$0xff]   ;;  %v2849_v29 = vld [vmem:[%s2942_s22 + $0x158] sm:$0xff]  }
  0x17   : > { %v2850_v30 = vld [vmem:[%s2942_s22 + $0x60] sm:$0xff]   ;;  %v2852_v32 = vld [vmem:[%s2942_s22 + $0x68] sm:$0xff]   ;;  %v2854_v34 = vld [vmem:[%s2942_s22 + $0x70] sm:$0xff]  }
  0x18   : > { %2684 = vmatmul.mubr.msk.bf16.vlgmr.msra.gmra.mxu0 %vm645_vm2, %v2828_v8  ;;  %2748 = vmatmul.mubr.msk.bf16.vlgmr.msra.gmra.mxu1 %vm645_vm2, %v2829_v9  ;;  %v2851_v31 = vld [vmem:[%s2942_s22 + $0x160] sm:$0xff]   ;;  %v2853_v33 = vld [vmem:[%s2942_s22 + $0x168] sm:$0xff]   ;;  %v2855_v35 = vld [vmem:[%s2942_s22 + $0x170] sm:$0xff]  }
  0x19   : > { %2687 = vmatprep.mubr.msk.bf16.mxu0 %vm645_vm2, %v2830_v10  ;;  %2751 = vmatprep.mubr.msk.bf16.mxu1 %vm645_vm2, %v2831_v11  ;;  %v2856_v36 = vld [vmem:[%s2942_s22 + $0x78] sm:$0xff]   ;;  %v2858_v38 = vld [vmem:[%s2942_s22 + $0x80] sm:$0xff]   ;;  %v2860_v40 = vld [vmem:[%s2942_s22 + $0x88] sm:$0xff]  }
  0x1a   : > { %v2857_v37 = vld [vmem:[%s2942_s22 + $0x178] sm:$0xff]   ;;  %v2859_v39 = vld [vmem:[%s2942_s22 + $0x180] sm:$0xff]   ;;  %v2861_v41 = vld [vmem:[%s2942_s22 + $0x188] sm:$0xff]  }
  0x1b   : > { %v2862_v42 = vld [vmem:[%s2942_s22 + $0x90] sm:$0xff]   ;;  %v2864_v44 = vld [vmem:[%s2942_s22 + $0x98] sm:$0xff]   ;;  %v2866_v46 = vld [vmem:[%s2942_s22 + $0xa0] sm:$0xff]  }
  0x1c   : > { %v2863_v43 = vld [vmem:[%s2942_s22 + $0x190] sm:$0xff]   ;;  %v2865_v45 = vld [vmem:[%s2942_s22 + $0x198] sm:$0xff]   ;;  %v2867_v47 = vld [vmem:[%s2942_s22 + $0x1a0] sm:$0xff]  }
  0x1d   : > { %v2868_v48 = vld [vmem:[%s2942_s22 + $0xa8] sm:$0xff]   ;;  %v2870_v50 = vld [vmem:[%s2942_s22 + $0xb0] sm:$0xff]   ;;  %v2872_v52 = vld [vmem:[%s2942_s22 + $0xb8] sm:$0xff]  }
  0x1e   : > { %v2869_v49 = vld [vmem:[%s2942_s22 + $0x1a8] sm:$0xff]   ;;  %v2871_v51 = vld [vmem:[%s2942_s22 + $0x1b0] sm:$0xff]   ;;  %v2873_v53 = vld [vmem:[%s2942_s22 + $0x1b8] sm:$0xff]  }
  0x1f   : > { %v2874_v54 = vld [vmem:[%s2942_s22 + $0xc0] sm:$0xff]   ;;  %v2876_v56 = vld [vmem:[%s2942_s22 + $0xc8] sm:$0xff]   ;;  %v2878_v58 = vld [vmem:[%s2942_s22 + $0xd0] sm:$0xff]  }
  0x20   : > { %2688 = vmatmul.mubr.msk.bf16.gmra.mxu0 %vm645_vm2, %v2832_v12  ;;  %2752 = vmatmul.mubr.msk.bf16.gmra.mxu1 %vm645_vm2, %v2833_v13  ;;  %v2875_v55 = vld [vmem:[%s2942_s22 + $0x1c0] sm:$0xff]   ;;  %v2877_v57 = vld [vmem:[%s2942_s22 + $0x1c8] sm:$0xff]   ;;  %v2879_v59 = vld [vmem:[%s2942_s22 + $0x1d0] sm:$0xff]  }
  0x21   : > { %2691 = vmatprep.mubr.msk.bf16.mxu0 %vm645_vm2, %v2834_v14  ;;  %2755 = vmatprep.mubr.msk.bf16.mxu1 %vm645_vm2, %v2835_v15  ;;  %v2880_v60 = vld [vmem:[%s2942_s22 + $0xd8] sm:$0xff]   ;;  %v2882_v62 = vld [vmem:[%s2942_s22 + $0xe0] sm:$0xff]   ;;  %v2884_v0 = vld [vmem:[%s2942_s22 + $0xe8] sm:$0xff]  }
  0x22   : > { %v2881_v61 = vld [vmem:[%s2942_s22 + $0x1d8] sm:$0xff]   ;;  %v2883_v63 = vld [vmem:[%s2942_s22 + $0x1e0] sm:$0xff]   ;;  %v2885_v1 = vld [vmem:[%s2942_s22 + $0x1e8] sm:$0xff]  }
  0x23   : > { %v2886_v2 = vld [vmem:[%s2942_s22 + $0xf0] sm:$0xff]   ;;  %v2888_v4 = vld [vmem:[%s2942_s22 + $0xf8] sm:$0xff]   ;;  %v3075_v6 = vld [vmem:[%s3478_s2] ss:$0 sm:$0xff] }
  0x24   : > { %v2887_v3 = vld [vmem:[%s2942_s22 + $0x1f0] sm:$0xff]   ;;  %v2889_v5 = vld [vmem:[%s2942_s22 + $0x1f8] sm:$0xff]  }
  0x28   : > { %2692 = vmatmul.mubr.msk.bf16.gmra.mxu0 %vm645_vm2, %v2836_v16  ;;  %2756 = vmatmul.mubr.msk.bf16.gmra.mxu1 %vm645_vm2, %v2837_v17 }
  0x29   : > { %2695 = vmatprep.mubr.msk.bf16.mxu0 %vm645_vm2, %v2838_v18  ;;  %2759 = vmatprep.mubr.msk.bf16.mxu1 %vm645_vm2, %v2839_v19 }
  0x30   : > { %2696 = vmatmul.mubr.msk.bf16.gmra.mxu0 %vm645_vm2, %v2840_v20  ;;  %2760 = vmatmul.mubr.msk.bf16.gmra.mxu1 %vm645_vm2, %v2841_v21 }
  0x31   : > { %2699 = vmatprep.mubr.msk.bf16.mxu0 %vm645_vm2, %v2842_v22  ;;  %2763 = vmatprep.mubr.msk.bf16.mxu1 %vm645_vm2, %v2843_v23 }
  0x38   : > { %2700 = vmatmul.mubr.msk.bf16.gmra.mxu0 %vm645_vm2, %v2844_v24  ;;  %2764 = vmatmul.mubr.msk.bf16.gmra.mxu1 %vm645_vm2, %v2845_v25 }
  0x39   : > { %2703 = vmatprep.mubr.msk.bf16.mxu0 %vm645_vm2, %v2846_v26  ;;  %2767 = vmatprep.mubr.msk.bf16.mxu1 %vm645_vm2, %v2847_v27 }
  0x40   : > { %2704 = vmatmul.mubr.msk.bf16.gmra.mxu0 %vm645_vm2, %v2848_v28  ;;  %2768 = vmatmul.mubr.msk.bf16.gmra.mxu1 %vm645_vm2, %v2849_v29 }
  0x41   : > { %2707 = vmatprep.mubr.msk.bf16.mxu0 %vm645_vm2, %v2850_v30  ;;  %2771 = vmatprep.mubr.msk.bf16.mxu1 %vm645_vm2, %v2851_v31 }
  0x48   : > { %2708 = vmatmul.mubr.msk.bf16.gmra.mxu0 %vm645_vm2, %v2852_v32  ;;  %2772 = vmatmul.mubr.msk.bf16.gmra.mxu1 %vm645_vm2, %v2853_v33 }
  0x49   : > { %2711 = vmatprep.mubr.msk.bf16.mxu0 %vm645_vm2, %v2854_v34  ;;  %2775 = vmatprep.mubr.msk.bf16.mxu1 %vm645_vm2, %v2855_v35 }
  0x50   : > { %2712 = vmatmul.mubr.msk.bf16.gmra.mxu0 %vm645_vm2, %v2856_v36  ;;  %2776 = vmatmul.mubr.msk.bf16.gmra.mxu1 %vm645_vm2, %v2857_v37 }
  0x51   : > { %2715 = vmatprep.mubr.msk.bf16.mxu0 %vm645_vm2, %v2858_v38  ;;  %2779 = vmatprep.mubr.msk.bf16.mxu1 %vm645_vm2, %v2859_v39 }
  0x58   : > { %2716 = vmatmul.mubr.msk.bf16.gmra.mxu0 %vm645_vm2, %v2860_v40  ;;  %2780 = vmatmul.mubr.msk.bf16.gmra.mxu1 %vm645_vm2, %v2861_v41 }
  0x59   : > { %2719 = vmatprep.mubr.msk.bf16.mxu0 %vm645_vm2, %v2862_v42  ;;  %2783 = vmatprep.mubr.msk.bf16.mxu1 %vm645_vm2, %v2863_v43 }
  0x60   : > { %2720 = vmatmul.mubr.msk.bf16.gmra.mxu0 %vm645_vm2, %v2864_v44  ;;  %2784 = vmatmul.mubr.msk.bf16.gmra.mxu1 %vm645_vm2, %v2865_v45 }
  0x61   : > { %2723 = vmatprep.mubr.msk.bf16.mxu0 %vm645_vm2, %v2866_v46  ;;  %2787 = vmatprep.mubr.msk.bf16.mxu1 %vm645_vm2, %v2867_v47 }
  0x68   : > { %2724 = vmatmul.mubr.msk.bf16.gmra.mxu0 %vm645_vm2, %v2868_v48  ;;  %2788 = vmatmul.mubr.msk.bf16.gmra.mxu1 %vm645_vm2, %v2869_v49 }
  0x69   : > { %2727 = vmatprep.mubr.msk.bf16.mxu0 %vm645_vm2, %v2870_v50  ;;  %2791 = vmatprep.mubr.msk.bf16.mxu1 %vm645_vm2, %v2871_v51 }
  0x70   : > { %2728 = vmatmul.mubr.msk.bf16.gmra.mxu0 %vm645_vm2, %v2872_v52  ;;  %2792 = vmatmul.mubr.msk.bf16.gmra.mxu1 %vm645_vm2, %v2873_v53 }
  0x71   : > { %2731 = vmatprep.mubr.msk.bf16.mxu0 %vm645_vm2, %v2874_v54  ;;  %2795 = vmatprep.mubr.msk.bf16.mxu1 %vm645_vm2, %v2875_v55 }
  0x78   : > { %2732 = vmatmul.mubr.msk.bf16.gmra.mxu0 %vm645_vm2, %v2876_v56  ;;  %2796 = vmatmul.mubr.msk.bf16.gmra.mxu1 %vm645_vm2, %v2877_v57 }
  0x79   : > { %2735 = vmatprep.mubr.msk.bf16.mxu0 %vm645_vm2, %v2878_v58  ;;  %2799 = vmatprep.mubr.msk.bf16.mxu1 %vm645_vm2, %v2879_v59 }
  0x80   : > { %2736 = vmatmul.mubr.msk.bf16.gmra.mxu0 %vm645_vm2, %v2880_v60  ;;  %2800 = vmatmul.mubr.msk.bf16.gmra.mxu1 %vm645_vm2, %v2881_v61 }
  0x81   : > { %2739 = vmatprep.mubr.msk.bf16.mxu0 %vm645_vm2, %v2882_v62  ;;  %2803 = vmatprep.mubr.msk.bf16.mxu1 %vm645_vm2, %v2883_v63 }
  0x88   : > { %2740 = vmatmul.mubr.msk.bf16.gmra.mxu0 %vm645_vm2, %v2884_v0  ;;  %2804 = vmatmul.mubr.msk.bf16.gmra.mxu1 %vm645_vm2, %v2885_v1 }
  0x89   : > { %2743 = vmatprep.mubr.msk.bf16.mxu0 %vm645_vm2, %v2886_v2  ;;  %2807 = vmatprep.mubr.msk.bf16.mxu1 %vm645_vm2, %v2887_v3 }
  0x90   : > { %2744 = vmatmul.mubr.msk.bf16.gmra.mxu0 %vm645_vm2, %v2888_v4  ;;  %2808 = vmatmul.mubr.msk.bf16.gmra.mxu1 %vm645_vm2, %v2889_v5 }
  0xd8   : > { %v2685_v7 = vpop.f32.mrf.mxu0  ;;  %v2749_v8 = vpop.f32.mrf.mxu1 }
  0xd9   : > { %v888_v9 = vadd.f32 %v2685_v7, %v3075_v6  ;;  %v1144_v10 = vadd.f32 %v2749_v8, %v3075_v6 }
  0xda   : > { %v879_v11 = vpop.f32.mrf.mxu0  ;;  %v1135_v12 = vpop.f32.mrf.mxu1 }
  0xdb   : > { %v1392_v13 = vmax.f32 %v888_v9, 0.0  ;;  %v1456_v14 = vmax.f32 %v1144_v10, 0.0  ;;  %v880_v15 = vadd.f32 %v3075_v6, %v879_v11  ;;  %v1136_v16 = vadd.f32 %v3075_v6, %v1135_v12 }
  0xdc   : > { %v2686_v17 = vpop.f32.mrf.mxu0  ;;  %v2750_v18 = vpop.f32.mrf.mxu1 }
  0xdd   : > { %v2487_v19 = vpack.c.bf16 %v1392_v13, %v1392_v13  ;;  %v2551_v20 = vpack.c.bf16 %v1456_v14, %v1456_v14  ;;  %v1390_v21 = vmax.f32 %v880_v15, 0.0  ;;  %v1454_v22 = vmax.f32 %v1136_v16, 0.0 }
  0xde   : > { %v891_v23 = vadd.f32 %v2686_v17, %v3075_v6  ;;  %v1147_v24 = vadd.f32 %v2750_v18, %v3075_v6  ;;  %v882_v25 = vpop.f32.mrf.mxu0  ;;  %v1138_v26 = vpop.f32.mrf.mxu1 }
  0xdf   : > { %2033 = vst.msk [vmem:[%s3086_s27 + $0x8] sm:$0xf] %vm2030_vm3, %v2487_v19  ;;  %2097 = vst.msk [vmem:[%s3086_s27 + $0x108] sm:$0xf] %vm2030_vm3, %v2551_v20  ;;  %v2485_v27 = vpack.c.bf16 %v1390_v21, %v1390_v21  ;;  %v2549_v28 = vpack.c.bf16 %v1454_v22, %v1454_v22  ;;  %v883_v29 = vadd.f32 %v3075_v6, %v882_v25 }
  0xe0   : > { %v1139_v30 = vadd.f32 %v3075_v6, %v1138_v26  ;;  %v1393_v31 = vmax.f32 %v891_v23, 0.0  ;;  %v1457_v32 = vmax.f32 %v1147_v24, 0.0  ;;  %v2689_v33 = vpop.f32.mrf.mxu0  ;;  %v2753_v34 = vpop.f32.mrf.mxu1 }
  0xe1   : > { %2031 = vst.msk [vmem:[%s3086_s27] sm:$0xf] %vm2030_vm3, %v2485_v27  ;;  %2095 = vst.msk [vmem:[%s3086_s27 + $0x100] sm:$0xf] %vm2030_vm3, %v2549_v28  ;;  %v1391_v35 = vmax.f32 %v883_v29, 0.0  ;;  %v904_v37 = vadd.f32 %v2689_v33, %v3075_v6  ;;  %v1160_v38 = vadd.f32 %v2753_v34, %v3075_v6 }
  0xe2   : > { %v1455_v36 = vmax.f32 %v1139_v30, 0.0  ;;  %v2488_v39 = vpack.c.bf16 %v1393_v31, %v1393_v31  ;;  %v2552_v40 = vpack.c.bf16 %v1457_v32, %v1457_v32  ;;  %v895_v41 = vpop.f32.mrf.mxu0  ;;  %v1151_v42 = vpop.f32.mrf.mxu1 }
  0xe3   : > { %v2486_v43 = vpack.c.bf16 %v1391_v35, %v1391_v35  ;;  %v1396_v45 = vmax.f32 %v904_v37, 0.0  ;;  %v1460_v46 = vmax.f32 %v1160_v38, 0.0  ;;  %v896_v47 = vadd.f32 %v3075_v6, %v895_v41 }
  0xe4   : > { %v2550_v44 = vpack.c.bf16 %v1455_v36, %v1455_v36  ;;  %2034 = vst.msk [vmem:[%s3086_s27 + $0xc] sm:$0xf] %vm2030_vm3, %v2488_v39  ;;  %2098 = vst.msk [vmem:[%s3086_s27 + $0x10c] sm:$0xf] %vm2030_vm3, %v2552_v40  ;;  %v1152_v48 = vadd.f32 %v3075_v6, %v1151_v42  ;;  %v2690_v49 = vpop.f32.mrf.mxu0  ;;  %v2754_v50 = vpop.f32.mrf.mxu1 }
  0xe5   : > { %2032 = vst.msk [vmem:[%s3086_s27 + $0x4] sm:$0xf] %vm2030_vm3, %v2486_v43  ;;  %v2491_v51 = vpack.c.bf16 %v1396_v45, %v1396_v45  ;;  %v2555_v52 = vpack.c.bf16 %v1460_v46, %v1460_v46  ;;  %v907_v53 = vadd.f32 %v2690_v49, %v3075_v6  ;;  %v1163_v54 = vadd.f32 %v2754_v50, %v3075_v6 }
  0xe6   : > { %2096 = vst.msk [vmem:[%s3086_s27 + $0x104] sm:$0xf] %vm2030_vm3, %v2550_v44  ;;  %v1394_v55 = vmax.f32 %v896_v47, 0.0  ;;  %v1458_v56 = vmax.f32 %v1152_v48, 0.0  ;;  %v898_v57 = vpop.f32.mrf.mxu0  ;;  %v1154_v58 = vpop.f32.mrf.mxu1 }
  0xe7   : > { %2037 = vst.msk [vmem:[%s3086_s27 + $0x18] sm:$0xf] %vm2030_vm3, %v2491_v51  ;;  %2101 = vst.msk [vmem:[%s3086_s27 + $0x118] sm:$0xf] %vm2030_vm3, %v2555_v52  ;;  %v1397_v59 = vmax.f32 %v907_v53, 0.0  ;;  %v1461_v60 = vmax.f32 %v1163_v54, 0.0  ;;  %v899_v61 = vadd.f32 %v3075_v6, %v898_v57  ;;  %v1155_v62 = vadd.f32 %v3075_v6, %v1154_v58 }
  0xe8   : > { %v2489_v63 = vpack.c.bf16 %v1394_v55, %v1394_v55  ;;  %v2553_v0 = vpack.c.bf16 %v1458_v56, %v1458_v56  ;;  %v2693_v1 = vpop.f32.mrf.mxu0  ;;  %v2757_v2 = vpop.f32.mrf.mxu1 }
  0xe9   : > { %v2492_v3 = vpack.c.bf16 %v1397_v59, %v1397_v59  ;;  %v2556_v4 = vpack.c.bf16 %v1461_v60, %v1461_v60  ;;  %v1395_v5 = vmax.f32 %v899_v61, 0.0  ;;  %v1459_v7 = vmax.f32 %v1155_v62, 0.0 }
  0xea   : > { %2035 = vst.msk [vmem:[%s3086_s27 + $0x10] sm:$0xf] %vm2030_vm3, %v2489_v63  ;;  %2099 = vst.msk [vmem:[%s3086_s27 + $0x110] sm:$0xf] %vm2030_vm3, %v2553_v0  ;;  %v920_v8 = vadd.f32 %v2693_v1, %v3075_v6  ;;  %v1176_v9 = vadd.f32 %v2757_v2, %v3075_v6  ;;  %v911_v10 = vpop.f32.mrf.mxu0  ;;  %v1167_v11 = vpop.f32.mrf.mxu1 }
  0xeb   : > { %2038 = vst.msk [vmem:[%s3086_s27 + $0x1c] sm:$0xf] %vm2030_vm3, %v2492_v3  ;;  %2102 = vst.msk [vmem:[%s3086_s27 + $0x11c] sm:$0xf] %vm2030_vm3, %v2556_v4  ;;  %v2490_v12 = vpack.c.bf16 %v1395_v5, %v1395_v5  ;;  %v2554_v13 = vpack.c.bf16 %v1459_v7, %v1459_v7  ;;  %v912_v14 = vadd.f32 %v3075_v6, %v911_v10 }
  0xec   : > { %v1168_v15 = vadd.f32 %v3075_v6, %v1167_v11  ;;  %v1400_v16 = vmax.f32 %v920_v8, 0.0  ;;  %v1464_v17 = vmax.f32 %v1176_v9, 0.0  ;;  %v2694_v18 = vpop.f32.mrf.mxu0  ;;  %v2758_v19 = vpop.f32.mrf.mxu1 }
  0xed   : > { %2036 = vst.msk [vmem:[%s3086_s27 + $0x14] sm:$0xf] %vm2030_vm3, %v2490_v12  ;;  %2100 = vst.msk [vmem:[%s3086_s27 + $0x114] sm:$0xf] %vm2030_vm3, %v2554_v13  ;;  %v1398_v20 = vmax.f32 %v912_v14, 0.0  ;;  %v923_v22 = vadd.f32 %v2694_v18, %v3075_v6  ;;  %v1179_v23 = vadd.f32 %v2758_v19, %v3075_v6 }
  0xee   : > { %v1462_v21 = vmax.f32 %v1168_v15, 0.0  ;;  %v2495_v24 = vpack.c.bf16 %v1400_v16, %v1400_v16  ;;  %v2559_v25 = vpack.c.bf16 %v1464_v17, %v1464_v17  ;;  %v914_v26 = vpop.f32.mrf.mxu0  ;;  %v1170_v27 = vpop.f32.mrf.mxu1 }
  0xef   : > { %v2493_v28 = vpack.c.bf16 %v1398_v20, %v1398_v20  ;;  %v1401_v30 = vmax.f32 %v923_v22, 0.0  ;;  %v1465_v31 = vmax.f32 %v1179_v23, 0.0  ;;  %v915_v32 = vadd.f32 %v3075_v6, %v914_v26 }
  0xf0   : > { %v2557_v29 = vpack.c.bf16 %v1462_v21, %v1462_v21  ;;  %2041 = vst.msk [vmem:[%s3086_s27 + $0x28] sm:$0xf] %vm2030_vm3, %v2495_v24  ;;  %2105 = vst.msk [vmem:[%s3086_s27 + $0x128] sm:$0xf] %vm2030_vm3, %v2559_v25  ;;  %v1171_v33 = vadd.f32 %v3075_v6, %v1170_v27  ;;  %v2697_v34 = vpop.f32.mrf.mxu0  ;;  %v2761_v35 = vpop.f32.mrf.mxu1 }
  0xf1   : > { %2039 = vst.msk [vmem:[%s3086_s27 + $0x20] sm:$0xf] %vm2030_vm3, %v2493_v28  ;;  %v2496_v36 = vpack.c.bf16 %v1401_v30, %v1401_v30  ;;  %v2560_v37 = vpack.c.bf16 %v1465_v31, %v1465_v31  ;;  %v936_v38 = vadd.f32 %v2697_v34, %v3075_v6  ;;  %v1192_v39 = vadd.f32 %v2761_v35, %v3075_v6 }
  0xf2   : > { %2103 = vst.msk [vmem:[%s3086_s27 + $0x120] sm:$0xf] %vm2030_vm3, %v2557_v29  ;;  %v1399_v40 = vmax.f32 %v915_v32, 0.0  ;;  %v1463_v41 = vmax.f32 %v1171_v33, 0.0  ;;  %v927_v42 = vpop.f32.mrf.mxu0  ;;  %v1183_v43 = vpop.f32.mrf.mxu1 }
  0xf3   : > { %2042 = vst.msk [vmem:[%s3086_s27 + $0x2c] sm:$0xf] %vm2030_vm3, %v2496_v36  ;;  %2106 = vst.msk [vmem:[%s3086_s27 + $0x12c] sm:$0xf] %vm2030_vm3, %v2560_v37  ;;  %v1404_v44 = vmax.f32 %v936_v38, 0.0  ;;  %v1468_v45 = vmax.f32 %v1192_v39, 0.0  ;;  %v928_v46 = vadd.f32 %v3075_v6, %v927_v42  ;;  %v1184_v47 = vadd.f32 %v3075_v6, %v1183_v43 }
  0xf4   : > { %v2494_v48 = vpack.c.bf16 %v1399_v40, %v1399_v40  ;;  %v2558_v49 = vpack.c.bf16 %v1463_v41, %v1463_v41  ;;  %v2698_v50 = vpop.f32.mrf.mxu0  ;;  %v2762_v51 = vpop.f32.mrf.mxu1 }
  0xf5   : > { %v2499_v52 = vpack.c.bf16 %v1404_v44, %v1404_v44  ;;  %v2563_v53 = vpack.c.bf16 %v1468_v45, %v1468_v45  ;;  %v1402_v54 = vmax.f32 %v928_v46, 0.0  ;;  %v1466_v55 = vmax.f32 %v1184_v47, 0.0 }
  0xf6   : > { %2040 = vst.msk [vmem:[%s3086_s27 + $0x24] sm:$0xf] %vm2030_vm3, %v2494_v48  ;;  %2104 = vst.msk [vmem:[%s3086_s27 + $0x124] sm:$0xf] %vm2030_vm3, %v2558_v49  ;;  %v939_v56 = vadd.f32 %v2698_v50, %v3075_v6  ;;  %v1195_v57 = vadd.f32 %v2762_v51, %v3075_v6  ;;  %v930_v58 = vpop.f32.mrf.mxu0  ;;  %v1186_v59 = vpop.f32.mrf.mxu1 }
  0xf7   : > { %2045 = vst.msk [vmem:[%s3086_s27 + $0x38] sm:$0xf] %vm2030_vm3, %v2499_v52  ;;  %2109 = vst.msk [vmem:[%s3086_s27 + $0x138] sm:$0xf] %vm2030_vm3, %v2563_v53  ;;  %v2497_v60 = vpack.c.bf16 %v1402_v54, %v1402_v54  ;;  %v2561_v61 = vpack.c.bf16 %v1466_v55, %v1466_v55  ;;  %v931_v62 = vadd.f32 %v3075_v6, %v930_v58 }
  0xf8   : > { %v1187_v63 = vadd.f32 %v3075_v6, %v1186_v59  ;;  %v1405_v0 = vmax.f32 %v939_v56, 0.0  ;;  %v1469_v1 = vmax.f32 %v1195_v57, 0.0  ;;  %v2701_v2 = vpop.f32.mrf.mxu0  ;;  %v2765_v3 = vpop.f32.mrf.mxu1 }
  0xf9   : > { %2043 = vst.msk [vmem:[%s3086_s27 + $0x30] sm:$0xf] %vm2030_vm3, %v2497_v60  ;;  %2107 = vst.msk [vmem:[%s3086_s27 + $0x130] sm:$0xf] %vm2030_vm3, %v2561_v61  ;;  %v1403_v4 = vmax.f32 %v931_v62, 0.0  ;;  %v952_v7 = vadd.f32 %v2701_v2, %v3075_v6  ;;  %v1208_v8 = vadd.f32 %v2765_v3, %v3075_v6 }
  0xfa   : > { %v1467_v5 = vmax.f32 %v1187_v63, 0.0  ;;  %v2500_v9 = vpack.c.bf16 %v1405_v0, %v1405_v0  ;;  %v2564_v10 = vpack.c.bf16 %v1469_v1, %v1469_v1  ;;  %v943_v11 = vpop.f32.mrf.mxu0  ;;  %v1199_v12 = vpop.f32.mrf.mxu1 }
  0xfb   : > { %v2498_v13 = vpack.c.bf16 %v1403_v4, %v1403_v4  ;;  %v1408_v15 = vmax.f32 %v952_v7, 0.0  ;;  %v1472_v16 = vmax.f32 %v1208_v8, 0.0  ;;  %v944_v17 = vadd.f32 %v3075_v6, %v943_v11 }
  0xfc   : > { %v2562_v14 = vpack.c.bf16 %v1467_v5, %v1467_v5  ;;  %2046 = vst.msk [vmem:[%s3086_s27 + $0x3c] sm:$0xf] %vm2030_vm3, %v2500_v9  ;;  %2110 = vst.msk [vmem:[%s3086_s27 + $0x13c] sm:$0xf] %vm2030_vm3, %v2564_v10  ;;  %v1200_v18 = vadd.f32 %v3075_v6, %v1199_v12  ;;  %v2702_v19 = vpop.f32.mrf.mxu0  ;;  %v2766_v20 = vpop.f32.mrf.mxu1 }
  0xfd   : > { %2044 = vst.msk [vmem:[%s3086_s27 + $0x34] sm:$0xf] %vm2030_vm3, %v2498_v13  ;;  %v2503_v21 = vpack.c.bf16 %v1408_v15, %v1408_v15  ;;  %v2567_v22 = vpack.c.bf16 %v1472_v16, %v1472_v16  ;;  %v955_v23 = vadd.f32 %v2702_v19, %v3075_v6  ;;  %v1211_v24 = vadd.f32 %v2766_v20, %v3075_v6 }
  0xfe   : > { %2108 = vst.msk [vmem:[%s3086_s27 + $0x134] sm:$0xf] %vm2030_vm3, %v2562_v14  ;;  %v1406_v25 = vmax.f32 %v944_v17, 0.0  ;;  %v1470_v26 = vmax.f32 %v1200_v18, 0.0  ;;  %v946_v27 = vpop.f32.mrf.mxu0  ;;  %v1202_v28 = vpop.f32.mrf.mxu1 }
  0xff   : > { %2049 = vst.msk [vmem:[%s3086_s27 + $0x48] sm:$0xf] %vm2030_vm3, %v2503_v21  ;;  %2113 = vst.msk [vmem:[%s3086_s27 + $0x148] sm:$0xf] %vm2030_vm3, %v2567_v22  ;;  %v1409_v29 = vmax.f32 %v955_v23, 0.0  ;;  %v1473_v30 = vmax.f32 %v1211_v24, 0.0  ;;  %v947_v31 = vadd.f32 %v3075_v6, %v946_v27  ;;  %v1203_v32 = vadd.f32 %v3075_v6, %v1202_v28 }
 0x100   : > { %v2501_v33 = vpack.c.bf16 %v1406_v25, %v1406_v25  ;;  %v2565_v34 = vpack.c.bf16 %v1470_v26, %v1470_v26  ;;  %v2705_v35 = vpop.f32.mrf.mxu0  ;;  %v2769_v36 = vpop.f32.mrf.mxu1 }
 0x101   : > { %v2504_v37 = vpack.c.bf16 %v1409_v29, %v1409_v29  ;;  %v2568_v38 = vpack.c.bf16 %v1473_v30, %v1473_v30  ;;  %v1407_v39 = vmax.f32 %v947_v31, 0.0  ;;  %v1471_v40 = vmax.f32 %v1203_v32, 0.0 }
 0x102   : > { %2047 = vst.msk [vmem:[%s3086_s27 + $0x40] sm:$0xf] %vm2030_vm3, %v2501_v33  ;;  %2111 = vst.msk [vmem:[%s3086_s27 + $0x140] sm:$0xf] %vm2030_vm3, %v2565_v34  ;;  %v968_v41 = vadd.f32 %v2705_v35, %v3075_v6  ;;  %v1224_v42 = vadd.f32 %v2769_v36, %v3075_v6  ;;  %v959_v43 = vpop.f32.mrf.mxu0  ;;  %v1215_v44 = vpop.f32.mrf.mxu1 }
 0x103   : > { %2050 = vst.msk [vmem:[%s3086_s27 + $0x4c] sm:$0xf] %vm2030_vm3, %v2504_v37  ;;  %2114 = vst.msk [vmem:[%s3086_s27 + $0x14c] sm:$0xf] %vm2030_vm3, %v2568_v38  ;;  %v2502_v45 = vpack.c.bf16 %v1407_v39, %v1407_v39  ;;  %v2566_v46 = vpack.c.bf16 %v1471_v40, %v1471_v40  ;;  %v960_v47 = vadd.f32 %v3075_v6, %v959_v43 }
 0x104   : > { %v1216_v48 = vadd.f32 %v3075_v6, %v1215_v44  ;;  %v1412_v49 = vmax.f32 %v968_v41, 0.0  ;;  %v1476_v50 = vmax.f32 %v1224_v42, 0.0  ;;  %v2706_v51 = vpop.f32.mrf.mxu0  ;;  %v2770_v52 = vpop.f32.mrf.mxu1 }
 0x105   : > { %2048 = vst.msk [vmem:[%s3086_s27 + $0x44] sm:$0xf] %vm2030_vm3, %v2502_v45  ;;  %2112 = vst.msk [vmem:[%s3086_s27 + $0x144] sm:$0xf] %vm2030_vm3, %v2566_v46  ;;  %v1410_v53 = vmax.f32 %v960_v47, 0.0  ;;  %v971_v55 = vadd.f32 %v2706_v51, %v3075_v6  ;;  %v1227_v56 = vadd.f32 %v2770_v52, %v3075_v6 }
 0x106   : > { %v1474_v54 = vmax.f32 %v1216_v48, 0.0  ;;  %v2507_v57 = vpack.c.bf16 %v1412_v49, %v1412_v49  ;;  %v2571_v58 = vpack.c.bf16 %v1476_v50, %v1476_v50  ;;  %v962_v59 = vpop.f32.mrf.mxu0  ;;  %v1218_v60 = vpop.f32.mrf.mxu1 }
 0x107   : > { %v2505_v61 = vpack.c.bf16 %v1410_v53, %v1410_v53  ;;  %v1413_v63 = vmax.f32 %v971_v55, 0.0  ;;  %v1477_v0 = vmax.f32 %v1227_v56, 0.0  ;;  %v963_v1 = vadd.f32 %v3075_v6, %v962_v59 }
 0x108   : > { %v2569_v62 = vpack.c.bf16 %v1474_v54, %v1474_v54  ;;  %2053 = vst.msk [vmem:[%s3086_s27 + $0x58] sm:$0xf] %vm2030_vm3, %v2507_v57  ;;  %2117 = vst.msk [vmem:[%s3086_s27 + $0x158] sm:$0xf] %vm2030_vm3, %v2571_v58  ;;  %v1219_v2 = vadd.f32 %v3075_v6, %v1218_v60  ;;  %v2709_v3 = vpop.f32.mrf.mxu0  ;;  %v2773_v4 = vpop.f32.mrf.mxu1 }
 0x109   : > { %2051 = vst.msk [vmem:[%s3086_s27 + $0x50] sm:$0xf] %vm2030_vm3, %v2505_v61  ;;  %v2508_v5 = vpack.c.bf16 %v1413_v63, %v1413_v63  ;;  %v2572_v7 = vpack.c.bf16 %v1477_v0, %v1477_v0  ;;  %v984_v8 = vadd.f32 %v2709_v3, %v3075_v6  ;;  %v1240_v9 = vadd.f32 %v2773_v4, %v3075_v6 }
 0x10a   : > { %2115 = vst.msk [vmem:[%s3086_s27 + $0x150] sm:$0xf] %vm2030_vm3, %v2569_v62  ;;  %v1411_v10 = vmax.f32 %v963_v1, 0.0  ;;  %v1475_v11 = vmax.f32 %v1219_v2, 0.0  ;;  %v975_v12 = vpop.f32.mrf.mxu0  ;;  %v1231_v13 = vpop.f32.mrf.mxu1 }
 0x10b   : > { %2054 = vst.msk [vmem:[%s3086_s27 + $0x5c] sm:$0xf] %vm2030_vm3, %v2508_v5  ;;  %2118 = vst.msk [vmem:[%s3086_s27 + $0x15c] sm:$0xf] %vm2030_vm3, %v2572_v7  ;;  %v1416_v14 = vmax.f32 %v984_v8, 0.0  ;;  %v1480_v15 = vmax.f32 %v1240_v9, 0.0  ;;  %v976_v16 = vadd.f32 %v3075_v6, %v975_v12  ;;  %v1232_v17 = vadd.f32 %v3075_v6, %v1231_v13 }
 0x10c   : > { %v2506_v18 = vpack.c.bf16 %v1411_v10, %v1411_v10  ;;  %v2570_v19 = vpack.c.bf16 %v1475_v11, %v1475_v11  ;;  %v2710_v20 = vpop.f32.mrf.mxu0  ;;  %v2774_v21 = vpop.f32.mrf.mxu1 }
 0x10d   : > { %v2511_v22 = vpack.c.bf16 %v1416_v14, %v1416_v14  ;;  %v2575_v23 = vpack.c.bf16 %v1480_v15, %v1480_v15  ;;  %v1414_v24 = vmax.f32 %v976_v16, 0.0  ;;  %v1478_v25 = vmax.f32 %v1232_v17, 0.0 }
 0x10e   : > { %2052 = vst.msk [vmem:[%s3086_s27 + $0x54] sm:$0xf] %vm2030_vm3, %v2506_v18  ;;  %2116 = vst.msk [vmem:[%s3086_s27 + $0x154] sm:$0xf] %vm2030_vm3, %v2570_v19  ;;  %v987_v26 = vadd.f32 %v2710_v20, %v3075_v6  ;;  %v1243_v27 = vadd.f32 %v2774_v21, %v3075_v6  ;;  %v978_v28 = vpop.f32.mrf.mxu0  ;;  %v1234_v29 = vpop.f32.mrf.mxu1 }
 0x10f   : > { %2057 = vst.msk [vmem:[%s3086_s27 + $0x68] sm:$0xf] %vm2030_vm3, %v2511_v22  ;;  %2121 = vst.msk [vmem:[%s3086_s27 + $0x168] sm:$0xf] %vm2030_vm3, %v2575_v23  ;;  %v2509_v30 = vpack.c.bf16 %v1414_v24, %v1414_v24  ;;  %v2573_v31 = vpack.c.bf16 %v1478_v25, %v1478_v25  ;;  %v979_v32 = vadd.f32 %v3075_v6, %v978_v28 }
 0x110   : > { %v1235_v33 = vadd.f32 %v3075_v6, %v1234_v29  ;;  %v1417_v34 = vmax.f32 %v987_v26, 0.0  ;;  %v1481_v35 = vmax.f32 %v1243_v27, 0.0  ;;  %v2713_v36 = vpop.f32.mrf.mxu0  ;;  %v2777_v37 = vpop.f32.mrf.mxu1 }
 0x111   : > { %2055 = vst.msk [vmem:[%s3086_s27 + $0x60] sm:$0xf] %vm2030_vm3, %v2509_v30  ;;  %2119 = vst.msk [vmem:[%s3086_s27 + $0x160] sm:$0xf] %vm2030_vm3, %v2573_v31  ;;  %v1415_v38 = vmax.f32 %v979_v32, 0.0  ;;  %v1000_v40 = vadd.f32 %v2713_v36, %v3075_v6  ;;  %v1256_v41 = vadd.f32 %v2777_v37, %v3075_v6 }
 0x112   : > { %v1479_v39 = vmax.f32 %v1235_v33, 0.0  ;;  %v2512_v42 = vpack.c.bf16 %v1417_v34, %v1417_v34  ;;  %v2576_v43 = vpack.c.bf16 %v1481_v35, %v1481_v35  ;;  %v991_v44 = vpop.f32.mrf.mxu0  ;;  %v1247_v45 = vpop.f32.mrf.mxu1 }
 0x113   : > { %v2510_v46 = vpack.c.bf16 %v1415_v38, %v1415_v38  ;;  %v1420_v48 = vmax.f32 %v1000_v40, 0.0  ;;  %v1484_v49 = vmax.f32 %v1256_v41, 0.0  ;;  %v992_v50 = vadd.f32 %v3075_v6, %v991_v44 }
 0x114   : > { %v2574_v47 = vpack.c.bf16 %v1479_v39, %v1479_v39  ;;  %2058 = vst.msk [vmem:[%s3086_s27 + $0x6c] sm:$0xf] %vm2030_vm3, %v2512_v42  ;;  %2122 = vst.msk [vmem:[%s3086_s27 + $0x16c] sm:$0xf] %vm2030_vm3, %v2576_v43  ;;  %v1248_v51 = vadd.f32 %v3075_v6, %v1247_v45  ;;  %v2714_v52 = vpop.f32.mrf.mxu0  ;;  %v2778_v53 = vpop.f32.mrf.mxu1 }
 0x115   : > { %2056 = vst.msk [vmem:[%s3086_s27 + $0x64] sm:$0xf] %vm2030_vm3, %v2510_v46  ;;  %v2515_v54 = vpack.c.bf16 %v1420_v48, %v1420_v48  ;;  %v2579_v55 = vpack.c.bf16 %v1484_v49, %v1484_v49  ;;  %v1003_v56 = vadd.f32 %v2714_v52, %v3075_v6  ;;  %v1259_v57 = vadd.f32 %v2778_v53, %v3075_v6 }
 0x116   : > { %2120 = vst.msk [vmem:[%s3086_s27 + $0x164] sm:$0xf] %vm2030_vm3, %v2574_v47  ;;  %v1418_v58 = vmax.f32 %v992_v50, 0.0  ;;  %v1482_v59 = vmax.f32 %v1248_v51, 0.0  ;;  %v994_v60 = vpop.f32.mrf.mxu0  ;;  %v1250_v61 = vpop.f32.mrf.mxu1 }
 0x117   : > { %2061 = vst.msk [vmem:[%s3086_s27 + $0x78] sm:$0xf] %vm2030_vm3, %v2515_v54  ;;  %2125 = vst.msk [vmem:[%s3086_s27 + $0x178] sm:$0xf] %vm2030_vm3, %v2579_v55  ;;  %v1421_v62 = vmax.f32 %v1003_v56, 0.0  ;;  %v1485_v63 = vmax.f32 %v1259_v57, 0.0  ;;  %v995_v0 = vadd.f32 %v3075_v6, %v994_v60  ;;  %v1251_v1 = vadd.f32 %v3075_v6, %v1250_v61 }
 0x118   : > { %v2513_v2 = vpack.c.bf16 %v1418_v58, %v1418_v58  ;;  %v2577_v3 = vpack.c.bf16 %v1482_v59, %v1482_v59  ;;  %v2717_v4 = vpop.f32.mrf.mxu0  ;;  %v2781_v5 = vpop.f32.mrf.mxu1 }
 0x119   : > { %v2516_v7 = vpack.c.bf16 %v1421_v62, %v1421_v62  ;;  %v2580_v8 = vpack.c.bf16 %v1485_v63, %v1485_v63  ;;  %v1419_v9 = vmax.f32 %v995_v0, 0.0  ;;  %v1483_v10 = vmax.f32 %v1251_v1, 0.0 }
 0x11a   : > { %2059 = vst.msk [vmem:[%s3086_s27 + $0x70] sm:$0xf] %vm2030_vm3, %v2513_v2  ;;  %2123 = vst.msk [vmem:[%s3086_s27 + $0x170] sm:$0xf] %vm2030_vm3, %v2577_v3  ;;  %v1016_v11 = vadd.f32 %v2717_v4, %v3075_v6  ;;  %v1272_v12 = vadd.f32 %v2781_v5, %v3075_v6  ;;  %v1007_v13 = vpop.f32.mrf.mxu0  ;;  %v1263_v14 = vpop.f32.mrf.mxu1 }
 0x11b   : > { %2062 = vst.msk [vmem:[%s3086_s27 + $0x7c] sm:$0xf] %vm2030_vm3, %v2516_v7  ;;  %2126 = vst.msk [vmem:[%s3086_s27 + $0x17c] sm:$0xf] %vm2030_vm3, %v2580_v8  ;;  %v2514_v15 = vpack.c.bf16 %v1419_v9, %v1419_v9  ;;  %v2578_v16 = vpack.c.bf16 %v1483_v10, %v1483_v10  ;;  %v1008_v17 = vadd.f32 %v3075_v6, %v1007_v13 }
 0x11c   : > { %v1264_v18 = vadd.f32 %v3075_v6, %v1263_v14  ;;  %v1424_v19 = vmax.f32 %v1016_v11, 0.0  ;;  %v1488_v20 = vmax.f32 %v1272_v12, 0.0  ;;  %v2718_v21 = vpop.f32.mrf.mxu0  ;;  %v2782_v22 = vpop.f32.mrf.mxu1 }
 0x11d   : > { %2060 = vst.msk [vmem:[%s3086_s27 + $0x74] sm:$0xf] %vm2030_vm3, %v2514_v15  ;;  %2124 = vst.msk [vmem:[%s3086_s27 + $0x174] sm:$0xf] %vm2030_vm3, %v2578_v16  ;;  %v1422_v23 = vmax.f32 %v1008_v17, 0.0  ;;  %v1019_v25 = vadd.f32 %v2718_v21, %v3075_v6  ;;  %v1275_v26 = vadd.f32 %v2782_v22, %v3075_v6 }
 0x11e   : > { %v1486_v24 = vmax.f32 %v1264_v18, 0.0  ;;  %v2519_v27 = vpack.c.bf16 %v1424_v19, %v1424_v19  ;;  %v2583_v28 = vpack.c.bf16 %v1488_v20, %v1488_v20  ;;  %v1010_v29 = vpop.f32.mrf.mxu0  ;;  %v1266_v30 = vpop.f32.mrf.mxu1 }
 0x11f   : > { %v2517_v31 = vpack.c.bf16 %v1422_v23, %v1422_v23  ;;  %v1425_v33 = vmax.f32 %v1019_v25, 0.0  ;;  %v1489_v34 = vmax.f32 %v1275_v26, 0.0  ;;  %v1011_v35 = vadd.f32 %v3075_v6, %v1010_v29 }
 0x120   : > { %v2581_v32 = vpack.c.bf16 %v1486_v24, %v1486_v24  ;;  %2065 = vst.msk [vmem:[%s3086_s27 + $0x88] sm:$0xf] %vm2030_vm3, %v2519_v27  ;;  %2129 = vst.msk [vmem:[%s3086_s27 + $0x188] sm:$0xf] %vm2030_vm3, %v2583_v28  ;;  %v1267_v36 = vadd.f32 %v3075_v6, %v1266_v30  ;;  %v2721_v37 = vpop.f32.mrf.mxu0  ;;  %v2785_v38 = vpop.f32.mrf.mxu1 }
 0x121   : > { %2063 = vst.msk [vmem:[%s3086_s27 + $0x80] sm:$0xf] %vm2030_vm3, %v2517_v31  ;;  %v2520_v39 = vpack.c.bf16 %v1425_v33, %v1425_v33  ;;  %v2584_v40 = vpack.c.bf16 %v1489_v34, %v1489_v34  ;;  %v1032_v41 = vadd.f32 %v2721_v37, %v3075_v6  ;;  %v1288_v42 = vadd.f32 %v2785_v38, %v3075_v6 }
 0x122   : > { %2127 = vst.msk [vmem:[%s3086_s27 + $0x180] sm:$0xf] %vm2030_vm3, %v2581_v32  ;;  %v1423_v43 = vmax.f32 %v1011_v35, 0.0  ;;  %v1487_v44 = vmax.f32 %v1267_v36, 0.0  ;;  %v1023_v45 = vpop.f32.mrf.mxu0  ;;  %v1279_v46 = vpop.f32.mrf.mxu1 }
 0x123   : > { %2066 = vst.msk [vmem:[%s3086_s27 + $0x8c] sm:$0xf] %vm2030_vm3, %v2520_v39  ;;  %2130 = vst.msk [vmem:[%s3086_s27 + $0x18c] sm:$0xf] %vm2030_vm3, %v2584_v40  ;;  %v1428_v47 = vmax.f32 %v1032_v41, 0.0  ;;  %v1492_v48 = vmax.f32 %v1288_v42, 0.0  ;;  %v1024_v49 = vadd.f32 %v3075_v6, %v1023_v45  ;;  %v1280_v50 = vadd.f32 %v3075_v6, %v1279_v46 }
 0x124   : > { %v2518_v51 = vpack.c.bf16 %v1423_v43, %v1423_v43  ;;  %v2582_v52 = vpack.c.bf16 %v1487_v44, %v1487_v44  ;;  %v2722_v53 = vpop.f32.mrf.mxu0  ;;  %v2786_v54 = vpop.f32.mrf.mxu1 }
 0x125   : > { %v2523_v55 = vpack.c.bf16 %v1428_v47, %v1428_v47  ;;  %v2587_v56 = vpack.c.bf16 %v1492_v48, %v1492_v48  ;;  %v1426_v57 = vmax.f32 %v1024_v49, 0.0  ;;  %v1490_v58 = vmax.f32 %v1280_v50, 0.0 }
 0x126   : > { %2064 = vst.msk [vmem:[%s3086_s27 + $0x84] sm:$0xf] %vm2030_vm3, %v2518_v51  ;;  %2128 = vst.msk [vmem:[%s3086_s27 + $0x184] sm:$0xf] %vm2030_vm3, %v2582_v52  ;;  %v1035_v59 = vadd.f32 %v2722_v53, %v3075_v6  ;;  %v1291_v60 = vadd.f32 %v2786_v54, %v3075_v6  ;;  %v1026_v61 = vpop.f32.mrf.mxu0  ;;  %v1282_v62 = vpop.f32.mrf.mxu1 }
 0x127   : > { %2069 = vst.msk [vmem:[%s3086_s27 + $0x98] sm:$0xf] %vm2030_vm3, %v2523_v55  ;;  %2133 = vst.msk [vmem:[%s3086_s27 + $0x198] sm:$0xf] %vm2030_vm3, %v2587_v56  ;;  %v2521_v63 = vpack.c.bf16 %v1426_v57, %v1426_v57  ;;  %v2585_v0 = vpack.c.bf16 %v1490_v58, %v1490_v58  ;;  %v1027_v1 = vadd.f32 %v3075_v6, %v1026_v61 }
 0x128   : > { %v1283_v2 = vadd.f32 %v3075_v6, %v1282_v62  ;;  %v1429_v3 = vmax.f32 %v1035_v59, 0.0  ;;  %v1493_v4 = vmax.f32 %v1291_v60, 0.0  ;;  %v2725_v5 = vpop.f32.mrf.mxu0  ;;  %v2789_v7 = vpop.f32.mrf.mxu1 }
 0x129   : > { %2067 = vst.msk [vmem:[%s3086_s27 + $0x90] sm:$0xf] %vm2030_vm3, %v2521_v63  ;;  %2131 = vst.msk [vmem:[%s3086_s27 + $0x190] sm:$0xf] %vm2030_vm3, %v2585_v0  ;;  %v1427_v8 = vmax.f32 %v1027_v1, 0.0  ;;  %v1048_v10 = vadd.f32 %v2725_v5, %v3075_v6  ;;  %v1304_v11 = vadd.f32 %v2789_v7, %v3075_v6 }
 0x12a   : > { %v1491_v9 = vmax.f32 %v1283_v2, 0.0  ;;  %v2524_v12 = vpack.c.bf16 %v1429_v3, %v1429_v3  ;;  %v2588_v13 = vpack.c.bf16 %v1493_v4, %v1493_v4  ;;  %v1039_v14 = vpop.f32.mrf.mxu0  ;;  %v1295_v15 = vpop.f32.mrf.mxu1 }
 0x12b   : > { %v2522_v16 = vpack.c.bf16 %v1427_v8, %v1427_v8  ;;  %v1432_v18 = vmax.f32 %v1048_v10, 0.0  ;;  %v1496_v19 = vmax.f32 %v1304_v11, 0.0  ;;  %v1040_v20 = vadd.f32 %v3075_v6, %v1039_v14 }
 0x12c   : > { %v2586_v17 = vpack.c.bf16 %v1491_v9, %v1491_v9  ;;  %2070 = vst.msk [vmem:[%s3086_s27 + $0x9c] sm:$0xf] %vm2030_vm3, %v2524_v12  ;;  %2134 = vst.msk [vmem:[%s3086_s27 + $0x19c] sm:$0xf] %vm2030_vm3, %v2588_v13  ;;  %v1296_v21 = vadd.f32 %v3075_v6, %v1295_v15  ;;  %v2726_v22 = vpop.f32.mrf.mxu0  ;;  %v2790_v23 = vpop.f32.mrf.mxu1 }
 0x12d   : > { %2068 = vst.msk [vmem:[%s3086_s27 + $0x94] sm:$0xf] %vm2030_vm3, %v2522_v16  ;;  %v2527_v24 = vpack.c.bf16 %v1432_v18, %v1432_v18  ;;  %v2591_v25 = vpack.c.bf16 %v1496_v19, %v1496_v19  ;;  %v1051_v26 = vadd.f32 %v2726_v22, %v3075_v6  ;;  %v1307_v27 = vadd.f32 %v2790_v23, %v3075_v6 }
 0x12e   : > { %2132 = vst.msk [vmem:[%s3086_s27 + $0x194] sm:$0xf] %vm2030_vm3, %v2586_v17  ;;  %v1430_v28 = vmax.f32 %v1040_v20, 0.0  ;;  %v1494_v29 = vmax.f32 %v1296_v21, 0.0  ;;  %v1042_v30 = vpop.f32.mrf.mxu0  ;;  %v1298_v31 = vpop.f32.mrf.mxu1 }
 0x12f   : > { %2073 = vst.msk [vmem:[%s3086_s27 + $0xa8] sm:$0xf] %vm2030_vm3, %v2527_v24  ;;  %2137 = vst.msk [vmem:[%s3086_s27 + $0x1a8] sm:$0xf] %vm2030_vm3, %v2591_v25  ;;  %v1433_v32 = vmax.f32 %v1051_v26, 0.0  ;;  %v1497_v33 = vmax.f32 %v1307_v27, 0.0  ;;  %v1043_v34 = vadd.f32 %v3075_v6, %v1042_v30  ;;  %v1299_v35 = vadd.f32 %v3075_v6, %v1298_v31 }
 0x130   : > { %v2525_v36 = vpack.c.bf16 %v1430_v28, %v1430_v28  ;;  %v2589_v37 = vpack.c.bf16 %v1494_v29, %v1494_v29  ;;  %v2729_v38 = vpop.f32.mrf.mxu0  ;;  %v2793_v39 = vpop.f32.mrf.mxu1 }
 0x131   : > { %v2528_v40 = vpack.c.bf16 %v1433_v32, %v1433_v32  ;;  %v2592_v41 = vpack.c.bf16 %v1497_v33, %v1497_v33  ;;  %v1431_v42 = vmax.f32 %v1043_v34, 0.0  ;;  %v1495_v43 = vmax.f32 %v1299_v35, 0.0 }
 0x132   : > { %2071 = vst.msk [vmem:[%s3086_s27 + $0xa0] sm:$0xf] %vm2030_vm3, %v2525_v36  ;;  %2135 = vst.msk [vmem:[%s3086_s27 + $0x1a0] sm:$0xf] %vm2030_vm3, %v2589_v37  ;;  %v1064_v44 = vadd.f32 %v2729_v38, %v3075_v6  ;;  %v1320_v45 = vadd.f32 %v2793_v39, %v3075_v6  ;;  %v1055_v46 = vpop.f32.mrf.mxu0  ;;  %v1311_v47 = vpop.f32.mrf.mxu1 }
 0x133   : > { %2074 = vst.msk [vmem:[%s3086_s27 + $0xac] sm:$0xf] %vm2030_vm3, %v2528_v40  ;;  %2138 = vst.msk [vmem:[%s3086_s27 + $0x1ac] sm:$0xf] %vm2030_vm3, %v2592_v41  ;;  %v2526_v48 = vpack.c.bf16 %v1431_v42, %v1431_v42  ;;  %v2590_v49 = vpack.c.bf16 %v1495_v43, %v1495_v43  ;;  %v1056_v50 = vadd.f32 %v3075_v6, %v1055_v46  ;;  %v3391_v43 = vld [vmem:[%s3478_s2] ss:$0 sm:$0xff] }
 0x134   : > { %v1312_v51 = vadd.f32 %v3075_v6, %v1311_v47  ;;  %v1436_v52 = vmax.f32 %v1064_v44, 0.0  ;;  %v1500_v53 = vmax.f32 %v1320_v45, 0.0  ;;  %v2730_v54 = vpop.f32.mrf.mxu0  ;;  %v2794_v55 = vpop.f32.mrf.mxu1 }
 0x135   : > { %2072 = vst.msk [vmem:[%s3086_s27 + $0xa4] sm:$0xf] %vm2030_vm3, %v2526_v48  ;;  %2136 = vst.msk [vmem:[%s3086_s27 + $0x1a4] sm:$0xf] %vm2030_vm3, %v2590_v49  ;;  %v1434_v56 = vmax.f32 %v1056_v50, 0.0  ;;  %v1067_v58 = vadd.f32 %v2730_v54, %v3075_v6  ;;  %v1323_v59 = vadd.f32 %v2794_v55, %v3075_v6 }
 0x136   : > { %v1498_v57 = vmax.f32 %v1312_v51, 0.0  ;;  %v2531_v60 = vpack.c.bf16 %v1436_v52, %v1436_v52  ;;  %v2595_v61 = vpack.c.bf16 %v1500_v53, %v1500_v53  ;;  %v1058_v62 = vpop.f32.mrf.mxu0  ;;  %v1314_v63 = vpop.f32.mrf.mxu1 }
 0x137   : > { %v2529_v0 = vpack.c.bf16 %v1434_v56, %v1434_v56  ;;  %v1437_v2 = vmax.f32 %v1067_v58, 0.0  ;;  %v1501_v3 = vmax.f32 %v1323_v59, 0.0  ;;  %v1059_v4 = vadd.f32 %v3075_v6, %v1058_v62 }
 0x138   : > { %v2593_v1 = vpack.c.bf16 %v1498_v57, %v1498_v57  ;;  %2077 = vst.msk [vmem:[%s3086_s27 + $0xb8] sm:$0xf] %vm2030_vm3, %v2531_v60  ;;  %2141 = vst.msk [vmem:[%s3086_s27 + $0x1b8] sm:$0xf] %vm2030_vm3, %v2595_v61  ;;  %v1315_v5 = vadd.f32 %v3075_v6, %v1314_v63  ;;  %v2733_v7 = vpop.f32.mrf.mxu0  ;;  %v2797_v8 = vpop.f32.mrf.mxu1 }
 0x139   : > { %2075 = vst.msk [vmem:[%s3086_s27 + $0xb0] sm:$0xf] %vm2030_vm3, %v2529_v0  ;;  %v2532_v9 = vpack.c.bf16 %v1437_v2, %v1437_v2  ;;  %v2596_v10 = vpack.c.bf16 %v1501_v3, %v1501_v3  ;;  %v1080_v11 = vadd.f32 %v2733_v7, %v3075_v6  ;;  %v1336_v12 = vadd.f32 %v2797_v8, %v3075_v6 }
 0x13a   : > { %2139 = vst.msk [vmem:[%s3086_s27 + $0x1b0] sm:$0xf] %vm2030_vm3, %v2593_v1  ;;  %v1435_v13 = vmax.f32 %v1059_v4, 0.0  ;;  %v1499_v14 = vmax.f32 %v1315_v5, 0.0  ;;  %v1071_v15 = vpop.f32.mrf.mxu0  ;;  %v1327_v16 = vpop.f32.mrf.mxu1 }
 0x13b   : > { %2078 = vst.msk [vmem:[%s3086_s27 + $0xbc] sm:$0xf] %vm2030_vm3, %v2532_v9  ;;  %2142 = vst.msk [vmem:[%s3086_s27 + $0x1bc] sm:$0xf] %vm2030_vm3, %v2596_v10  ;;  %v1440_v17 = vmax.f32 %v1080_v11, 0.0  ;;  %v1504_v18 = vmax.f32 %v1336_v12, 0.0  ;;  %v1072_v19 = vadd.f32 %v3075_v6, %v1071_v15  ;;  %v1328_v20 = vadd.f32 %v3075_v6, %v1327_v16 }
 0x13c   : > { %v2530_v21 = vpack.c.bf16 %v1435_v13, %v1435_v13  ;;  %v2594_v22 = vpack.c.bf16 %v1499_v14, %v1499_v14  ;;  %v2734_v23 = vpop.f32.mrf.mxu0  ;;  %v2798_v24 = vpop.f32.mrf.mxu1 }
 0x13d   : > { %v2535_v25 = vpack.c.bf16 %v1440_v17, %v1440_v17  ;;  %v2599_v26 = vpack.c.bf16 %v1504_v18, %v1504_v18  ;;  %v1438_v27 = vmax.f32 %v1072_v19, 0.0  ;;  %v1502_v28 = vmax.f32 %v1328_v20, 0.0 }
 0x13e   : > { %2076 = vst.msk [vmem:[%s3086_s27 + $0xb4] sm:$0xf] %vm2030_vm3, %v2530_v21  ;;  %2140 = vst.msk [vmem:[%s3086_s27 + $0x1b4] sm:$0xf] %vm2030_vm3, %v2594_v22  ;;  %v1083_v29 = vadd.f32 %v2734_v23, %v3075_v6  ;;  %v1339_v30 = vadd.f32 %v2798_v24, %v3075_v6  ;;  %v1074_v31 = vpop.f32.mrf.mxu0  ;;  %v1330_v32 = vpop.f32.mrf.mxu1 }
 0x13f   : > { %2081 = vst.msk [vmem:[%s3086_s27 + $0xc8] sm:$0xf] %vm2030_vm3, %v2535_v25  ;;  %2145 = vst.msk [vmem:[%s3086_s27 + $0x1c8] sm:$0xf] %vm2030_vm3, %v2599_v26  ;;  %v2533_v33 = vpack.c.bf16 %v1438_v27, %v1438_v27  ;;  %v2597_v34 = vpack.c.bf16 %v1502_v28, %v1502_v28  ;;  %v1075_v35 = vadd.f32 %v3075_v6, %v1074_v31 }
 0x140   : > { %v1331_v36 = vadd.f32 %v3075_v6, %v1330_v32  ;;  %v1441_v37 = vmax.f32 %v1083_v29, 0.0  ;;  %v1505_v38 = vmax.f32 %v1339_v30, 0.0  ;;  %v2737_v39 = vpop.f32.mrf.mxu0  ;;  %v2801_v40 = vpop.f32.mrf.mxu1 }
 0x141   : > { %2079 = vst.msk [vmem:[%s3086_s27 + $0xc0] sm:$0xf] %vm2030_vm3, %v2533_v33  ;;  %2143 = vst.msk [vmem:[%s3086_s27 + $0x1c0] sm:$0xf] %vm2030_vm3, %v2597_v34  ;;  %v1439_v41 = vmax.f32 %v1075_v35, 0.0  ;;  %v1096_v44 = vadd.f32 %v3391_v43, %v2737_v39  ;;  %v1352_v6 = vadd.f32 %v3391_v43, %v2801_v40 }
 0x142   : > { %v1503_v42 = vmax.f32 %v1331_v36, 0.0  ;;  %v2536_v45 = vpack.c.bf16 %v1441_v37, %v1441_v37  ;;  %v2600_v46 = vpack.c.bf16 %v1505_v38, %v1505_v38  ;;  %v1087_v47 = vpop.f32.mrf.mxu0  ;;  %v1343_v48 = vpop.f32.mrf.mxu1 }
 0x143   : > { %v2534_v49 = vpack.c.bf16 %v1439_v41, %v1439_v41  ;;  %v1444_v51 = vmax.f32 %v1096_v44, 0.0  ;;  %v1508_v52 = vmax.f32 %v1352_v6, 0.0  ;;  %v1088_v53 = vadd.f32 %v3391_v43, %v1087_v47 }
 0x144   : > { %v2598_v50 = vpack.c.bf16 %v1503_v42, %v1503_v42  ;;  %2082 = vst.msk [vmem:[%s3086_s27 + $0xcc] sm:$0xf] %vm2030_vm3, %v2536_v45  ;;  %2146 = vst.msk [vmem:[%s3086_s27 + $0x1cc] sm:$0xf] %vm2030_vm3, %v2600_v46  ;;  %v1344_v54 = vadd.f32 %v3391_v43, %v1343_v48  ;;  %v2738_v55 = vpop.f32.mrf.mxu0  ;;  %v2802_v56 = vpop.f32.mrf.mxu1 }
 0x145   : > { %2080 = vst.msk [vmem:[%s3086_s27 + $0xc4] sm:$0xf] %vm2030_vm3, %v2534_v49  ;;  %v2539_v57 = vpack.c.bf16 %v1444_v51, %v1444_v51  ;;  %v2603_v58 = vpack.c.bf16 %v1508_v52, %v1508_v52  ;;  %v1099_v59 = vadd.f32 %v3391_v43, %v2738_v55  ;;  %v1355_v60 = vadd.f32 %v3391_v43, %v2802_v56 }
 0x146   : > { %2144 = vst.msk [vmem:[%s3086_s27 + $0x1c4] sm:$0xf] %vm2030_vm3, %v2598_v50  ;;  %v1442_v61 = vmax.f32 %v1088_v53, 0.0  ;;  %v1506_v62 = vmax.f32 %v1344_v54, 0.0  ;;  %v1090_v63 = vpop.f32.mrf.mxu0  ;;  %v1346_v0 = vpop.f32.mrf.mxu1 }
 0x147   : > { %2085 = vst.msk [vmem:[%s3086_s27 + $0xd8] sm:$0xf] %vm2030_vm3, %v2539_v57  ;;  %2149 = vst.msk [vmem:[%s3086_s27 + $0x1d8] sm:$0xf] %vm2030_vm3, %v2603_v58  ;;  %v1445_v1 = vmax.f32 %v1099_v59, 0.0  ;;  %v1509_v2 = vmax.f32 %v1355_v60, 0.0  ;;  %v1091_v3 = vadd.f32 %v3391_v43, %v1090_v63  ;;  %v1347_v4 = vadd.f32 %v3391_v43, %v1346_v0 }
 0x148   : > { %v2537_v5 = vpack.c.bf16 %v1442_v61, %v1442_v61  ;;  %v2601_v7 = vpack.c.bf16 %v1506_v62, %v1506_v62  ;;  %v2741_v8 = vpop.f32.mrf.mxu0  ;;  %v2805_v9 = vpop.f32.mrf.mxu1 }
 0x149   : > { %v2540_v10 = vpack.c.bf16 %v1445_v1, %v1445_v1  ;;  %v2604_v11 = vpack.c.bf16 %v1509_v2, %v1509_v2  ;;  %v1443_v12 = vmax.f32 %v1091_v3, 0.0  ;;  %v1507_v13 = vmax.f32 %v1347_v4, 0.0 }
 0x14a   : > { %2083 = vst.msk [vmem:[%s3086_s27 + $0xd0] sm:$0xf] %vm2030_vm3, %v2537_v5  ;;  %2147 = vst.msk [vmem:[%s3086_s27 + $0x1d0] sm:$0xf] %vm2030_vm3, %v2601_v7  ;;  %v1112_v14 = vadd.f32 %v3391_v43, %v2741_v8  ;;  %v1368_v15 = vadd.f32 %v3391_v43, %v2805_v9  ;;  %v1103_v16 = vpop.f32.mrf.mxu0  ;;  %v1359_v17 = vpop.f32.mrf.mxu1 }
 0x14b   : > { %2086 = vst.msk [vmem:[%s3086_s27 + $0xdc] sm:$0xf] %vm2030_vm3, %v2540_v10  ;;  %2150 = vst.msk [vmem:[%s3086_s27 + $0x1dc] sm:$0xf] %vm2030_vm3, %v2604_v11  ;;  %v2538_v18 = vpack.c.bf16 %v1443_v12, %v1443_v12  ;;  %v2602_v19 = vpack.c.bf16 %v1507_v13, %v1507_v13  ;;  %v1104_v20 = vadd.f32 %v3391_v43, %v1103_v16 }
 0x14c   : > { %v1360_v21 = vadd.f32 %v3391_v43, %v1359_v17  ;;  %v1448_v22 = vmax.f32 %v1112_v14, 0.0  ;;  %v1512_v23 = vmax.f32 %v1368_v15, 0.0  ;;  %v2742_v24 = vpop.f32.mrf.mxu0  ;;  %v2806_v25 = vpop.f32.mrf.mxu1 }
 0x14d   : > { %2084 = vst.msk [vmem:[%s3086_s27 + $0xd4] sm:$0xf] %vm2030_vm3, %v2538_v18  ;;  %2148 = vst.msk [vmem:[%s3086_s27 + $0x1d4] sm:$0xf] %vm2030_vm3, %v2602_v19  ;;  %v1446_v26 = vmax.f32 %v1104_v20, 0.0  ;;  %v1115_v28 = vadd.f32 %v3391_v43, %v2742_v24  ;;  %v1371_v29 = vadd.f32 %v3391_v43, %v2806_v25 }
 0x14e   : > { %v1510_v27 = vmax.f32 %v1360_v21, 0.0  ;;  %v2543_v30 = vpack.c.bf16 %v1448_v22, %v1448_v22  ;;  %v2607_v31 = vpack.c.bf16 %v1512_v23, %v1512_v23  ;;  %v1106_v32 = vpop.f32.mrf.mxu0  ;;  %v1362_v33 = vpop.f32.mrf.mxu1 }
 0x14f   : > { %v2541_v34 = vpack.c.bf16 %v1446_v26, %v1446_v26  ;;  %v1449_v36 = vmax.f32 %v1115_v28, 0.0  ;;  %v1513_v37 = vmax.f32 %v1371_v29, 0.0  ;;  %v1107_v38 = vadd.f32 %v3391_v43, %v1106_v32 }
 0x150   : > { %v2605_v35 = vpack.c.bf16 %v1510_v27, %v1510_v27  ;;  %2089 = vst.msk [vmem:[%s3086_s27 + $0xe8] sm:$0xf] %vm2030_vm3, %v2543_v30  ;;  %2153 = vst.msk [vmem:[%s3086_s27 + $0x1e8] sm:$0xf] %vm2030_vm3, %v2607_v31  ;;  %v1363_v39 = vadd.f32 %v3391_v43, %v1362_v33  ;;  %v2745_v40 = vpop.f32.mrf.mxu0  ;;  %v2809_v41 = vpop.f32.mrf.mxu1 }
 0x151   : > { %2087 = vst.msk [vmem:[%s3086_s27 + $0xe0] sm:$0xf] %vm2030_vm3, %v2541_v34  ;;  %v2544_v42 = vpack.c.bf16 %v1449_v36, %v1449_v36  ;;  %v2608_v44 = vpack.c.bf16 %v1513_v37, %v1513_v37  ;;  %v1128_v6 = vadd.f32 %v3391_v43, %v2745_v40  ;;  %v1384_v45 = vadd.f32 %v3391_v43, %v2809_v41 }
 0x152   : > { %2151 = vst.msk [vmem:[%s3086_s27 + $0x1e0] sm:$0xf] %vm2030_vm3, %v2605_v35  ;;  %v1447_v46 = vmax.f32 %v1107_v38, 0.0  ;;  %v1511_v47 = vmax.f32 %v1363_v39, 0.0  ;;  %v1119_v48 = vpop.f32.mrf.mxu0  ;;  %v1375_v49 = vpop.f32.mrf.mxu1 }
 0x153   : > { %2090 = vst.msk [vmem:[%s3086_s27 + $0xec] sm:$0xf] %vm2030_vm3, %v2544_v42  ;;  %2154 = vst.msk [vmem:[%s3086_s27 + $0x1ec] sm:$0xf] %vm2030_vm3, %v2608_v44  ;;  %v1452_v50 = vmax.f32 %v1128_v6, 0.0  ;;  %v1516_v51 = vmax.f32 %v1384_v45, 0.0  ;;  %v1120_v52 = vadd.f32 %v3391_v43, %v1119_v48  ;;  %v1376_v53 = vadd.f32 %v3391_v43, %v1375_v49 }
 0x154   : > { %v2542_v54 = vpack.c.bf16 %v1447_v46, %v1447_v46  ;;  %v2606_v55 = vpack.c.bf16 %v1511_v47, %v1511_v47  ;;  %v2746_v56 = vpop.f32.mrf.mxu0  ;;  %v2810_v57 = vpop.f32.mrf.mxu1 }
 0x155   : > { %v2547_v58 = vpack.c.bf16 %v1452_v50, %v1452_v50  ;;  %v2611_v59 = vpack.c.bf16 %v1516_v51, %v1516_v51  ;;  %v1450_v60 = vmax.f32 %v1120_v52, 0.0  ;;  %v1514_v61 = vmax.f32 %v1376_v53, 0.0 }
 0x156   : > { %2088 = vst.msk [vmem:[%s3086_s27 + $0xe4] sm:$0xf] %vm2030_vm3, %v2542_v54  ;;  %2152 = vst.msk [vmem:[%s3086_s27 + $0x1e4] sm:$0xf] %vm2030_vm3, %v2606_v55  ;;  %v1131_v62 = vadd.f32 %v3391_v43, %v2746_v56  ;;  %v1387_v63 = vadd.f32 %v3391_v43, %v2810_v57  ;;  %v1122_v0 = vpop.f32.mrf.mxu0  ;;  %v1378_v1 = vpop.f32.mrf.mxu1 }
 0x157   : > { %2093 = vst.msk [vmem:[%s3086_s27 + $0xf8] sm:$0xf] %vm2030_vm3, %v2547_v58  ;;  %2157 = vst.msk [vmem:[%s3086_s27 + $0x1f8] sm:$0xf] %vm2030_vm3, %v2611_v59  ;;  %v2545_v2 = vpack.c.bf16 %v1450_v60, %v1450_v60  ;;  %v2609_v3 = vpack.c.bf16 %v1514_v61, %v1514_v61  ;;  %v1123_v4 = vadd.f32 %v3391_v43, %v1122_v0 }
 0x158   : > { %v1379_v5 = vadd.f32 %v3391_v43, %v1378_v1  ;;  %v1453_v7 = vmax.f32 %v1131_v62, 0.0  ;;  %v1517_v8 = vmax.f32 %v1387_v63, 0.0 }
 0x159   : > { %2091 = vst.msk [vmem:[%s3086_s27 + $0xf0] sm:$0xf] %vm2030_vm3, %v2545_v2  ;;  %2155 = vst.msk [vmem:[%s3086_s27 + $0x1f0] sm:$0xf] %vm2030_vm3, %v2609_v3  ;;  %v1451_v9 = vmax.f32 %v1123_v4, 0.0 }
 0x15a   : > { %v1515_v10 = vmax.f32 %v1379_v5, 0.0  ;;  %v2548_v11 = vpack.c.bf16 %v1453_v7, %v1453_v7  ;;  %v2612_v12 = vpack.c.bf16 %v1517_v8, %v1517_v8 }
 0x15b   : > { %v2546_v13 = vpack.c.bf16 %v1451_v9, %v1451_v9 }
 0x15c   : > { %v2610_v14 = vpack.c.bf16 %v1515_v10, %v1515_v10  ;;  %2094 = vst.msk [vmem:[%s3086_s27 + $0xfc] sm:$0xf] %vm2030_vm3, %v2548_v11  ;;  %2158 = vst.msk [vmem:[%s3086_s27 + $0x1fc] sm:$0xf] %vm2030_vm3, %v2612_v12 }
 0x15d   : > { %2092 = vst.msk [vmem:[%s3086_s27 + $0xf4] sm:$0xf] %vm2030_vm3, %v2546_v13 }
 0x15e   : > { %2156 = vst.msk [vmem:[%s3086_s27 + $0x1f4] sm:$0xf] %vm2030_vm3, %v2610_v14 }
 0x15f PF: > { %s13_s12 = sadd.s32 1, %s2897_s12  }
 0x160   : > { %p10_p4 = scmp.ge.s32.totalorder %s13_s12, 4  }
 0x162   :  { %12 = sbr.rel (!%p10_p4) target bundleno = 1 (0x1), region = 62 }

// kernel: _lambda_.11
= control target key start
LH: loop header
LB: loop body
LE: loop exit
PB: predicated region body
PF: predicated region fallthrough
CT: control target
= control target key end

     0   :  { %s3237_s12 = smov 0   ;;  %s3891_s0 = inlined_call_operand.vmem [shape: bf16[2048,144], index: 0, kind: input, shape index: {}]   ;;  %s3892_s1 = inlined_call_operand.vmem [shape: bf16[144,16], index: 1, kind: input, shape index: {}]   ;;  %s3893_s2 = inlined_call_operand.vmem [shape: f32[1,16], index: 2, kind: input, shape index: {}]   ;;  %s3894_s3 = inlined_call_operand.vmem [shape: bf16[2048,16], index: 3, kind: output, shape index: {}]  }
   0x1 LB: > { %s2524_s13 = sadd.s32 4294967295, %s3214_s12   ;;  %p2528_p0 = scmp.ge.s32.totalorder %s3214_s12, 1  ;;  %s3214_s12 = sphi %s3237_s12, %s13_s12  }
   0x2   : > { %p139_p1 = scmp.lt.s32.totalorder %s3214_s12, 3 }
   0x4   : > { %p140_p2 = pnand %p2528_p0, %p139_p1 }
   0x5   : > { %s2529_s16 = sshll.u32 (!%p140_p2), %s2524_s13, 7 }
   0x6   : > { %143 = sbr.rel (%p140_p2) target bundleno = 500 (0x1f4), region = 32  ;;  %p165_p3 = scmp.lt.s32.totalorder (!%p140_p2), %s2529_s16, 255 }
   0xb   : > { %v3022_v0 = vld [vmem:[%s3892_s1 + $0x38] sm:$0xff]   ;;  %v3216_v1 = vmov 0   ;;  %v3023_v2 = vld [vmem:[%s3892_s1 + $0x30] sm:$0xff]   ;;  %s3896_s16 = smov (!%p165_p3, %s2529_s16), 255  ;;  %v3024_v3 = vld [vmem:[%s3892_s1 + $0x28] sm:$0xff]   ;;  %vm961_vm0 = vcmask 130048  }
   0xc   : > { %1154 = vmatprep.subr.bf16.mxu0 %v3216_v1  ;;  %2995 = vmatprep.subr.bf16.mxu1 %v3216_v1  ;;  %s2866_s21 = sshll.u32 %s3896_s16, 3  ;;  %v3025_v4 = vld [vmem:[%s3892_s1 + $0x20] sm:$0xff]   ;;  %v3026_v7 = vld [vmem:[%s3892_s1 + $0x18] sm:$0xff]   ;;  %v3027_v8 = vld [vmem:[%s3892_s1 + $0x10] sm:$0xff]   ;;  %s2533_s13 = sshll.u32 %s3896_s16, 2  ;;  %vm2339_vm1 = vcmask 125952  }
   0xd   : > { %1155 = vmatpush1.bf16.msra.mxu0 %v3022_v0  ;;  %3004 = vmatpush1.bf16.msra.mxu1 %v3022_v0  ;;  %s3260_s24 = scalar_lea.vmem %s3891_s0, %s2866_s21  ;;  %v3028_v9 = vld [vmem:[%s3892_s1 + $0x8] sm:$0xff]   ;;  %v3029_v10 = vld [vmem:[%s3892_s1] sm:$0xff]   ;;  %s3451_s16 = scalar_lea.vmem %s3894_s3, %s2533_s13 }
   0xe   : > { %1156 = vmatprep.subr.bf16.mxu0 %v3216_v1  ;;  %2996 = vmatprep.subr.bf16.mxu1 %v3216_v1  ;;  %v3033_v5 = vld [vmem:[%s3260_s24 + $0x4] ss:$8 sps:$4 sm:$0xff]   ;;  %v3031_v12 = vld [vmem:[%s3260_s24] ss:$8 sps:$4 sm:$0xff]   ;;  %v3037_v14 = vld [vmem:[%s3260_s24 + $0x14] ss:$8 sps:$4 sm:$0xff]  }
   0xf   : > { %v3036_v6 = vld [vmem:[%s3260_s24 + $0x204] ss:$8 sps:$4 sm:$0xff]   ;;  %2672 = vmatprep.mubr.msk.bf16.mxu0 %vm961_vm0, %v3033_v5  ;;  %v3034_v13 = vld [vmem:[%s3260_s24 + $0x200] ss:$8 sps:$4 sm:$0xff]   ;;  %v3039_v15 = vld [vmem:[%s3260_s24 + $0x214] ss:$8 sps:$4 sm:$0xff]  }
  0x10   : > { %2704 = vmatprep.mubr.msk.bf16.mxu1 %vm961_vm0, %v3036_v6  ;;  %v3030_v11 = vld [vmem:[%s3892_s1 + $0x40] sm:$0xff]   ;;  %v3041_v16 = vld [vmem:[%s3260_s24 + $0x10] ss:$8 sps:$4 sm:$0xff]   ;;  %v3049_v22 = vld [vmem:[%s3260_s24 + $0x34] ss:$8 sps:$4 sm:$0xff]  }
  0x11   : > { %1157 = vmatpush1.bf16.msra.mxu0 %v3023_v2  ;;  %3005 = vmatpush1.bf16.msra.mxu1 %v3023_v2  ;;  %v3042_v17 = vld [vmem:[%s3260_s24 + $0x210] ss:$8 sps:$4 sm:$0xff]   ;;  %v3043_v18 = vld [vmem:[%s3260_s24 + $0x24] ss:$8 sps:$4 sm:$0xff]   ;;  %v3047_v20 = vld [vmem:[%s3260_s24 + $0x20] ss:$8 sps:$4 sm:$0xff]  }
  0x12   : > { %1158 = vmatprep.subr.bf16.mxu0 %v3216_v1  ;;  %2997 = vmatprep.subr.bf16.mxu1 %v3216_v1  ;;  %v3045_v19 = vld [vmem:[%s3260_s24 + $0x224] ss:$8 sps:$4 sm:$0xff]   ;;  %v3048_v21 = vld [vmem:[%s3260_s24 + $0x220] ss:$8 sps:$4 sm:$0xff]   ;;  %v3051_v23 = vld [vmem:[%s3260_s24 + $0x234] ss:$8 sps:$4 sm:$0xff]  }
  0x13   : > { %v3053_v24 = vld [vmem:[%s3260_s24 + $0x30] ss:$8 sps:$4 sm:$0xff]   ;;  %v3055_v26 = vld [vmem:[%s3260_s24 + $0x44] ss:$8 sps:$4 sm:$0xff]   ;;  %v3059_v28 = vld [vmem:[%s3260_s24 + $0x40] ss:$8 sps:$4 sm:$0xff]  }
  0x14   : > { %v3054_v25 = vld [vmem:[%s3260_s24 + $0x230] ss:$8 sps:$4 sm:$0xff]   ;;  %v3057_v27 = vld [vmem:[%s3260_s24 + $0x244] ss:$8 sps:$4 sm:$0xff]   ;;  %v3060_v29 = vld [vmem:[%s3260_s24 + $0x240] ss:$8 sps:$4 sm:$0xff]  }
  0x15   : > { %1159 = vmatpush1.bf16.msra.mxu0 %v3024_v3  ;;  %3006 = vmatpush1.bf16.msra.mxu1 %v3024_v3  ;;  %v3061_v30 = vld [vmem:[%s3260_s24 + $0x54] ss:$8 sps:$4 sm:$0xff]   ;;  %v3065_v32 = vld [vmem:[%s3260_s24 + $0x50] ss:$8 sps:$4 sm:$0xff]   ;;  %v3067_v34 = vld [vmem:[%s3260_s24 + $0x64] ss:$8 sps:$4 sm:$0xff]  }
  0x16   : > { %1160 = vmatprep.subr.bf16.mxu0 %v3216_v1  ;;  %2998 = vmatprep.subr.bf16.mxu1 %v3216_v1  ;;  %v3063_v31 = vld [vmem:[%s3260_s24 + $0x254] ss:$8 sps:$4 sm:$0xff]   ;;  %v3066_v33 = vld [vmem:[%s3260_s24 + $0x250] ss:$8 sps:$4 sm:$0xff]   ;;  %v3069_v35 = vld [vmem:[%s3260_s24 + $0x264] ss:$8 sps:$4 sm:$0xff]  }
  0x17   : > { %v3071_v36 = vld [vmem:[%s3260_s24 + $0x60] ss:$8 sps:$4 sm:$0xff]   ;;  %v3073_v38 = vld [vmem:[%s3260_s24 + $0x74] ss:$8 sps:$4 sm:$0xff]   ;;  %v3077_v40 = vld [vmem:[%s3260_s24 + $0x70] ss:$8 sps:$4 sm:$0xff]  }
  0x18   : > { %v3072_v37 = vld [vmem:[%s3260_s24 + $0x260] ss:$8 sps:$4 sm:$0xff]   ;;  %v3075_v39 = vld [vmem:[%s3260_s24 + $0x274] ss:$8 sps:$4 sm:$0xff]   ;;  %v3078_v41 = vld [vmem:[%s3260_s24 + $0x270] ss:$8 sps:$4 sm:$0xff]  }
  0x19   : > { %1161 = vmatpush1.bf16.msra.mxu0 %v3025_v4  ;;  %3007 = vmatpush1.bf16.msra.mxu1 %v3025_v4  ;;  %v3079_v42 = vld [vmem:[%s3260_s24 + $0x84] ss:$8 sps:$4 sm:$0xff]   ;;  %v3083_v44 = vld [vmem:[%s3260_s24 + $0x80] ss:$8 sps:$4 sm:$0xff]   ;;  %v3085_v46 = vld [vmem:[%s3260_s24 + $0x94] ss:$8 sps:$4 sm:$0xff]  }
  0x1a   : > { %1162 = vmatprep.subr.bf16.mxu0 %v3216_v1  ;;  %2999 = vmatprep.subr.bf16.mxu1 %v3216_v1  ;;  %v3081_v43 = vld [vmem:[%s3260_s24 + $0x284] ss:$8 sps:$4 sm:$0xff]   ;;  %v3084_v45 = vld [vmem:[%s3260_s24 + $0x280] ss:$8 sps:$4 sm:$0xff]   ;;  %v3087_v47 = vld [vmem:[%s3260_s24 + $0x294] ss:$8 sps:$4 sm:$0xff]  }
  0x1b   : > { %v3089_v48 = vld [vmem:[%s3260_s24 + $0x90] ss:$8 sps:$4 sm:$0xff]   ;;  %v3091_v50 = vld [vmem:[%s3260_s24 + $0xa4] ss:$8 sps:$4 sm:$0xff]   ;;  %v3095_v52 = vld [vmem:[%s3260_s24 + $0xa0] ss:$8 sps:$4 sm:$0xff]  }
  0x1c   : > { %v3090_v49 = vld [vmem:[%s3260_s24 + $0x290] ss:$8 sps:$4 sm:$0xff]   ;;  %v3093_v51 = vld [vmem:[%s3260_s24 + $0x2a4] ss:$8 sps:$4 sm:$0xff]   ;;  %v3096_v53 = vld [vmem:[%s3260_s24 + $0x2a0] ss:$8 sps:$4 sm:$0xff]  }
  0x1d   : > { %1163 = vmatpush1.bf16.msra.mxu0 %v3026_v7  ;;  %3008 = vmatpush1.bf16.msra.mxu1 %v3026_v7  ;;  %v3097_v54 = vld [vmem:[%s3260_s24 + $0xb4] ss:$8 sps:$4 sm:$0xff]   ;;  %v3101_v56 = vld [vmem:[%s3260_s24 + $0xb0] ss:$8 sps:$4 sm:$0xff]   ;;  %v3103_v58 = vld [vmem:[%s3260_s24 + $0xc4] ss:$8 sps:$4 sm:$0xff]  }
  0x1e   : > { %1164 = vmatprep.subr.bf16.mxu0 %v3216_v1  ;;  %3000 = vmatprep.subr.bf16.mxu1 %v3216_v1  ;;  %v3099_v55 = vld [vmem:[%s3260_s24 + $0x2b4] ss:$8 sps:$4 sm:$0xff]   ;;  %v3102_v57 = vld [vmem:[%s3260_s24 + $0x2b0] ss:$8 sps:$4 sm:$0xff]   ;;  %v3105_v59 = vld [vmem:[%s3260_s24 + $0x2c4] ss:$8 sps:$4 sm:$0xff]  }
  0x1f   : > { %v3107_v60 = vld [vmem:[%s3260_s24 + $0xc0] ss:$8 sps:$4 sm:$0xff]   ;;  %v3109_v62 = vld [vmem:[%s3260_s24 + $0xd4] ss:$8 sps:$4 sm:$0xff]   ;;  %v3113_v0 = vld [vmem:[%s3260_s24 + $0xd0] ss:$8 sps:$4 sm:$0xff]  }
  0x20   : > { %v3108_v61 = vld [vmem:[%s3260_s24 + $0x2c0] ss:$8 sps:$4 sm:$0xff]   ;;  %v3111_v63 = vld [vmem:[%s3260_s24 + $0x2d4] ss:$8 sps:$4 sm:$0xff]   ;;  %v3115_v2 = vld [vmem:[%s3260_s24 + $0xe4] ss:$8 sps:$4 sm:$0xff]  }
  0x21   : > { %1165 = vmatpush1.bf16.msra.mxu0 %v3027_v8  ;;  %3009 = vmatpush1.bf16.msra.mxu1 %v3027_v8  ;;  %v3117_v3 = vld [vmem:[%s3260_s24 + $0x2e4] ss:$8 sps:$4 sm:$0xff]   ;;  %v3119_v4 = vld [vmem:[%s3260_s24 + $0xe0] ss:$8 sps:$4 sm:$0xff]   ;;  %v3121_v6 = vld [vmem:[%s3260_s24 + $0xf4] ss:$8 sps:$4 sm:$0xff]  }
  0x22   : > { %1166 = vmatprep.subr.bf16.mxu0 %v3216_v1  ;;  %3001 = vmatprep.subr.bf16.mxu1 %v3216_v1  ;;  %v3120_v5 = vld [vmem:[%s3260_s24 + $0x2e0] ss:$8 sps:$4 sm:$0xff]   ;;  %v3123_v7 = vld [vmem:[%s3260_s24 + $0x2f4] ss:$8 sps:$4 sm:$0xff]   ;;  %v3125_v8 = vld [vmem:[%s3260_s24 + $0xf0] ss:$8 sps:$4 sm:$0xff]  }
  0x25   : > { %1167 = vmatpush1.bf16.msra.mxu0 %v3028_v9  ;;  %3010 = vmatpush1.bf16.msra.mxu1 %v3028_v9  ;;  %v3126_v9 = vld [vmem:[%s3260_s24 + $0x2f0] ss:$8 sps:$4 sm:$0xff]  }
  0x26   : > { %1168 = vmatprep.subr.bf16.mxu0 %v3216_v1  ;;  %3002 = vmatprep.subr.bf16.mxu1 %v3216_v1 }
  0x29   : > { %1169 = vmatpush1.bf16.msra.mxu0 %v3029_v10  ;;  %3011 = vmatpush1.bf16.msra.mxu1 %v3029_v10  ;;  %v3127_v10 = vld [vmem:[%s3260_s24 + $0x104] ss:$8 sps:$4 sm:$0xff]  }
  0x2a   : > { %1184 = vmatprep.subr.bf16.mxu0 %v3216_v1  ;;  %3003 = vmatprep.subr.bf16.mxu1 %v3216_v1  ;;  %v3114_v1 = vld [vmem:[%s3260_s24 + $0x2d0] ss:$8 sps:$4 sm:$0xff]  }
  0x2d   : > { %1185 = vmatpush2.bf16.msra.mxu0 %v3030_v11  ;;  %3012 = vmatpush2.bf16.msra.mxu1 %v3030_v11  ;;  %v3129_v11 = vld [vmem:[%s3260_s24 + $0x304] ss:$8 sps:$4 sm:$0xff]  }
  0x30   : > { %1187 = vmatmul.mubr.bf16.vlgmr.msra.gmra.mxu0 %v3031_v12  ;;  %1443 = vmatmul.mubr.bf16.vlgmr.msra.gmra.mxu1 %v3034_v13  ;;  %v3131_v12 = vld [vmem:[%s3260_s24 + $0x100] ss:$8 sps:$4 sm:$0xff]  }
  0x31   : > { %2673 = vmatprep.mubr.msk.bf16.mxu0 %vm961_vm0, %v3037_v14  ;;  %2705 = vmatprep.mubr.msk.bf16.mxu1 %vm961_vm0, %v3039_v15  ;;  %v3132_v13 = vld [vmem:[%s3260_s24 + $0x300] ss:$8 sps:$4 sm:$0xff]   ;;  %v3133_v14 = vld [vmem:[%s3260_s24 + $0x114] ss:$8 sps:$4 sm:$0xff]  }
  0x32   : > { %v3135_v15 = vld [vmem:[%s3260_s24 + $0x314] ss:$8 sps:$4 sm:$0xff]  }
  0x38   : > { %1195 = vmatmul.mubr.bf16.gmra.mxu0 %v3041_v16  ;;  %1451 = vmatmul.mubr.bf16.gmra.mxu1 %v3042_v17  ;;  %v3137_v16 = vld [vmem:[%s3260_s24 + $0x110] ss:$8 sps:$4 sm:$0xff]  }
  0x39   : > { %2674 = vmatprep.mubr.msk.bf16.mxu0 %vm961_vm0, %v3043_v18  ;;  %2706 = vmatprep.mubr.msk.bf16.mxu1 %vm961_vm0, %v3045_v19  ;;  %v3138_v17 = vld [vmem:[%s3260_s24 + $0x310] ss:$8 sps:$4 sm:$0xff]   ;;  %v3139_v18 = vld [vmem:[%s3260_s24 + $0x124] ss:$8 sps:$4 sm:$0xff]  }
  0x3a   : > { %v3141_v19 = vld [vmem:[%s3260_s24 + $0x324] ss:$8 sps:$4 sm:$0xff]  }
  0x40   : > { %1203 = vmatmul.mubr.bf16.gmra.mxu0 %v3047_v20  ;;  %1459 = vmatmul.mubr.bf16.gmra.mxu1 %v3048_v21  ;;  %v3143_v20 = vld [vmem:[%s3260_s24 + $0x120] ss:$8 sps:$4 sm:$0xff]  }
  0x41   : > { %2675 = vmatprep.mubr.msk.bf16.mxu0 %vm961_vm0, %v3049_v22  ;;  %2707 = vmatprep.mubr.msk.bf16.mxu1 %vm961_vm0, %v3051_v23  ;;  %v3144_v21 = vld [vmem:[%s3260_s24 + $0x320] ss:$8 sps:$4 sm:$0xff]   ;;  %v3145_v22 = vld [vmem:[%s3260_s24 + $0x134] ss:$8 sps:$4 sm:$0xff]  }
  0x42   : > { %v3147_v23 = vld [vmem:[%s3260_s24 + $0x334] ss:$8 sps:$4 sm:$0xff]  }
  0x48   : > { %1211 = vmatmul.mubr.bf16.gmra.mxu0 %v3053_v24  ;;  %1467 = vmatmul.mubr.bf16.gmra.mxu1 %v3054_v25  ;;  %v3149_v24 = vld [vmem:[%s3260_s24 + $0x130] ss:$8 sps:$4 sm:$0xff]  }
  0x49   : > { %2676 = vmatprep.mubr.msk.bf16.mxu0 %vm961_vm0, %v3055_v26  ;;  %2708 = vmatprep.mubr.msk.bf16.mxu1 %vm961_vm0, %v3057_v27  ;;  %v3150_v25 = vld [vmem:[%s3260_s24 + $0x330] ss:$8 sps:$4 sm:$0xff]   ;;  %v3151_v26 = vld [vmem:[%s3260_s24 + $0x144] ss:$8 sps:$4 sm:$0xff]  }
  0x4a   : > { %v3153_v27 = vld [vmem:[%s3260_s24 + $0x344] ss:$8 sps:$4 sm:$0xff]  }
  0x50   : > { %1219 = vmatmul.mubr.bf16.gmra.mxu0 %v3059_v28  ;;  %1475 = vmatmul.mubr.bf16.gmra.mxu1 %v3060_v29  ;;  %v3155_v28 = vld [vmem:[%s3260_s24 + $0x140] ss:$8 sps:$4 sm:$0xff]  }
  0x51   : > { %2677 = vmatprep.mubr.msk.bf16.mxu0 %vm961_vm0, %v3061_v30  ;;  %2709 = vmatprep.mubr.msk.bf16.mxu1 %vm961_vm0, %v3063_v31  ;;  %v3156_v29 = vld [vmem:[%s3260_s24 + $0x340] ss:$8 sps:$4 sm:$0xff]   ;;  %v3157_v30 = vld [vmem:[%s3260_s24 + $0x154] ss:$8 sps:$4 sm:$0xff]  }
  0x52   : > { %v3159_v31 = vld [vmem:[%s3260_s24 + $0x354] ss:$8 sps:$4 sm:$0xff]  }
  0x58   : > { %1227 = vmatmul.mubr.bf16.gmra.mxu0 %v3065_v32  ;;  %1483 = vmatmul.mubr.bf16.gmra.mxu1 %v3066_v33  ;;  %v3161_v32 = vld [vmem:[%s3260_s24 + $0x150] ss:$8 sps:$4 sm:$0xff]  }
  0x59   : > { %2678 = vmatprep.mubr.msk.bf16.mxu0 %vm961_vm0, %v3067_v34  ;;  %2710 = vmatprep.mubr.msk.bf16.mxu1 %vm961_vm0, %v3069_v35  ;;  %v3162_v33 = vld [vmem:[%s3260_s24 + $0x350] ss:$8 sps:$4 sm:$0xff]   ;;  %v3163_v34 = vld [vmem:[%s3260_s24 + $0x164] ss:$8 sps:$4 sm:$0xff]  }
  0x5a   : > { %v3165_v35 = vld [vmem:[%s3260_s24 + $0x364] ss:$8 sps:$4 sm:$0xff]  }
  0x60   : > { %1235 = vmatmul.mubr.bf16.gmra.mxu0 %v3071_v36  ;;  %1491 = vmatmul.mubr.bf16.gmra.mxu1 %v3072_v37  ;;  %v3167_v36 = vld [vmem:[%s3260_s24 + $0x160] ss:$8 sps:$4 sm:$0xff]  }
  0x61   : > { %2679 = vmatprep.mubr.msk.bf16.mxu0 %vm961_vm0, %v3073_v38  ;;  %2711 = vmatprep.mubr.msk.bf16.mxu1 %vm961_vm0, %v3075_v39  ;;  %v3168_v37 = vld [vmem:[%s3260_s24 + $0x360] ss:$8 sps:$4 sm:$0xff]   ;;  %v3169_v38 = vld [vmem:[%s3260_s24 + $0x174] ss:$8 sps:$4 sm:$0xff]  }
  0x62   : > { %v3171_v39 = vld [vmem:[%s3260_s24 + $0x374] ss:$8 sps:$4 sm:$0xff]  }
  0x68   : > { %1243 = vmatmul.mubr.bf16.gmra.mxu0 %v3077_v40  ;;  %1499 = vmatmul.mubr.bf16.gmra.mxu1 %v3078_v41  ;;  %v3173_v40 = vld [vmem:[%s3260_s24 + $0x170] ss:$8 sps:$4 sm:$0xff]  }
  0x69   : > { %2680 = vmatprep.mubr.msk.bf16.mxu0 %vm961_vm0, %v3079_v42  ;;  %2712 = vmatprep.mubr.msk.bf16.mxu1 %vm961_vm0, %v3081_v43  ;;  %v3174_v41 = vld [vmem:[%s3260_s24 + $0x370] ss:$8 sps:$4 sm:$0xff]   ;;  %v3175_v42 = vld [vmem:[%s3260_s24 + $0x184] ss:$8 sps:$4 sm:$0xff]  }
  0x6a   : > { %v3177_v43 = vld [vmem:[%s3260_s24 + $0x384] ss:$8 sps:$4 sm:$0xff]  }
  0x70   : > { %1251 = vmatmul.mubr.bf16.gmra.mxu0 %v3083_v44  ;;  %1507 = vmatmul.mubr.bf16.gmra.mxu1 %v3084_v45  ;;  %v226_v44 = vld [vmem:[%s3260_s24 + $0x180] sm:$0xff]  ;;  %v227_v45 = vld [vmem:[%s3260_s24 + $0x188] sm:$0xff] }
  0x71   : > { %2681 = vmatprep.mubr.msk.bf16.mxu0 %vm961_vm0, %v3085_v46  ;;  %2713 = vmatprep.mubr.msk.bf16.mxu1 %vm961_vm0, %v3087_v47  ;;  %v290_v46 = vld [vmem:[%s3260_s24 + $0x380] sm:$0xff]  ;;  %v291_v47 = vld [vmem:[%s3260_s24 + $0x388] sm:$0xff] }
  0x78   : > { %1259 = vmatmul.mubr.bf16.gmra.mxu0 %v3089_v48  ;;  %1515 = vmatmul.mubr.bf16.gmra.mxu1 %v3090_v49  ;;  %v2583_v48 = vcombine.low %v226_v44, %v227_v45  ;;  %v2647_v49 = vcombine.low %v290_v46, %v291_v47  ;;  %v232_v45 = vld [vmem:[%s3260_s24 + $0x1b0] sm:$0xff] }
  0x79   : > { %2682 = vmatprep.mubr.msk.bf16.mxu0 %vm961_vm0, %v3091_v50  ;;  %2714 = vmatprep.mubr.msk.bf16.mxu1 %vm961_vm0, %v3093_v51  ;;  %v3179_v50 = vld [vmem:[%s3260_s24 + $0x194] ss:$8 sps:$4 sm:$0xff]  }
  0x7a   : > { %v3181_v51 = vld [vmem:[%s3260_s24 + $0x394] ss:$8 sps:$4 sm:$0xff]  }
  0x80   : > { %1267 = vmatmul.mubr.bf16.gmra.mxu0 %v3095_v52  ;;  %1523 = vmatmul.mubr.bf16.gmra.mxu1 %v3096_v53  ;;  %v3437_v52 = vld [vmem:[%s3893_s2] ss:$0 sm:$0xff] }
  0x81   : > { %2683 = vmatprep.mubr.msk.bf16.mxu0 %vm961_vm0, %v3097_v54  ;;  %2715 = vmatprep.mubr.msk.bf16.mxu1 %vm961_vm0, %v3099_v55  ;;  %v228_v55 = vld [vmem:[%s3260_s24 + $0x190] sm:$0xff] }
  0x88   : > { %1275 = vmatmul.mubr.bf16.gmra.mxu0 %v3101_v56  ;;  %1531 = vmatmul.mubr.bf16.gmra.mxu1 %v3102_v57 }
  0x89   : > { %2684 = vmatprep.mubr.msk.bf16.mxu0 %vm961_vm0, %v3103_v58  ;;  %2716 = vmatprep.mubr.msk.bf16.mxu1 %vm961_vm0, %v3105_v59  ;;  %v229_v58 = vld [vmem:[%s3260_s24 + $0x198] sm:$0xff]  ;;  %v292_v59 = vld [vmem:[%s3260_s24 + $0x390] sm:$0xff] }
  0x90   : > { %1283 = vmatmul.mubr.bf16.gmra.mxu0 %v3107_v60  ;;  %1539 = vmatmul.mubr.bf16.gmra.mxu1 %v3108_v61  ;;  %v293_v60 = vld [vmem:[%s3260_s24 + $0x398] sm:$0xff] }
  0x91   : > { %2685 = vmatprep.mubr.msk.bf16.mxu0 %vm961_vm0, %v3109_v62  ;;  %2717 = vmatprep.mubr.msk.bf16.mxu1 %vm961_vm0, %v3111_v63 }
  0x98   : > { %1291 = vmatmul.mubr.bf16.gmra.mxu0 %v3113_v0  ;;  %1547 = vmatmul.mubr.bf16.gmra.mxu1 %v3114_v1 }
  0x99   : > { %2686 = vmatprep.mubr.msk.bf16.mxu0 %vm961_vm0, %v3115_v2  ;;  %2718 = vmatprep.mubr.msk.bf16.mxu1 %vm961_vm0, %v3117_v3  ;;  %v2585_v3 = vcombine.low %v228_v55, %v229_v58 }
  0xa0   : > { %1299 = vmatmul.mubr.bf16.gmra.mxu0 %v3119_v4  ;;  %1555 = vmatmul.mubr.bf16.gmra.mxu1 %v3120_v5  ;;  %v2649_v4 = vcombine.low %v292_v59, %v293_v60 }
  0xa1   : > { %2687 = vmatprep.mubr.msk.bf16.mxu0 %vm961_vm0, %v3121_v6  ;;  %2719 = vmatprep.mubr.msk.bf16.mxu1 %vm961_vm0, %v3123_v7 }
  0xa8   : > { %1307 = vmatmul.mubr.bf16.gmra.mxu0 %v3125_v8  ;;  %1563 = vmatmul.mubr.bf16.gmra.mxu1 %v3126_v9  ;;  %v3183_v9 = vld [vmem:[%s3260_s24 + $0x1a4] ss:$8 sps:$4 sm:$0xff]  }
  0xa9   : > { %2688 = vmatprep.mubr.msk.bf16.mxu0 %vm961_vm0, %v3127_v10  ;;  %2720 = vmatprep.mubr.msk.bf16.mxu1 %vm961_vm0, %v3129_v11 }
  0xb0   : > { %1315 = vmatmul.mubr.bf16.gmra.mxu0 %v3131_v12  ;;  %1571 = vmatmul.mubr.bf16.gmra.mxu1 %v3132_v13  ;;  %v3185_v12 = vld [vmem:[%s3260_s24 + $0x3a4] ss:$8 sps:$4 sm:$0xff]  }
  0xb1   : > { %2689 = vmatprep.mubr.msk.bf16.mxu0 %vm961_vm0, %v3133_v14  ;;  %2721 = vmatprep.mubr.msk.bf16.mxu1 %vm961_vm0, %v3135_v15 }
  0xb8   : > { %1323 = vmatmul.mubr.bf16.gmra.mxu0 %v3137_v16  ;;  %1579 = vmatmul.mubr.bf16.gmra.mxu1 %v3138_v17  ;;  %v230_v17 = vld [vmem:[%s3260_s24 + $0x1a0] sm:$0xff] }
  0xb9   : > { %2690 = vmatprep.mubr.msk.bf16.mxu0 %vm961_vm0, %v3139_v18  ;;  %2722 = vmatprep.mubr.msk.bf16.mxu1 %vm961_vm0, %v3141_v19 }
  0xc0   : > { %1331 = vmatmul.mubr.bf16.gmra.mxu0 %v3143_v20  ;;  %1587 = vmatmul.mubr.bf16.gmra.mxu1 %v3144_v21 }
  0xc1   : > { %2691 = vmatprep.mubr.msk.bf16.mxu0 %vm961_vm0, %v3145_v22  ;;  %2723 = vmatprep.mubr.msk.bf16.mxu1 %vm961_vm0, %v3147_v23  ;;  %v231_v22 = vld [vmem:[%s3260_s24 + $0x1a8] sm:$0xff]  ;;  %v294_v23 = vld [vmem:[%s3260_s24 + $0x3a0] sm:$0xff] }
  0xc8   : > { %1339 = vmatmul.mubr.bf16.gmra.mxu0 %v3149_v24  ;;  %1595 = vmatmul.mubr.bf16.gmra.mxu1 %v3150_v25  ;;  %v295_v24 = vld [vmem:[%s3260_s24 + $0x3a8] sm:$0xff] }
  0xc9   : > { %2692 = vmatprep.mubr.msk.bf16.mxu0 %vm961_vm0, %v3151_v26  ;;  %2724 = vmatprep.mubr.msk.bf16.mxu1 %vm961_vm0, %v3153_v27 }
  0xd0   : > { %1347 = vmatmul.mubr.bf16.gmra.mxu0 %v3155_v28  ;;  %1603 = vmatmul.mubr.bf16.gmra.mxu1 %v3156_v29 }
  0xd1   : > { %2693 = vmatprep.mubr.msk.bf16.mxu0 %vm961_vm0, %v3157_v30  ;;  %2725 = vmatprep.mubr.msk.bf16.mxu1 %vm961_vm0, %v3159_v31  ;;  %v2587_v31 = vcombine.low %v230_v17, %v231_v22  ;;  %v299_v17 = vld [vmem:[%s3260_s24 + $0x3c8] sm:$0xff] }
  0xd8   : > { %1355 = vmatmul.mubr.bf16.gmra.mxu0 %v3161_v32  ;;  %1611 = vmatmul.mubr.bf16.gmra.mxu1 %v3162_v33  ;;  %v2651_v32 = vcombine.low %v294_v23, %v295_v24 }
  0xd9   : > { %2694 = vmatprep.mubr.msk.bf16.mxu0 %vm961_vm0, %v3163_v34  ;;  %2726 = vmatprep.mubr.msk.bf16.mxu1 %vm961_vm0, %v3165_v35 }
  0xe0   : > { %1363 = vmatmul.mubr.bf16.gmra.mxu0 %v3167_v36  ;;  %1619 = vmatmul.mubr.bf16.gmra.mxu1 %v3168_v37  ;;  %v3187_v37 = vld [vmem:[%s3260_s24 + $0x1b4] ss:$8 sps:$4 sm:$0xff]  }
  0xe1   : > { %2695 = vmatprep.mubr.msk.bf16.mxu0 %vm961_vm0, %v3169_v38  ;;  %2727 = vmatprep.mubr.msk.bf16.mxu1 %vm961_vm0, %v3171_v39 }
  0xe8   : > { %1371 = vmatmul.mubr.bf16.gmra.mxu0 %v3173_v40  ;;  %1627 = vmatmul.mubr.bf16.gmra.mxu1 %v3174_v41  ;;  %v3189_v40 = vld [vmem:[%s3260_s24 + $0x3b4] ss:$8 sps:$4 sm:$0xff]  }
  0xe9   : > { %2696 = vmatprep.mubr.msk.bf16.mxu0 %vm961_vm0, %v3175_v42  ;;  %2728 = vmatprep.mubr.msk.bf16.mxu1 %vm961_vm0, %v3177_v43 }
  0xf0   : > { %v1188_v53 = vpop.f32.mrf.mxu0  ;;  %1379 = vmatmul.mubr.bf16.gmra.mxu0 %v2583_v48  ;;  %v1444_v54 = vpop.f32.mrf.mxu1  ;;  %1635 = vmatmul.mubr.bf16.gmra.mxu1 %v2647_v49 }
  0xf1   : > { %v1189_v56 = vadd.f32 %v3437_v52, %v1188_v53  ;;  %v1445_v57 = vadd.f32 %v3437_v52, %v1444_v54  ;;  %2697 = vmatprep.mubr.msk.bf16.mxu0 %vm961_vm0, %v3179_v50  ;;  %2729 = vmatprep.mubr.msk.bf16.mxu1 %vm961_vm0, %v3181_v51  ;;  %v233_v50 = vld [vmem:[%s3260_s24 + $0x1b8] sm:$0xff]  ;;  %v296_v51 = vld [vmem:[%s3260_s24 + $0x3b0] sm:$0xff] }
  0xf2   : > { %v1190_v61 = vpop.f32.mrf.mxu0  ;;  %v1446_v62 = vpop.f32.mrf.mxu1  ;;  %v297_v53 = vld [vmem:[%s3260_s24 + $0x3b8] sm:$0xff]  ;;  %v2589_v60 = vcombine.low %v232_v45, %v233_v50 }
  0xf3   : > { %v1699_v63 = vmax.f32 %v1189_v56, 0.0  ;;  %v1763_v0 = vmax.f32 %v1445_v57, 0.0  ;;  %v2653_v61 = vcombine.low %v296_v51, %v297_v53  ;;  %v301_v45 = vld [vmem:[%s3260_s24 + $0x3d8] sm:$0xff] }
  0xf4   : > { %v1191_v1 = vpop.f32.mrf.mxu0  ;;  %v1447_v2 = vpop.f32.mrf.mxu1 }
  0xf5   : > { %v2867_v5 = vpack.c.bf16 %v1699_v63, %v1699_v63  ;;  %v2931_v6 = vpack.c.bf16 %v1763_v0, %v1763_v0  ;;  %v1192_v7 = vadd.f32 %v3437_v52, %v1191_v1  ;;  %v1448_v8 = vadd.f32 %v3437_v52, %v1447_v2  ;;  %v3191_v2 = vld [vmem:[%s3260_s24 + $0x1c4] ss:$8 sps:$4 sm:$0xff]  }
  0xf6   : > { %v1193_v10 = vpop.f32.mrf.mxu0  ;;  %v1449_v11 = vpop.f32.mrf.mxu1 }
  0xf7   : > { %2340 = vst.msk [vmem:[%s3451_s16] sm:$0xf] %vm2339_vm1, %v2867_v5  ;;  %2404 = vst.msk [vmem:[%s3451_s16 + $0x100] sm:$0xf] %vm2339_vm1, %v2931_v6  ;;  %v1700_v13 = vmax.f32 %v1192_v7, 0.0  ;;  %v1764_v14 = vmax.f32 %v1448_v8, 0.0 }
  0xf8   : > { %v1196_v15 = vpop.f32.mrf.mxu0  ;;  %1387 = vmatmul.mubr.bf16.gmra.mxu0 %v2585_v3  ;;  %v1452_v16 = vpop.f32.mrf.mxu1  ;;  %1643 = vmatmul.mubr.bf16.gmra.mxu1 %v2649_v4  ;;  %v3193_v5 = vld [vmem:[%s3260_s24 + $0x3c4] ss:$8 sps:$4 sm:$0xff]  }
  0xf9   : > { %v2868_v18 = vpack.c.bf16 %v1700_v13, %v1700_v13  ;;  %v2932_v19 = vpack.c.bf16 %v1764_v14, %v1764_v14  ;;  %v1197_v20 = vadd.f32 %v3437_v52, %v1196_v15  ;;  %v1453_v21 = vadd.f32 %v3437_v52, %v1452_v16  ;;  %2698 = vmatprep.mubr.msk.bf16.mxu0 %vm961_vm0, %v3183_v9  ;;  %v234_v10 = vld [vmem:[%s3260_s24 + $0x1c0] sm:$0xff]  ;;  %v235_v15 = vld [vmem:[%s3260_s24 + $0x1c8] sm:$0xff] }
  0xfa   : > { %v1198_v25 = vpop.f32.mrf.mxu0  ;;  %v1454_v26 = vpop.f32.mrf.mxu1  ;;  %2730 = vmatprep.mubr.msk.bf16.mxu1 %vm961_vm0, %v3185_v12  ;;  %v298_v16 = vld [vmem:[%s3260_s24 + $0x3c0] sm:$0xff]  ;;  %v2591_v24 = vcombine.low %v234_v10, %v235_v15  ;;  %v303_v10 = vld [vmem:[%s3260_s24 + $0x3e8] sm:$0xff] }
  0xfb   : > { %2341 = vst.msk [vmem:[%s3451_s16 + $0x4] sm:$0xf] %vm2339_vm1, %v2868_v18  ;;  %2405 = vst.msk [vmem:[%s3451_s16 + $0x104] sm:$0xf] %vm2339_vm1, %v2932_v19  ;;  %v1701_v27 = vmax.f32 %v1197_v20, 0.0  ;;  %v1765_v28 = vmax.f32 %v1453_v21, 0.0  ;;  %v2655_v25 = vcombine.low %v298_v16, %v299_v17 }
  0xfc   : > { %v1199_v29 = vpop.f32.mrf.mxu0  ;;  %v1455_v30 = vpop.f32.mrf.mxu1 }
  0xfd   : > { %v2869_v33 = vpack.c.bf16 %v1701_v27, %v1701_v27  ;;  %v2933_v34 = vpack.c.bf16 %v1765_v28, %v1765_v28  ;;  %v1200_v35 = vadd.f32 %v3437_v52, %v1199_v29  ;;  %v1456_v36 = vadd.f32 %v3437_v52, %v1455_v30  ;;  %v3195_v30 = vld [vmem:[%s3260_s24 + $0x1d4] ss:$8 sps:$4 sm:$0xff]  }
  0xfe   : > { %v1201_v38 = vpop.f32.mrf.mxu0  ;;  %v1457_v39 = vpop.f32.mrf.mxu1 }
  0xff   : > { %2342 = vst.msk [vmem:[%s3451_s16 + $0x8] sm:$0xf] %vm2339_vm1, %v2869_v33  ;;  %2406 = vst.msk [vmem:[%s3451_s16 + $0x108] sm:$0xf] %vm2339_vm1, %v2933_v34  ;;  %v1702_v41 = vmax.f32 %v1200_v35, 0.0  ;;  %v1766_v42 = vmax.f32 %v1456_v36, 0.0 }
 0x100   : > { %v1204_v43 = vpop.f32.mrf.mxu0  ;;  %1395 = vmatmul.mubr.bf16.gmra.mxu0 %v2587_v31  ;;  %v1460_v44 = vpop.f32.mrf.mxu1  ;;  %1651 = vmatmul.mubr.bf16.gmra.mxu1 %v2651_v32  ;;  %v3197_v33 = vld [vmem:[%s3260_s24 + $0x3d4] ss:$8 sps:$4 sm:$0xff]  }
 0x101   : > { %v2870_v46 = vpack.c.bf16 %v1702_v41, %v1702_v41  ;;  %v2934_v47 = vpack.c.bf16 %v1766_v42, %v1766_v42  ;;  %v1205_v48 = vadd.f32 %v3437_v52, %v1204_v43  ;;  %v1461_v49 = vadd.f32 %v3437_v52, %v1460_v44  ;;  %2699 = vmatprep.mubr.msk.bf16.mxu0 %vm961_vm0, %v3187_v37  ;;  %v236_v38 = vld [vmem:[%s3260_s24 + $0x1d0] sm:$0xff]  ;;  %v237_v43 = vld [vmem:[%s3260_s24 + $0x1d8] sm:$0xff] }
 0x102   : > { %v1206_v54 = vpop.f32.mrf.mxu0  ;;  %v1462_v55 = vpop.f32.mrf.mxu1  ;;  %2731 = vmatprep.mubr.msk.bf16.mxu1 %vm961_vm0, %v3189_v40  ;;  %v300_v44 = vld [vmem:[%s3260_s24 + $0x3d0] sm:$0xff]  ;;  %v2593_v53 = vcombine.low %v236_v38, %v237_v43  ;;  %v305_v38 = vld [vmem:[%s3260_s24 + $0x3f8] sm:$0xff] }
 0x103   : > { %2343 = vst.msk [vmem:[%s3451_s16 + $0xc] sm:$0xf] %vm2339_vm1, %v2870_v46  ;;  %2407 = vst.msk [vmem:[%s3451_s16 + $0x10c] sm:$0xf] %vm2339_vm1, %v2934_v47  ;;  %v1703_v56 = vmax.f32 %v1205_v48, 0.0  ;;  %v1767_v57 = vmax.f32 %v1461_v49, 0.0  ;;  %v2657_v54 = vcombine.low %v300_v44, %v301_v45 }
 0x104   : > { %v1207_v58 = vpop.f32.mrf.mxu0  ;;  %v1463_v59 = vpop.f32.mrf.mxu1 }
 0x105   : > { %v2871_v62 = vpack.c.bf16 %v1703_v56, %v1703_v56  ;;  %v2935_v63 = vpack.c.bf16 %v1767_v57, %v1767_v57  ;;  %v1208_v0 = vadd.f32 %v3437_v52, %v1207_v58  ;;  %v1464_v1 = vadd.f32 %v3437_v52, %v1463_v59  ;;  %v3199_v59 = vld [vmem:[%s3260_s24 + $0x1e4] ss:$8 sps:$4 sm:$0xff]  }
 0x106   : > { %v1209_v3 = vpop.f32.mrf.mxu0  ;;  %v1465_v4 = vpop.f32.mrf.mxu1 }
 0x107   : > { %2344 = vst.msk [vmem:[%s3451_s16 + $0x10] sm:$0xf] %vm2339_vm1, %v2871_v62  ;;  %2408 = vst.msk [vmem:[%s3451_s16 + $0x110] sm:$0xf] %vm2339_vm1, %v2935_v63  ;;  %v1704_v6 = vmax.f32 %v1208_v0, 0.0  ;;  %v1768_v7 = vmax.f32 %v1464_v1, 0.0 }
 0x108   : > { %v1212_v8 = vpop.f32.mrf.mxu0  ;;  %1403 = vmatmul.mubr.bf16.gmra.mxu0 %v2589_v60  ;;  %v1468_v9 = vpop.f32.mrf.mxu1  ;;  %1659 = vmatmul.mubr.bf16.gmra.mxu1 %v2653_v61  ;;  %v3201_v62 = vld [vmem:[%s3260_s24 + $0x3e4] ss:$8 sps:$4 sm:$0xff]  }
 0x109   : > { %v2872_v11 = vpack.c.bf16 %v1704_v6, %v1704_v6  ;;  %v2936_v12 = vpack.c.bf16 %v1768_v7, %v1768_v7  ;;  %v1213_v13 = vadd.f32 %v3437_v52, %v1212_v8  ;;  %v1469_v14 = vadd.f32 %v3437_v52, %v1468_v9  ;;  %2700 = vmatprep.mubr.msk.bf16.mxu0 %vm961_vm0, %v3191_v2  ;;  %v238_v3 = vld [vmem:[%s3260_s24 + $0x1e0] sm:$0xff]  ;;  %v239_v8 = vld [vmem:[%s3260_s24 + $0x1e8] sm:$0xff] }
 0x10a   : > { %v1214_v18 = vpop.f32.mrf.mxu0  ;;  %v1470_v19 = vpop.f32.mrf.mxu1  ;;  %2732 = vmatprep.mubr.msk.bf16.mxu1 %vm961_vm0, %v3193_v5  ;;  %v302_v9 = vld [vmem:[%s3260_s24 + $0x3e0] sm:$0xff]  ;;  %v2595_v17 = vcombine.low %v238_v3, %v239_v8 }
 0x10b   : > { %2345 = vst.msk [vmem:[%s3451_s16 + $0x14] sm:$0xf] %vm2339_vm1, %v2872_v11  ;;  %2409 = vst.msk [vmem:[%s3451_s16 + $0x114] sm:$0xf] %vm2339_vm1, %v2936_v12  ;;  %v1705_v20 = vmax.f32 %v1213_v13, 0.0  ;;  %v1769_v21 = vmax.f32 %v1469_v14, 0.0  ;;  %v2659_v18 = vcombine.low %v302_v9, %v303_v10 }
 0x10c   : > { %v1215_v22 = vpop.f32.mrf.mxu0  ;;  %v1471_v23 = vpop.f32.mrf.mxu1 }
 0x10d   : > { %v2873_v26 = vpack.c.bf16 %v1705_v20, %v1705_v20  ;;  %v2937_v27 = vpack.c.bf16 %v1769_v21, %v1769_v21  ;;  %v1216_v28 = vadd.f32 %v3437_v52, %v1215_v22  ;;  %v1472_v29 = vadd.f32 %v3437_v52, %v1471_v23  ;;  %v3203_v23 = vld [vmem:[%s3260_s24 + $0x1f4] ss:$8 sps:$4 sm:$0xff]  }
 0x10e   : > { %v1217_v31 = vpop.f32.mrf.mxu0  ;;  %v1473_v32 = vpop.f32.mrf.mxu1 }
 0x10f   : > { %2346 = vst.msk [vmem:[%s3451_s16 + $0x18] sm:$0xf] %vm2339_vm1, %v2873_v26  ;;  %2410 = vst.msk [vmem:[%s3451_s16 + $0x118] sm:$0xf] %vm2339_vm1, %v2937_v27  ;;  %v1706_v34 = vmax.f32 %v1216_v28, 0.0  ;;  %v1770_v35 = vmax.f32 %v1472_v29, 0.0 }
 0x110   : > { %v1220_v36 = vpop.f32.mrf.mxu0  ;;  %1411 = vmatmul.mubr.bf16.gmra.mxu0 %v2591_v24  ;;  %v1476_v37 = vpop.f32.mrf.mxu1  ;;  %1667 = vmatmul.mubr.bf16.gmra.mxu1 %v2655_v25  ;;  %v3205_v26 = vld [vmem:[%s3260_s24 + $0x3f4] ss:$8 sps:$4 sm:$0xff]  }
 0x111   : > { %v2874_v39 = vpack.c.bf16 %v1706_v34, %v1706_v34  ;;  %v2938_v40 = vpack.c.bf16 %v1770_v35, %v1770_v35  ;;  %v1221_v41 = vadd.f32 %v3437_v52, %v1220_v36  ;;  %v1477_v42 = vadd.f32 %v3437_v52, %v1476_v37  ;;  %2701 = vmatprep.mubr.msk.bf16.mxu0 %vm961_vm0, %v3195_v30  ;;  %v240_v31 = vld [vmem:[%s3260_s24 + $0x1f0] sm:$0xff]  ;;  %v241_v36 = vld [vmem:[%s3260_s24 + $0x1f8] sm:$0xff] }
 0x112   : > { %v1222_v46 = vpop.f32.mrf.mxu0  ;;  %v1478_v47 = vpop.f32.mrf.mxu1  ;;  %2733 = vmatprep.mubr.msk.bf16.mxu1 %vm961_vm0, %v3197_v33  ;;  %v304_v37 = vld [vmem:[%s3260_s24 + $0x3f0] sm:$0xff]  ;;  %v2597_v45 = vcombine.low %v240_v31, %v241_v36 }
 0x113   : > { %2347 = vst.msk [vmem:[%s3451_s16 + $0x1c] sm:$0xf] %vm2339_vm1, %v2874_v39  ;;  %2411 = vst.msk [vmem:[%s3451_s16 + $0x11c] sm:$0xf] %vm2339_vm1, %v2938_v40  ;;  %v1707_v48 = vmax.f32 %v1221_v41, 0.0  ;;  %v1771_v49 = vmax.f32 %v1477_v42, 0.0  ;;  %v2661_v46 = vcombine.low %v304_v37, %v305_v38 }
 0x114   : > { %v1223_v50 = vpop.f32.mrf.mxu0  ;;  %v1479_v51 = vpop.f32.mrf.mxu1 }
 0x115   : > { %v2875_v55 = vpack.c.bf16 %v1707_v48, %v1707_v48  ;;  %v2939_v56 = vpack.c.bf16 %v1771_v49, %v1771_v49  ;;  %v1224_v57 = vadd.f32 %v3437_v52, %v1223_v50  ;;  %v1480_v58 = vadd.f32 %v3437_v52, %v1479_v51 }
 0x116   : > { %v1225_v60 = vpop.f32.mrf.mxu0  ;;  %v1481_v61 = vpop.f32.mrf.mxu1 }
 0x117   : > { %2348 = vst.msk [vmem:[%s3451_s16 + $0x20] sm:$0xf] %vm2339_vm1, %v2875_v55  ;;  %2412 = vst.msk [vmem:[%s3451_s16 + $0x120] sm:$0xf] %vm2339_vm1, %v2939_v56  ;;  %v1708_v63 = vmax.f32 %v1224_v57, 0.0  ;;  %v1772_v0 = vmax.f32 %v1480_v58, 0.0 }
 0x118   : > { %v1228_v1 = vpop.f32.mrf.mxu0  ;;  %1419 = vmatmul.mubr.bf16.gmra.mxu0 %v2593_v53  ;;  %v1484_v2 = vpop.f32.mrf.mxu1  ;;  %1675 = vmatmul.mubr.bf16.gmra.mxu1 %v2657_v54 }
 0x119   : > { %v2876_v4 = vpack.c.bf16 %v1708_v63, %v1708_v63  ;;  %v2940_v5 = vpack.c.bf16 %v1772_v0, %v1772_v0  ;;  %v1229_v6 = vadd.f32 %v3437_v52, %v1228_v1  ;;  %v1485_v7 = vadd.f32 %v3437_v52, %v1484_v2  ;;  %2702 = vmatprep.mubr.msk.bf16.mxu0 %vm961_vm0, %v3199_v59 }
 0x11a   : > { %v1230_v11 = vpop.f32.mrf.mxu0  ;;  %v1486_v12 = vpop.f32.mrf.mxu1  ;;  %2734 = vmatprep.mubr.msk.bf16.mxu1 %vm961_vm0, %v3201_v62 }
 0x11b   : > { %2349 = vst.msk [vmem:[%s3451_s16 + $0x24] sm:$0xf] %vm2339_vm1, %v2876_v4  ;;  %2413 = vst.msk [vmem:[%s3451_s16 + $0x124] sm:$0xf] %vm2339_vm1, %v2940_v5  ;;  %v1709_v13 = vmax.f32 %v1229_v6, 0.0  ;;  %v1773_v14 = vmax.f32 %v1485_v7, 0.0 }
 0x11c   : > { %v1231_v15 = vpop.f32.mrf.mxu0  ;;  %v1487_v16 = vpop.f32.mrf.mxu1 }
 0x11d   : > { %v2877_v19 = vpack.c.bf16 %v1709_v13, %v1709_v13  ;;  %v2941_v20 = vpack.c.bf16 %v1773_v14, %v1773_v14  ;;  %v1232_v21 = vadd.f32 %v3437_v52, %v1231_v15  ;;  %v1488_v22 = vadd.f32 %v3437_v52, %v1487_v16 }
 0x11e   : > { %v1233_v24 = vpop.f32.mrf.mxu0  ;;  %v1489_v25 = vpop.f32.mrf.mxu1 }
 0x11f   : > { %2350 = vst.msk [vmem:[%s3451_s16 + $0x28] sm:$0xf] %vm2339_vm1, %v2877_v19  ;;  %2414 = vst.msk [vmem:[%s3451_s16 + $0x128] sm:$0xf] %vm2339_vm1, %v2941_v20  ;;  %v1710_v27 = vmax.f32 %v1232_v21, 0.0  ;;  %v1774_v28 = vmax.f32 %v1488_v22, 0.0 }
 0x120   : > { %v1236_v29 = vpop.f32.mrf.mxu0  ;;  %1427 = vmatmul.mubr.bf16.gmra.mxu0 %v2595_v17  ;;  %v1492_v30 = vpop.f32.mrf.mxu1  ;;  %1683 = vmatmul.mubr.bf16.gmra.mxu1 %v2659_v18 }
 0x121   : > { %v2878_v32 = vpack.c.bf16 %v1710_v27, %v1710_v27  ;;  %v2942_v33 = vpack.c.bf16 %v1774_v28, %v1774_v28  ;;  %v1237_v34 = vadd.f32 %v3437_v52, %v1236_v29  ;;  %v1493_v35 = vadd.f32 %v3437_v52, %v1492_v30  ;;  %2703 = vmatprep.mubr.msk.bf16.mxu0 %vm961_vm0, %v3203_v23 }
 0x122   : > { %v1238_v39 = vpop.f32.mrf.mxu0  ;;  %v1494_v40 = vpop.f32.mrf.mxu1  ;;  %2735 = vmatprep.mubr.msk.bf16.mxu1 %vm961_vm0, %v3205_v26 }
 0x123   : > { %2351 = vst.msk [vmem:[%s3451_s16 + $0x2c] sm:$0xf] %vm2339_vm1, %v2878_v32  ;;  %2415 = vst.msk [vmem:[%s3451_s16 + $0x12c] sm:$0xf] %vm2339_vm1, %v2942_v33  ;;  %v1711_v41 = vmax.f32 %v1237_v34, 0.0  ;;  %v1775_v42 = vmax.f32 %v1493_v35, 0.0 }
 0x124   : > { %v1239_v43 = vpop.f32.mrf.mxu0  ;;  %v1495_v44 = vpop.f32.mrf.mxu1 }
 0x125   : > { %v2879_v47 = vpack.c.bf16 %v1711_v41, %v1711_v41  ;;  %v2943_v48 = vpack.c.bf16 %v1775_v42, %v1775_v42  ;;  %v1240_v49 = vadd.f32 %v3437_v52, %v1239_v43  ;;  %v1496_v50 = vadd.f32 %v3437_v52, %v1495_v44 }
 0x126   : > { %v1241_v51 = vpop.f32.mrf.mxu0  ;;  %v1497_v53 = vpop.f32.mrf.mxu1 }
 0x127   : > { %2352 = vst.msk [vmem:[%s3451_s16 + $0x30] sm:$0xf] %vm2339_vm1, %v2879_v47  ;;  %2416 = vst.msk [vmem:[%s3451_s16 + $0x130] sm:$0xf] %vm2339_vm1, %v2943_v48  ;;  %v1712_v54 = vmax.f32 %v1240_v49, 0.0  ;;  %v1776_v55 = vmax.f32 %v1496_v50, 0.0 }
 0x128   : > { %v1244_v56 = vpop.f32.mrf.mxu0  ;;  %1435 = vmatmul.mubr.bf16.gmra.mxu0 %v2597_v45  ;;  %v1500_v57 = vpop.f32.mrf.mxu1  ;;  %1691 = vmatmul.mubr.bf16.gmra.mxu1 %v2661_v46 }
 0x129   : > { %v2880_v58 = vpack.c.bf16 %v1712_v54, %v1712_v54  ;;  %v2944_v59 = vpack.c.bf16 %v1776_v55, %v1776_v55  ;;  %v1245_v60 = vadd.f32 %v3437_v52, %v1244_v56  ;;  %v1501_v61 = vadd.f32 %v3437_v52, %v1500_v57 }
 0x12a   : > { %v1246_v62 = vpop.f32.mrf.mxu0  ;;  %v1502_v63 = vpop.f32.mrf.mxu1 }
 0x12b   : > { %2353 = vst.msk [vmem:[%s3451_s16 + $0x34] sm:$0xf] %vm2339_vm1, %v2880_v58  ;;  %2417 = vst.msk [vmem:[%s3451_s16 + $0x134] sm:$0xf] %vm2339_vm1, %v2944_v59  ;;  %v1713_v0 = vmax.f32 %v1245_v60, 0.0  ;;  %v1777_v1 = vmax.f32 %v1501_v61, 0.0 }
 0x12c   : > { %v1247_v2 = vpop.f32.mrf.mxu0  ;;  %v1503_v3 = vpop.f32.mrf.mxu1 }
 0x12d   : > { %v2881_v4 = vpack.c.bf16 %v1713_v0, %v1713_v0  ;;  %v2945_v5 = vpack.c.bf16 %v1777_v1, %v1777_v1  ;;  %v1248_v6 = vadd.f32 %v3437_v52, %v1247_v2  ;;  %v1504_v7 = vadd.f32 %v3437_v52, %v1503_v3 }
 0x12e   : > { %v1249_v8 = vpop.f32.mrf.mxu0  ;;  %v1505_v9 = vpop.f32.mrf.mxu1 }
 0x12f   : > { %2354 = vst.msk [vmem:[%s3451_s16 + $0x38] sm:$0xf] %vm2339_vm1, %v2881_v4  ;;  %2418 = vst.msk [vmem:[%s3451_s16 + $0x138] sm:$0xf] %vm2339_vm1, %v2945_v5  ;;  %v1714_v10 = vmax.f32 %v1248_v6, 0.0  ;;  %v1778_v11 = vmax.f32 %v1504_v7, 0.0 }
 0x130   : > { %v1252_v12 = vpop.f32.mrf.mxu0  ;;  %v1508_v13 = vpop.f32.mrf.mxu1 }
 0x131   : > { %v2882_v14 = vpack.c.bf16 %v1714_v10, %v1714_v10  ;;  %v2946_v15 = vpack.c.bf16 %v1778_v11, %v1778_v11  ;;  %v1253_v16 = vadd.f32 %v3437_v52, %v1252_v12  ;;  %v1509_v17 = vadd.f32 %v3437_v52, %v1508_v13 }
 0x132   : > { %v1254_v18 = vpop.f32.mrf.mxu0  ;;  %v1510_v19 = vpop.f32.mrf.mxu1 }
 0x133   : > { %2355 = vst.msk [vmem:[%s3451_s16 + $0x3c] sm:$0xf] %vm2339_vm1, %v2882_v14  ;;  %2419 = vst.msk [vmem:[%s3451_s16 + $0x13c] sm:$0xf] %vm2339_vm1, %v2946_v15  ;;  %v1715_v20 = vmax.f32 %v1253_v16, 0.0  ;;  %v1779_v21 = vmax.f32 %v1509_v17, 0.0 }
 0x134   : > { %v1255_v22 = vpop.f32.mrf.mxu0  ;;  %v1511_v23 = vpop.f32.mrf.mxu1 }
 0x135   : > { %v2883_v24 = vpack.c.bf16 %v1715_v20, %v1715_v20  ;;  %v2947_v25 = vpack.c.bf16 %v1779_v21, %v1779_v21  ;;  %v1256_v26 = vadd.f32 %v3437_v52, %v1255_v22  ;;  %v1512_v27 = vadd.f32 %v3437_v52, %v1511_v23 }
 0x136   : > { %v1257_v28 = vpop.f32.mrf.mxu0  ;;  %v1513_v29 = vpop.f32.mrf.mxu1 }
 0x137   : > { %2356 = vst.msk [vmem:[%s3451_s16 + $0x40] sm:$0xf] %vm2339_vm1, %v2883_v24  ;;  %2420 = vst.msk [vmem:[%s3451_s16 + $0x140] sm:$0xf] %vm2339_vm1, %v2947_v25  ;;  %v1716_v30 = vmax.f32 %v1256_v26, 0.0  ;;  %v1780_v31 = vmax.f32 %v1512_v27, 0.0 }
 0x138   : > { %v1260_v32 = vpop.f32.mrf.mxu0  ;;  %v1516_v33 = vpop.f32.mrf.mxu1 }
 0x139   : > { %v2884_v34 = vpack.c.bf16 %v1716_v30, %v1716_v30  ;;  %v2948_v35 = vpack.c.bf16 %v1780_v31, %v1780_v31  ;;  %v1261_v36 = vadd.f32 %v3437_v52, %v1260_v32  ;;  %v1517_v37 = vadd.f32 %v3437_v52, %v1516_v33 }
 0x13a   : > { %v1262_v38 = vpop.f32.mrf.mxu0  ;;  %v1518_v39 = vpop.f32.mrf.mxu1 }
 0x13b   : > { %2357 = vst.msk [vmem:[%s3451_s16 + $0x44] sm:$0xf] %vm2339_vm1, %v2884_v34  ;;  %2421 = vst.msk [vmem:[%s3451_s16 + $0x144] sm:$0xf] %vm2339_vm1, %v2948_v35  ;;  %v1717_v40 = vmax.f32 %v1261_v36, 0.0  ;;  %v1781_v41 = vmax.f32 %v1517_v37, 0.0 }
 0x13c   : > { %v1263_v42 = vpop.f32.mrf.mxu0  ;;  %v1519_v43 = vpop.f32.mrf.mxu1 }
 0x13d   : > { %v2885_v44 = vpack.c.bf16 %v1717_v40, %v1717_v40  ;;  %v2949_v45 = vpack.c.bf16 %v1781_v41, %v1781_v41  ;;  %v1264_v46 = vadd.f32 %v3437_v52, %v1263_v42  ;;  %v1520_v47 = vadd.f32 %v3437_v52, %v1519_v43 }
 0x13e   : > { %v1265_v48 = vpop.f32.mrf.mxu0  ;;  %v1521_v49 = vpop.f32.mrf.mxu1 }
 0x13f   : > { %2358 = vst.msk [vmem:[%s3451_s16 + $0x48] sm:$0xf] %vm2339_vm1, %v2885_v44  ;;  %2422 = vst.msk [vmem:[%s3451_s16 + $0x148] sm:$0xf] %vm2339_vm1, %v2949_v45  ;;  %v1718_v50 = vmax.f32 %v1264_v46, 0.0  ;;  %v1782_v51 = vmax.f32 %v1520_v47, 0.0 }
 0x140   : > { %v1268_v53 = vpop.f32.mrf.mxu0  ;;  %v1524_v54 = vpop.f32.mrf.mxu1 }
 0x141   : > { %v2886_v55 = vpack.c.bf16 %v1718_v50, %v1718_v50  ;;  %v2950_v56 = vpack.c.bf16 %v1782_v51, %v1782_v51  ;;  %v1269_v57 = vadd.f32 %v3437_v52, %v1268_v53  ;;  %v1525_v58 = vadd.f32 %v3437_v52, %v1524_v54 }
 0x142   : > { %v1270_v59 = vpop.f32.mrf.mxu0  ;;  %v1526_v60 = vpop.f32.mrf.mxu1 }
 0x143   : > { %2359 = vst.msk [vmem:[%s3451_s16 + $0x4c] sm:$0xf] %vm2339_vm1, %v2886_v55  ;;  %2423 = vst.msk [vmem:[%s3451_s16 + $0x14c] sm:$0xf] %vm2339_vm1, %v2950_v56  ;;  %v1719_v61 = vmax.f32 %v1269_v57, 0.0  ;;  %v1783_v62 = vmax.f32 %v1525_v58, 0.0 }
 0x144   : > { %v1271_v63 = vpop.f32.mrf.mxu0  ;;  %v1527_v0 = vpop.f32.mrf.mxu1 }
 0x145   : > { %v2887_v1 = vpack.c.bf16 %v1719_v61, %v1719_v61  ;;  %v2951_v2 = vpack.c.bf16 %v1783_v62, %v1783_v62  ;;  %v1272_v3 = vadd.f32 %v3437_v52, %v1271_v63  ;;  %v1528_v4 = vadd.f32 %v3437_v52, %v1527_v0 }
 0x146   : > { %v1273_v5 = vpop.f32.mrf.mxu0  ;;  %v1529_v6 = vpop.f32.mrf.mxu1 }
 0x147   : > { %2360 = vst.msk [vmem:[%s3451_s16 + $0x50] sm:$0xf] %vm2339_vm1, %v2887_v1  ;;  %2424 = vst.msk [vmem:[%s3451_s16 + $0x150] sm:$0xf] %vm2339_vm1, %v2951_v2  ;;  %v1720_v7 = vmax.f32 %v1272_v3, 0.0  ;;  %v1784_v8 = vmax.f32 %v1528_v4, 0.0 }
 0x148   : > { %v1276_v9 = vpop.f32.mrf.mxu0  ;;  %v1532_v10 = vpop.f32.mrf.mxu1 }
 0x149   : > { %v2888_v11 = vpack.c.bf16 %v1720_v7, %v1720_v7  ;;  %v2952_v12 = vpack.c.bf16 %v1784_v8, %v1784_v8  ;;  %v1277_v13 = vadd.f32 %v3437_v52, %v1276_v9  ;;  %v1533_v14 = vadd.f32 %v3437_v52, %v1532_v10 }
 0x14a   : > { %v1278_v15 = vpop.f32.mrf.mxu0  ;;  %v1534_v16 = vpop.f32.mrf.mxu1 }
 0x14b   : > { %2361 = vst.msk [vmem:[%s3451_s16 + $0x54] sm:$0xf] %vm2339_vm1, %v2888_v11  ;;  %2425 = vst.msk [vmem:[%s3451_s16 + $0x154] sm:$0xf] %vm2339_vm1, %v2952_v12  ;;  %v1721_v17 = vmax.f32 %v1277_v13, 0.0  ;;  %v1785_v18 = vmax.f32 %v1533_v14, 0.0 }
 0x14c   : > { %v1279_v19 = vpop.f32.mrf.mxu0  ;;  %v1535_v20 = vpop.f32.mrf.mxu1 }
 0x14d   : > { %v2889_v21 = vpack.c.bf16 %v1721_v17, %v1721_v17  ;;  %v2953_v22 = vpack.c.bf16 %v1785_v18, %v1785_v18  ;;  %v1280_v23 = vadd.f32 %v3437_v52, %v1279_v19  ;;  %v1536_v24 = vadd.f32 %v3437_v52, %v1535_v20 }
 0x14e   : > { %v1281_v25 = vpop.f32.mrf.mxu0  ;;  %v1537_v26 = vpop.f32.mrf.mxu1 }
 0x14f   : > { %2362 = vst.msk [vmem:[%s3451_s16 + $0x58] sm:$0xf] %vm2339_vm1, %v2889_v21  ;;  %2426 = vst.msk [vmem:[%s3451_s16 + $0x158] sm:$0xf] %vm2339_vm1, %v2953_v22  ;;  %v1722_v27 = vmax.f32 %v1280_v23, 0.0  ;;  %v1786_v28 = vmax.f32 %v1536_v24, 0.0 }
 0x150   : > { %v1284_v29 = vpop.f32.mrf.mxu0  ;;  %v1540_v30 = vpop.f32.mrf.mxu1 }
 0x151   : > { %v2890_v31 = vpack.c.bf16 %v1722_v27, %v1722_v27  ;;  %v2954_v32 = vpack.c.bf16 %v1786_v28, %v1786_v28  ;;  %v1285_v33 = vadd.f32 %v3437_v52, %v1284_v29  ;;  %v1541_v34 = vadd.f32 %v3437_v52, %v1540_v30 }
 0x152   : > { %v1286_v35 = vpop.f32.mrf.mxu0  ;;  %v1542_v36 = vpop.f32.mrf.mxu1 }
 0x153   : > { %2363 = vst.msk [vmem:[%s3451_s16 + $0x5c] sm:$0xf] %vm2339_vm1, %v2890_v31  ;;  %2427 = vst.msk [vmem:[%s3451_s16 + $0x15c] sm:$0xf] %vm2339_vm1, %v2954_v32  ;;  %v1723_v37 = vmax.f32 %v1285_v33, 0.0  ;;  %v1787_v38 = vmax.f32 %v1541_v34, 0.0 }
 0x154   : > { %v1287_v39 = vpop.f32.mrf.mxu0  ;;  %v1543_v40 = vpop.f32.mrf.mxu1 }
 0x155   : > { %v2891_v41 = vpack.c.bf16 %v1723_v37, %v1723_v37  ;;  %v2955_v42 = vpack.c.bf16 %v1787_v38, %v1787_v38  ;;  %v1288_v43 = vadd.f32 %v3437_v52, %v1287_v39  ;;  %v1544_v44 = vadd.f32 %v3437_v52, %v1543_v40 }
 0x156   : > { %v1289_v45 = vpop.f32.mrf.mxu0  ;;  %v1545_v46 = vpop.f32.mrf.mxu1 }
 0x157   : > { %2364 = vst.msk [vmem:[%s3451_s16 + $0x60] sm:$0xf] %vm2339_vm1, %v2891_v41  ;;  %2428 = vst.msk [vmem:[%s3451_s16 + $0x160] sm:$0xf] %vm2339_vm1, %v2955_v42  ;;  %v1724_v47 = vmax.f32 %v1288_v43, 0.0  ;;  %v1788_v48 = vmax.f32 %v1544_v44, 0.0 }
 0x158   : > { %v1292_v49 = vpop.f32.mrf.mxu0  ;;  %v1548_v50 = vpop.f32.mrf.mxu1 }
 0x159   : > { %v2892_v51 = vpack.c.bf16 %v1724_v47, %v1724_v47  ;;  %v2956_v53 = vpack.c.bf16 %v1788_v48, %v1788_v48  ;;  %v1293_v54 = vadd.f32 %v3437_v52, %v1292_v49  ;;  %v1549_v55 = vadd.f32 %v3437_v52, %v1548_v50 }
 0x15a   : > { %v1294_v56 = vpop.f32.mrf.mxu0  ;;  %v1550_v57 = vpop.f32.mrf.mxu1 }
 0x15b   : > { %2365 = vst.msk [vmem:[%s3451_s16 + $0x64] sm:$0xf] %vm2339_vm1, %v2892_v51  ;;  %2429 = vst.msk [vmem:[%s3451_s16 + $0x164] sm:$0xf] %vm2339_vm1, %v2956_v53  ;;  %v1725_v58 = vmax.f32 %v1293_v54, 0.0  ;;  %v1789_v59 = vmax.f32 %v1549_v55, 0.0 }
 0x15c   : > { %v1295_v60 = vpop.f32.mrf.mxu0  ;;  %v1551_v61 = vpop.f32.mrf.mxu1 }
 0x15d   : > { %v2893_v62 = vpack.c.bf16 %v1725_v58, %v1725_v58  ;;  %v2957_v63 = vpack.c.bf16 %v1789_v59, %v1789_v59  ;;  %v1296_v0 = vadd.f32 %v3437_v52, %v1295_v60  ;;  %v1552_v1 = vadd.f32 %v3437_v52, %v1551_v61 }
 0x15e   : > { %v1297_v2 = vpop.f32.mrf.mxu0  ;;  %v1553_v3 = vpop.f32.mrf.mxu1 }
 0x15f   : > { %2366 = vst.msk [vmem:[%s3451_s16 + $0x68] sm:$0xf] %vm2339_vm1, %v2893_v62  ;;  %2430 = vst.msk [vmem:[%s3451_s16 + $0x168] sm:$0xf] %vm2339_vm1, %v2957_v63  ;;  %v1726_v4 = vmax.f32 %v1296_v0, 0.0  ;;  %v1790_v5 = vmax.f32 %v1552_v1, 0.0 }
 0x160   : > { %v1300_v6 = vpop.f32.mrf.mxu0  ;;  %v1556_v7 = vpop.f32.mrf.mxu1 }
 0x161   : > { %v2894_v8 = vpack.c.bf16 %v1726_v4, %v1726_v4  ;;  %v2958_v9 = vpack.c.bf16 %v1790_v5, %v1790_v5  ;;  %v1301_v10 = vadd.f32 %v3437_v52, %v1300_v6  ;;  %v1557_v11 = vadd.f32 %v3437_v52, %v1556_v7 }
 0x162   : > { %v1302_v12 = vpop.f32.mrf.mxu0  ;;  %v1558_v13 = vpop.f32.mrf.mxu1 }
 0x163   : > { %2367 = vst.msk [vmem:[%s3451_s16 + $0x6c] sm:$0xf] %vm2339_vm1, %v2894_v8  ;;  %2431 = vst.msk [vmem:[%s3451_s16 + $0x16c] sm:$0xf] %vm2339_vm1, %v2958_v9  ;;  %v1727_v14 = vmax.f32 %v1301_v10, 0.0  ;;  %v1791_v15 = vmax.f32 %v1557_v11, 0.0 }
 0x164   : > { %v1303_v16 = vpop.f32.mrf.mxu0  ;;  %v1559_v17 = vpop.f32.mrf.mxu1 }
 0x165   : > { %v2895_v18 = vpack.c.bf16 %v1727_v14, %v1727_v14  ;;  %v2959_v19 = vpack.c.bf16 %v1791_v15, %v1791_v15  ;;  %v1304_v20 = vadd.f32 %v3437_v52, %v1303_v16  ;;  %v1560_v21 = vadd.f32 %v3437_v52, %v1559_v17 }
 0x166   : > { %v1305_v22 = vpop.f32.mrf.mxu0  ;;  %v1561_v23 = vpop.f32.mrf.mxu1 }
 0x167   : > { %2368 = vst.msk [vmem:[%s3451_s16 + $0x70] sm:$0xf] %vm2339_vm1, %v2895_v18  ;;  %2432 = vst.msk [vmem:[%s3451_s16 + $0x170] sm:$0xf] %vm2339_vm1, %v2959_v19  ;;  %v1728_v24 = vmax.f32 %v1304_v20, 0.0  ;;  %v1792_v25 = vmax.f32 %v1560_v21, 0.0 }
 0x168   : > { %v1308_v26 = vpop.f32.mrf.mxu0  ;;  %v1564_v27 = vpop.f32.mrf.mxu1 }
 0x169   : > { %v2896_v28 = vpack.c.bf16 %v1728_v24, %v1728_v24  ;;  %v2960_v29 = vpack.c.bf16 %v1792_v25, %v1792_v25  ;;  %v1309_v30 = vadd.f32 %v3437_v52, %v1308_v26  ;;  %v1565_v31 = vadd.f32 %v3437_v52, %v1564_v27  ;;  %v3714_v27 = vld [vmem:[%s3893_s2] ss:$0 sm:$0xff] }
 0x16a   : > { %v1310_v32 = vpop.f32.mrf.mxu0  ;;  %v1566_v33 = vpop.f32.mrf.mxu1 }
 0x16b   : > { %2369 = vst.msk [vmem:[%s3451_s16 + $0x74] sm:$0xf] %vm2339_vm1, %v2896_v28  ;;  %2433 = vst.msk [vmem:[%s3451_s16 + $0x174] sm:$0xf] %vm2339_vm1, %v2960_v29  ;;  %v1729_v34 = vmax.f32 %v1309_v30, 0.0  ;;  %v1793_v35 = vmax.f32 %v1565_v31, 0.0 }
 0x16c   : > { %v1311_v36 = vpop.f32.mrf.mxu0  ;;  %v1567_v37 = vpop.f32.mrf.mxu1 }
 0x16d   : > { %v2897_v38 = vpack.c.bf16 %v1729_v34, %v1729_v34  ;;  %v2961_v39 = vpack.c.bf16 %v1793_v35, %v1793_v35  ;;  %v1312_v40 = vadd.f32 %v3437_v52, %v1311_v36  ;;  %v1568_v41 = vadd.f32 %v3437_v52, %v1567_v37 }
 0x16e   : > { %v1313_v42 = vpop.f32.mrf.mxu0  ;;  %v1569_v43 = vpop.f32.mrf.mxu1 }
 0x16f   : > { %2370 = vst.msk [vmem:[%s3451_s16 + $0x78] sm:$0xf] %vm2339_vm1, %v2897_v38  ;;  %2434 = vst.msk [vmem:[%s3451_s16 + $0x178] sm:$0xf] %vm2339_vm1, %v2961_v39  ;;  %v1730_v44 = vmax.f32 %v1312_v40, 0.0  ;;  %v1794_v45 = vmax.f32 %v1568_v41, 0.0 }
 0x170   : > { %v1316_v46 = vpop.f32.mrf.mxu0  ;;  %v1572_v47 = vpop.f32.mrf.mxu1 }
 0x171   : > { %v2898_v48 = vpack.c.bf16 %v1730_v44, %v1730_v44  ;;  %v2962_v49 = vpack.c.bf16 %v1794_v45, %v1794_v45  ;;  %v1317_v50 = vadd.f32 %v3437_v52, %v1316_v46  ;;  %v1573_v51 = vadd.f32 %v3437_v52, %v1572_v47 }
 0x172   : > { %v1318_v53 = vpop.f32.mrf.mxu0  ;;  %v1574_v54 = vpop.f32.mrf.mxu1 }
 0x173   : > { %2371 = vst.msk [vmem:[%s3451_s16 + $0x7c] sm:$0xf] %vm2339_vm1, %v2898_v48  ;;  %2435 = vst.msk [vmem:[%s3451_s16 + $0x17c] sm:$0xf] %vm2339_vm1, %v2962_v49  ;;  %v1731_v55 = vmax.f32 %v1317_v50, 0.0  ;;  %v1795_v56 = vmax.f32 %v1573_v51, 0.0 }
 0x174   : > { %v1319_v57 = vpop.f32.mrf.mxu0  ;;  %v1575_v58 = vpop.f32.mrf.mxu1 }
 0x175   : > { %v2899_v59 = vpack.c.bf16 %v1731_v55, %v1731_v55  ;;  %v2963_v60 = vpack.c.bf16 %v1795_v56, %v1795_v56  ;;  %v1320_v61 = vadd.f32 %v3437_v52, %v1319_v57  ;;  %v1576_v62 = vadd.f32 %v3437_v52, %v1575_v58 }
 0x176   : > { %v1321_v63 = vpop.f32.mrf.mxu0  ;;  %v1577_v0 = vpop.f32.mrf.mxu1 }
 0x177   : > { %2372 = vst.msk [vmem:[%s3451_s16 + $0x80] sm:$0xf] %vm2339_vm1, %v2899_v59  ;;  %2436 = vst.msk [vmem:[%s3451_s16 + $0x180] sm:$0xf] %vm2339_vm1, %v2963_v60  ;;  %v1732_v1 = vmax.f32 %v1320_v61, 0.0  ;;  %v1796_v2 = vmax.f32 %v1576_v62, 0.0 }
 0x178   : > { %v1324_v3 = vpop.f32.mrf.mxu0  ;;  %v1580_v4 = vpop.f32.mrf.mxu1 }
 0x179   : > { %v2900_v5 = vpack.c.bf16 %v1732_v1, %v1732_v1  ;;  %v2964_v6 = vpack.c.bf16 %v1796_v2, %v1796_v2  ;;  %v1325_v7 = vadd.f32 %v3437_v52, %v1324_v3  ;;  %v1581_v8 = vadd.f32 %v3437_v52, %v1580_v4 }
 0x17a   : > { %v1326_v9 = vpop.f32.mrf.mxu0  ;;  %v1582_v10 = vpop.f32.mrf.mxu1 }
 0x17b   : > { %2373 = vst.msk [vmem:[%s3451_s16 + $0x84] sm:$0xf] %vm2339_vm1, %v2900_v5  ;;  %2437 = vst.msk [vmem:[%s3451_s16 + $0x184] sm:$0xf] %vm2339_vm1, %v2964_v6  ;;  %v1733_v11 = vmax.f32 %v1325_v7, 0.0  ;;  %v1797_v12 = vmax.f32 %v1581_v8, 0.0 }
 0x17c   : > { %v1327_v13 = vpop.f32.mrf.mxu0  ;;  %v1583_v14 = vpop.f32.mrf.mxu1 }
 0x17d   : > { %v2901_v15 = vpack.c.bf16 %v1733_v11, %v1733_v11  ;;  %v2965_v16 = vpack.c.bf16 %v1797_v12, %v1797_v12  ;;  %v1328_v17 = vadd.f32 %v3437_v52, %v1327_v13  ;;  %v1584_v18 = vadd.f32 %v3437_v52, %v1583_v14 }
 0x17e   : > { %v1329_v19 = vpop.f32.mrf.mxu0  ;;  %v1585_v20 = vpop.f32.mrf.mxu1 }
 0x17f   : > { %2374 = vst.msk [vmem:[%s3451_s16 + $0x88] sm:$0xf] %vm2339_vm1, %v2901_v15  ;;  %2438 = vst.msk [vmem:[%s3451_s16 + $0x188] sm:$0xf] %vm2339_vm1, %v2965_v16  ;;  %v1734_v21 = vmax.f32 %v1328_v17, 0.0  ;;  %v1798_v22 = vmax.f32 %v1584_v18, 0.0 }
 0x180   : > { %v1332_v23 = vpop.f32.mrf.mxu0  ;;  %v1588_v24 = vpop.f32.mrf.mxu1 }
 0x181   : > { %v2902_v25 = vpack.c.bf16 %v1734_v21, %v1734_v21  ;;  %v2966_v26 = vpack.c.bf16 %v1798_v22, %v1798_v22  ;;  %v1333_v52 = vadd.f32 %v3714_v27, %v1332_v23  ;;  %v1589_v28 = vadd.f32 %v3714_v27, %v1588_v24 }
 0x182   : > { %v1334_v29 = vpop.f32.mrf.mxu0  ;;  %v1590_v30 = vpop.f32.mrf.mxu1 }
 0x183   : > { %2375 = vst.msk [vmem:[%s3451_s16 + $0x8c] sm:$0xf] %vm2339_vm1, %v2902_v25  ;;  %2439 = vst.msk [vmem:[%s3451_s16 + $0x18c] sm:$0xf] %vm2339_vm1, %v2966_v26  ;;  %v1735_v31 = vmax.f32 %v1333_v52, 0.0  ;;  %v1799_v32 = vmax.f32 %v1589_v28, 0.0 }
 0x184   : > { %v1335_v33 = vpop.f32.mrf.mxu0  ;;  %v1591_v34 = vpop.f32.mrf.mxu1 }
 0x185   : > { %v2903_v35 = vpack.c.bf16 %v1735_v31, %v1735_v31  ;;  %v2967_v36 = vpack.c.bf16 %v1799_v32, %v1799_v32  ;;  %v1336_v37 = vadd.f32 %v3714_v27, %v1335_v33  ;;  %v1592_v38 = vadd.f32 %v3714_v27, %v1591_v34 }
 0x186   : > { %v1337_v39 = vpop.f32.mrf.mxu0  ;;  %v1593_v40 = vpop.f32.mrf.mxu1 }
 0x187   : > { %2376 = vst.msk [vmem:[%s3451_s16 + $0x90] sm:$0xf] %vm2339_vm1, %v2903_v35  ;;  %2440 = vst.msk [vmem:[%s3451_s16 + $0x190] sm:$0xf] %vm2339_vm1, %v2967_v36  ;;  %v1736_v41 = vmax.f32 %v1336_v37, 0.0  ;;  %v1800_v42 = vmax.f32 %v1592_v38, 0.0 }
 0x188   : > { %v1340_v43 = vpop.f32.mrf.mxu0  ;;  %v1596_v44 = vpop.f32.mrf.mxu1 }
 0x189   : > { %v2904_v45 = vpack.c.bf16 %v1736_v41, %v1736_v41  ;;  %v2968_v46 = vpack.c.bf16 %v1800_v42, %v1800_v42  ;;  %v1341_v47 = vadd.f32 %v3714_v27, %v1340_v43  ;;  %v1597_v48 = vadd.f32 %v3714_v27, %v1596_v44 }
 0x18a   : > { %v1342_v49 = vpop.f32.mrf.mxu0  ;;  %v1598_v50 = vpop.f32.mrf.mxu1 }
 0x18b   : > { %2377 = vst.msk [vmem:[%s3451_s16 + $0x94] sm:$0xf] %vm2339_vm1, %v2904_v45  ;;  %2441 = vst.msk [vmem:[%s3451_s16 + $0x194] sm:$0xf] %vm2339_vm1, %v2968_v46  ;;  %v1737_v51 = vmax.f32 %v1341_v47, 0.0  ;;  %v1801_v53 = vmax.f32 %v1597_v48, 0.0 }
 0x18c   : > { %v1343_v54 = vpop.f32.mrf.mxu0  ;;  %v1599_v55 = vpop.f32.mrf.mxu1 }
 0x18d   : > { %v2905_v56 = vpack.c.bf16 %v1737_v51, %v1737_v51  ;;  %v2969_v57 = vpack.c.bf16 %v1801_v53, %v1801_v53  ;;  %v1344_v58 = vadd.f32 %v3714_v27, %v1343_v54  ;;  %v1600_v59 = vadd.f32 %v3714_v27, %v1599_v55 }
 0x18e   : > { %v1345_v60 = vpop.f32.mrf.mxu0  ;;  %v1601_v61 = vpop.f32.mrf.mxu1 }
 0x18f   : > { %2378 = vst.msk [vmem:[%s3451_s16 + $0x98] sm:$0xf] %vm2339_vm1, %v2905_v56  ;;  %2442 = vst.msk [vmem:[%s3451_s16 + $0x198] sm:$0xf] %vm2339_vm1, %v2969_v57  ;;  %v1738_v62 = vmax.f32 %v1344_v58, 0.0  ;;  %v1802_v63 = vmax.f32 %v1600_v59, 0.0 }
 0x190   : > { %v1348_v0 = vpop.f32.mrf.mxu0  ;;  %v1604_v1 = vpop.f32.mrf.mxu1 }
 0x191   : > { %v2906_v2 = vpack.c.bf16 %v1738_v62, %v1738_v62  ;;  %v2970_v3 = vpack.c.bf16 %v1802_v63, %v1802_v63  ;;  %v1349_v4 = vadd.f32 %v3714_v27, %v1348_v0  ;;  %v1605_v5 = vadd.f32 %v3714_v27, %v1604_v1 }
 0x192   : > { %v1350_v6 = vpop.f32.mrf.mxu0  ;;  %v1606_v7 = vpop.f32.mrf.mxu1 }
 0x193   : > { %2379 = vst.msk [vmem:[%s3451_s16 + $0x9c] sm:$0xf] %vm2339_vm1, %v2906_v2  ;;  %2443 = vst.msk [vmem:[%s3451_s16 + $0x19c] sm:$0xf] %vm2339_vm1, %v2970_v3  ;;  %v1739_v8 = vmax.f32 %v1349_v4, 0.0  ;;  %v1803_v9 = vmax.f32 %v1605_v5, 0.0 }
 0x194   : > { %v1351_v10 = vpop.f32.mrf.mxu0  ;;  %v1607_v11 = vpop.f32.mrf.mxu1 }
 0x195   : > { %v2907_v12 = vpack.c.bf16 %v1739_v8, %v1739_v8  ;;  %v2971_v13 = vpack.c.bf16 %v1803_v9, %v1803_v9  ;;  %v1352_v14 = vadd.f32 %v3714_v27, %v1351_v10  ;;  %v1608_v15 = vadd.f32 %v3714_v27, %v1607_v11 }
 0x196   : > { %v1353_v16 = vpop.f32.mrf.mxu0  ;;  %v1609_v17 = vpop.f32.mrf.mxu1 }
 0x197   : > { %2380 = vst.msk [vmem:[%s3451_s16 + $0xa0] sm:$0xf] %vm2339_vm1, %v2907_v12  ;;  %2444 = vst.msk [vmem:[%s3451_s16 + $0x1a0] sm:$0xf] %vm2339_vm1, %v2971_v13  ;;  %v1740_v18 = vmax.f32 %v1352_v14, 0.0  ;;  %v1804_v19 = vmax.f32 %v1608_v15, 0.0 }
 0x198   : > { %v1356_v20 = vpop.f32.mrf.mxu0  ;;  %v1612_v21 = vpop.f32.mrf.mxu1 }
 0x199   : > { %v2908_v22 = vpack.c.bf16 %v1740_v18, %v1740_v18  ;;  %v2972_v23 = vpack.c.bf16 %v1804_v19, %v1804_v19  ;;  %v1357_v24 = vadd.f32 %v3714_v27, %v1356_v20  ;;  %v1613_v25 = vadd.f32 %v3714_v27, %v1612_v21 }
 0x19a   : > { %v1358_v26 = vpop.f32.mrf.mxu0  ;;  %v1614_v52 = vpop.f32.mrf.mxu1 }
 0x19b   : > { %2381 = vst.msk [vmem:[%s3451_s16 + $0xa4] sm:$0xf] %vm2339_vm1, %v2908_v22  ;;  %2445 = vst.msk [vmem:[%s3451_s16 + $0x1a4] sm:$0xf] %vm2339_vm1, %v2972_v23  ;;  %v1741_v28 = vmax.f32 %v1357_v24, 0.0  ;;  %v1805_v29 = vmax.f32 %v1613_v25, 0.0 }
 0x19c   : > { %v1359_v30 = vpop.f32.mrf.mxu0  ;;  %v1615_v31 = vpop.f32.mrf.mxu1 }
 0x19d   : > { %v2909_v32 = vpack.c.bf16 %v1741_v28, %v1741_v28  ;;  %v2973_v33 = vpack.c.bf16 %v1805_v29, %v1805_v29  ;;  %v1360_v34 = vadd.f32 %v3714_v27, %v1359_v30  ;;  %v1616_v35 = vadd.f32 %v3714_v27, %v1615_v31 }
 0x19e   : > { %v1361_v36 = vpop.f32.mrf.mxu0  ;;  %v1617_v37 = vpop.f32.mrf.mxu1 }
 0x19f   : > { %2382 = vst.msk [vmem:[%s3451_s16 + $0xa8] sm:$0xf] %vm2339_vm1, %v2909_v32  ;;  %2446 = vst.msk [vmem:[%s3451_s16 + $0x1a8] sm:$0xf] %vm2339_vm1, %v2973_v33  ;;  %v1742_v38 = vmax.f32 %v1360_v34, 0.0  ;;  %v1806_v39 = vmax.f32 %v1616_v35, 0.0 }
 0x1a0   : > { %v1364_v40 = vpop.f32.mrf.mxu0  ;;  %v1620_v41 = vpop.f32.mrf.mxu1 }
 0x1a1   : > { %v2910_v42 = vpack.c.bf16 %v1742_v38, %v1742_v38  ;;  %v2974_v43 = vpack.c.bf16 %v1806_v39, %v1806_v39  ;;  %v1365_v44 = vadd.f32 %v3714_v27, %v1364_v40  ;;  %v1621_v45 = vadd.f32 %v3714_v27, %v1620_v41 }
 0x1a2   : > { %v1366_v46 = vpop.f32.mrf.mxu0  ;;  %v1622_v47 = vpop.f32.mrf.mxu1 }
 0x1a3   : > { %2383 = vst.msk [vmem:[%s3451_s16 + $0xac] sm:$0xf] %vm2339_vm1, %v2910_v42  ;;  %2447 = vst.msk [vmem:[%s3451_s16 + $0x1ac] sm:$0xf] %vm2339_vm1, %v2974_v43  ;;  %v1743_v48 = vmax.f32 %v1365_v44, 0.0  ;;  %v1807_v49 = vmax.f32 %v1621_v45, 0.0 }
 0x1a4   : > { %v1367_v50 = vpop.f32.mrf.mxu0  ;;  %v1623_v51 = vpop.f32.mrf.mxu1 }
 0x1a5   : > { %v2911_v53 = vpack.c.bf16 %v1743_v48, %v1743_v48  ;;  %v2975_v54 = vpack.c.bf16 %v1807_v49, %v1807_v49  ;;  %v1368_v55 = vadd.f32 %v3714_v27, %v1367_v50  ;;  %v1624_v56 = vadd.f32 %v3714_v27, %v1623_v51 }
 0x1a6   : > { %v1369_v57 = vpop.f32.mrf.mxu0  ;;  %v1625_v58 = vpop.f32.mrf.mxu1 }
 0x1a7   : > { %2384 = vst.msk [vmem:[%s3451_s16 + $0xb0] sm:$0xf] %vm2339_vm1, %v2911_v53  ;;  %2448 = vst.msk [vmem:[%s3451_s16 + $0x1b0] sm:$0xf] %vm2339_vm1, %v2975_v54  ;;  %v1744_v59 = vmax.f32 %v1368_v55, 0.0  ;;  %v1808_v60 = vmax.f32 %v1624_v56, 0.0 }
 0x1a8   : > { %v1372_v61 = vpop.f32.mrf.mxu0  ;;  %v1628_v62 = vpop.f32.mrf.mxu1 }
 0x1a9   : > { %v2912_v63 = vpack.c.bf16 %v1744_v59, %v1744_v59  ;;  %v2976_v0 = vpack.c.bf16 %v1808_v60, %v1808_v60  ;;  %v1373_v1 = vadd.f32 %v3714_v27, %v1372_v61  ;;  %v1629_v2 = vadd.f32 %v3714_v27, %v1628_v62 }
 0x1aa   : > { %v1374_v3 = vpop.f32.mrf.mxu0  ;;  %v1630_v4 = vpop.f32.mrf.mxu1 }
 0x1ab   : > { %2385 = vst.msk [vmem:[%s3451_s16 + $0xb4] sm:$0xf] %vm2339_vm1, %v2912_v63  ;;  %2449 = vst.msk [vmem:[%s3451_s16 + $0x1b4] sm:$0xf] %vm2339_vm1, %v2976_v0  ;;  %v1745_v5 = vmax.f32 %v1373_v1, 0.0  ;;  %v1809_v6 = vmax.f32 %v1629_v2, 0.0 }
 0x1ac   : > { %v1375_v7 = vpop.f32.mrf.mxu0  ;;  %v1631_v8 = vpop.f32.mrf.mxu1 }
 0x1ad   : > { %v2913_v9 = vpack.c.bf16 %v1745_v5, %v1745_v5  ;;  %v2977_v10 = vpack.c.bf16 %v1809_v6, %v1809_v6  ;;  %v1376_v11 = vadd.f32 %v3714_v27, %v1375_v7  ;;  %v1632_v12 = vadd.f32 %v3714_v27, %v1631_v8 }
 0x1ae   : > { %v1377_v13 = vpop.f32.mrf.mxu0  ;;  %v1633_v14 = vpop.f32.mrf.mxu1 }
 0x1af   : > { %2386 = vst.msk [vmem:[%s3451_s16 + $0xb8] sm:$0xf] %vm2339_vm1, %v2913_v9  ;;  %2450 = vst.msk [vmem:[%s3451_s16 + $0x1b8] sm:$0xf] %vm2339_vm1, %v2977_v10  ;;  %v1746_v15 = vmax.f32 %v1376_v11, 0.0  ;;  %v1810_v16 = vmax.f32 %v1632_v12, 0.0 }
 0x1b0   : > { %v1380_v17 = vpop.f32.mrf.mxu0  ;;  %v1636_v18 = vpop.f32.mrf.mxu1 }
 0x1b1   : > { %v2914_v19 = vpack.c.bf16 %v1746_v15, %v1746_v15  ;;  %v2978_v20 = vpack.c.bf16 %v1810_v16, %v1810_v16  ;;  %v1381_v21 = vadd.f32 %v3714_v27, %v1380_v17  ;;  %v1637_v22 = vadd.f32 %v3714_v27, %v1636_v18 }
 0x1b2   : > { %v1382_v23 = vpop.f32.mrf.mxu0  ;;  %v1638_v24 = vpop.f32.mrf.mxu1 }
 0x1b3   : > { %2387 = vst.msk [vmem:[%s3451_s16 + $0xbc] sm:$0xf] %vm2339_vm1, %v2914_v19  ;;  %2451 = vst.msk [vmem:[%s3451_s16 + $0x1bc] sm:$0xf] %vm2339_vm1, %v2978_v20  ;;  %v1747_v25 = vmax.f32 %v1381_v21, 0.0  ;;  %v1811_v26 = vmax.f32 %v1637_v22, 0.0 }
 0x1b4   : > { %v1383_v52 = vpop.f32.mrf.mxu0  ;;  %v1639_v28 = vpop.f32.mrf.mxu1 }
 0x1b5   : > { %v2915_v29 = vpack.c.bf16 %v1747_v25, %v1747_v25  ;;  %v2979_v30 = vpack.c.bf16 %v1811_v26, %v1811_v26  ;;  %v1384_v31 = vadd.f32 %v3714_v27, %v1383_v52  ;;  %v1640_v32 = vadd.f32 %v3714_v27, %v1639_v28 }
 0x1b6   : > { %v1385_v33 = vpop.f32.mrf.mxu0  ;;  %v1641_v34 = vpop.f32.mrf.mxu1 }
 0x1b7   : > { %2388 = vst.msk [vmem:[%s3451_s16 + $0xc0] sm:$0xf] %vm2339_vm1, %v2915_v29  ;;  %2452 = vst.msk [vmem:[%s3451_s16 + $0x1c0] sm:$0xf] %vm2339_vm1, %v2979_v30  ;;  %v1748_v35 = vmax.f32 %v1384_v31, 0.0  ;;  %v1812_v36 = vmax.f32 %v1640_v32, 0.0 }
 0x1b8   : > { %v1388_v37 = vpop.f32.mrf.mxu0  ;;  %v1644_v38 = vpop.f32.mrf.mxu1 }
 0x1b9   : > { %v2916_v39 = vpack.c.bf16 %v1748_v35, %v1748_v35  ;;  %v2980_v40 = vpack.c.bf16 %v1812_v36, %v1812_v36  ;;  %v1389_v41 = vadd.f32 %v3714_v27, %v1388_v37  ;;  %v1645_v42 = vadd.f32 %v3714_v27, %v1644_v38 }
 0x1ba   : > { %v1390_v43 = vpop.f32.mrf.mxu0  ;;  %v1646_v44 = vpop.f32.mrf.mxu1 }
 0x1bb   : > { %2389 = vst.msk [vmem:[%s3451_s16 + $0xc4] sm:$0xf] %vm2339_vm1, %v2916_v39  ;;  %2453 = vst.msk [vmem:[%s3451_s16 + $0x1c4] sm:$0xf] %vm2339_vm1, %v2980_v40  ;;  %v1749_v45 = vmax.f32 %v1389_v41, 0.0  ;;  %v1813_v46 = vmax.f32 %v1645_v42, 0.0 }
 0x1bc   : > { %v1391_v47 = vpop.f32.mrf.mxu0  ;;  %v1647_v48 = vpop.f32.mrf.mxu1 }
 0x1bd   : > { %v2917_v49 = vpack.c.bf16 %v1749_v45, %v1749_v45  ;;  %v2981_v50 = vpack.c.bf16 %v1813_v46, %v1813_v46  ;;  %v1392_v51 = vadd.f32 %v3714_v27, %v1391_v47  ;;  %v1648_v53 = vadd.f32 %v3714_v27, %v1647_v48 }
 0x1be   : > { %v1393_v54 = vpop.f32.mrf.mxu0  ;;  %v1649_v55 = vpop.f32.mrf.mxu1 }
 0x1bf   : > { %2390 = vst.msk [vmem:[%s3451_s16 + $0xc8] sm:$0xf] %vm2339_vm1, %v2917_v49  ;;  %2454 = vst.msk [vmem:[%s3451_s16 + $0x1c8] sm:$0xf] %vm2339_vm1, %v2981_v50  ;;  %v1750_v56 = vmax.f32 %v1392_v51, 0.0  ;;  %v1814_v57 = vmax.f32 %v1648_v53, 0.0 }
 0x1c0   : > { %v1396_v58 = vpop.f32.mrf.mxu0  ;;  %v1652_v59 = vpop.f32.mrf.mxu1 }
 0x1c1   : > { %v2918_v60 = vpack.c.bf16 %v1750_v56, %v1750_v56  ;;  %v2982_v61 = vpack.c.bf16 %v1814_v57, %v1814_v57  ;;  %v1397_v62 = vadd.f32 %v3714_v27, %v1396_v58  ;;  %v1653_v63 = vadd.f32 %v3714_v27, %v1652_v59 }
 0x1c2   : > { %v1398_v0 = vpop.f32.mrf.mxu0  ;;  %v1654_v1 = vpop.f32.mrf.mxu1 }
 0x1c3   : > { %2391 = vst.msk [vmem:[%s3451_s16 + $0xcc] sm:$0xf] %vm2339_vm1, %v2918_v60  ;;  %2455 = vst.msk [vmem:[%s3451_s16 + $0x1cc] sm:$0xf] %vm2339_vm1, %v2982_v61  ;;  %v1751_v2 = vmax.f32 %v1397_v62, 0.0  ;;  %v1815_v3 = vmax.f32 %v1653_v63, 0.0 }
 0x1c4   : > { %v1399_v4 = vpop.f32.mrf.mxu0  ;;  %v1655_v5 = vpop.f32.mrf.mxu1 }
 0x1c5   : > { %v2919_v6 = vpack.c.bf16 %v1751_v2, %v1751_v2  ;;  %v2983_v7 = vpack.c.bf16 %v1815_v3, %v1815_v3  ;;  %v1400_v8 = vadd.f32 %v3714_v27, %v1399_v4  ;;  %v1656_v9 = vadd.f32 %v3714_v27, %v1655_v5 }
 0x1c6   : > { %v1401_v10 = vpop.f32.mrf.mxu0  ;;  %v1657_v11 = vpop.f32.mrf.mxu1 }
 0x1c7   : > { %2392 = vst.msk [vmem:[%s3451_s16 + $0xd0] sm:$0xf] %vm2339_vm1, %v2919_v6  ;;  %2456 = vst.msk [vmem:[%s3451_s16 + $0x1d0] sm:$0xf] %vm2339_vm1, %v2983_v7  ;;  %v1752_v12 = vmax.f32 %v1400_v8, 0.0  ;;  %v1816_v13 = vmax.f32 %v1656_v9, 0.0 }
 0x1c8   : > { %v1404_v14 = vpop.f32.mrf.mxu0  ;;  %v1660_v15 = vpop.f32.mrf.mxu1 }
 0x1c9   : > { %v2920_v16 = vpack.c.bf16 %v1752_v12, %v1752_v12  ;;  %v2984_v17 = vpack.c.bf16 %v1816_v13, %v1816_v13  ;;  %v1405_v18 = vadd.f32 %v3714_v27, %v1404_v14  ;;  %v1661_v19 = vadd.f32 %v3714_v27, %v1660_v15 }
 0x1ca   : > { %v1406_v20 = vpop.f32.mrf.mxu0  ;;  %v1662_v21 = vpop.f32.mrf.mxu1 }
 0x1cb   : > { %2393 = vst.msk [vmem:[%s3451_s16 + $0xd4] sm:$0xf] %vm2339_vm1, %v2920_v16  ;;  %2457 = vst.msk [vmem:[%s3451_s16 + $0x1d4] sm:$0xf] %vm2339_vm1, %v2984_v17  ;;  %v1753_v22 = vmax.f32 %v1405_v18, 0.0  ;;  %v1817_v23 = vmax.f32 %v1661_v19, 0.0 }
 0x1cc   : > { %v1407_v24 = vpop.f32.mrf.mxu0  ;;  %v1663_v25 = vpop.f32.mrf.mxu1 }
 0x1cd   : > { %v2921_v26 = vpack.c.bf16 %v1753_v22, %v1753_v22  ;;  %v2985_v52 = vpack.c.bf16 %v1817_v23, %v1817_v23  ;;  %v1408_v28 = vadd.f32 %v3714_v27, %v1407_v24  ;;  %v1664_v29 = vadd.f32 %v3714_v27, %v1663_v25 }
 0x1ce   : > { %v1409_v30 = vpop.f32.mrf.mxu0  ;;  %v1665_v31 = vpop.f32.mrf.mxu1 }
 0x1cf   : > { %2394 = vst.msk [vmem:[%s3451_s16 + $0xd8] sm:$0xf] %vm2339_vm1, %v2921_v26  ;;  %2458 = vst.msk [vmem:[%s3451_s16 + $0x1d8] sm:$0xf] %vm2339_vm1, %v2985_v52  ;;  %v1754_v32 = vmax.f32 %v1408_v28, 0.0  ;;  %v1818_v33 = vmax.f32 %v1664_v29, 0.0 }
 0x1d0   : > { %v1412_v34 = vpop.f32.mrf.mxu0  ;;  %v1668_v35 = vpop.f32.mrf.mxu1 }
 0x1d1   : > { %v2922_v36 = vpack.c.bf16 %v1754_v32, %v1754_v32  ;;  %v2986_v37 = vpack.c.bf16 %v1818_v33, %v1818_v33  ;;  %v1413_v38 = vadd.f32 %v3714_v27, %v1412_v34  ;;  %v1669_v39 = vadd.f32 %v3714_v27, %v1668_v35 }
 0x1d2   : > { %v1414_v40 = vpop.f32.mrf.mxu0  ;;  %v1670_v41 = vpop.f32.mrf.mxu1 }
 0x1d3   : > { %2395 = vst.msk [vmem:[%s3451_s16 + $0xdc] sm:$0xf] %vm2339_vm1, %v2922_v36  ;;  %2459 = vst.msk [vmem:[%s3451_s16 + $0x1dc] sm:$0xf] %vm2339_vm1, %v2986_v37  ;;  %v1755_v42 = vmax.f32 %v1413_v38, 0.0  ;;  %v1819_v43 = vmax.f32 %v1669_v39, 0.0 }
 0x1d4   : > { %v1415_v44 = vpop.f32.mrf.mxu0  ;;  %v1671_v45 = vpop.f32.mrf.mxu1 }
 0x1d5   : > { %v2923_v46 = vpack.c.bf16 %v1755_v42, %v1755_v42  ;;  %v2987_v47 = vpack.c.bf16 %v1819_v43, %v1819_v43  ;;  %v1416_v48 = vadd.f32 %v3714_v27, %v1415_v44  ;;  %v1672_v49 = vadd.f32 %v3714_v27, %v1671_v45 }
 0x1d6   : > { %v1417_v50 = vpop.f32.mrf.mxu0  ;;  %v1673_v51 = vpop.f32.mrf.mxu1 }
 0x1d7   : > { %2396 = vst.msk [vmem:[%s3451_s16 + $0xe0] sm:$0xf] %vm2339_vm1, %v2923_v46  ;;  %2460 = vst.msk [vmem:[%s3451_s16 + $0x1e0] sm:$0xf] %vm2339_vm1, %v2987_v47  ;;  %v1756_v53 = vmax.f32 %v1416_v48, 0.0  ;;  %v1820_v54 = vmax.f32 %v1672_v49, 0.0 }
 0x1d8   : > { %v1420_v55 = vpop.f32.mrf.mxu0  ;;  %v1676_v56 = vpop.f32.mrf.mxu1 }
 0x1d9   : > { %v2924_v57 = vpack.c.bf16 %v1756_v53, %v1756_v53  ;;  %v2988_v58 = vpack.c.bf16 %v1820_v54, %v1820_v54  ;;  %v1421_v59 = vadd.f32 %v3714_v27, %v1420_v55  ;;  %v1677_v60 = vadd.f32 %v3714_v27, %v1676_v56 }
 0x1da   : > { %v1422_v61 = vpop.f32.mrf.mxu0  ;;  %v1678_v62 = vpop.f32.mrf.mxu1 }
 0x1db   : > { %2397 = vst.msk [vmem:[%s3451_s16 + $0xe4] sm:$0xf] %vm2339_vm1, %v2924_v57  ;;  %2461 = vst.msk [vmem:[%s3451_s16 + $0x1e4] sm:$0xf] %vm2339_vm1, %v2988_v58  ;;  %v1757_v63 = vmax.f32 %v1421_v59, 0.0  ;;  %v1821_v0 = vmax.f32 %v1677_v60, 0.0 }
 0x1dc   : > { %v1423_v1 = vpop.f32.mrf.mxu0  ;;  %v1679_v2 = vpop.f32.mrf.mxu1 }
 0x1dd   : > { %v2925_v3 = vpack.c.bf16 %v1757_v63, %v1757_v63  ;;  %v2989_v4 = vpack.c.bf16 %v1821_v0, %v1821_v0  ;;  %v1424_v5 = vadd.f32 %v3714_v27, %v1423_v1  ;;  %v1680_v6 = vadd.f32 %v3714_v27, %v1679_v2 }
 0x1de   : > { %v1425_v7 = vpop.f32.mrf.mxu0  ;;  %v1681_v8 = vpop.f32.mrf.mxu1 }
 0x1df   : > { %2398 = vst.msk [vmem:[%s3451_s16 + $0xe8] sm:$0xf] %vm2339_vm1, %v2925_v3  ;;  %2462 = vst.msk [vmem:[%s3451_s16 + $0x1e8] sm:$0xf] %vm2339_vm1, %v2989_v4  ;;  %v1758_v9 = vmax.f32 %v1424_v5, 0.0  ;;  %v1822_v10 = vmax.f32 %v1680_v6, 0.0 }
 0x1e0   : > { %v1428_v11 = vpop.f32.mrf.mxu0  ;;  %v1684_v12 = vpop.f32.mrf.mxu1 }
 0x1e1   : > { %v2926_v13 = vpack.c.bf16 %v1758_v9, %v1758_v9  ;;  %v2990_v14 = vpack.c.bf16 %v1822_v10, %v1822_v10  ;;  %v1429_v15 = vadd.f32 %v3714_v27, %v1428_v11  ;;  %v1685_v16 = vadd.f32 %v3714_v27, %v1684_v12 }
 0x1e2   : > { %v1430_v17 = vpop.f32.mrf.mxu0  ;;  %v1686_v18 = vpop.f32.mrf.mxu1 }
 0x1e3   : > { %2399 = vst.msk [vmem:[%s3451_s16 + $0xec] sm:$0xf] %vm2339_vm1, %v2926_v13  ;;  %2463 = vst.msk [vmem:[%s3451_s16 + $0x1ec] sm:$0xf] %vm2339_vm1, %v2990_v14  ;;  %v1759_v19 = vmax.f32 %v1429_v15, 0.0  ;;  %v1823_v20 = vmax.f32 %v1685_v16, 0.0 }
 0x1e4   : > { %v1431_v21 = vpop.f32.mrf.mxu0  ;;  %v1687_v22 = vpop.f32.mrf.mxu1 }
 0x1e5   : > { %v2927_v23 = vpack.c.bf16 %v1759_v19, %v1759_v19  ;;  %v2991_v24 = vpack.c.bf16 %v1823_v20, %v1823_v20  ;;  %v1432_v25 = vadd.f32 %v3714_v27, %v1431_v21  ;;  %v1688_v26 = vadd.f32 %v3714_v27, %v1687_v22 }
 0x1e6   : > { %v1433_v52 = vpop.f32.mrf.mxu0  ;;  %v1689_v28 = vpop.f32.mrf.mxu1 }
 0x1e7   : > { %2400 = vst.msk [vmem:[%s3451_s16 + $0xf0] sm:$0xf] %vm2339_vm1, %v2927_v23  ;;  %2464 = vst.msk [vmem:[%s3451_s16 + $0x1f0] sm:$0xf] %vm2339_vm1, %v2991_v24  ;;  %v1760_v29 = vmax.f32 %v1432_v25, 0.0  ;;  %v1824_v30 = vmax.f32 %v1688_v26, 0.0 }
 0x1e8   : > { %v1436_v31 = vpop.f32.mrf.mxu0  ;;  %v1692_v32 = vpop.f32.mrf.mxu1 }
 0x1e9   : > { %v2928_v33 = vpack.c.bf16 %v1760_v29, %v1760_v29  ;;  %v2992_v34 = vpack.c.bf16 %v1824_v30, %v1824_v30  ;;  %v1437_v35 = vadd.f32 %v3714_v27, %v1436_v31  ;;  %v1693_v36 = vadd.f32 %v3714_v27, %v1692_v32 }
 0x1ea   : > { %v1438_v37 = vpop.f32.mrf.mxu0  ;;  %v1694_v38 = vpop.f32.mrf.mxu1 }
 0x1eb   : > { %2401 = vst.msk [vmem:[%s3451_s16 + $0xf4] sm:$0xf] %vm2339_vm1, %v2928_v33  ;;  %2465 = vst.msk [vmem:[%s3451_s16 + $0x1f4] sm:$0xf] %vm2339_vm1, %v2992_v34  ;;  %v1761_v39 = vmax.f32 %v1437_v35, 0.0  ;;  %v1825_v40 = vmax.f32 %v1693_v36, 0.0 }
 0x1ec   : > { %v1439_v41 = vpop.f32.mrf.mxu0  ;;  %v1695_v42 = vpop.f32.mrf.mxu1 }
 0x1ed   : > { %v2929_v43 = vpack.c.bf16 %v1761_v39, %v1761_v39  ;;  %v2993_v44 = vpack.c.bf16 %v1825_v40, %v1825_v40  ;;  %v1440_v45 = vadd.f32 %v3714_v27, %v1439_v41  ;;  %v1696_v46 = vadd.f32 %v3714_v27, %v1695_v42 }
 0x1ee   : > { %v1441_v47 = vpop.f32.mrf.mxu0  ;;  %v1697_v48 = vpop.f32.mrf.mxu1 }
 0x1ef   : > { %2402 = vst.msk [vmem:[%s3451_s16 + $0xf8] sm:$0xf] %vm2339_vm1, %v2929_v43  ;;  %2466 = vst.msk [vmem:[%s3451_s16 + $0x1f8] sm:$0xf] %vm2339_vm1, %v2993_v44  ;;  %v1762_v49 = vmax.f32 %v1440_v45, 0.0  ;;  %v1826_v50 = vmax.f32 %v1696_v46, 0.0 }
 0x1f1   : > { %v2930_v51 = vpack.c.bf16 %v1762_v49, %v1762_v49  ;;  %v2994_v53 = vpack.c.bf16 %v1826_v50, %v1826_v50 }
 0x1f3   : > { %2403 = vst.msk [vmem:[%s3451_s16 + $0xfc] sm:$0xf] %vm2339_vm1, %v2930_v51  ;;  %2467 = vst.msk [vmem:[%s3451_s16 + $0x1fc] sm:$0xf] %vm2339_vm1, %v2994_v53 }
 0x1f4 PF: > { %s13_s12 = sadd.s32 1, %s3214_s12  }
 0x1f5   : > { %p10_p4 = scmp.ge.s32.totalorder %s13_s12, 4  }
 0x1f7   :  { %12 = sbr.rel (!%p10_p4) target bundleno = 1 (0x1), region = 62 }

// kernel: _lambda_.12
= control target key start
LH: loop header
LB: loop body
LE: loop exit
PB: predicated region body
PF: predicated region fallthrough
CT: control target
= control target key end

     0   :  { %s4009_s15 = smov 0   ;;  %s4789_s0 = inlined_call_operand.vmem [shape: bf16[2048,144], index: 0, kind: input, shape index: {}]   ;;  %s4790_s1 = inlined_call_operand.vmem [shape: bf16[144,16], index: 1, kind: input, shape index: {}]   ;;  %s4791_s2 = inlined_call_operand.vmem [shape: f32[1,16], index: 2, kind: input, shape index: {}]   ;;  %s4792_s3 = inlined_call_operand.vmem [shape: bf16[2048,16], index: 3, kind: input, shape index: {}]   ;;  %s4793_s4 = inlined_call_operand.vmem [shape: bf16[2048,16], index: 4, kind: output, shape index: {}]  }
   0x1 LB: > { %s2969_s16 = sadd.s32 4294967295, %s3981_s15   ;;  %p2973_p0 = scmp.ge.s32.totalorder %s3981_s15, 1  ;;  %s3981_s15 = sphi %s4009_s15, %s14_s15  }
   0x2   : > { %p175_p1 = scmp.lt.s32.totalorder %s3981_s15, 3 }
   0x4   : > { %p176_p2 = pnand %p2973_p0, %p175_p1 }
   0x5   : > { %s2974_s19 = sshll.u32 (!%p176_p2), %s2969_s16, 7 }
   0x6   : > { %179 = sbr.rel (%p176_p2) target bundleno = 502 (0x1f6), region = 36  ;;  %p208_p3 = scmp.lt.s32.totalorder (!%p176_p2), %s2974_s19, 255 }
   0xb   : > { %v3788_v0 = vld [vmem:[%s4790_s1 + $0x38] sm:$0xff]   ;;  %v3983_v1 = vmov 0   ;;  %v3789_v2 = vld [vmem:[%s4790_s1 + $0x30] sm:$0xff]   ;;  %s4795_s19 = smov (!%p208_p3, %s2974_s19), 255  ;;  %v3790_v3 = vld [vmem:[%s4790_s1 + $0x28] sm:$0xff]   ;;  %vm1010_vm0 = vcmask 130048  }
   0xc   : > { %1203 = vmatprep.subr.bf16.mxu0 %v3983_v1  ;;  %3761 = vmatprep.subr.bf16.mxu1 %v3983_v1  ;;  %s3313_s24 = sshll.u32 %s4795_s19, 3  ;;  %v3791_v4 = vld [vmem:[%s4790_s1 + $0x20] sm:$0xff]   ;;  %v3792_v7 = vld [vmem:[%s4790_s1 + $0x18] sm:$0xff]   ;;  %v3793_v8 = vld [vmem:[%s4790_s1 + $0x10] sm:$0xff]   ;;  %s2978_s14 = sshll.u32 %s4795_s19, 2  ;;  %vm2772_vm1 = vcmask 125952  }
   0xd   : > { %1204 = vmatpush1.bf16.msra.mxu0 %v3788_v0  ;;  %3770 = vmatpush1.bf16.msra.mxu1 %v3788_v0  ;;  %s4032_s27 = scalar_lea.vmem %s4789_s0, %s3313_s24  ;;  %v3794_v9 = vld [vmem:[%s4790_s1 + $0x8] sm:$0xff]   ;;  %v3795_v10 = vld [vmem:[%s4790_s1] sm:$0xff]   ;;  %s4210_s18 = scalar_lea.vmem %s4792_s3, %s2978_s14 }
   0xe   : > { %1205 = vmatprep.subr.bf16.mxu0 %v3983_v1  ;;  %3762 = vmatprep.subr.bf16.mxu1 %v3983_v1  ;;  %v3799_v5 = vld [vmem:[%s4032_s27 + $0x4] ss:$8 sps:$4 sm:$0xff]   ;;  %v3797_v12 = vld [vmem:[%s4032_s27] ss:$8 sps:$4 sm:$0xff]   ;;  %v3803_v14 = vld [vmem:[%s4032_s27 + $0x14] ss:$8 sps:$4 sm:$0xff]   ;;  %s4244_s24 = scalar_lea.vmem %s4793_s4, %s2978_s14 }
   0xf   : > { %v3802_v6 = vld [vmem:[%s4032_s27 + $0x204] ss:$8 sps:$4 sm:$0xff]   ;;  %3119 = vmatprep.mubr.msk.bf16.mxu0 %vm1010_vm0, %v3799_v5  ;;  %v3800_v13 = vld [vmem:[%s4032_s27 + $0x200] ss:$8 sps:$4 sm:$0xff]   ;;  %v3805_v15 = vld [vmem:[%s4032_s27 + $0x214] ss:$8 sps:$4 sm:$0xff]  }
  0x10   : > { %3151 = vmatprep.mubr.msk.bf16.mxu1 %vm1010_vm0, %v3802_v6  ;;  %v3796_v11 = vld [vmem:[%s4790_s1 + $0x40] sm:$0xff]   ;;  %v3807_v16 = vld [vmem:[%s4032_s27 + $0x10] ss:$8 sps:$4 sm:$0xff]   ;;  %v3815_v22 = vld [vmem:[%s4032_s27 + $0x34] ss:$8 sps:$4 sm:$0xff]  }
  0x11   : > { %1206 = vmatpush1.bf16.msra.mxu0 %v3789_v2  ;;  %3771 = vmatpush1.bf16.msra.mxu1 %v3789_v2  ;;  %v3808_v17 = vld [vmem:[%s4032_s27 + $0x210] ss:$8 sps:$4 sm:$0xff]   ;;  %v3809_v18 = vld [vmem:[%s4032_s27 + $0x24] ss:$8 sps:$4 sm:$0xff]   ;;  %v3813_v20 = vld [vmem:[%s4032_s27 + $0x20] ss:$8 sps:$4 sm:$0xff]  }
  0x12   : > { %1207 = vmatprep.subr.bf16.mxu0 %v3983_v1  ;;  %3763 = vmatprep.subr.bf16.mxu1 %v3983_v1  ;;  %v3811_v19 = vld [vmem:[%s4032_s27 + $0x224] ss:$8 sps:$4 sm:$0xff]   ;;  %v3814_v21 = vld [vmem:[%s4032_s27 + $0x220] ss:$8 sps:$4 sm:$0xff]   ;;  %v3817_v23 = vld [vmem:[%s4032_s27 + $0x234] ss:$8 sps:$4 sm:$0xff]  }
  0x13   : > { %v3819_v24 = vld [vmem:[%s4032_s27 + $0x30] ss:$8 sps:$4 sm:$0xff]   ;;  %v3821_v26 = vld [vmem:[%s4032_s27 + $0x44] ss:$8 sps:$4 sm:$0xff]   ;;  %v3825_v28 = vld [vmem:[%s4032_s27 + $0x40] ss:$8 sps:$4 sm:$0xff]  }
  0x14   : > { %v3820_v25 = vld [vmem:[%s4032_s27 + $0x230] ss:$8 sps:$4 sm:$0xff]   ;;  %v3823_v27 = vld [vmem:[%s4032_s27 + $0x244] ss:$8 sps:$4 sm:$0xff]   ;;  %v3826_v29 = vld [vmem:[%s4032_s27 + $0x240] ss:$8 sps:$4 sm:$0xff]  }
  0x15   : > { %1208 = vmatpush1.bf16.msra.mxu0 %v3790_v3  ;;  %3772 = vmatpush1.bf16.msra.mxu1 %v3790_v3  ;;  %v3827_v30 = vld [vmem:[%s4032_s27 + $0x54] ss:$8 sps:$4 sm:$0xff]   ;;  %v3831_v32 = vld [vmem:[%s4032_s27 + $0x50] ss:$8 sps:$4 sm:$0xff]   ;;  %v3833_v34 = vld [vmem:[%s4032_s27 + $0x64] ss:$8 sps:$4 sm:$0xff]  }
  0x16   : > { %1209 = vmatprep.subr.bf16.mxu0 %v3983_v1  ;;  %3764 = vmatprep.subr.bf16.mxu1 %v3983_v1  ;;  %v3829_v31 = vld [vmem:[%s4032_s27 + $0x254] ss:$8 sps:$4 sm:$0xff]   ;;  %v3832_v33 = vld [vmem:[%s4032_s27 + $0x250] ss:$8 sps:$4 sm:$0xff]   ;;  %v3835_v35 = vld [vmem:[%s4032_s27 + $0x264] ss:$8 sps:$4 sm:$0xff]  }
  0x17   : > { %v3837_v36 = vld [vmem:[%s4032_s27 + $0x60] ss:$8 sps:$4 sm:$0xff]   ;;  %v3839_v38 = vld [vmem:[%s4032_s27 + $0x74] ss:$8 sps:$4 sm:$0xff]   ;;  %v3843_v40 = vld [vmem:[%s4032_s27 + $0x70] ss:$8 sps:$4 sm:$0xff]  }
  0x18   : > { %v3838_v37 = vld [vmem:[%s4032_s27 + $0x260] ss:$8 sps:$4 sm:$0xff]   ;;  %v3841_v39 = vld [vmem:[%s4032_s27 + $0x274] ss:$8 sps:$4 sm:$0xff]   ;;  %v3844_v41 = vld [vmem:[%s4032_s27 + $0x270] ss:$8 sps:$4 sm:$0xff]  }
  0x19   : > { %1210 = vmatpush1.bf16.msra.mxu0 %v3791_v4  ;;  %3773 = vmatpush1.bf16.msra.mxu1 %v3791_v4  ;;  %v3845_v42 = vld [vmem:[%s4032_s27 + $0x84] ss:$8 sps:$4 sm:$0xff]   ;;  %v3849_v44 = vld [vmem:[%s4032_s27 + $0x80] ss:$8 sps:$4 sm:$0xff]   ;;  %v3851_v46 = vld [vmem:[%s4032_s27 + $0x94] ss:$8 sps:$4 sm:$0xff]  }
  0x1a   : > { %1211 = vmatprep.subr.bf16.mxu0 %v3983_v1  ;;  %3765 = vmatprep.subr.bf16.mxu1 %v3983_v1  ;;  %v3847_v43 = vld [vmem:[%s4032_s27 + $0x284] ss:$8 sps:$4 sm:$0xff]   ;;  %v3850_v45 = vld [vmem:[%s4032_s27 + $0x280] ss:$8 sps:$4 sm:$0xff]   ;;  %v3853_v47 = vld [vmem:[%s4032_s27 + $0x294] ss:$8 sps:$4 sm:$0xff]  }
  0x1b   : > { %v3855_v48 = vld [vmem:[%s4032_s27 + $0x90] ss:$8 sps:$4 sm:$0xff]   ;;  %v3857_v50 = vld [vmem:[%s4032_s27 + $0xa4] ss:$8 sps:$4 sm:$0xff]   ;;  %v3861_v52 = vld [vmem:[%s4032_s27 + $0xa0] ss:$8 sps:$4 sm:$0xff]  }
  0x1c   : > { %v3856_v49 = vld [vmem:[%s4032_s27 + $0x290] ss:$8 sps:$4 sm:$0xff]   ;;  %v3859_v51 = vld [vmem:[%s4032_s27 + $0x2a4] ss:$8 sps:$4 sm:$0xff]   ;;  %v3862_v53 = vld [vmem:[%s4032_s27 + $0x2a0] ss:$8 sps:$4 sm:$0xff]  }
  0x1d   : > { %1212 = vmatpush1.bf16.msra.mxu0 %v3792_v7  ;;  %3774 = vmatpush1.bf16.msra.mxu1 %v3792_v7  ;;  %v3863_v54 = vld [vmem:[%s4032_s27 + $0xb4] ss:$8 sps:$4 sm:$0xff]   ;;  %v3867_v56 = vld [vmem:[%s4032_s27 + $0xb0] ss:$8 sps:$4 sm:$0xff]   ;;  %v3869_v58 = vld [vmem:[%s4032_s27 + $0xc4] ss:$8 sps:$4 sm:$0xff]  }
  0x1e   : > { %1213 = vmatprep.subr.bf16.mxu0 %v3983_v1  ;;  %3766 = vmatprep.subr.bf16.mxu1 %v3983_v1  ;;  %v3865_v55 = vld [vmem:[%s4032_s27 + $0x2b4] ss:$8 sps:$4 sm:$0xff]   ;;  %v3868_v57 = vld [vmem:[%s4032_s27 + $0x2b0] ss:$8 sps:$4 sm:$0xff]   ;;  %v3871_v59 = vld [vmem:[%s4032_s27 + $0x2c4] ss:$8 sps:$4 sm:$0xff]  }
  0x1f   : > { %v3873_v60 = vld [vmem:[%s4032_s27 + $0xc0] ss:$8 sps:$4 sm:$0xff]   ;;  %v3875_v62 = vld [vmem:[%s4032_s27 + $0xd4] ss:$8 sps:$4 sm:$0xff]   ;;  %v3879_v0 = vld [vmem:[%s4032_s27 + $0xd0] ss:$8 sps:$4 sm:$0xff]  }
  0x20   : > { %v3874_v61 = vld [vmem:[%s4032_s27 + $0x2c0] ss:$8 sps:$4 sm:$0xff]   ;;  %v3877_v63 = vld [vmem:[%s4032_s27 + $0x2d4] ss:$8 sps:$4 sm:$0xff]   ;;  %v3881_v2 = vld [vmem:[%s4032_s27 + $0xe4] ss:$8 sps:$4 sm:$0xff]  }
  0x21   : > { %1214 = vmatpush1.bf16.msra.mxu0 %v3793_v8  ;;  %3775 = vmatpush1.bf16.msra.mxu1 %v3793_v8  ;;  %v3883_v3 = vld [vmem:[%s4032_s27 + $0x2e4] ss:$8 sps:$4 sm:$0xff]   ;;  %v3885_v4 = vld [vmem:[%s4032_s27 + $0xe0] ss:$8 sps:$4 sm:$0xff]   ;;  %v3887_v6 = vld [vmem:[%s4032_s27 + $0xf4] ss:$8 sps:$4 sm:$0xff]  }
  0x22   : > { %1215 = vmatprep.subr.bf16.mxu0 %v3983_v1  ;;  %3767 = vmatprep.subr.bf16.mxu1 %v3983_v1  ;;  %v3886_v5 = vld [vmem:[%s4032_s27 + $0x2e0] ss:$8 sps:$4 sm:$0xff]   ;;  %v3889_v7 = vld [vmem:[%s4032_s27 + $0x2f4] ss:$8 sps:$4 sm:$0xff]   ;;  %v3891_v8 = vld [vmem:[%s4032_s27 + $0xf0] ss:$8 sps:$4 sm:$0xff]  }
  0x25   : > { %1216 = vmatpush1.bf16.msra.mxu0 %v3794_v9  ;;  %3776 = vmatpush1.bf16.msra.mxu1 %v3794_v9  ;;  %v3892_v9 = vld [vmem:[%s4032_s27 + $0x2f0] ss:$8 sps:$4 sm:$0xff]  }
  0x26   : > { %1217 = vmatprep.subr.bf16.mxu0 %v3983_v1  ;;  %3768 = vmatprep.subr.bf16.mxu1 %v3983_v1 }
  0x29   : > { %1218 = vmatpush1.bf16.msra.mxu0 %v3795_v10  ;;  %3777 = vmatpush1.bf16.msra.mxu1 %v3795_v10  ;;  %v3893_v10 = vld [vmem:[%s4032_s27 + $0x104] ss:$8 sps:$4 sm:$0xff]  }
  0x2a   : > { %1233 = vmatprep.subr.bf16.mxu0 %v3983_v1  ;;  %3769 = vmatprep.subr.bf16.mxu1 %v3983_v1  ;;  %v3880_v1 = vld [vmem:[%s4032_s27 + $0x2d0] ss:$8 sps:$4 sm:$0xff]  }
  0x2d   : > { %1234 = vmatpush2.bf16.msra.mxu0 %v3796_v11  ;;  %3778 = vmatpush2.bf16.msra.mxu1 %v3796_v11  ;;  %v3895_v11 = vld [vmem:[%s4032_s27 + $0x304] ss:$8 sps:$4 sm:$0xff]  }
  0x30   : > { %1236 = vmatmul.mubr.bf16.vlgmr.msra.gmra.mxu0 %v3797_v12  ;;  %1492 = vmatmul.mubr.bf16.vlgmr.msra.gmra.mxu1 %v3800_v13  ;;  %v3897_v12 = vld [vmem:[%s4032_s27 + $0x100] ss:$8 sps:$4 sm:$0xff]  }
  0x31   : > { %3120 = vmatprep.mubr.msk.bf16.mxu0 %vm1010_vm0, %v3803_v14  ;;  %3152 = vmatprep.mubr.msk.bf16.mxu1 %vm1010_vm0, %v3805_v15  ;;  %v3898_v13 = vld [vmem:[%s4032_s27 + $0x300] ss:$8 sps:$4 sm:$0xff]   ;;  %v3899_v14 = vld [vmem:[%s4032_s27 + $0x114] ss:$8 sps:$4 sm:$0xff]  }
  0x32   : > { %v3901_v15 = vld [vmem:[%s4032_s27 + $0x314] ss:$8 sps:$4 sm:$0xff]  }
  0x38   : > { %1244 = vmatmul.mubr.bf16.gmra.mxu0 %v3807_v16  ;;  %1500 = vmatmul.mubr.bf16.gmra.mxu1 %v3808_v17  ;;  %v3903_v16 = vld [vmem:[%s4032_s27 + $0x110] ss:$8 sps:$4 sm:$0xff]  }
  0x39   : > { %3121 = vmatprep.mubr.msk.bf16.mxu0 %vm1010_vm0, %v3809_v18  ;;  %3153 = vmatprep.mubr.msk.bf16.mxu1 %vm1010_vm0, %v3811_v19  ;;  %v3904_v17 = vld [vmem:[%s4032_s27 + $0x310] ss:$8 sps:$4 sm:$0xff]   ;;  %v3905_v18 = vld [vmem:[%s4032_s27 + $0x124] ss:$8 sps:$4 sm:$0xff]  }
  0x3a   : > { %v3907_v19 = vld [vmem:[%s4032_s27 + $0x324] ss:$8 sps:$4 sm:$0xff]  }
  0x40   : > { %1252 = vmatmul.mubr.bf16.gmra.mxu0 %v3813_v20  ;;  %1508 = vmatmul.mubr.bf16.gmra.mxu1 %v3814_v21  ;;  %v3909_v20 = vld [vmem:[%s4032_s27 + $0x120] ss:$8 sps:$4 sm:$0xff]  }
  0x41   : > { %3122 = vmatprep.mubr.msk.bf16.mxu0 %vm1010_vm0, %v3815_v22  ;;  %3154 = vmatprep.mubr.msk.bf16.mxu1 %vm1010_vm0, %v3817_v23  ;;  %v3910_v21 = vld [vmem:[%s4032_s27 + $0x320] ss:$8 sps:$4 sm:$0xff]   ;;  %v3911_v22 = vld [vmem:[%s4032_s27 + $0x134] ss:$8 sps:$4 sm:$0xff]  }
  0x42   : > { %v3913_v23 = vld [vmem:[%s4032_s27 + $0x334] ss:$8 sps:$4 sm:$0xff]  }
  0x48   : > { %1260 = vmatmul.mubr.bf16.gmra.mxu0 %v3819_v24  ;;  %1516 = vmatmul.mubr.bf16.gmra.mxu1 %v3820_v25  ;;  %v3915_v24 = vld [vmem:[%s4032_s27 + $0x130] ss:$8 sps:$4 sm:$0xff]  }
  0x49   : > { %3123 = vmatprep.mubr.msk.bf16.mxu0 %vm1010_vm0, %v3821_v26  ;;  %3155 = vmatprep.mubr.msk.bf16.mxu1 %vm1010_vm0, %v3823_v27  ;;  %v3916_v25 = vld [vmem:[%s4032_s27 + $0x330] ss:$8 sps:$4 sm:$0xff]   ;;  %v3917_v26 = vld [vmem:[%s4032_s27 + $0x144] ss:$8 sps:$4 sm:$0xff]  }
  0x4a   : > { %v3919_v27 = vld [vmem:[%s4032_s27 + $0x344] ss:$8 sps:$4 sm:$0xff]  }
  0x50   : > { %1268 = vmatmul.mubr.bf16.gmra.mxu0 %v3825_v28  ;;  %1524 = vmatmul.mubr.bf16.gmra.mxu1 %v3826_v29  ;;  %v3921_v28 = vld [vmem:[%s4032_s27 + $0x140] ss:$8 sps:$4 sm:$0xff]  }
  0x51   : > { %3124 = vmatprep.mubr.msk.bf16.mxu0 %vm1010_vm0, %v3827_v30  ;;  %3156 = vmatprep.mubr.msk.bf16.mxu1 %vm1010_vm0, %v3829_v31  ;;  %v3922_v29 = vld [vmem:[%s4032_s27 + $0x340] ss:$8 sps:$4 sm:$0xff]   ;;  %v3923_v30 = vld [vmem:[%s4032_s27 + $0x154] ss:$8 sps:$4 sm:$0xff]  }
  0x52   : > { %v3925_v31 = vld [vmem:[%s4032_s27 + $0x354] ss:$8 sps:$4 sm:$0xff]  }
  0x58   : > { %1276 = vmatmul.mubr.bf16.gmra.mxu0 %v3831_v32  ;;  %1532 = vmatmul.mubr.bf16.gmra.mxu1 %v3832_v33  ;;  %v3927_v32 = vld [vmem:[%s4032_s27 + $0x150] ss:$8 sps:$4 sm:$0xff]  }
  0x59   : > { %3125 = vmatprep.mubr.msk.bf16.mxu0 %vm1010_vm0, %v3833_v34  ;;  %3157 = vmatprep.mubr.msk.bf16.mxu1 %vm1010_vm0, %v3835_v35  ;;  %v3928_v33 = vld [vmem:[%s4032_s27 + $0x350] ss:$8 sps:$4 sm:$0xff]   ;;  %v3929_v34 = vld [vmem:[%s4032_s27 + $0x164] ss:$8 sps:$4 sm:$0xff]  }
  0x5a   : > { %v3931_v35 = vld [vmem:[%s4032_s27 + $0x364] ss:$8 sps:$4 sm:$0xff]  }
  0x60   : > { %1284 = vmatmul.mubr.bf16.gmra.mxu0 %v3837_v36  ;;  %1540 = vmatmul.mubr.bf16.gmra.mxu1 %v3838_v37  ;;  %v3933_v36 = vld [vmem:[%s4032_s27 + $0x160] ss:$8 sps:$4 sm:$0xff]  }
  0x61   : > { %3126 = vmatprep.mubr.msk.bf16.mxu0 %vm1010_vm0, %v3839_v38  ;;  %3158 = vmatprep.mubr.msk.bf16.mxu1 %vm1010_vm0, %v3841_v39  ;;  %v3934_v37 = vld [vmem:[%s4032_s27 + $0x360] ss:$8 sps:$4 sm:$0xff]   ;;  %v3935_v38 = vld [vmem:[%s4032_s27 + $0x174] ss:$8 sps:$4 sm:$0xff]  }
  0x62   : > { %v3937_v39 = vld [vmem:[%s4032_s27 + $0x374] ss:$8 sps:$4 sm:$0xff]  }
  0x68   : > { %1292 = vmatmul.mubr.bf16.gmra.mxu0 %v3843_v40  ;;  %1548 = vmatmul.mubr.bf16.gmra.mxu1 %v3844_v41  ;;  %v3939_v40 = vld [vmem:[%s4032_s27 + $0x170] ss:$8 sps:$4 sm:$0xff]  }
  0x69   : > { %3127 = vmatprep.mubr.msk.bf16.mxu0 %vm1010_vm0, %v3845_v42  ;;  %3159 = vmatprep.mubr.msk.bf16.mxu1 %vm1010_vm0, %v3847_v43  ;;  %v3940_v41 = vld [vmem:[%s4032_s27 + $0x370] ss:$8 sps:$4 sm:$0xff]   ;;  %v3941_v42 = vld [vmem:[%s4032_s27 + $0x184] ss:$8 sps:$4 sm:$0xff]  }
  0x6a   : > { %v3943_v43 = vld [vmem:[%s4032_s27 + $0x384] ss:$8 sps:$4 sm:$0xff]  }
  0x70   : > { %1300 = vmatmul.mubr.bf16.gmra.mxu0 %v3849_v44  ;;  %1556 = vmatmul.mubr.bf16.gmra.mxu1 %v3850_v45  ;;  %v275_v44 = vld [vmem:[%s4032_s27 + $0x180] sm:$0xff]  ;;  %v276_v45 = vld [vmem:[%s4032_s27 + $0x188] sm:$0xff] }
  0x71   : > { %3128 = vmatprep.mubr.msk.bf16.mxu0 %vm1010_vm0, %v3851_v46  ;;  %3160 = vmatprep.mubr.msk.bf16.mxu1 %vm1010_vm0, %v3853_v47  ;;  %v339_v46 = vld [vmem:[%s4032_s27 + $0x380] sm:$0xff]  ;;  %v340_v47 = vld [vmem:[%s4032_s27 + $0x388] sm:$0xff] }
  0x78   : > { %1308 = vmatmul.mubr.bf16.gmra.mxu0 %v3855_v48  ;;  %1564 = vmatmul.mubr.bf16.gmra.mxu1 %v3856_v49  ;;  %v3443_v48 = vld [vmem:[%s4210_s18] sm:$0xff]   ;;  %v3030_v49 = vcombine.low %v275_v44, %v276_v45  ;;  %v4263_v45 = vld [vmem:[%s4210_s18 + $0x10] sm:$0xff]  }
  0x79   : > { %3129 = vmatprep.mubr.msk.bf16.mxu0 %vm1010_vm0, %v3857_v50  ;;  %3161 = vmatprep.mubr.msk.bf16.mxu1 %vm1010_vm0, %v3859_v51  ;;  %v3729_v50 = vld [vmem:[%s4210_s18 + $0x100] sm:$0xff]   ;;  %v3094_v51 = vcombine.low %v339_v46, %v340_v47  ;;  %v4266_v46 = vld [vmem:[%s4210_s18 + $0x110] sm:$0xff]  }
  0x80   : > { %1316 = vmatmul.mubr.bf16.gmra.mxu0 %v3861_v52  ;;  %1572 = vmatmul.mubr.bf16.gmra.mxu1 %v3862_v53  ;;  %v3945_v52 = vld [vmem:[%s4032_s27 + $0x194] ss:$8 sps:$4 sm:$0xff]  }
  0x81   : > { %3130 = vmatprep.mubr.msk.bf16.mxu0 %vm1010_vm0, %v3863_v54  ;;  %3162 = vmatprep.mubr.msk.bf16.mxu1 %vm1010_vm0, %v3865_v55  ;;  %v3947_v53 = vld [vmem:[%s4032_s27 + $0x394] ss:$8 sps:$4 sm:$0xff]   ;;  %v4219_v54 = vld [vmem:[%s4791_s2] ss:$0 sm:$0xff]  ;;  %v3444_v55 = vunpack.c.l.bf16 %v3443_v48 }
  0x88   : > { %1324 = vmatmul.mubr.bf16.gmra.mxu0 %v3867_v56  ;;  %1580 = vmatmul.mubr.bf16.gmra.mxu1 %v3868_v57  ;;  %v3572_v56 = vunpack.c.l.bf16 %v3729_v50 }
  0x89   : > { %3131 = vmatprep.mubr.msk.bf16.mxu0 %vm1010_vm0, %v3869_v58  ;;  %3163 = vmatprep.mubr.msk.bf16.mxu1 %vm1010_vm0, %v3871_v59  ;;  %v277_v59 = vld [vmem:[%s4032_s27 + $0x190] sm:$0xff] }
  0x90   : > { %1332 = vmatmul.mubr.bf16.gmra.mxu0 %v3873_v60  ;;  %1588 = vmatmul.mubr.bf16.gmra.mxu1 %v3874_v61 }
  0x91   : > { %3132 = vmatprep.mubr.msk.bf16.mxu0 %vm1010_vm0, %v3875_v62  ;;  %3164 = vmatprep.mubr.msk.bf16.mxu1 %vm1010_vm0, %v3877_v63  ;;  %v278_v62 = vld [vmem:[%s4032_s27 + $0x198] sm:$0xff]  ;;  %v341_v63 = vld [vmem:[%s4032_s27 + $0x390] sm:$0xff] }
  0x98   : > { %1340 = vmatmul.mubr.bf16.gmra.mxu0 %v3879_v0  ;;  %1596 = vmatmul.mubr.bf16.gmra.mxu1 %v3880_v1  ;;  %v342_v0 = vld [vmem:[%s4032_s27 + $0x398] sm:$0xff] }
  0x99   : > { %3133 = vmatprep.mubr.msk.bf16.mxu0 %vm1010_vm0, %v3881_v2  ;;  %3165 = vmatprep.mubr.msk.bf16.mxu1 %vm1010_vm0, %v3883_v3 }
  0xa0   : > { %1348 = vmatmul.mubr.bf16.gmra.mxu0 %v3885_v4  ;;  %1604 = vmatmul.mubr.bf16.gmra.mxu1 %v3886_v5  ;;  %v3445_v5 = vunpack.c.h.bf16 %v3443_v48 }
  0xa1   : > { %3134 = vmatprep.mubr.msk.bf16.mxu0 %vm1010_vm0, %v3887_v6  ;;  %3166 = vmatprep.mubr.msk.bf16.mxu1 %vm1010_vm0, %v3889_v7  ;;  %v3573_v6 = vunpack.c.h.bf16 %v3729_v50  ;;  %v4230_v7 = vld [vmem:[%s4210_s18 + $0x8] sm:$0xff]  }
  0xa8   : > { %1356 = vmatmul.mubr.bf16.gmra.mxu0 %v3891_v8  ;;  %1612 = vmatmul.mubr.bf16.gmra.mxu1 %v3892_v9  ;;  %v4233_v8 = vld [vmem:[%s4210_s18 + $0x108] sm:$0xff]  }
  0xa9   : > { %3135 = vmatprep.mubr.msk.bf16.mxu0 %vm1010_vm0, %v3893_v10  ;;  %3167 = vmatprep.mubr.msk.bf16.mxu1 %vm1010_vm0, %v3895_v11  ;;  %v3032_v11 = vcombine.low %v277_v59, %v278_v62 }
  0xb0   : > { %1364 = vmatmul.mubr.bf16.gmra.mxu0 %v3897_v12  ;;  %1620 = vmatmul.mubr.bf16.gmra.mxu1 %v3898_v13  ;;  %v3096_v12 = vcombine.low %v341_v63, %v342_v0 }
  0xb1   : > { %3136 = vmatprep.mubr.msk.bf16.mxu0 %vm1010_vm0, %v3899_v14  ;;  %3168 = vmatprep.mubr.msk.bf16.mxu1 %vm1010_vm0, %v3901_v15 }
  0xb8   : > { %1372 = vmatmul.mubr.bf16.gmra.mxu0 %v3903_v16  ;;  %1628 = vmatmul.mubr.bf16.gmra.mxu1 %v3904_v17  ;;  %v3949_v17 = vld [vmem:[%s4032_s27 + $0x1a4] ss:$8 sps:$4 sm:$0xff]  }
  0xb9   : > { %3137 = vmatprep.mubr.msk.bf16.mxu0 %vm1010_vm0, %v3905_v18  ;;  %3169 = vmatprep.mubr.msk.bf16.mxu1 %vm1010_vm0, %v3907_v19  ;;  %v3951_v18 = vld [vmem:[%s4032_s27 + $0x3a4] ss:$8 sps:$4 sm:$0xff]  }
  0xc0   : > { %1380 = vmatmul.mubr.bf16.gmra.mxu0 %v3909_v20  ;;  %1636 = vmatmul.mubr.bf16.gmra.mxu1 %v3910_v21  ;;  %v3448_v21 = vunpack.c.l.bf16 %v4230_v7 }
  0xc1   : > { %3138 = vmatprep.mubr.msk.bf16.mxu0 %vm1010_vm0, %v3911_v22  ;;  %3170 = vmatprep.mubr.msk.bf16.mxu1 %vm1010_vm0, %v3913_v23  ;;  %v3576_v22 = vunpack.c.l.bf16 %v4233_v8 }
  0xc8   : > { %1388 = vmatmul.mubr.bf16.gmra.mxu0 %v3915_v24  ;;  %1644 = vmatmul.mubr.bf16.gmra.mxu1 %v3916_v25 }
  0xc9   : > { %3139 = vmatprep.mubr.msk.bf16.mxu0 %vm1010_vm0, %v3917_v26  ;;  %3171 = vmatprep.mubr.msk.bf16.mxu1 %vm1010_vm0, %v3919_v27 }
  0xd0   : > { %1396 = vmatmul.mubr.bf16.gmra.mxu0 %v3921_v28  ;;  %1652 = vmatmul.mubr.bf16.gmra.mxu1 %v3922_v29  ;;  %v279_v29 = vld [vmem:[%s4032_s27 + $0x1a0] sm:$0xff] }
  0xd1   : > { %3140 = vmatprep.mubr.msk.bf16.mxu0 %vm1010_vm0, %v3923_v30  ;;  %3172 = vmatprep.mubr.msk.bf16.mxu1 %vm1010_vm0, %v3925_v31 }
  0xd8   : > { %1404 = vmatmul.mubr.bf16.gmra.mxu0 %v3927_v32  ;;  %1660 = vmatmul.mubr.bf16.gmra.mxu1 %v3928_v33 }
  0xd9   : > { %3141 = vmatprep.mubr.msk.bf16.mxu0 %vm1010_vm0, %v3929_v34  ;;  %3173 = vmatprep.mubr.msk.bf16.mxu1 %vm1010_vm0, %v3931_v35  ;;  %v280_v34 = vld [vmem:[%s4032_s27 + $0x1a8] sm:$0xff]  ;;  %v343_v35 = vld [vmem:[%s4032_s27 + $0x3a0] sm:$0xff] }
  0xe0   : > { %1412 = vmatmul.mubr.bf16.gmra.mxu0 %v3933_v36  ;;  %1668 = vmatmul.mubr.bf16.gmra.mxu1 %v3934_v37  ;;  %v344_v36 = vld [vmem:[%s4032_s27 + $0x3a8] sm:$0xff] }
  0xe1   : > { %3142 = vmatprep.mubr.msk.bf16.mxu0 %vm1010_vm0, %v3935_v38  ;;  %3174 = vmatprep.mubr.msk.bf16.mxu1 %vm1010_vm0, %v3937_v39  ;;  %v3449_v39 = vunpack.c.h.bf16 %v4230_v7  ;;  %v3098_v50 = vcombine.low %v343_v35, %v344_v36 }
  0xe8   : > { %1420 = vmatmul.mubr.bf16.gmra.mxu0 %v3939_v40  ;;  %1676 = vmatmul.mubr.bf16.gmra.mxu1 %v3940_v41  ;;  %v3577_v40 = vunpack.c.h.bf16 %v4233_v8 }
  0xe9   : > { %3143 = vmatprep.mubr.msk.bf16.mxu0 %vm1010_vm0, %v3941_v42  ;;  %3175 = vmatprep.mubr.msk.bf16.mxu1 %vm1010_vm0, %v3943_v43 }
  0xf0   : > { %v1237_v57 = vpop.f32.mrf.mxu0  ;;  %1428 = vmatmul.mubr.bf16.gmra.mxu0 %v3030_v49  ;;  %v1493_v58 = vpop.f32.mrf.mxu1  ;;  %1684 = vmatmul.mubr.bf16.gmra.mxu1 %v3094_v51  ;;  %v3034_v49 = vcombine.low %v279_v29, %v280_v34 }
  0xf1   : > { %v1238_v60 = vadd.f32 %v4219_v54, %v1237_v57  ;;  %v1494_v61 = vadd.f32 %v4219_v54, %v1493_v58  ;;  %3144 = vmatprep.mubr.msk.bf16.mxu0 %vm1010_vm0, %v3945_v52  ;;  %3176 = vmatprep.mubr.msk.bf16.mxu1 %vm1010_vm0, %v3947_v53  ;;  %v3955_v57 = vld [vmem:[%s4032_s27 + $0x3b4] ss:$8 sps:$4 sm:$0xff]  }
  0xf2   : > { %v1239_v1 = vpop.f32.mrf.mxu0  ;;  %v1495_v2 = vpop.f32.mrf.mxu1 }
  0xf3   : > { %v2004_v3 = vadd.f32 %v3444_v55, %v1238_v60  ;;  %v2068_v4 = vadd.f32 %v3572_v56, %v1494_v61  ;;  %v3953_v56 = vld [vmem:[%s4032_s27 + $0x1b4] ss:$8 sps:$4 sm:$0xff]   ;;  %v3452_v60 = vunpack.c.l.bf16 %v4263_v45  ;;  %v3580_v61 = vunpack.c.l.bf16 %v4266_v46 }
  0xf4   : > { %v1240_v9 = vpop.f32.mrf.mxu0  ;;  %v1496_v10 = vpop.f32.mrf.mxu1 }
  0xf5   : > { %v2132_v13 = vmax.f32 %v2004_v3, 0.0  ;;  %v2196_v14 = vmax.f32 %v2068_v4, 0.0  ;;  %v1241_v15 = vadd.f32 %v4219_v54, %v1240_v9  ;;  %v1497_v16 = vadd.f32 %v4219_v54, %v1496_v10  ;;  %v281_v4 = vld [vmem:[%s4032_s27 + $0x1b0] sm:$0xff]  ;;  %v282_v9 = vld [vmem:[%s4032_s27 + $0x1b8] sm:$0xff] }
  0xf6   : > { %v1242_v19 = vpop.f32.mrf.mxu0  ;;  %v1498_v20 = vpop.f32.mrf.mxu1  ;;  %v345_v10 = vld [vmem:[%s4032_s27 + $0x3b0] sm:$0xff] }
  0xf7   : > { %v3314_v23 = vpack.c.bf16 %v2132_v13, %v2132_v13  ;;  %v3378_v24 = vpack.c.bf16 %v2196_v14, %v2196_v14  ;;  %v2005_v25 = vadd.f32 %v3445_v5, %v1241_v15  ;;  %v2069_v26 = vadd.f32 %v3573_v6, %v1497_v16  ;;  %v4293_v20 = vld [vmem:[%s4210_s18 + $0x18] sm:$0xff]  }
  0xf8   : > { %v1245_v27 = vpop.f32.mrf.mxu0  ;;  %1436 = vmatmul.mubr.bf16.gmra.mxu0 %v3032_v11  ;;  %v1501_v28 = vpop.f32.mrf.mxu1  ;;  %1692 = vmatmul.mubr.bf16.gmra.mxu1 %v3096_v12  ;;  %v346_v11 = vld [vmem:[%s4032_s27 + $0x3b8] sm:$0xff]  ;;  %v3453_v14 = vunpack.c.h.bf16 %v4263_v45  ;;  %v3581_v15 = vunpack.c.h.bf16 %v4266_v46  ;;  %v3456_v34 = vunpack.c.l.bf16 %v4293_v20 }
  0xf9   : > { %2773 = vst.msk [vmem:[%s4244_s24] sm:$0xf] %vm2772_vm1, %v3314_v23  ;;  %2837 = vst.msk [vmem:[%s4244_s24 + $0x100] sm:$0xf] %vm2772_vm1, %v3378_v24  ;;  %v2133_v30 = vmax.f32 %v2005_v25, 0.0  ;;  %v2197_v31 = vmax.f32 %v2069_v26, 0.0  ;;  %v1246_v32 = vadd.f32 %v4219_v54, %v1245_v27  ;;  %v1502_v33 = vadd.f32 %v4219_v54, %v1501_v28  ;;  %3145 = vmatprep.mubr.msk.bf16.mxu0 %vm1010_vm0, %v3949_v17 }
  0xfa   : > { %3177 = vmatprep.mubr.msk.bf16.mxu1 %vm1010_vm0, %v3951_v18  ;;  %v1247_v37 = vpop.f32.mrf.mxu0  ;;  %v1503_v38 = vpop.f32.mrf.mxu1  ;;  %v3036_v24 = vcombine.low %v281_v4, %v282_v9  ;;  %v3100_v25 = vcombine.low %v345_v10, %v346_v11 }
  0xfb   : > { %v3315_v41 = vpack.c.bf16 %v2133_v30, %v2133_v30  ;;  %v3379_v42 = vpack.c.bf16 %v2197_v31, %v2197_v31  ;;  %v2006_v43 = vadd.f32 %v3448_v21, %v1246_v32  ;;  %v2070_v44 = vadd.f32 %v3576_v22, %v1502_v33  ;;  %v4296_v21 = vld [vmem:[%s4210_s18 + $0x118] sm:$0xff]   ;;  %v3957_v30 = vld [vmem:[%s4032_s27 + $0x1c4] ss:$8 sps:$4 sm:$0xff]  }
  0xfc   : > { %v1248_v47 = vpop.f32.mrf.mxu0  ;;  %v1504_v48 = vpop.f32.mrf.mxu1  ;;  %v3959_v31 = vld [vmem:[%s4032_s27 + $0x3c4] ss:$8 sps:$4 sm:$0xff]   ;;  %v3584_v35 = vunpack.c.l.bf16 %v4296_v21 }
  0xfd   : > { %2774 = vst.msk [vmem:[%s4244_s24 + $0x4] sm:$0xf] %vm2772_vm1, %v3315_v41  ;;  %2838 = vst.msk [vmem:[%s4244_s24 + $0x104] sm:$0xf] %vm2772_vm1, %v3379_v42  ;;  %v2134_v51 = vmax.f32 %v2006_v43, 0.0  ;;  %v2198_v52 = vmax.f32 %v2070_v44, 0.0  ;;  %v1249_v53 = vadd.f32 %v4219_v54, %v1248_v47  ;;  %v1505_v55 = vadd.f32 %v4219_v54, %v1504_v48 }
  0xfe   : > { %v1250_v58 = vpop.f32.mrf.mxu0  ;;  %v1506_v59 = vpop.f32.mrf.mxu1  ;;  %v283_v42 = vld [vmem:[%s4032_s27 + $0x1c0] sm:$0xff]  ;;  %v284_v47 = vld [vmem:[%s4032_s27 + $0x1c8] sm:$0xff] }
  0xff   : > { %v3316_v62 = vpack.c.bf16 %v2134_v51, %v2134_v51  ;;  %v3380_v63 = vpack.c.bf16 %v2198_v52, %v2198_v52  ;;  %v2007_v0 = vadd.f32 %v3449_v39, %v1249_v53  ;;  %v2071_v1 = vadd.f32 %v3577_v40, %v1505_v55  ;;  %v347_v48 = vld [vmem:[%s4032_s27 + $0x3c0] sm:$0xff] }
 0x100   : > { %v1253_v2 = vpop.f32.mrf.mxu0  ;;  %1444 = vmatmul.mubr.bf16.gmra.mxu0 %v3034_v49  ;;  %v1509_v3 = vpop.f32.mrf.mxu1  ;;  %1700 = vmatmul.mubr.bf16.gmra.mxu1 %v3098_v50  ;;  %v348_v49 = vld [vmem:[%s4032_s27 + $0x3c8] sm:$0xff]  ;;  %v3457_v52 = vunpack.c.h.bf16 %v4293_v20  ;;  %v3585_v53 = vunpack.c.h.bf16 %v4296_v21  ;;  %v4323_v59 = vld [vmem:[%s4210_s18 + $0x20] sm:$0xff]  }
 0x101   : > { %2775 = vst.msk [vmem:[%s4244_s24 + $0x8] sm:$0xf] %vm2772_vm1, %v3316_v62  ;;  %2839 = vst.msk [vmem:[%s4244_s24 + $0x108] sm:$0xf] %vm2772_vm1, %v3380_v63  ;;  %v2135_v5 = vmax.f32 %v2007_v0, 0.0  ;;  %v2199_v6 = vmax.f32 %v2071_v1, 0.0  ;;  %v1254_v7 = vadd.f32 %v4219_v54, %v1253_v2  ;;  %v1510_v8 = vadd.f32 %v4219_v54, %v1509_v3  ;;  %3146 = vmatprep.mubr.msk.bf16.mxu0 %vm1010_vm0, %v3953_v56 }
 0x102   : > { %3178 = vmatprep.mubr.msk.bf16.mxu1 %vm1010_vm0, %v3955_v57  ;;  %v1255_v12 = vpop.f32.mrf.mxu0  ;;  %v1511_v13 = vpop.f32.mrf.mxu1  ;;  %v3038_v63 = vcombine.low %v283_v42, %v284_v47  ;;  %v3102_v0 = vcombine.low %v347_v48, %v348_v49  ;;  %v3460_v9 = vunpack.c.l.bf16 %v4323_v59 }
 0x103   : > { %v3317_v16 = vpack.c.bf16 %v2135_v5, %v2135_v5  ;;  %v3381_v17 = vpack.c.bf16 %v2199_v6, %v2199_v6  ;;  %v2008_v18 = vadd.f32 %v3452_v60, %v1254_v7  ;;  %v2072_v19 = vadd.f32 %v3580_v61, %v1510_v8  ;;  %v4326_v60 = vld [vmem:[%s4210_s18 + $0x120] sm:$0xff]   ;;  %v3961_v5 = vld [vmem:[%s4032_s27 + $0x1d4] ss:$8 sps:$4 sm:$0xff]  }
 0x104   : > { %v1256_v22 = vpop.f32.mrf.mxu0  ;;  %v1512_v23 = vpop.f32.mrf.mxu1  ;;  %v3963_v6 = vld [vmem:[%s4032_s27 + $0x3d4] ss:$8 sps:$4 sm:$0xff]   ;;  %v3588_v10 = vunpack.c.l.bf16 %v4326_v60 }
 0x105   : > { %2776 = vst.msk [vmem:[%s4244_s24 + $0xc] sm:$0xf] %vm2772_vm1, %v3317_v16  ;;  %2840 = vst.msk [vmem:[%s4244_s24 + $0x10c] sm:$0xf] %vm2772_vm1, %v3381_v17  ;;  %v2136_v26 = vmax.f32 %v2008_v18, 0.0  ;;  %v2200_v27 = vmax.f32 %v2072_v19, 0.0  ;;  %v1257_v28 = vadd.f32 %v4219_v54, %v1256_v22  ;;  %v1513_v29 = vadd.f32 %v4219_v54, %v1512_v23 }
 0x106   : > { %v1258_v32 = vpop.f32.mrf.mxu0  ;;  %v1514_v33 = vpop.f32.mrf.mxu1  ;;  %v285_v17 = vld [vmem:[%s4032_s27 + $0x1d0] sm:$0xff]  ;;  %v286_v22 = vld [vmem:[%s4032_s27 + $0x1d8] sm:$0xff] }
 0x107   : > { %v3318_v36 = vpack.c.bf16 %v2136_v26, %v2136_v26  ;;  %v3382_v37 = vpack.c.bf16 %v2200_v27, %v2200_v27  ;;  %v2009_v38 = vadd.f32 %v3453_v14, %v1257_v28  ;;  %v2073_v39 = vadd.f32 %v3581_v15, %v1513_v29  ;;  %v349_v23 = vld [vmem:[%s4032_s27 + $0x3d0] sm:$0xff]  ;;  %v4353_v33 = vld [vmem:[%s4210_s18 + $0x28] sm:$0xff]  }
 0x108   : > { %v1261_v40 = vpop.f32.mrf.mxu0  ;;  %1452 = vmatmul.mubr.bf16.gmra.mxu0 %v3036_v24  ;;  %v1517_v41 = vpop.f32.mrf.mxu1  ;;  %1708 = vmatmul.mubr.bf16.gmra.mxu1 %v3100_v25  ;;  %v350_v24 = vld [vmem:[%s4032_s27 + $0x3d8] sm:$0xff]  ;;  %v3461_v27 = vunpack.c.h.bf16 %v4323_v59  ;;  %v3589_v28 = vunpack.c.h.bf16 %v4326_v60  ;;  %v3464_v47 = vunpack.c.l.bf16 %v4353_v33 }
 0x109   : > { %2777 = vst.msk [vmem:[%s4244_s24 + $0x10] sm:$0xf] %vm2772_vm1, %v3318_v36  ;;  %2841 = vst.msk [vmem:[%s4244_s24 + $0x110] sm:$0xf] %vm2772_vm1, %v3382_v37  ;;  %v2137_v43 = vmax.f32 %v2009_v38, 0.0  ;;  %v2201_v44 = vmax.f32 %v2073_v39, 0.0  ;;  %v1262_v45 = vadd.f32 %v4219_v54, %v1261_v40  ;;  %v1518_v46 = vadd.f32 %v4219_v54, %v1517_v41  ;;  %3147 = vmatprep.mubr.msk.bf16.mxu0 %vm1010_vm0, %v3957_v30 }
 0x10a   : > { %3179 = vmatprep.mubr.msk.bf16.mxu1 %vm1010_vm0, %v3959_v31  ;;  %v1263_v50 = vpop.f32.mrf.mxu0  ;;  %v1519_v51 = vpop.f32.mrf.mxu1  ;;  %v3040_v37 = vcombine.low %v285_v17, %v286_v22  ;;  %v3104_v38 = vcombine.low %v349_v23, %v350_v24 }
 0x10b   : > { %v3319_v55 = vpack.c.bf16 %v2137_v43, %v2137_v43  ;;  %v3383_v56 = vpack.c.bf16 %v2201_v44, %v2201_v44  ;;  %v2010_v57 = vadd.f32 %v3456_v34, %v1262_v45  ;;  %v2074_v58 = vadd.f32 %v3584_v35, %v1518_v46  ;;  %v4356_v34 = vld [vmem:[%s4210_s18 + $0x128] sm:$0xff]  }
 0x10c   : > { %v1264_v61 = vpop.f32.mrf.mxu0  ;;  %v1520_v62 = vpop.f32.mrf.mxu1  ;;  %v3965_v43 = vld [vmem:[%s4032_s27 + $0x1e4] ss:$8 sps:$4 sm:$0xff]   ;;  %v3592_v48 = vunpack.c.l.bf16 %v4356_v34 }
 0x10d   : > { %2778 = vst.msk [vmem:[%s4244_s24 + $0x14] sm:$0xf] %vm2772_vm1, %v3319_v55  ;;  %2842 = vst.msk [vmem:[%s4244_s24 + $0x114] sm:$0xf] %vm2772_vm1, %v3383_v56  ;;  %v2138_v1 = vmax.f32 %v2010_v57, 0.0  ;;  %v2202_v2 = vmax.f32 %v2074_v58, 0.0  ;;  %v1265_v3 = vadd.f32 %v4219_v54, %v1264_v61  ;;  %v1521_v4 = vadd.f32 %v4219_v54, %v1520_v62 }
 0x10e   : > { %v1266_v7 = vpop.f32.mrf.mxu0  ;;  %v1522_v8 = vpop.f32.mrf.mxu1  ;;  %v3967_v44 = vld [vmem:[%s4032_s27 + $0x3e4] ss:$8 sps:$4 sm:$0xff]  }
 0x10f   : > { %v3320_v11 = vpack.c.bf16 %v2138_v1, %v2138_v1  ;;  %v3384_v12 = vpack.c.bf16 %v2202_v2, %v2202_v2  ;;  %v2011_v13 = vadd.f32 %v3457_v52, %v1265_v3  ;;  %v2075_v14 = vadd.f32 %v3585_v53, %v1521_v4  ;;  %v287_v56 = vld [vmem:[%s4032_s27 + $0x1e0] sm:$0xff]  ;;  %v288_v61 = vld [vmem:[%s4032_s27 + $0x1e8] sm:$0xff]  ;;  %v4383_v8 = vld [vmem:[%s4210_s18 + $0x30] sm:$0xff]  }
 0x110   : > { %v1269_v15 = vpop.f32.mrf.mxu0  ;;  %1460 = vmatmul.mubr.bf16.gmra.mxu0 %v3038_v63  ;;  %v1525_v16 = vpop.f32.mrf.mxu1  ;;  %1716 = vmatmul.mubr.bf16.gmra.mxu1 %v3102_v0  ;;  %v351_v62 = vld [vmem:[%s4032_s27 + $0x3e0] sm:$0xff]  ;;  %v352_v63 = vld [vmem:[%s4032_s27 + $0x3e8] sm:$0xff]  ;;  %v3465_v2 = vunpack.c.h.bf16 %v4353_v33  ;;  %v3593_v3 = vunpack.c.h.bf16 %v4356_v34  ;;  %v3468_v22 = vunpack.c.l.bf16 %v4383_v8 }
 0x111   : > { %2779 = vst.msk [vmem:[%s4244_s24 + $0x18] sm:$0xf] %vm2772_vm1, %v3320_v11  ;;  %2843 = vst.msk [vmem:[%s4244_s24 + $0x118] sm:$0xf] %vm2772_vm1, %v3384_v12  ;;  %v2139_v18 = vmax.f32 %v2011_v13, 0.0  ;;  %v2203_v19 = vmax.f32 %v2075_v14, 0.0  ;;  %v1270_v20 = vadd.f32 %v4219_v54, %v1269_v15  ;;  %v1526_v21 = vadd.f32 %v4219_v54, %v1525_v16  ;;  %3148 = vmatprep.mubr.msk.bf16.mxu0 %vm1010_vm0, %v3961_v5 }
 0x112   : > { %3180 = vmatprep.mubr.msk.bf16.mxu1 %vm1010_vm0, %v3963_v6  ;;  %v1271_v25 = vpop.f32.mrf.mxu0  ;;  %v1527_v26 = vpop.f32.mrf.mxu1  ;;  %v3042_v12 = vcombine.low %v287_v56, %v288_v61  ;;  %v3106_v13 = vcombine.low %v351_v62, %v352_v63 }
 0x113   : > { %v3321_v29 = vpack.c.bf16 %v2139_v18, %v2139_v18  ;;  %v3385_v30 = vpack.c.bf16 %v2203_v19, %v2203_v19  ;;  %v2012_v31 = vadd.f32 %v3460_v9, %v1270_v20  ;;  %v2076_v32 = vadd.f32 %v3588_v10, %v1526_v21  ;;  %v4386_v9 = vld [vmem:[%s4210_s18 + $0x130] sm:$0xff]  }
 0x114   : > { %v1272_v35 = vpop.f32.mrf.mxu0  ;;  %v1528_v36 = vpop.f32.mrf.mxu1  ;;  %v3969_v18 = vld [vmem:[%s4032_s27 + $0x1f4] ss:$8 sps:$4 sm:$0xff]   ;;  %v3596_v23 = vunpack.c.l.bf16 %v4386_v9 }
 0x115   : > { %2780 = vst.msk [vmem:[%s4244_s24 + $0x1c] sm:$0xf] %vm2772_vm1, %v3321_v29  ;;  %2844 = vst.msk [vmem:[%s4244_s24 + $0x11c] sm:$0xf] %vm2772_vm1, %v3385_v30  ;;  %v2140_v39 = vmax.f32 %v2012_v31, 0.0  ;;  %v2204_v40 = vmax.f32 %v2076_v32, 0.0  ;;  %v1273_v41 = vadd.f32 %v4219_v54, %v1272_v35  ;;  %v1529_v42 = vadd.f32 %v4219_v54, %v1528_v36 }
 0x116   : > { %v1274_v45 = vpop.f32.mrf.mxu0  ;;  %v1530_v46 = vpop.f32.mrf.mxu1  ;;  %v3971_v19 = vld [vmem:[%s4032_s27 + $0x3f4] ss:$8 sps:$4 sm:$0xff]  }
 0x117   : > { %v3322_v49 = vpack.c.bf16 %v2140_v39, %v2140_v39  ;;  %v3386_v50 = vpack.c.bf16 %v2204_v40, %v2204_v40  ;;  %v2013_v51 = vadd.f32 %v3461_v27, %v1273_v41  ;;  %v2077_v52 = vadd.f32 %v3589_v28, %v1529_v42  ;;  %v289_v30 = vld [vmem:[%s4032_s27 + $0x1f0] sm:$0xff]  ;;  %v290_v35 = vld [vmem:[%s4032_s27 + $0x1f8] sm:$0xff] }
 0x118   : > { %v1277_v53 = vpop.f32.mrf.mxu0  ;;  %1468 = vmatmul.mubr.bf16.gmra.mxu0 %v3040_v37  ;;  %v1533_v55 = vpop.f32.mrf.mxu1  ;;  %1724 = vmatmul.mubr.bf16.gmra.mxu1 %v3104_v38  ;;  %v353_v36 = vld [vmem:[%s4032_s27 + $0x3f0] sm:$0xff]  ;;  %v354_v37 = vld [vmem:[%s4032_s27 + $0x3f8] sm:$0xff]  ;;  %v3469_v40 = vunpack.c.h.bf16 %v4383_v8  ;;  %v3597_v41 = vunpack.c.h.bf16 %v4386_v9 }
 0x119   : > { %2781 = vst.msk [vmem:[%s4244_s24 + $0x20] sm:$0xf] %vm2772_vm1, %v3322_v49  ;;  %2845 = vst.msk [vmem:[%s4244_s24 + $0x120] sm:$0xf] %vm2772_vm1, %v3386_v50  ;;  %v2141_v57 = vmax.f32 %v2013_v51, 0.0  ;;  %v2205_v58 = vmax.f32 %v2077_v52, 0.0  ;;  %v1278_v59 = vadd.f32 %v4219_v54, %v1277_v53  ;;  %v1534_v60 = vadd.f32 %v4219_v54, %v1533_v55  ;;  %3149 = vmatprep.mubr.msk.bf16.mxu0 %vm1010_vm0, %v3965_v43 }
 0x11a   : > { %3181 = vmatprep.mubr.msk.bf16.mxu1 %vm1010_vm0, %v3967_v44  ;;  %v1279_v0 = vpop.f32.mrf.mxu0  ;;  %v1535_v1 = vpop.f32.mrf.mxu1  ;;  %v3704_v46 = vld [vmem:[%s4210_s18 + $0x38] sm:$0xff]   ;;  %v3044_v50 = vcombine.low %v289_v30, %v290_v35  ;;  %v3108_v51 = vcombine.low %v353_v36, %v354_v37 }
 0x11b   : > { %v3323_v4 = vpack.c.bf16 %v2141_v57, %v2141_v57  ;;  %v3387_v5 = vpack.c.bf16 %v2205_v58, %v2205_v58  ;;  %v2014_v6 = vadd.f32 %v3464_v47, %v1278_v59  ;;  %v2078_v7 = vadd.f32 %v3592_v48, %v1534_v60  ;;  %v3736_v47 = vld [vmem:[%s4210_s18 + $0x138] sm:$0xff]  }
 0x11c   : > { %v1280_v10 = vpop.f32.mrf.mxu0  ;;  %v1536_v11 = vpop.f32.mrf.mxu1  ;;  %v3472_v59 = vunpack.c.l.bf16 %v3704_v46  ;;  %v3600_v60 = vunpack.c.l.bf16 %v3736_v47  ;;  %v3473_v9 = vunpack.c.h.bf16 %v3704_v46  ;;  %v3738_v46 = vld [vmem:[%s4210_s18 + $0x148] sm:$0xff]  }
 0x11d   : > { %2782 = vst.msk [vmem:[%s4244_s24 + $0x24] sm:$0xf] %vm2772_vm1, %v3323_v4  ;;  %2846 = vst.msk [vmem:[%s4244_s24 + $0x124] sm:$0xf] %vm2772_vm1, %v3387_v5  ;;  %v2142_v14 = vmax.f32 %v2014_v6, 0.0  ;;  %v2206_v15 = vmax.f32 %v2078_v7, 0.0  ;;  %v1281_v16 = vadd.f32 %v4219_v54, %v1280_v10  ;;  %v1537_v17 = vadd.f32 %v4219_v54, %v1536_v11 }
 0x11e   : > { %v1282_v20 = vpop.f32.mrf.mxu0  ;;  %v1538_v21 = vpop.f32.mrf.mxu1  ;;  %v3601_v10 = vunpack.c.h.bf16 %v3736_v47 }
 0x11f   : > { %v3324_v24 = vpack.c.bf16 %v2142_v14, %v2142_v14  ;;  %v3388_v25 = vpack.c.bf16 %v2206_v15, %v2206_v15  ;;  %v2015_v26 = vadd.f32 %v3465_v2, %v1281_v16  ;;  %v2079_v27 = vadd.f32 %v3593_v3, %v1537_v17  ;;  %v3705_v15 = vld [vmem:[%s4210_s18 + $0x40] sm:$0xff]  }
 0x120   : > { %v1285_v28 = vpop.f32.mrf.mxu0  ;;  %1476 = vmatmul.mubr.bf16.gmra.mxu0 %v3042_v12  ;;  %v1541_v29 = vpop.f32.mrf.mxu1  ;;  %1732 = vmatmul.mubr.bf16.gmra.mxu1 %v3106_v13  ;;  %v3737_v16 = vld [vmem:[%s4210_s18 + $0x140] sm:$0xff]  }
 0x121   : > { %2783 = vst.msk [vmem:[%s4244_s24 + $0x28] sm:$0xf] %vm2772_vm1, %v3324_v24  ;;  %2847 = vst.msk [vmem:[%s4244_s24 + $0x128] sm:$0xf] %vm2772_vm1, %v3388_v25  ;;  %v2143_v31 = vmax.f32 %v2015_v26, 0.0  ;;  %v2207_v32 = vmax.f32 %v2079_v27, 0.0  ;;  %v1286_v33 = vadd.f32 %v4219_v54, %v1285_v28  ;;  %v1542_v34 = vadd.f32 %v4219_v54, %v1541_v29  ;;  %3150 = vmatprep.mubr.msk.bf16.mxu0 %vm1010_vm0, %v3969_v18 }
 0x122   : > { %3182 = vmatprep.mubr.msk.bf16.mxu1 %vm1010_vm0, %v3971_v19  ;;  %v1287_v38 = vpop.f32.mrf.mxu0  ;;  %v1543_v39 = vpop.f32.mrf.mxu1  ;;  %v3476_v25 = vunpack.c.l.bf16 %v3705_v15  ;;  %v3604_v26 = vunpack.c.l.bf16 %v3737_v16 }
 0x123   : > { %v3325_v42 = vpack.c.bf16 %v2143_v31, %v2143_v31  ;;  %v3389_v43 = vpack.c.bf16 %v2207_v32, %v2207_v32  ;;  %v2016_v44 = vadd.f32 %v3468_v22, %v1286_v33  ;;  %v2080_v45 = vadd.f32 %v3596_v23, %v1542_v34 }
 0x124   : > { %v1288_v48 = vpop.f32.mrf.mxu0  ;;  %v1544_v49 = vpop.f32.mrf.mxu1  ;;  %v3477_v39 = vunpack.c.h.bf16 %v3705_v15 }
 0x125   : > { %2784 = vst.msk [vmem:[%s4244_s24 + $0x2c] sm:$0xf] %vm2772_vm1, %v3325_v42  ;;  %2848 = vst.msk [vmem:[%s4244_s24 + $0x12c] sm:$0xf] %vm2772_vm1, %v3389_v43  ;;  %v2144_v52 = vmax.f32 %v2016_v44, 0.0  ;;  %v2208_v53 = vmax.f32 %v2080_v45, 0.0  ;;  %v1289_v55 = vadd.f32 %v4219_v54, %v1288_v48  ;;  %v1545_v56 = vadd.f32 %v4219_v54, %v1544_v49 }
 0x126   : > { %v1290_v57 = vpop.f32.mrf.mxu0  ;;  %v1546_v58 = vpop.f32.mrf.mxu1  ;;  %v3706_v45 = vld [vmem:[%s4210_s18 + $0x48] sm:$0xff]  }
 0x127   : > { %v3326_v61 = vpack.c.bf16 %v2144_v52, %v2144_v52  ;;  %v3390_v62 = vpack.c.bf16 %v2208_v53, %v2208_v53  ;;  %v2017_v63 = vadd.f32 %v3469_v40, %v1289_v55  ;;  %v2081_v0 = vadd.f32 %v3597_v41, %v1545_v56 }
 0x128   : > { %v1293_v1 = vpop.f32.mrf.mxu0  ;;  %1484 = vmatmul.mubr.bf16.gmra.mxu0 %v3044_v50  ;;  %v1549_v2 = vpop.f32.mrf.mxu1  ;;  %1740 = vmatmul.mubr.bf16.gmra.mxu1 %v3108_v51  ;;  %v3605_v40 = vunpack.c.h.bf16 %v3737_v16  ;;  %v3480_v56 = vunpack.c.l.bf16 %v3706_v45  ;;  %v3608_v57 = vunpack.c.l.bf16 %v3738_v46 }
 0x129   : > { %2785 = vst.msk [vmem:[%s4244_s24 + $0x30] sm:$0xf] %vm2772_vm1, %v3326_v61  ;;  %2849 = vst.msk [vmem:[%s4244_s24 + $0x130] sm:$0xf] %vm2772_vm1, %v3390_v62  ;;  %v2145_v3 = vmax.f32 %v2017_v63, 0.0  ;;  %v2209_v4 = vmax.f32 %v2081_v0, 0.0  ;;  %v1294_v5 = vadd.f32 %v4219_v54, %v1293_v1  ;;  %v1550_v6 = vadd.f32 %v4219_v54, %v1549_v2 }
 0x12a   : > { %v1295_v7 = vpop.f32.mrf.mxu0  ;;  %v1551_v8 = vpop.f32.mrf.mxu1 }
 0x12b   : > { %v3327_v11 = vpack.c.bf16 %v2145_v3, %v2145_v3  ;;  %v3391_v12 = vpack.c.bf16 %v2209_v4, %v2209_v4  ;;  %v2018_v13 = vadd.f32 %v3472_v59, %v1294_v5  ;;  %v2082_v14 = vadd.f32 %v3600_v60, %v1550_v6 }
 0x12c   : > { %v1296_v17 = vpop.f32.mrf.mxu0  ;;  %v1552_v18 = vpop.f32.mrf.mxu1  ;;  %v3481_v6 = vunpack.c.h.bf16 %v3706_v45  ;;  %v3609_v7 = vunpack.c.h.bf16 %v3738_v46 }
 0x12d   : > { %2786 = vst.msk [vmem:[%s4244_s24 + $0x34] sm:$0xf] %vm2772_vm1, %v3327_v11  ;;  %2850 = vst.msk [vmem:[%s4244_s24 + $0x134] sm:$0xf] %vm2772_vm1, %v3391_v12  ;;  %v2146_v19 = vmax.f32 %v2018_v13, 0.0  ;;  %v2210_v20 = vmax.f32 %v2082_v14, 0.0  ;;  %v1297_v21 = vadd.f32 %v4219_v54, %v1296_v17  ;;  %v1553_v22 = vadd.f32 %v4219_v54, %v1552_v18 }
 0x12e   : > { %v1298_v23 = vpop.f32.mrf.mxu0  ;;  %v1554_v24 = vpop.f32.mrf.mxu1  ;;  %v3707_v12 = vld [vmem:[%s4210_s18 + $0x50] sm:$0xff]  }
 0x12f   : > { %v3328_v27 = vpack.c.bf16 %v2146_v19, %v2146_v19  ;;  %v3392_v28 = vpack.c.bf16 %v2210_v20, %v2210_v20  ;;  %v2019_v29 = vadd.f32 %v3473_v9, %v1297_v21  ;;  %v2083_v30 = vadd.f32 %v3601_v10, %v1553_v22  ;;  %v3739_v13 = vld [vmem:[%s4210_s18 + $0x150] sm:$0xff]  }
 0x130   : > { %v1301_v31 = vpop.f32.mrf.mxu0  ;;  %v1557_v32 = vpop.f32.mrf.mxu1  ;;  %v3484_v22 = vunpack.c.l.bf16 %v3707_v12  ;;  %v3612_v23 = vunpack.c.l.bf16 %v3739_v13 }
 0x131   : > { %2787 = vst.msk [vmem:[%s4244_s24 + $0x38] sm:$0xf] %vm2772_vm1, %v3328_v27  ;;  %2851 = vst.msk [vmem:[%s4244_s24 + $0x138] sm:$0xf] %vm2772_vm1, %v3392_v28  ;;  %v2147_v33 = vmax.f32 %v2019_v29, 0.0  ;;  %v2211_v34 = vmax.f32 %v2083_v30, 0.0  ;;  %v1302_v35 = vadd.f32 %v4219_v54, %v1301_v31  ;;  %v1558_v36 = vadd.f32 %v4219_v54, %v1557_v32 }
 0x132   : > { %v1303_v37 = vpop.f32.mrf.mxu0  ;;  %v1559_v38 = vpop.f32.mrf.mxu1 }
 0x133   : > { %v3329_v41 = vpack.c.bf16 %v2147_v33, %v2147_v33  ;;  %v3393_v42 = vpack.c.bf16 %v2211_v34, %v2211_v34  ;;  %v2020_v43 = vadd.f32 %v3476_v25, %v1302_v35  ;;  %v2084_v44 = vadd.f32 %v3604_v26, %v1558_v36 }
 0x134   : > { %v1304_v47 = vpop.f32.mrf.mxu0  ;;  %v1560_v48 = vpop.f32.mrf.mxu1  ;;  %v3485_v36 = vunpack.c.h.bf16 %v3707_v12  ;;  %v3613_v37 = vunpack.c.h.bf16 %v3739_v13 }
 0x135   : > { %2788 = vst.msk [vmem:[%s4244_s24 + $0x3c] sm:$0xf] %vm2772_vm1, %v3329_v41  ;;  %2852 = vst.msk [vmem:[%s4244_s24 + $0x13c] sm:$0xf] %vm2772_vm1, %v3393_v42  ;;  %v2148_v49 = vmax.f32 %v2020_v43, 0.0  ;;  %v2212_v50 = vmax.f32 %v2084_v44, 0.0  ;;  %v1305_v51 = vadd.f32 %v4219_v54, %v1304_v47  ;;  %v1561_v52 = vadd.f32 %v4219_v54, %v1560_v48 }
 0x136   : > { %v1306_v53 = vpop.f32.mrf.mxu0  ;;  %v1562_v55 = vpop.f32.mrf.mxu1  ;;  %v3708_v42 = vld [vmem:[%s4210_s18 + $0x58] sm:$0xff]  }
 0x137   : > { %v3330_v58 = vpack.c.bf16 %v2148_v49, %v2148_v49  ;;  %v3394_v59 = vpack.c.bf16 %v2212_v50, %v2212_v50  ;;  %v2021_v60 = vadd.f32 %v3477_v39, %v1305_v51  ;;  %v2085_v61 = vadd.f32 %v3605_v40, %v1561_v52  ;;  %v3740_v43 = vld [vmem:[%s4210_s18 + $0x158] sm:$0xff]  }
 0x138   : > { %v1309_v62 = vpop.f32.mrf.mxu0  ;;  %v1565_v63 = vpop.f32.mrf.mxu1  ;;  %v3488_v52 = vunpack.c.l.bf16 %v3708_v42  ;;  %v3616_v53 = vunpack.c.l.bf16 %v3740_v43 }
 0x139   : > { %2789 = vst.msk [vmem:[%s4244_s24 + $0x40] sm:$0xf] %vm2772_vm1, %v3330_v58  ;;  %2853 = vst.msk [vmem:[%s4244_s24 + $0x140] sm:$0xf] %vm2772_vm1, %v3394_v59  ;;  %v2149_v0 = vmax.f32 %v2021_v60, 0.0  ;;  %v2213_v1 = vmax.f32 %v2085_v61, 0.0  ;;  %v1310_v2 = vadd.f32 %v4219_v54, %v1309_v62  ;;  %v1566_v3 = vadd.f32 %v4219_v54, %v1565_v63 }
 0x13a   : > { %v1311_v4 = vpop.f32.mrf.mxu0  ;;  %v1567_v5 = vpop.f32.mrf.mxu1 }
 0x13b   : > { %v3331_v8 = vpack.c.bf16 %v2149_v0, %v2149_v0  ;;  %v3395_v9 = vpack.c.bf16 %v2213_v1, %v2213_v1  ;;  %v2022_v10 = vadd.f32 %v3480_v56, %v1310_v2  ;;  %v2086_v11 = vadd.f32 %v3608_v57, %v1566_v3 }
 0x13c   : > { %v1312_v14 = vpop.f32.mrf.mxu0  ;;  %v1568_v15 = vpop.f32.mrf.mxu1  ;;  %v3489_v3 = vunpack.c.h.bf16 %v3708_v42  ;;  %v3617_v4 = vunpack.c.h.bf16 %v3740_v43 }
 0x13d   : > { %2790 = vst.msk [vmem:[%s4244_s24 + $0x44] sm:$0xf] %vm2772_vm1, %v3331_v8  ;;  %2854 = vst.msk [vmem:[%s4244_s24 + $0x144] sm:$0xf] %vm2772_vm1, %v3395_v9  ;;  %v2150_v16 = vmax.f32 %v2022_v10, 0.0  ;;  %v2214_v17 = vmax.f32 %v2086_v11, 0.0  ;;  %v1313_v18 = vadd.f32 %v4219_v54, %v1312_v14  ;;  %v1569_v19 = vadd.f32 %v4219_v54, %v1568_v15 }
 0x13e   : > { %v1314_v20 = vpop.f32.mrf.mxu0  ;;  %v1570_v21 = vpop.f32.mrf.mxu1  ;;  %v3709_v9 = vld [vmem:[%s4210_s18 + $0x60] sm:$0xff]  }
 0x13f   : > { %v3332_v24 = vpack.c.bf16 %v2150_v16, %v2150_v16  ;;  %v3396_v25 = vpack.c.bf16 %v2214_v17, %v2214_v17  ;;  %v2023_v26 = vadd.f32 %v3481_v6, %v1313_v18  ;;  %v2087_v27 = vadd.f32 %v3609_v7, %v1569_v19  ;;  %v3741_v10 = vld [vmem:[%s4210_s18 + $0x160] sm:$0xff]  }
 0x140   : > { %v1317_v28 = vpop.f32.mrf.mxu0  ;;  %v1573_v29 = vpop.f32.mrf.mxu1  ;;  %v3492_v19 = vunpack.c.l.bf16 %v3709_v9  ;;  %v3620_v20 = vunpack.c.l.bf16 %v3741_v10 }
 0x141   : > { %2791 = vst.msk [vmem:[%s4244_s24 + $0x48] sm:$0xf] %vm2772_vm1, %v3332_v24  ;;  %2855 = vst.msk [vmem:[%s4244_s24 + $0x148] sm:$0xf] %vm2772_vm1, %v3396_v25  ;;  %v2151_v30 = vmax.f32 %v2023_v26, 0.0  ;;  %v2215_v31 = vmax.f32 %v2087_v27, 0.0  ;;  %v1318_v32 = vadd.f32 %v4219_v54, %v1317_v28  ;;  %v1574_v33 = vadd.f32 %v4219_v54, %v1573_v29 }
 0x142   : > { %v1319_v34 = vpop.f32.mrf.mxu0  ;;  %v1575_v35 = vpop.f32.mrf.mxu1 }
 0x143   : > { %v3333_v38 = vpack.c.bf16 %v2151_v30, %v2151_v30  ;;  %v3397_v39 = vpack.c.bf16 %v2215_v31, %v2215_v31  ;;  %v2024_v40 = vadd.f32 %v3484_v22, %v1318_v32  ;;  %v2088_v41 = vadd.f32 %v3612_v23, %v1574_v33 }
 0x144   : > { %v1320_v44 = vpop.f32.mrf.mxu0  ;;  %v1576_v45 = vpop.f32.mrf.mxu1  ;;  %v3493_v33 = vunpack.c.h.bf16 %v3709_v9  ;;  %v3621_v34 = vunpack.c.h.bf16 %v3741_v10 }
 0x145   : > { %2792 = vst.msk [vmem:[%s4244_s24 + $0x4c] sm:$0xf] %vm2772_vm1, %v3333_v38  ;;  %2856 = vst.msk [vmem:[%s4244_s24 + $0x14c] sm:$0xf] %vm2772_vm1, %v3397_v39  ;;  %v2152_v46 = vmax.f32 %v2024_v40, 0.0  ;;  %v2216_v47 = vmax.f32 %v2088_v41, 0.0  ;;  %v1321_v48 = vadd.f32 %v4219_v54, %v1320_v44  ;;  %v1577_v49 = vadd.f32 %v4219_v54, %v1576_v45 }
 0x146   : > { %v1322_v50 = vpop.f32.mrf.mxu0  ;;  %v1578_v51 = vpop.f32.mrf.mxu1  ;;  %v3710_v39 = vld [vmem:[%s4210_s18 + $0x68] sm:$0xff]   ;;  %v4505_v44 = vld [vmem:[%s4791_s2] ss:$0 sm:$0xff] }
 0x147   : > { %v3334_v55 = vpack.c.bf16 %v2152_v46, %v2152_v46  ;;  %v3398_v56 = vpack.c.bf16 %v2216_v47, %v2216_v47  ;;  %v2025_v57 = vadd.f32 %v3485_v36, %v1321_v48  ;;  %v2089_v58 = vadd.f32 %v3613_v37, %v1577_v49  ;;  %v3742_v40 = vld [vmem:[%s4210_s18 + $0x168] sm:$0xff]  }
 0x148   : > { %v1325_v59 = vpop.f32.mrf.mxu0  ;;  %v1581_v60 = vpop.f32.mrf.mxu1  ;;  %v3496_v49 = vunpack.c.l.bf16 %v3710_v39  ;;  %v3624_v50 = vunpack.c.l.bf16 %v3742_v40 }
 0x149   : > { %2793 = vst.msk [vmem:[%s4244_s24 + $0x50] sm:$0xf] %vm2772_vm1, %v3334_v55  ;;  %2857 = vst.msk [vmem:[%s4244_s24 + $0x150] sm:$0xf] %vm2772_vm1, %v3398_v56  ;;  %v2153_v61 = vmax.f32 %v2025_v57, 0.0  ;;  %v2217_v62 = vmax.f32 %v2089_v58, 0.0  ;;  %v1326_v63 = vadd.f32 %v4219_v54, %v1325_v59  ;;  %v1582_v0 = vadd.f32 %v4219_v54, %v1581_v60 }
 0x14a   : > { %v1327_v1 = vpop.f32.mrf.mxu0  ;;  %v1583_v2 = vpop.f32.mrf.mxu1 }
 0x14b   : > { %v3335_v5 = vpack.c.bf16 %v2153_v61, %v2153_v61  ;;  %v3399_v6 = vpack.c.bf16 %v2217_v62, %v2217_v62  ;;  %v2026_v7 = vadd.f32 %v3488_v52, %v1326_v63  ;;  %v2090_v8 = vadd.f32 %v3616_v53, %v1582_v0 }
 0x14c   : > { %v1328_v11 = vpop.f32.mrf.mxu0  ;;  %v1584_v12 = vpop.f32.mrf.mxu1  ;;  %v3497_v0 = vunpack.c.h.bf16 %v3710_v39  ;;  %v3625_v1 = vunpack.c.h.bf16 %v3742_v40 }
 0x14d   : > { %2794 = vst.msk [vmem:[%s4244_s24 + $0x54] sm:$0xf] %vm2772_vm1, %v3335_v5  ;;  %2858 = vst.msk [vmem:[%s4244_s24 + $0x154] sm:$0xf] %vm2772_vm1, %v3399_v6  ;;  %v2154_v13 = vmax.f32 %v2026_v7, 0.0  ;;  %v2218_v14 = vmax.f32 %v2090_v8, 0.0  ;;  %v1329_v15 = vadd.f32 %v4219_v54, %v1328_v11  ;;  %v1585_v16 = vadd.f32 %v4219_v54, %v1584_v12 }
 0x14e   : > { %v1330_v17 = vpop.f32.mrf.mxu0  ;;  %v1586_v18 = vpop.f32.mrf.mxu1  ;;  %v3711_v6 = vld [vmem:[%s4210_s18 + $0x70] sm:$0xff]  }
 0x14f   : > { %v3336_v21 = vpack.c.bf16 %v2154_v13, %v2154_v13  ;;  %v3400_v22 = vpack.c.bf16 %v2218_v14, %v2218_v14  ;;  %v2027_v23 = vadd.f32 %v3489_v3, %v1329_v15  ;;  %v2091_v24 = vadd.f32 %v3617_v4, %v1585_v16  ;;  %v3743_v7 = vld [vmem:[%s4210_s18 + $0x170] sm:$0xff]  }
 0x150   : > { %v1333_v25 = vpop.f32.mrf.mxu0  ;;  %v1589_v26 = vpop.f32.mrf.mxu1  ;;  %v3500_v16 = vunpack.c.l.bf16 %v3711_v6  ;;  %v3628_v17 = vunpack.c.l.bf16 %v3743_v7 }
 0x151   : > { %2795 = vst.msk [vmem:[%s4244_s24 + $0x58] sm:$0xf] %vm2772_vm1, %v3336_v21  ;;  %2859 = vst.msk [vmem:[%s4244_s24 + $0x158] sm:$0xf] %vm2772_vm1, %v3400_v22  ;;  %v2155_v27 = vmax.f32 %v2027_v23, 0.0  ;;  %v2219_v28 = vmax.f32 %v2091_v24, 0.0  ;;  %v1334_v29 = vadd.f32 %v4219_v54, %v1333_v25  ;;  %v1590_v30 = vadd.f32 %v4219_v54, %v1589_v26 }
 0x152   : > { %v1335_v31 = vpop.f32.mrf.mxu0  ;;  %v1591_v32 = vpop.f32.mrf.mxu1 }
 0x153   : > { %v3337_v35 = vpack.c.bf16 %v2155_v27, %v2155_v27  ;;  %v3401_v36 = vpack.c.bf16 %v2219_v28, %v2219_v28  ;;  %v2028_v37 = vadd.f32 %v3492_v19, %v1334_v29  ;;  %v2092_v38 = vadd.f32 %v3620_v20, %v1590_v30 }
 0x154   : > { %v1336_v41 = vpop.f32.mrf.mxu0  ;;  %v1592_v42 = vpop.f32.mrf.mxu1  ;;  %v3501_v30 = vunpack.c.h.bf16 %v3711_v6  ;;  %v3629_v31 = vunpack.c.h.bf16 %v3743_v7 }
 0x155   : > { %2796 = vst.msk [vmem:[%s4244_s24 + $0x5c] sm:$0xf] %vm2772_vm1, %v3337_v35  ;;  %2860 = vst.msk [vmem:[%s4244_s24 + $0x15c] sm:$0xf] %vm2772_vm1, %v3401_v36  ;;  %v2156_v43 = vmax.f32 %v2028_v37, 0.0  ;;  %v2220_v54 = vmax.f32 %v2092_v38, 0.0  ;;  %v1337_v45 = vadd.f32 %v4505_v44, %v1336_v41  ;;  %v1593_v46 = vadd.f32 %v4505_v44, %v1592_v42 }
 0x156   : > { %v1338_v47 = vpop.f32.mrf.mxu0  ;;  %v1594_v48 = vpop.f32.mrf.mxu1  ;;  %v3712_v36 = vld [vmem:[%s4210_s18 + $0x78] sm:$0xff]  }
 0x157   : > { %v3338_v51 = vpack.c.bf16 %v2156_v43, %v2156_v43  ;;  %v3402_v52 = vpack.c.bf16 %v2220_v54, %v2220_v54  ;;  %v2029_v53 = vadd.f32 %v3493_v33, %v1337_v45  ;;  %v2093_v55 = vadd.f32 %v3621_v34, %v1593_v46  ;;  %v3744_v37 = vld [vmem:[%s4210_s18 + $0x178] sm:$0xff]  }
 0x158   : > { %v1341_v56 = vpop.f32.mrf.mxu0  ;;  %v1597_v57 = vpop.f32.mrf.mxu1  ;;  %v3504_v46 = vunpack.c.l.bf16 %v3712_v36  ;;  %v3632_v47 = vunpack.c.l.bf16 %v3744_v37 }
 0x159   : > { %2797 = vst.msk [vmem:[%s4244_s24 + $0x60] sm:$0xf] %vm2772_vm1, %v3338_v51  ;;  %2861 = vst.msk [vmem:[%s4244_s24 + $0x160] sm:$0xf] %vm2772_vm1, %v3402_v52  ;;  %v2157_v58 = vmax.f32 %v2029_v53, 0.0  ;;  %v2221_v59 = vmax.f32 %v2093_v55, 0.0  ;;  %v1342_v60 = vadd.f32 %v4505_v44, %v1341_v56  ;;  %v1598_v61 = vadd.f32 %v4505_v44, %v1597_v57 }
 0x15a   : > { %v1343_v62 = vpop.f32.mrf.mxu0  ;;  %v1599_v63 = vpop.f32.mrf.mxu1 }
 0x15b   : > { %v3339_v2 = vpack.c.bf16 %v2157_v58, %v2157_v58  ;;  %v3403_v3 = vpack.c.bf16 %v2221_v59, %v2221_v59  ;;  %v2030_v4 = vadd.f32 %v3496_v49, %v1342_v60  ;;  %v2094_v5 = vadd.f32 %v3624_v50, %v1598_v61 }
 0x15c   : > { %v1344_v8 = vpop.f32.mrf.mxu0  ;;  %v1600_v9 = vpop.f32.mrf.mxu1  ;;  %v3505_v61 = vunpack.c.h.bf16 %v3712_v36  ;;  %v3633_v62 = vunpack.c.h.bf16 %v3744_v37 }
 0x15d   : > { %2798 = vst.msk [vmem:[%s4244_s24 + $0x64] sm:$0xf] %vm2772_vm1, %v3339_v2  ;;  %2862 = vst.msk [vmem:[%s4244_s24 + $0x164] sm:$0xf] %vm2772_vm1, %v3403_v3  ;;  %v2158_v10 = vmax.f32 %v2030_v4, 0.0  ;;  %v2222_v11 = vmax.f32 %v2094_v5, 0.0  ;;  %v1345_v12 = vadd.f32 %v4505_v44, %v1344_v8  ;;  %v1601_v13 = vadd.f32 %v4505_v44, %v1600_v9 }
 0x15e   : > { %v1346_v14 = vpop.f32.mrf.mxu0  ;;  %v1602_v15 = vpop.f32.mrf.mxu1  ;;  %v3713_v3 = vld [vmem:[%s4210_s18 + $0x80] sm:$0xff]  }
 0x15f   : > { %v3340_v18 = vpack.c.bf16 %v2158_v10, %v2158_v10  ;;  %v3404_v19 = vpack.c.bf16 %v2222_v11, %v2222_v11  ;;  %v2031_v20 = vadd.f32 %v3497_v0, %v1345_v12  ;;  %v2095_v21 = vadd.f32 %v3625_v1, %v1601_v13  ;;  %v3745_v4 = vld [vmem:[%s4210_s18 + $0x180] sm:$0xff]  }
 0x160   : > { %v1349_v22 = vpop.f32.mrf.mxu0  ;;  %v1605_v23 = vpop.f32.mrf.mxu1  ;;  %v3508_v13 = vunpack.c.l.bf16 %v3713_v3  ;;  %v3636_v14 = vunpack.c.l.bf16 %v3745_v4 }
 0x161   : > { %2799 = vst.msk [vmem:[%s4244_s24 + $0x68] sm:$0xf] %vm2772_vm1, %v3340_v18  ;;  %2863 = vst.msk [vmem:[%s4244_s24 + $0x168] sm:$0xf] %vm2772_vm1, %v3404_v19  ;;  %v2159_v24 = vmax.f32 %v2031_v20, 0.0  ;;  %v2223_v25 = vmax.f32 %v2095_v21, 0.0  ;;  %v1350_v26 = vadd.f32 %v4505_v44, %v1349_v22  ;;  %v1606_v27 = vadd.f32 %v4505_v44, %v1605_v23 }
 0x162   : > { %v1351_v28 = vpop.f32.mrf.mxu0  ;;  %v1607_v29 = vpop.f32.mrf.mxu1 }
 0x163   : > { %v3341_v32 = vpack.c.bf16 %v2159_v24, %v2159_v24  ;;  %v3405_v33 = vpack.c.bf16 %v2223_v25, %v2223_v25  ;;  %v2032_v34 = vadd.f32 %v3500_v16, %v1350_v26  ;;  %v2096_v35 = vadd.f32 %v3628_v17, %v1606_v27 }
 0x164   : > { %v1352_v38 = vpop.f32.mrf.mxu0  ;;  %v1608_v39 = vpop.f32.mrf.mxu1  ;;  %v3509_v27 = vunpack.c.h.bf16 %v3713_v3  ;;  %v3637_v28 = vunpack.c.h.bf16 %v3745_v4 }
 0x165   : > { %2800 = vst.msk [vmem:[%s4244_s24 + $0x6c] sm:$0xf] %vm2772_vm1, %v3341_v32  ;;  %2864 = vst.msk [vmem:[%s4244_s24 + $0x16c] sm:$0xf] %vm2772_vm1, %v3405_v33  ;;  %v2160_v40 = vmax.f32 %v2032_v34, 0.0  ;;  %v2224_v41 = vmax.f32 %v2096_v35, 0.0  ;;  %v1353_v42 = vadd.f32 %v4505_v44, %v1352_v38  ;;  %v1609_v43 = vadd.f32 %v4505_v44, %v1608_v39 }
 0x166   : > { %v1354_v54 = vpop.f32.mrf.mxu0  ;;  %v1610_v45 = vpop.f32.mrf.mxu1  ;;  %v3714_v33 = vld [vmem:[%s4210_s18 + $0x88] sm:$0xff]  }
 0x167   : > { %v3342_v48 = vpack.c.bf16 %v2160_v40, %v2160_v40  ;;  %v3406_v49 = vpack.c.bf16 %v2224_v41, %v2224_v41  ;;  %v2033_v50 = vadd.f32 %v3501_v30, %v1353_v42  ;;  %v2097_v51 = vadd.f32 %v3629_v31, %v1609_v43  ;;  %v3746_v34 = vld [vmem:[%s4210_s18 + $0x188] sm:$0xff]  }
 0x168   : > { %v1357_v52 = vpop.f32.mrf.mxu0  ;;  %v1613_v53 = vpop.f32.mrf.mxu1  ;;  %v3512_v43 = vunpack.c.l.bf16 %v3714_v33  ;;  %v3640_v54 = vunpack.c.l.bf16 %v3746_v34 }
 0x169   : > { %2801 = vst.msk [vmem:[%s4244_s24 + $0x70] sm:$0xf] %vm2772_vm1, %v3342_v48  ;;  %2865 = vst.msk [vmem:[%s4244_s24 + $0x170] sm:$0xf] %vm2772_vm1, %v3406_v49  ;;  %v2161_v55 = vmax.f32 %v2033_v50, 0.0  ;;  %v2225_v56 = vmax.f32 %v2097_v51, 0.0  ;;  %v1358_v57 = vadd.f32 %v4505_v44, %v1357_v52  ;;  %v1614_v58 = vadd.f32 %v4505_v44, %v1613_v53 }
 0x16a   : > { %v1359_v59 = vpop.f32.mrf.mxu0  ;;  %v1615_v60 = vpop.f32.mrf.mxu1 }
 0x16b   : > { %v3343_v63 = vpack.c.bf16 %v2161_v55, %v2161_v55  ;;  %v3407_v0 = vpack.c.bf16 %v2225_v56, %v2225_v56  ;;  %v2034_v1 = vadd.f32 %v3504_v46, %v1358_v57  ;;  %v2098_v2 = vadd.f32 %v3632_v47, %v1614_v58 }
 0x16c   : > { %v1360_v5 = vpop.f32.mrf.mxu0  ;;  %v1616_v6 = vpop.f32.mrf.mxu1  ;;  %v3513_v58 = vunpack.c.h.bf16 %v3714_v33  ;;  %v3641_v59 = vunpack.c.h.bf16 %v3746_v34 }
 0x16d   : > { %2802 = vst.msk [vmem:[%s4244_s24 + $0x74] sm:$0xf] %vm2772_vm1, %v3343_v63  ;;  %2866 = vst.msk [vmem:[%s4244_s24 + $0x174] sm:$0xf] %vm2772_vm1, %v3407_v0  ;;  %v2162_v7 = vmax.f32 %v2034_v1, 0.0  ;;  %v2226_v8 = vmax.f32 %v2098_v2, 0.0  ;;  %v1361_v9 = vadd.f32 %v4505_v44, %v1360_v5  ;;  %v1617_v10 = vadd.f32 %v4505_v44, %v1616_v6 }
 0x16e   : > { %v1362_v11 = vpop.f32.mrf.mxu0  ;;  %v1618_v12 = vpop.f32.mrf.mxu1  ;;  %v3715_v0 = vld [vmem:[%s4210_s18 + $0x90] sm:$0xff]  }
 0x16f   : > { %v3344_v15 = vpack.c.bf16 %v2162_v7, %v2162_v7  ;;  %v3408_v16 = vpack.c.bf16 %v2226_v8, %v2226_v8  ;;  %v2035_v17 = vadd.f32 %v3505_v61, %v1361_v9  ;;  %v2099_v18 = vadd.f32 %v3633_v62, %v1617_v10  ;;  %v3747_v1 = vld [vmem:[%s4210_s18 + $0x190] sm:$0xff]  }
 0x170   : > { %v1365_v19 = vpop.f32.mrf.mxu0  ;;  %v1621_v20 = vpop.f32.mrf.mxu1  ;;  %v3516_v10 = vunpack.c.l.bf16 %v3715_v0  ;;  %v3644_v11 = vunpack.c.l.bf16 %v3747_v1 }
 0x171   : > { %2803 = vst.msk [vmem:[%s4244_s24 + $0x78] sm:$0xf] %vm2772_vm1, %v3344_v15  ;;  %2867 = vst.msk [vmem:[%s4244_s24 + $0x178] sm:$0xf] %vm2772_vm1, %v3408_v16  ;;  %v2163_v21 = vmax.f32 %v2035_v17, 0.0  ;;  %v2227_v22 = vmax.f32 %v2099_v18, 0.0  ;;  %v1366_v23 = vadd.f32 %v4505_v44, %v1365_v19  ;;  %v1622_v24 = vadd.f32 %v4505_v44, %v1621_v20 }
 0x172   : > { %v1367_v25 = vpop.f32.mrf.mxu0  ;;  %v1623_v26 = vpop.f32.mrf.mxu1 }
 0x173   : > { %v3345_v29 = vpack.c.bf16 %v2163_v21, %v2163_v21  ;;  %v3409_v30 = vpack.c.bf16 %v2227_v22, %v2227_v22  ;;  %v2036_v31 = vadd.f32 %v3508_v13, %v1366_v23  ;;  %v2100_v32 = vadd.f32 %v3636_v14, %v1622_v24 }
 0x174   : > { %v1368_v35 = vpop.f32.mrf.mxu0  ;;  %v1624_v36 = vpop.f32.mrf.mxu1  ;;  %v3517_v24 = vunpack.c.h.bf16 %v3715_v0  ;;  %v3645_v25 = vunpack.c.h.bf16 %v3747_v1 }
 0x175   : > { %2804 = vst.msk [vmem:[%s4244_s24 + $0x7c] sm:$0xf] %vm2772_vm1, %v3345_v29  ;;  %2868 = vst.msk [vmem:[%s4244_s24 + $0x17c] sm:$0xf] %vm2772_vm1, %v3409_v30  ;;  %v2164_v37 = vmax.f32 %v2036_v31, 0.0  ;;  %v2228_v38 = vmax.f32 %v2100_v32, 0.0  ;;  %v1369_v39 = vadd.f32 %v4505_v44, %v1368_v35  ;;  %v1625_v40 = vadd.f32 %v4505_v44, %v1624_v36 }
 0x176   : > { %v1370_v41 = vpop.f32.mrf.mxu0  ;;  %v1626_v42 = vpop.f32.mrf.mxu1  ;;  %v3716_v30 = vld [vmem:[%s4210_s18 + $0x98] sm:$0xff]  }
 0x177   : > { %v3346_v45 = vpack.c.bf16 %v2164_v37, %v2164_v37  ;;  %v3410_v46 = vpack.c.bf16 %v2228_v38, %v2228_v38  ;;  %v2037_v47 = vadd.f32 %v3509_v27, %v1369_v39  ;;  %v2101_v48 = vadd.f32 %v3637_v28, %v1625_v40  ;;  %v3748_v31 = vld [vmem:[%s4210_s18 + $0x198] sm:$0xff]  }
 0x178   : > { %v1373_v49 = vpop.f32.mrf.mxu0  ;;  %v1629_v50 = vpop.f32.mrf.mxu1  ;;  %v3520_v40 = vunpack.c.l.bf16 %v3716_v30  ;;  %v3648_v41 = vunpack.c.l.bf16 %v3748_v31 }
 0x179   : > { %2805 = vst.msk [vmem:[%s4244_s24 + $0x80] sm:$0xf] %vm2772_vm1, %v3346_v45  ;;  %2869 = vst.msk [vmem:[%s4244_s24 + $0x180] sm:$0xf] %vm2772_vm1, %v3410_v46  ;;  %v2165_v51 = vmax.f32 %v2037_v47, 0.0  ;;  %v2229_v52 = vmax.f32 %v2101_v48, 0.0  ;;  %v1374_v53 = vadd.f32 %v4505_v44, %v1373_v49  ;;  %v1630_v55 = vadd.f32 %v4505_v44, %v1629_v50 }
 0x17a   : > { %v1375_v56 = vpop.f32.mrf.mxu0  ;;  %v1631_v57 = vpop.f32.mrf.mxu1 }
 0x17b   : > { %v3347_v60 = vpack.c.bf16 %v2165_v51, %v2165_v51  ;;  %v3411_v61 = vpack.c.bf16 %v2229_v52, %v2229_v52  ;;  %v2038_v62 = vadd.f32 %v3512_v43, %v1374_v53  ;;  %v2102_v63 = vadd.f32 %v3640_v54, %v1630_v55 }
 0x17c   : > { %v1376_v2 = vpop.f32.mrf.mxu0  ;;  %v1632_v3 = vpop.f32.mrf.mxu1  ;;  %v3521_v55 = vunpack.c.h.bf16 %v3716_v30  ;;  %v3649_v56 = vunpack.c.h.bf16 %v3748_v31 }
 0x17d   : > { %2806 = vst.msk [vmem:[%s4244_s24 + $0x84] sm:$0xf] %vm2772_vm1, %v3347_v60  ;;  %2870 = vst.msk [vmem:[%s4244_s24 + $0x184] sm:$0xf] %vm2772_vm1, %v3411_v61  ;;  %v2166_v4 = vmax.f32 %v2038_v62, 0.0  ;;  %v2230_v5 = vmax.f32 %v2102_v63, 0.0  ;;  %v1377_v6 = vadd.f32 %v4505_v44, %v1376_v2  ;;  %v1633_v7 = vadd.f32 %v4505_v44, %v1632_v3 }
 0x17e   : > { %v1378_v8 = vpop.f32.mrf.mxu0  ;;  %v1634_v9 = vpop.f32.mrf.mxu1  ;;  %v3717_v61 = vld [vmem:[%s4210_s18 + $0xa0] sm:$0xff]  }
 0x17f   : > { %v3348_v12 = vpack.c.bf16 %v2166_v4, %v2166_v4  ;;  %v3412_v13 = vpack.c.bf16 %v2230_v5, %v2230_v5  ;;  %v2039_v14 = vadd.f32 %v3513_v58, %v1377_v6  ;;  %v2103_v15 = vadd.f32 %v3641_v59, %v1633_v7  ;;  %v3749_v62 = vld [vmem:[%s4210_s18 + $0x1a0] sm:$0xff]  }
 0x180   : > { %v1381_v16 = vpop.f32.mrf.mxu0  ;;  %v1637_v17 = vpop.f32.mrf.mxu1  ;;  %v3524_v7 = vunpack.c.l.bf16 %v3717_v61  ;;  %v3652_v8 = vunpack.c.l.bf16 %v3749_v62 }
 0x181   : > { %2807 = vst.msk [vmem:[%s4244_s24 + $0x88] sm:$0xf] %vm2772_vm1, %v3348_v12  ;;  %2871 = vst.msk [vmem:[%s4244_s24 + $0x188] sm:$0xf] %vm2772_vm1, %v3412_v13  ;;  %v2167_v18 = vmax.f32 %v2039_v14, 0.0  ;;  %v2231_v19 = vmax.f32 %v2103_v15, 0.0  ;;  %v1382_v20 = vadd.f32 %v4505_v44, %v1381_v16  ;;  %v1638_v21 = vadd.f32 %v4505_v44, %v1637_v17 }
 0x182   : > { %v1383_v22 = vpop.f32.mrf.mxu0  ;;  %v1639_v23 = vpop.f32.mrf.mxu1 }
 0x183   : > { %v3349_v26 = vpack.c.bf16 %v2167_v18, %v2167_v18  ;;  %v3413_v27 = vpack.c.bf16 %v2231_v19, %v2231_v19  ;;  %v2040_v28 = vadd.f32 %v3516_v10, %v1382_v20  ;;  %v2104_v29 = vadd.f32 %v3644_v11, %v1638_v21 }
 0x184   : > { %v1384_v32 = vpop.f32.mrf.mxu0  ;;  %v1640_v33 = vpop.f32.mrf.mxu1  ;;  %v3525_v21 = vunpack.c.h.bf16 %v3717_v61  ;;  %v3653_v22 = vunpack.c.h.bf16 %v3749_v62 }
 0x185   : > { %2808 = vst.msk [vmem:[%s4244_s24 + $0x8c] sm:$0xf] %vm2772_vm1, %v3349_v26  ;;  %2872 = vst.msk [vmem:[%s4244_s24 + $0x18c] sm:$0xf] %vm2772_vm1, %v3413_v27  ;;  %v2168_v34 = vmax.f32 %v2040_v28, 0.0  ;;  %v2232_v35 = vmax.f32 %v2104_v29, 0.0  ;;  %v1385_v36 = vadd.f32 %v4505_v44, %v1384_v32  ;;  %v1641_v37 = vadd.f32 %v4505_v44, %v1640_v33 }
 0x186   : > { %v1386_v38 = vpop.f32.mrf.mxu0  ;;  %v1642_v39 = vpop.f32.mrf.mxu1  ;;  %v3718_v27 = vld [vmem:[%s4210_s18 + $0xa8] sm:$0xff]  }
 0x187   : > { %v3350_v42 = vpack.c.bf16 %v2168_v34, %v2168_v34  ;;  %v3414_v43 = vpack.c.bf16 %v2232_v35, %v2232_v35  ;;  %v2041_v54 = vadd.f32 %v3517_v24, %v1385_v36  ;;  %v2105_v45 = vadd.f32 %v3645_v25, %v1641_v37  ;;  %v3750_v28 = vld [vmem:[%s4210_s18 + $0x1a8] sm:$0xff]  }
 0x188   : > { %v1389_v46 = vpop.f32.mrf.mxu0  ;;  %v1645_v47 = vpop.f32.mrf.mxu1  ;;  %v3528_v37 = vunpack.c.l.bf16 %v3718_v27  ;;  %v3656_v38 = vunpack.c.l.bf16 %v3750_v28 }
 0x189   : > { %2809 = vst.msk [vmem:[%s4244_s24 + $0x90] sm:$0xf] %vm2772_vm1, %v3350_v42  ;;  %2873 = vst.msk [vmem:[%s4244_s24 + $0x190] sm:$0xf] %vm2772_vm1, %v3414_v43  ;;  %v2169_v48 = vmax.f32 %v2041_v54, 0.0  ;;  %v2233_v49 = vmax.f32 %v2105_v45, 0.0  ;;  %v1390_v50 = vadd.f32 %v4505_v44, %v1389_v46  ;;  %v1646_v51 = vadd.f32 %v4505_v44, %v1645_v47 }
 0x18a   : > { %v1391_v52 = vpop.f32.mrf.mxu0  ;;  %v1647_v53 = vpop.f32.mrf.mxu1 }
 0x18b   : > { %v3351_v57 = vpack.c.bf16 %v2169_v48, %v2169_v48  ;;  %v3415_v58 = vpack.c.bf16 %v2233_v49, %v2233_v49  ;;  %v2042_v59 = vadd.f32 %v3520_v40, %v1390_v50  ;;  %v2106_v60 = vadd.f32 %v3648_v41, %v1646_v51 }
 0x18c   : > { %v1392_v63 = vpop.f32.mrf.mxu0  ;;  %v1648_v0 = vpop.f32.mrf.mxu1  ;;  %v3529_v51 = vunpack.c.h.bf16 %v3718_v27  ;;  %v3657_v52 = vunpack.c.h.bf16 %v3750_v28 }
 0x18d   : > { %2810 = vst.msk [vmem:[%s4244_s24 + $0x94] sm:$0xf] %vm2772_vm1, %v3351_v57  ;;  %2874 = vst.msk [vmem:[%s4244_s24 + $0x194] sm:$0xf] %vm2772_vm1, %v3415_v58  ;;  %v2170_v1 = vmax.f32 %v2042_v59, 0.0  ;;  %v2234_v2 = vmax.f32 %v2106_v60, 0.0  ;;  %v1393_v3 = vadd.f32 %v4505_v44, %v1392_v63  ;;  %v1649_v4 = vadd.f32 %v4505_v44, %v1648_v0 }
 0x18e   : > { %v1394_v5 = vpop.f32.mrf.mxu0  ;;  %v1650_v6 = vpop.f32.mrf.mxu1  ;;  %v3719_v58 = vld [vmem:[%s4210_s18 + $0xb0] sm:$0xff]  }
 0x18f   : > { %v3352_v9 = vpack.c.bf16 %v2170_v1, %v2170_v1  ;;  %v3416_v10 = vpack.c.bf16 %v2234_v2, %v2234_v2  ;;  %v2043_v11 = vadd.f32 %v3521_v55, %v1393_v3  ;;  %v2107_v12 = vadd.f32 %v3649_v56, %v1649_v4  ;;  %v3751_v59 = vld [vmem:[%s4210_s18 + $0x1b0] sm:$0xff]  }
 0x190   : > { %v1397_v13 = vpop.f32.mrf.mxu0  ;;  %v1653_v14 = vpop.f32.mrf.mxu1  ;;  %v3532_v4 = vunpack.c.l.bf16 %v3719_v58  ;;  %v3660_v5 = vunpack.c.l.bf16 %v3751_v59 }
 0x191   : > { %2811 = vst.msk [vmem:[%s4244_s24 + $0x98] sm:$0xf] %vm2772_vm1, %v3352_v9  ;;  %2875 = vst.msk [vmem:[%s4244_s24 + $0x198] sm:$0xf] %vm2772_vm1, %v3416_v10  ;;  %v2171_v15 = vmax.f32 %v2043_v11, 0.0  ;;  %v2235_v16 = vmax.f32 %v2107_v12, 0.0  ;;  %v1398_v17 = vadd.f32 %v4505_v44, %v1397_v13  ;;  %v1654_v18 = vadd.f32 %v4505_v44, %v1653_v14 }
 0x192   : > { %v1399_v19 = vpop.f32.mrf.mxu0  ;;  %v1655_v20 = vpop.f32.mrf.mxu1 }
 0x193   : > { %v3353_v23 = vpack.c.bf16 %v2171_v15, %v2171_v15  ;;  %v3417_v24 = vpack.c.bf16 %v2235_v16, %v2235_v16  ;;  %v2044_v25 = vadd.f32 %v3524_v7, %v1398_v17  ;;  %v2108_v26 = vadd.f32 %v3652_v8, %v1654_v18 }
 0x194   : > { %v1400_v29 = vpop.f32.mrf.mxu0  ;;  %v1656_v30 = vpop.f32.mrf.mxu1  ;;  %v3533_v18 = vunpack.c.h.bf16 %v3719_v58  ;;  %v3661_v19 = vunpack.c.h.bf16 %v3751_v59 }
 0x195   : > { %2812 = vst.msk [vmem:[%s4244_s24 + $0x9c] sm:$0xf] %vm2772_vm1, %v3353_v23  ;;  %2876 = vst.msk [vmem:[%s4244_s24 + $0x19c] sm:$0xf] %vm2772_vm1, %v3417_v24  ;;  %v2172_v31 = vmax.f32 %v2044_v25, 0.0  ;;  %v2236_v32 = vmax.f32 %v2108_v26, 0.0  ;;  %v1401_v33 = vadd.f32 %v4505_v44, %v1400_v29  ;;  %v1657_v34 = vadd.f32 %v4505_v44, %v1656_v30 }
 0x196   : > { %v1402_v35 = vpop.f32.mrf.mxu0  ;;  %v1658_v36 = vpop.f32.mrf.mxu1  ;;  %v3720_v24 = vld [vmem:[%s4210_s18 + $0xb8] sm:$0xff]  }
 0x197   : > { %v3354_v39 = vpack.c.bf16 %v2172_v31, %v2172_v31  ;;  %v3418_v40 = vpack.c.bf16 %v2236_v32, %v2236_v32  ;;  %v2045_v41 = vadd.f32 %v3525_v21, %v1401_v33  ;;  %v2109_v42 = vadd.f32 %v3653_v22, %v1657_v34  ;;  %v3752_v25 = vld [vmem:[%s4210_s18 + $0x1b8] sm:$0xff]  }
 0x198   : > { %v1405_v43 = vpop.f32.mrf.mxu0  ;;  %v1661_v54 = vpop.f32.mrf.mxu1  ;;  %v3536_v34 = vunpack.c.l.bf16 %v3720_v24  ;;  %v3664_v35 = vunpack.c.l.bf16 %v3752_v25 }
 0x199   : > { %2813 = vst.msk [vmem:[%s4244_s24 + $0xa0] sm:$0xf] %vm2772_vm1, %v3354_v39  ;;  %2877 = vst.msk [vmem:[%s4244_s24 + $0x1a0] sm:$0xf] %vm2772_vm1, %v3418_v40  ;;  %v2173_v45 = vmax.f32 %v2045_v41, 0.0  ;;  %v2237_v46 = vmax.f32 %v2109_v42, 0.0  ;;  %v1406_v47 = vadd.f32 %v4505_v44, %v1405_v43  ;;  %v1662_v48 = vadd.f32 %v4505_v44, %v1661_v54 }
 0x19a   : > { %v1407_v49 = vpop.f32.mrf.mxu0  ;;  %v1663_v50 = vpop.f32.mrf.mxu1 }
 0x19b   : > { %v3355_v53 = vpack.c.bf16 %v2173_v45, %v2173_v45  ;;  %v3419_v55 = vpack.c.bf16 %v2237_v46, %v2237_v46  ;;  %v2046_v56 = vadd.f32 %v3528_v37, %v1406_v47  ;;  %v2110_v57 = vadd.f32 %v3656_v38, %v1662_v48 }
 0x19c   : > { %v1408_v60 = vpop.f32.mrf.mxu0  ;;  %v1664_v61 = vpop.f32.mrf.mxu1  ;;  %v3537_v48 = vunpack.c.h.bf16 %v3720_v24  ;;  %v3665_v49 = vunpack.c.h.bf16 %v3752_v25 }
 0x19d   : > { %2814 = vst.msk [vmem:[%s4244_s24 + $0xa4] sm:$0xf] %vm2772_vm1, %v3355_v53  ;;  %2878 = vst.msk [vmem:[%s4244_s24 + $0x1a4] sm:$0xf] %vm2772_vm1, %v3419_v55  ;;  %v2174_v62 = vmax.f32 %v2046_v56, 0.0  ;;  %v2238_v63 = vmax.f32 %v2110_v57, 0.0  ;;  %v1409_v0 = vadd.f32 %v4505_v44, %v1408_v60  ;;  %v1665_v1 = vadd.f32 %v4505_v44, %v1664_v61 }
 0x19e   : > { %v1410_v2 = vpop.f32.mrf.mxu0  ;;  %v1666_v3 = vpop.f32.mrf.mxu1  ;;  %v3721_v55 = vld [vmem:[%s4210_s18 + $0xc0] sm:$0xff]  }
 0x19f   : > { %v3356_v6 = vpack.c.bf16 %v2174_v62, %v2174_v62  ;;  %v3420_v7 = vpack.c.bf16 %v2238_v63, %v2238_v63  ;;  %v2047_v8 = vadd.f32 %v3529_v51, %v1409_v0  ;;  %v2111_v9 = vadd.f32 %v3657_v52, %v1665_v1  ;;  %v3753_v56 = vld [vmem:[%s4210_s18 + $0x1c0] sm:$0xff]  }
 0x1a0   : > { %v1413_v10 = vpop.f32.mrf.mxu0  ;;  %v1669_v11 = vpop.f32.mrf.mxu1  ;;  %v3540_v1 = vunpack.c.l.bf16 %v3721_v55  ;;  %v3668_v2 = vunpack.c.l.bf16 %v3753_v56 }
 0x1a1   : > { %2815 = vst.msk [vmem:[%s4244_s24 + $0xa8] sm:$0xf] %vm2772_vm1, %v3356_v6  ;;  %2879 = vst.msk [vmem:[%s4244_s24 + $0x1a8] sm:$0xf] %vm2772_vm1, %v3420_v7  ;;  %v2175_v12 = vmax.f32 %v2047_v8, 0.0  ;;  %v2239_v13 = vmax.f32 %v2111_v9, 0.0  ;;  %v1414_v14 = vadd.f32 %v4505_v44, %v1413_v10  ;;  %v1670_v15 = vadd.f32 %v4505_v44, %v1669_v11 }
 0x1a2   : > { %v1415_v16 = vpop.f32.mrf.mxu0  ;;  %v1671_v17 = vpop.f32.mrf.mxu1 }
 0x1a3   : > { %v3357_v20 = vpack.c.bf16 %v2175_v12, %v2175_v12  ;;  %v3421_v21 = vpack.c.bf16 %v2239_v13, %v2239_v13  ;;  %v2048_v22 = vadd.f32 %v3532_v4, %v1414_v14  ;;  %v2112_v23 = vadd.f32 %v3660_v5, %v1670_v15 }
 0x1a4   : > { %v1416_v26 = vpop.f32.mrf.mxu0  ;;  %v1672_v27 = vpop.f32.mrf.mxu1  ;;  %v3541_v15 = vunpack.c.h.bf16 %v3721_v55  ;;  %v3669_v16 = vunpack.c.h.bf16 %v3753_v56 }
 0x1a5   : > { %2816 = vst.msk [vmem:[%s4244_s24 + $0xac] sm:$0xf] %vm2772_vm1, %v3357_v20  ;;  %2880 = vst.msk [vmem:[%s4244_s24 + $0x1ac] sm:$0xf] %vm2772_vm1, %v3421_v21  ;;  %v2176_v28 = vmax.f32 %v2048_v22, 0.0  ;;  %v2240_v29 = vmax.f32 %v2112_v23, 0.0  ;;  %v1417_v30 = vadd.f32 %v4505_v44, %v1416_v26  ;;  %v1673_v31 = vadd.f32 %v4505_v44, %v1672_v27 }
 0x1a6   : > { %v1418_v32 = vpop.f32.mrf.mxu0  ;;  %v1674_v33 = vpop.f32.mrf.mxu1  ;;  %v3722_v21 = vld [vmem:[%s4210_s18 + $0xc8] sm:$0xff]  }
 0x1a7   : > { %v3358_v36 = vpack.c.bf16 %v2176_v28, %v2176_v28  ;;  %v3422_v37 = vpack.c.bf16 %v2240_v29, %v2240_v29  ;;  %v2049_v38 = vadd.f32 %v3533_v18, %v1417_v30  ;;  %v2113_v39 = vadd.f32 %v3661_v19, %v1673_v31  ;;  %v3754_v22 = vld [vmem:[%s4210_s18 + $0x1c8] sm:$0xff]  }
 0x1a8   : > { %v1421_v40 = vpop.f32.mrf.mxu0  ;;  %v1677_v41 = vpop.f32.mrf.mxu1  ;;  %v3544_v31 = vunpack.c.l.bf16 %v3722_v21  ;;  %v3672_v32 = vunpack.c.l.bf16 %v3754_v22 }
 0x1a9   : > { %2817 = vst.msk [vmem:[%s4244_s24 + $0xb0] sm:$0xf] %vm2772_vm1, %v3358_v36  ;;  %2881 = vst.msk [vmem:[%s4244_s24 + $0x1b0] sm:$0xf] %vm2772_vm1, %v3422_v37  ;;  %v2177_v42 = vmax.f32 %v2049_v38, 0.0  ;;  %v2241_v43 = vmax.f32 %v2113_v39, 0.0  ;;  %v1422_v54 = vadd.f32 %v4505_v44, %v1421_v40  ;;  %v1678_v45 = vadd.f32 %v4505_v44, %v1677_v41 }
 0x1aa   : > { %v1423_v46 = vpop.f32.mrf.mxu0  ;;  %v1679_v47 = vpop.f32.mrf.mxu1 }
 0x1ab   : > { %v3359_v50 = vpack.c.bf16 %v2177_v42, %v2177_v42  ;;  %v3423_v51 = vpack.c.bf16 %v2241_v43, %v2241_v43  ;;  %v2050_v52 = vadd.f32 %v3536_v34, %v1422_v54  ;;  %v2114_v53 = vadd.f32 %v3664_v35, %v1678_v45 }
 0x1ac   : > { %v1424_v57 = vpop.f32.mrf.mxu0  ;;  %v1680_v58 = vpop.f32.mrf.mxu1  ;;  %v3545_v45 = vunpack.c.h.bf16 %v3722_v21  ;;  %v3673_v46 = vunpack.c.h.bf16 %v3754_v22 }
 0x1ad   : > { %2818 = vst.msk [vmem:[%s4244_s24 + $0xb4] sm:$0xf] %vm2772_vm1, %v3359_v50  ;;  %2882 = vst.msk [vmem:[%s4244_s24 + $0x1b4] sm:$0xf] %vm2772_vm1, %v3423_v51  ;;  %v2178_v59 = vmax.f32 %v2050_v52, 0.0  ;;  %v2242_v60 = vmax.f32 %v2114_v53, 0.0  ;;  %v1425_v61 = vadd.f32 %v4505_v44, %v1424_v57  ;;  %v1681_v62 = vadd.f32 %v4505_v44, %v1680_v58 }
 0x1ae   : > { %v1426_v63 = vpop.f32.mrf.mxu0  ;;  %v1682_v0 = vpop.f32.mrf.mxu1  ;;  %v3723_v51 = vld [vmem:[%s4210_s18 + $0xd0] sm:$0xff]  }
 0x1af   : > { %v3360_v3 = vpack.c.bf16 %v2178_v59, %v2178_v59  ;;  %v3424_v4 = vpack.c.bf16 %v2242_v60, %v2242_v60  ;;  %v2051_v5 = vadd.f32 %v3537_v48, %v1425_v61  ;;  %v2115_v6 = vadd.f32 %v3665_v49, %v1681_v62  ;;  %v3755_v52 = vld [vmem:[%s4210_s18 + $0x1d0] sm:$0xff]  }
 0x1b0   : > { %v1429_v7 = vpop.f32.mrf.mxu0  ;;  %v1685_v8 = vpop.f32.mrf.mxu1  ;;  %v3548_v62 = vunpack.c.l.bf16 %v3723_v51  ;;  %v3676_v63 = vunpack.c.l.bf16 %v3755_v52 }
 0x1b1   : > { %2819 = vst.msk [vmem:[%s4244_s24 + $0xb8] sm:$0xf] %vm2772_vm1, %v3360_v3  ;;  %2883 = vst.msk [vmem:[%s4244_s24 + $0x1b8] sm:$0xf] %vm2772_vm1, %v3424_v4  ;;  %v2179_v9 = vmax.f32 %v2051_v5, 0.0  ;;  %v2243_v10 = vmax.f32 %v2115_v6, 0.0  ;;  %v1430_v11 = vadd.f32 %v4505_v44, %v1429_v7  ;;  %v1686_v12 = vadd.f32 %v4505_v44, %v1685_v8 }
 0x1b2   : > { %v1431_v13 = vpop.f32.mrf.mxu0  ;;  %v1687_v14 = vpop.f32.mrf.mxu1 }
 0x1b3   : > { %v3361_v17 = vpack.c.bf16 %v2179_v9, %v2179_v9  ;;  %v3425_v18 = vpack.c.bf16 %v2243_v10, %v2243_v10  ;;  %v2052_v19 = vadd.f32 %v3540_v1, %v1430_v11  ;;  %v2116_v20 = vadd.f32 %v3668_v2, %v1686_v12 }
 0x1b4   : > { %v1432_v23 = vpop.f32.mrf.mxu0  ;;  %v1688_v24 = vpop.f32.mrf.mxu1  ;;  %v3549_v12 = vunpack.c.h.bf16 %v3723_v51  ;;  %v3677_v13 = vunpack.c.h.bf16 %v3755_v52 }
 0x1b5   : > { %2820 = vst.msk [vmem:[%s4244_s24 + $0xbc] sm:$0xf] %vm2772_vm1, %v3361_v17  ;;  %2884 = vst.msk [vmem:[%s4244_s24 + $0x1bc] sm:$0xf] %vm2772_vm1, %v3425_v18  ;;  %v2180_v25 = vmax.f32 %v2052_v19, 0.0  ;;  %v2244_v26 = vmax.f32 %v2116_v20, 0.0  ;;  %v1433_v27 = vadd.f32 %v4505_v44, %v1432_v23  ;;  %v1689_v28 = vadd.f32 %v4505_v44, %v1688_v24 }
 0x1b6   : > { %v1434_v29 = vpop.f32.mrf.mxu0  ;;  %v1690_v30 = vpop.f32.mrf.mxu1  ;;  %v3724_v18 = vld [vmem:[%s4210_s18 + $0xd8] sm:$0xff]  }
 0x1b7   : > { %v3362_v33 = vpack.c.bf16 %v2180_v25, %v2180_v25  ;;  %v3426_v34 = vpack.c.bf16 %v2244_v26, %v2244_v26  ;;  %v2053_v35 = vadd.f32 %v3541_v15, %v1433_v27  ;;  %v2117_v36 = vadd.f32 %v3669_v16, %v1689_v28  ;;  %v3756_v19 = vld [vmem:[%s4210_s18 + $0x1d8] sm:$0xff]  }
 0x1b8   : > { %v1437_v37 = vpop.f32.mrf.mxu0  ;;  %v1693_v38 = vpop.f32.mrf.mxu1  ;;  %v3552_v28 = vunpack.c.l.bf16 %v3724_v18  ;;  %v3680_v29 = vunpack.c.l.bf16 %v3756_v19 }
 0x1b9   : > { %2821 = vst.msk [vmem:[%s4244_s24 + $0xc0] sm:$0xf] %vm2772_vm1, %v3362_v33  ;;  %2885 = vst.msk [vmem:[%s4244_s24 + $0x1c0] sm:$0xf] %vm2772_vm1, %v3426_v34  ;;  %v2181_v39 = vmax.f32 %v2053_v35, 0.0  ;;  %v2245_v40 = vmax.f32 %v2117_v36, 0.0  ;;  %v1438_v41 = vadd.f32 %v4505_v44, %v1437_v37  ;;  %v1694_v42 = vadd.f32 %v4505_v44, %v1693_v38 }
 0x1ba   : > { %v1439_v43 = vpop.f32.mrf.mxu0  ;;  %v1695_v54 = vpop.f32.mrf.mxu1 }
 0x1bb   : > { %v3363_v47 = vpack.c.bf16 %v2181_v39, %v2181_v39  ;;  %v3427_v48 = vpack.c.bf16 %v2245_v40, %v2245_v40  ;;  %v2054_v49 = vadd.f32 %v3544_v31, %v1438_v41  ;;  %v2118_v50 = vadd.f32 %v3672_v32, %v1694_v42 }
 0x1bc   : > { %v1440_v53 = vpop.f32.mrf.mxu0  ;;  %v1696_v55 = vpop.f32.mrf.mxu1  ;;  %v3553_v42 = vunpack.c.h.bf16 %v3724_v18  ;;  %v3681_v43 = vunpack.c.h.bf16 %v3756_v19 }
 0x1bd   : > { %2822 = vst.msk [vmem:[%s4244_s24 + $0xc4] sm:$0xf] %vm2772_vm1, %v3363_v47  ;;  %2886 = vst.msk [vmem:[%s4244_s24 + $0x1c4] sm:$0xf] %vm2772_vm1, %v3427_v48  ;;  %v2182_v56 = vmax.f32 %v2054_v49, 0.0  ;;  %v2246_v57 = vmax.f32 %v2118_v50, 0.0  ;;  %v1441_v58 = vadd.f32 %v4505_v44, %v1440_v53  ;;  %v1697_v59 = vadd.f32 %v4505_v44, %v1696_v55 }
 0x1be   : > { %v1442_v60 = vpop.f32.mrf.mxu0  ;;  %v1698_v61 = vpop.f32.mrf.mxu1  ;;  %v3725_v48 = vld [vmem:[%s4210_s18 + $0xe0] sm:$0xff]  }
 0x1bf   : > { %v3364_v0 = vpack.c.bf16 %v2182_v56, %v2182_v56  ;;  %v3428_v1 = vpack.c.bf16 %v2246_v57, %v2246_v57  ;;  %v2055_v2 = vadd.f32 %v3545_v45, %v1441_v58  ;;  %v2119_v3 = vadd.f32 %v3673_v46, %v1697_v59  ;;  %v3757_v49 = vld [vmem:[%s4210_s18 + $0x1e0] sm:$0xff]  }
 0x1c0   : > { %v1445_v4 = vpop.f32.mrf.mxu0  ;;  %v1701_v5 = vpop.f32.mrf.mxu1  ;;  %v3556_v59 = vunpack.c.l.bf16 %v3725_v48  ;;  %v3684_v60 = vunpack.c.l.bf16 %v3757_v49 }
 0x1c1   : > { %2823 = vst.msk [vmem:[%s4244_s24 + $0xc8] sm:$0xf] %vm2772_vm1, %v3364_v0  ;;  %2887 = vst.msk [vmem:[%s4244_s24 + $0x1c8] sm:$0xf] %vm2772_vm1, %v3428_v1  ;;  %v2183_v6 = vmax.f32 %v2055_v2, 0.0  ;;  %v2247_v7 = vmax.f32 %v2119_v3, 0.0  ;;  %v1446_v8 = vadd.f32 %v4505_v44, %v1445_v4  ;;  %v1702_v9 = vadd.f32 %v4505_v44, %v1701_v5 }
 0x1c2   : > { %v1447_v10 = vpop.f32.mrf.mxu0  ;;  %v1703_v11 = vpop.f32.mrf.mxu1 }
 0x1c3   : > { %v3365_v14 = vpack.c.bf16 %v2183_v6, %v2183_v6  ;;  %v3429_v15 = vpack.c.bf16 %v2247_v7, %v2247_v7  ;;  %v2056_v16 = vadd.f32 %v3548_v62, %v1446_v8  ;;  %v2120_v17 = vadd.f32 %v3676_v63, %v1702_v9 }
 0x1c4   : > { %v1448_v20 = vpop.f32.mrf.mxu0  ;;  %v1704_v21 = vpop.f32.mrf.mxu1  ;;  %v3557_v9 = vunpack.c.h.bf16 %v3725_v48  ;;  %v3685_v10 = vunpack.c.h.bf16 %v3757_v49 }
 0x1c5   : > { %2824 = vst.msk [vmem:[%s4244_s24 + $0xcc] sm:$0xf] %vm2772_vm1, %v3365_v14  ;;  %2888 = vst.msk [vmem:[%s4244_s24 + $0x1cc] sm:$0xf] %vm2772_vm1, %v3429_v15  ;;  %v2184_v22 = vmax.f32 %v2056_v16, 0.0  ;;  %v2248_v23 = vmax.f32 %v2120_v17, 0.0  ;;  %v1449_v24 = vadd.f32 %v4505_v44, %v1448_v20  ;;  %v1705_v25 = vadd.f32 %v4505_v44, %v1704_v21 }
 0x1c6   : > { %v1450_v26 = vpop.f32.mrf.mxu0  ;;  %v1706_v27 = vpop.f32.mrf.mxu1  ;;  %v3726_v15 = vld [vmem:[%s4210_s18 + $0xe8] sm:$0xff]  }
 0x1c7   : > { %v3366_v30 = vpack.c.bf16 %v2184_v22, %v2184_v22  ;;  %v3430_v31 = vpack.c.bf16 %v2248_v23, %v2248_v23  ;;  %v2057_v32 = vadd.f32 %v3549_v12, %v1449_v24  ;;  %v2121_v33 = vadd.f32 %v3677_v13, %v1705_v25  ;;  %v3758_v16 = vld [vmem:[%s4210_s18 + $0x1e8] sm:$0xff]  }
 0x1c8   : > { %v1453_v34 = vpop.f32.mrf.mxu0  ;;  %v1709_v35 = vpop.f32.mrf.mxu1  ;;  %v3560_v25 = vunpack.c.l.bf16 %v3726_v15  ;;  %v3688_v26 = vunpack.c.l.bf16 %v3758_v16 }
 0x1c9   : > { %2825 = vst.msk [vmem:[%s4244_s24 + $0xd0] sm:$0xf] %vm2772_vm1, %v3366_v30  ;;  %2889 = vst.msk [vmem:[%s4244_s24 + $0x1d0] sm:$0xf] %vm2772_vm1, %v3430_v31  ;;  %v2185_v36 = vmax.f32 %v2057_v32, 0.0  ;;  %v2249_v37 = vmax.f32 %v2121_v33, 0.0  ;;  %v1454_v38 = vadd.f32 %v4505_v44, %v1453_v34  ;;  %v1710_v39 = vadd.f32 %v4505_v44, %v1709_v35 }
 0x1ca   : > { %v1455_v40 = vpop.f32.mrf.mxu0  ;;  %v1711_v41 = vpop.f32.mrf.mxu1 }
 0x1cb   : > { %v3367_v54 = vpack.c.bf16 %v2185_v36, %v2185_v36  ;;  %v3431_v45 = vpack.c.bf16 %v2249_v37, %v2249_v37  ;;  %v2058_v46 = vadd.f32 %v3552_v28, %v1454_v38  ;;  %v2122_v47 = vadd.f32 %v3680_v29, %v1710_v39 }
 0x1cc   : > { %v1456_v50 = vpop.f32.mrf.mxu0  ;;  %v1712_v51 = vpop.f32.mrf.mxu1  ;;  %v3561_v39 = vunpack.c.h.bf16 %v3726_v15  ;;  %v3689_v40 = vunpack.c.h.bf16 %v3758_v16 }
 0x1cd   : > { %2826 = vst.msk [vmem:[%s4244_s24 + $0xd4] sm:$0xf] %vm2772_vm1, %v3367_v54  ;;  %2890 = vst.msk [vmem:[%s4244_s24 + $0x1d4] sm:$0xf] %vm2772_vm1, %v3431_v45  ;;  %v2186_v52 = vmax.f32 %v2058_v46, 0.0  ;;  %v2250_v53 = vmax.f32 %v2122_v47, 0.0  ;;  %v1457_v55 = vadd.f32 %v4505_v44, %v1456_v50  ;;  %v1713_v56 = vadd.f32 %v4505_v44, %v1712_v51 }
 0x1ce   : > { %v1458_v57 = vpop.f32.mrf.mxu0  ;;  %v1714_v58 = vpop.f32.mrf.mxu1  ;;  %v4726_v44 = vld [vmem:[%s4791_s2] ss:$0 sm:$0xff]  ;;  %v3727_v45 = vld [vmem:[%s4210_s18 + $0xf0] sm:$0xff]  }
 0x1cf   : > { %v3368_v61 = vpack.c.bf16 %v2186_v52, %v2186_v52  ;;  %v3432_v62 = vpack.c.bf16 %v2250_v53, %v2250_v53  ;;  %v2059_v63 = vadd.f32 %v3553_v42, %v1457_v55  ;;  %v2123_v0 = vadd.f32 %v3681_v43, %v1713_v56  ;;  %v3759_v46 = vld [vmem:[%s4210_s18 + $0x1f0] sm:$0xff]  }
 0x1d0   : > { %v1461_v1 = vpop.f32.mrf.mxu0  ;;  %v1717_v2 = vpop.f32.mrf.mxu1  ;;  %v3564_v56 = vunpack.c.l.bf16 %v3727_v45  ;;  %v3692_v57 = vunpack.c.l.bf16 %v3759_v46 }
 0x1d1   : > { %2827 = vst.msk [vmem:[%s4244_s24 + $0xd8] sm:$0xf] %vm2772_vm1, %v3368_v61  ;;  %2891 = vst.msk [vmem:[%s4244_s24 + $0x1d8] sm:$0xf] %vm2772_vm1, %v3432_v62  ;;  %v2187_v3 = vmax.f32 %v2059_v63, 0.0  ;;  %v2251_v4 = vmax.f32 %v2123_v0, 0.0  ;;  %v1462_v5 = vadd.f32 %v4726_v44, %v1461_v1  ;;  %v1718_v6 = vadd.f32 %v4726_v44, %v1717_v2 }
 0x1d2   : > { %v1463_v7 = vpop.f32.mrf.mxu0  ;;  %v1719_v8 = vpop.f32.mrf.mxu1 }
 0x1d3   : > { %v3369_v11 = vpack.c.bf16 %v2187_v3, %v2187_v3  ;;  %v3433_v12 = vpack.c.bf16 %v2251_v4, %v2251_v4  ;;  %v2060_v13 = vadd.f32 %v3556_v59, %v1462_v5  ;;  %v2124_v14 = vadd.f32 %v3684_v60, %v1718_v6 }
 0x1d4   : > { %v1464_v17 = vpop.f32.mrf.mxu0  ;;  %v1720_v18 = vpop.f32.mrf.mxu1  ;;  %v3565_v6 = vunpack.c.h.bf16 %v3727_v45  ;;  %v3693_v7 = vunpack.c.h.bf16 %v3759_v46 }
 0x1d5   : > { %2828 = vst.msk [vmem:[%s4244_s24 + $0xdc] sm:$0xf] %vm2772_vm1, %v3369_v11  ;;  %2892 = vst.msk [vmem:[%s4244_s24 + $0x1dc] sm:$0xf] %vm2772_vm1, %v3433_v12  ;;  %v2188_v19 = vmax.f32 %v2060_v13, 0.0  ;;  %v2252_v20 = vmax.f32 %v2124_v14, 0.0  ;;  %v1465_v21 = vadd.f32 %v4726_v44, %v1464_v17  ;;  %v1721_v22 = vadd.f32 %v4726_v44, %v1720_v18 }
 0x1d6   : > { %v1466_v23 = vpop.f32.mrf.mxu0  ;;  %v1722_v24 = vpop.f32.mrf.mxu1  ;;  %v3728_v12 = vld [vmem:[%s4210_s18 + $0xf8] sm:$0xff]  }
 0x1d7   : > { %v3370_v27 = vpack.c.bf16 %v2188_v19, %v2188_v19  ;;  %v3434_v28 = vpack.c.bf16 %v2252_v20, %v2252_v20  ;;  %v2061_v29 = vadd.f32 %v3557_v9, %v1465_v21  ;;  %v2125_v30 = vadd.f32 %v3685_v10, %v1721_v22  ;;  %v3760_v13 = vld [vmem:[%s4210_s18 + $0x1f8] sm:$0xff]  }
 0x1d8   : > { %v1469_v31 = vpop.f32.mrf.mxu0  ;;  %v1725_v32 = vpop.f32.mrf.mxu1  ;;  %v3568_v22 = vunpack.c.l.bf16 %v3728_v12  ;;  %v3696_v23 = vunpack.c.l.bf16 %v3760_v13 }
 0x1d9   : > { %2829 = vst.msk [vmem:[%s4244_s24 + $0xe0] sm:$0xf] %vm2772_vm1, %v3370_v27  ;;  %2893 = vst.msk [vmem:[%s4244_s24 + $0x1e0] sm:$0xf] %vm2772_vm1, %v3434_v28  ;;  %v2189_v33 = vmax.f32 %v2061_v29, 0.0  ;;  %v2253_v34 = vmax.f32 %v2125_v30, 0.0  ;;  %v1470_v35 = vadd.f32 %v4726_v44, %v1469_v31  ;;  %v1726_v36 = vadd.f32 %v4726_v44, %v1725_v32 }
 0x1da   : > { %v1471_v37 = vpop.f32.mrf.mxu0  ;;  %v1727_v38 = vpop.f32.mrf.mxu1 }
 0x1db   : > { %v3371_v41 = vpack.c.bf16 %v2189_v33, %v2189_v33  ;;  %v3435_v42 = vpack.c.bf16 %v2253_v34, %v2253_v34  ;;  %v2062_v43 = vadd.f32 %v3560_v25, %v1470_v35  ;;  %v2126_v54 = vadd.f32 %v3688_v26, %v1726_v36 }
 0x1dc   : > { %v1472_v47 = vpop.f32.mrf.mxu0  ;;  %v1728_v48 = vpop.f32.mrf.mxu1  ;;  %v3569_v36 = vunpack.c.h.bf16 %v3728_v12  ;;  %v3697_v37 = vunpack.c.h.bf16 %v3760_v13 }
 0x1dd   : > { %2830 = vst.msk [vmem:[%s4244_s24 + $0xe4] sm:$0xf] %vm2772_vm1, %v3371_v41  ;;  %2894 = vst.msk [vmem:[%s4244_s24 + $0x1e4] sm:$0xf] %vm2772_vm1, %v3435_v42  ;;  %v2190_v49 = vmax.f32 %v2062_v43, 0.0  ;;  %v2254_v50 = vmax.f32 %v2126_v54, 0.0  ;;  %v1473_v51 = vadd.f32 %v4726_v44, %v1472_v47  ;;  %v1729_v52 = vadd.f32 %v4726_v44, %v1728_v48 }
 0x1de   : > { %v1474_v53 = vpop.f32.mrf.mxu0  ;;  %v1730_v55 = vpop.f32.mrf.mxu1 }
 0x1df   : > { %v3372_v58 = vpack.c.bf16 %v2190_v49, %v2190_v49  ;;  %v3436_v59 = vpack.c.bf16 %v2254_v50, %v2254_v50  ;;  %v2063_v60 = vadd.f32 %v3561_v39, %v1473_v51  ;;  %v2127_v61 = vadd.f32 %v3689_v40, %v1729_v52 }
 0x1e0   : > { %v1477_v62 = vpop.f32.mrf.mxu0  ;;  %v1733_v63 = vpop.f32.mrf.mxu1 }
 0x1e1   : > { %2831 = vst.msk [vmem:[%s4244_s24 + $0xe8] sm:$0xf] %vm2772_vm1, %v3372_v58  ;;  %2895 = vst.msk [vmem:[%s4244_s24 + $0x1e8] sm:$0xf] %vm2772_vm1, %v3436_v59  ;;  %v2191_v0 = vmax.f32 %v2063_v60, 0.0  ;;  %v2255_v1 = vmax.f32 %v2127_v61, 0.0  ;;  %v1478_v2 = vadd.f32 %v4726_v44, %v1477_v62  ;;  %v1734_v3 = vadd.f32 %v4726_v44, %v1733_v63 }
 0x1e2   : > { %v1479_v4 = vpop.f32.mrf.mxu0  ;;  %v1735_v5 = vpop.f32.mrf.mxu1 }
 0x1e3   : > { %v3373_v8 = vpack.c.bf16 %v2191_v0, %v2191_v0  ;;  %v3437_v9 = vpack.c.bf16 %v2255_v1, %v2255_v1  ;;  %v2064_v10 = vadd.f32 %v3564_v56, %v1478_v2  ;;  %v2128_v11 = vadd.f32 %v3692_v57, %v1734_v3 }
 0x1e4   : > { %v1480_v14 = vpop.f32.mrf.mxu0  ;;  %v1736_v15 = vpop.f32.mrf.mxu1 }
 0x1e5   : > { %2832 = vst.msk [vmem:[%s4244_s24 + $0xec] sm:$0xf] %vm2772_vm1, %v3373_v8  ;;  %2896 = vst.msk [vmem:[%s4244_s24 + $0x1ec] sm:$0xf] %vm2772_vm1, %v3437_v9  ;;  %v2192_v16 = vmax.f32 %v2064_v10, 0.0  ;;  %v2256_v17 = vmax.f32 %v2128_v11, 0.0  ;;  %v1481_v18 = vadd.f32 %v4726_v44, %v1480_v14  ;;  %v1737_v19 = vadd.f32 %v4726_v44, %v1736_v15 }
 0x1e6   : > { %v1482_v20 = vpop.f32.mrf.mxu0  ;;  %v1738_v21 = vpop.f32.mrf.mxu1 }
 0x1e7   : > { %v3374_v24 = vpack.c.bf16 %v2192_v16, %v2192_v16  ;;  %v3438_v25 = vpack.c.bf16 %v2256_v17, %v2256_v17  ;;  %v2065_v26 = vadd.f32 %v3565_v6, %v1481_v18  ;;  %v2129_v27 = vadd.f32 %v3693_v7, %v1737_v19 }
 0x1e8   : > { %v1485_v28 = vpop.f32.mrf.mxu0  ;;  %v1741_v29 = vpop.f32.mrf.mxu1 }
 0x1e9   : > { %2833 = vst.msk [vmem:[%s4244_s24 + $0xf0] sm:$0xf] %vm2772_vm1, %v3374_v24  ;;  %2897 = vst.msk [vmem:[%s4244_s24 + $0x1f0] sm:$0xf] %vm2772_vm1, %v3438_v25  ;;  %v2193_v30 = vmax.f32 %v2065_v26, 0.0  ;;  %v2257_v31 = vmax.f32 %v2129_v27, 0.0  ;;  %v1486_v32 = vadd.f32 %v4726_v44, %v1485_v28  ;;  %v1742_v33 = vadd.f32 %v4726_v44, %v1741_v29 }
 0x1ea   : > { %v1487_v34 = vpop.f32.mrf.mxu0  ;;  %v1743_v35 = vpop.f32.mrf.mxu1 }
 0x1eb   : > { %v3375_v38 = vpack.c.bf16 %v2193_v30, %v2193_v30  ;;  %v3439_v39 = vpack.c.bf16 %v2257_v31, %v2257_v31  ;;  %v2066_v40 = vadd.f32 %v3568_v22, %v1486_v32  ;;  %v2130_v41 = vadd.f32 %v3696_v23, %v1742_v33 }
 0x1ec   : > { %v1488_v42 = vpop.f32.mrf.mxu0  ;;  %v1744_v43 = vpop.f32.mrf.mxu1 }
 0x1ed   : > { %2834 = vst.msk [vmem:[%s4244_s24 + $0xf4] sm:$0xf] %vm2772_vm1, %v3375_v38  ;;  %2898 = vst.msk [vmem:[%s4244_s24 + $0x1f4] sm:$0xf] %vm2772_vm1, %v3439_v39  ;;  %v2194_v54 = vmax.f32 %v2066_v40, 0.0  ;;  %v2258_v45 = vmax.f32 %v2130_v41, 0.0  ;;  %v1489_v46 = vadd.f32 %v4726_v44, %v1488_v42  ;;  %v1745_v47 = vadd.f32 %v4726_v44, %v1744_v43 }
 0x1ee   : > { %v1490_v48 = vpop.f32.mrf.mxu0  ;;  %v1746_v49 = vpop.f32.mrf.mxu1 }
 0x1ef   : > { %v3376_v50 = vpack.c.bf16 %v2194_v54, %v2194_v54  ;;  %v3440_v51 = vpack.c.bf16 %v2258_v45, %v2258_v45  ;;  %v2067_v52 = vadd.f32 %v3569_v36, %v1489_v46  ;;  %v2131_v53 = vadd.f32 %v3697_v37, %v1745_v47 }
 0x1f1   : > { %2835 = vst.msk [vmem:[%s4244_s24 + $0xf8] sm:$0xf] %vm2772_vm1, %v3376_v50  ;;  %2899 = vst.msk [vmem:[%s4244_s24 + $0x1f8] sm:$0xf] %vm2772_vm1, %v3440_v51  ;;  %v2195_v55 = vmax.f32 %v2067_v52, 0.0  ;;  %v2259_v56 = vmax.f32 %v2131_v53, 0.0 }
 0x1f3   : > { %v3377_v57 = vpack.c.bf16 %v2195_v55, %v2195_v55  ;;  %v3441_v58 = vpack.c.bf16 %v2259_v56, %v2259_v56 }
 0x1f5   : > { %2836 = vst.msk [vmem:[%s4244_s24 + $0xfc] sm:$0xf] %vm2772_vm1, %v3377_v57  ;;  %2900 = vst.msk [vmem:[%s4244_s24 + $0x1fc] sm:$0xf] %vm2772_vm1, %v3441_v58 }
 0x1f6 PF: > { %s14_s15 = sadd.s32 1, %s3981_s15  }
 0x1f7   : > { %p11_p4 = scmp.ge.s32.totalorder %s14_s15, 4  }
 0x1f9   :  { %13 = sbr.rel (!%p11_p4) target bundleno = 1 (0x1), region = 69 }

// kernel: _lambda_.14
= control target key start
LH: loop header
LB: loop body
LE: loop exit
PB: predicated region body
PF: predicated region fallthrough
CT: control target
= control target key end

     0   :  { %vm254_vm0 = vcmask 130048   ;;  %vm896_vm1 = vcmask 257024   ;;  %s1769_s1 = inlined_call_operand.vmem [shape: bf16[16,32], index: 1, kind: input, shape index: {}]   ;;  %s1770_s0 = inlined_call_operand.vmem [shape: bf16[512,16], index: 0, kind: input, shape index: {}]   ;;  %s1771_s2 = inlined_call_operand.vmem [shape: f32[1,32], index: 2, kind: input, shape index: {}]   ;;  %s1772_s3 = inlined_call_operand.vmem [shape: bf16[512,32], index: 3, kind: output, shape index: {}]  }
   0x1   :  { %v1260_v0 = vld [vmem:[%s1769_s1] sm:$0xff]   ;;  %v1263_v3 = vld [vmem:[%s1770_s0 + $0x8] sm:$0xff]   ;;  %v1265_v5 = vld [vmem:[%s1770_s0 + $0x10] sm:$0xff]  }
   0x2   :  { %v1261_v1 = vld [vmem:[%s1770_s0] sm:$0xff]   ;;  %1192 = vmatprep.subr.bf16.mxu0 %v1260_v0  ;;  %1258 = vmatprep.subr.bf16.mxu1 %v1260_v0  ;;  %v1264_v4 = vld [vmem:[%s1770_s0 + $0x88] sm:$0xff]   ;;  %v1266_v6 = vld [vmem:[%s1770_s0 + $0x90] sm:$0xff]  }
   0x3   :  { %v1262_v2 = vld [vmem:[%s1770_s0 + $0x80] sm:$0xff]   ;;  %1193 = vmatpush3.bf16.msra.mxu0 %v1260_v0  ;;  %1259 = vmatpush3.bf16.msra.mxu1 %v1260_v0  ;;  %v1267_v7 = vld [vmem:[%s1770_s0 + $0x18] sm:$0xff]   ;;  %v1271_v11 = vld [vmem:[%s1770_s0 + $0x28] sm:$0xff]  }
   0x4   :  { %1194 = vmatprep.mubr.msk.bf16.mxu0 %vm254_vm0, %v1261_v1  ;;  %1226 = vmatprep.mubr.msk.bf16.mxu1 %vm254_vm0, %v1262_v2  ;;  %v1268_v8 = vld [vmem:[%s1770_s0 + $0x98] sm:$0xff]   ;;  %v1269_v9 = vld [vmem:[%s1770_s0 + $0x20] sm:$0xff]   ;;  %v1272_v12 = vld [vmem:[%s1770_s0 + $0xa8] sm:$0xff]  }
   0x5   :  { %v1270_v10 = vld [vmem:[%s1770_s0 + $0xa0] sm:$0xff]   ;;  %v1273_v13 = vld [vmem:[%s1770_s0 + $0x30] sm:$0xff]   ;;  %v1275_v15 = vld [vmem:[%s1770_s0 + $0x38] sm:$0xff]  }
   0x6   :  { %1195 = vmatmul.mubr.msk.bf16.vlgmr.msra.gmra.mxu0 %vm254_vm0, %v1263_v3  ;;  %1227 = vmatmul.mubr.msk.bf16.vlgmr.msra.gmra.mxu1 %vm254_vm0, %v1264_v4  ;;  %v1274_v14 = vld [vmem:[%s1770_s0 + $0xb0] sm:$0xff]   ;;  %v1276_v16 = vld [vmem:[%s1770_s0 + $0xb8] sm:$0xff]   ;;  %v1277_v17 = vld [vmem:[%s1770_s0 + $0x40] sm:$0xff]  }
   0x7   :  { %1198 = vmatprep.mubr.msk.bf16.mxu0 %vm254_vm0, %v1265_v5  ;;  %1230 = vmatprep.mubr.msk.bf16.mxu1 %vm254_vm0, %v1266_v6  ;;  %v1278_v18 = vld [vmem:[%s1770_s0 + $0xc0] sm:$0xff]   ;;  %v1279_v19 = vld [vmem:[%s1770_s0 + $0x48] sm:$0xff]   ;;  %v1281_v21 = vld [vmem:[%s1770_s0 + $0x50] sm:$0xff]  }
   0x8   :  { %v1280_v20 = vld [vmem:[%s1770_s0 + $0xc8] sm:$0xff]   ;;  %v1282_v22 = vld [vmem:[%s1770_s0 + $0xd0] sm:$0xff]   ;;  %v1283_v23 = vld [vmem:[%s1770_s0 + $0x58] sm:$0xff]  }
   0x9   :  { %v1284_v24 = vld [vmem:[%s1770_s0 + $0xd8] sm:$0xff]   ;;  %v1285_v25 = vld [vmem:[%s1770_s0 + $0x60] sm:$0xff]   ;;  %v1287_v27 = vld [vmem:[%s1770_s0 + $0x68] sm:$0xff]  }
   0xa   :  { %v1286_v26 = vld [vmem:[%s1770_s0 + $0xe0] sm:$0xff]   ;;  %v1288_v28 = vld [vmem:[%s1770_s0 + $0xe8] sm:$0xff]   ;;  %v1289_v29 = vld [vmem:[%s1770_s0 + $0x70] sm:$0xff]  }
   0xb   :  { %v1290_v30 = vld [vmem:[%s1770_s0 + $0xf0] sm:$0xff]   ;;  %v1291_v31 = vld [vmem:[%s1770_s0 + $0x78] sm:$0xff]   ;;  %v1447_v33 = vld [vmem:[%s1771_s2] ss:$0 sm:$0xff] }
   0xc   :  { %v1292_v32 = vld [vmem:[%s1770_s0 + $0xf8] sm:$0xff]  }
   0xe   :  { %1199 = vmatmul.mubr.msk.bf16.gmra.mxu0 %vm254_vm0, %v1267_v7  ;;  %1231 = vmatmul.mubr.msk.bf16.gmra.mxu1 %vm254_vm0, %v1268_v8 }
   0xf   :  { %1202 = vmatprep.mubr.msk.bf16.mxu0 %vm254_vm0, %v1269_v9  ;;  %1234 = vmatprep.mubr.msk.bf16.mxu1 %vm254_vm0, %v1270_v10 }
  0x16   :  { %1203 = vmatmul.mubr.msk.bf16.gmra.mxu0 %vm254_vm0, %v1271_v11  ;;  %1235 = vmatmul.mubr.msk.bf16.gmra.mxu1 %vm254_vm0, %v1272_v12 }
  0x17   :  { %1206 = vmatprep.mubr.msk.bf16.mxu0 %vm254_vm0, %v1273_v13  ;;  %1238 = vmatprep.mubr.msk.bf16.mxu1 %vm254_vm0, %v1274_v14 }
  0x1e   :  { %1207 = vmatmul.mubr.msk.bf16.gmra.mxu0 %vm254_vm0, %v1275_v15  ;;  %1239 = vmatmul.mubr.msk.bf16.gmra.mxu1 %vm254_vm0, %v1276_v16 }
  0x1f   :  { %1210 = vmatprep.mubr.msk.bf16.mxu0 %vm254_vm0, %v1277_v17  ;;  %1242 = vmatprep.mubr.msk.bf16.mxu1 %vm254_vm0, %v1278_v18 }
  0x26   :  { %1211 = vmatmul.mubr.msk.bf16.gmra.mxu0 %vm254_vm0, %v1279_v19  ;;  %1243 = vmatmul.mubr.msk.bf16.gmra.mxu1 %vm254_vm0, %v1280_v20 }
  0x27   :  { %1214 = vmatprep.mubr.msk.bf16.mxu0 %vm254_vm0, %v1281_v21  ;;  %1246 = vmatprep.mubr.msk.bf16.mxu1 %vm254_vm0, %v1282_v22 }
  0x2e   :  { %1215 = vmatmul.mubr.msk.bf16.gmra.mxu0 %vm254_vm0, %v1283_v23  ;;  %1247 = vmatmul.mubr.msk.bf16.gmra.mxu1 %vm254_vm0, %v1284_v24 }
  0x2f   :  { %1218 = vmatprep.mubr.msk.bf16.mxu0 %vm254_vm0, %v1285_v25  ;;  %1250 = vmatprep.mubr.msk.bf16.mxu1 %vm254_vm0, %v1286_v26 }
  0x36   :  { %1219 = vmatmul.mubr.msk.bf16.gmra.mxu0 %vm254_vm0, %v1287_v27  ;;  %1251 = vmatmul.mubr.msk.bf16.gmra.mxu1 %vm254_vm0, %v1288_v28 }
  0x37   :  { %1222 = vmatprep.mubr.msk.bf16.mxu0 %vm254_vm0, %v1289_v29  ;;  %1254 = vmatprep.mubr.msk.bf16.mxu1 %vm254_vm0, %v1290_v30 }
  0x3e   :  { %1223 = vmatmul.mubr.msk.bf16.gmra.mxu0 %vm254_vm0, %v1291_v31  ;;  %1255 = vmatmul.mubr.msk.bf16.gmra.mxu1 %vm254_vm0, %v1292_v32 }
  0xc6   :  { %v1196_v34 = vpop.f32.mrf.mxu0  ;;  %v1228_v35 = vpop.f32.mrf.mxu1 }
  0xc7   :  { %v394_v36 = vadd.f32 %v1196_v34, %v1447_v33  ;;  %v522_v37 = vadd.f32 %v1228_v35, %v1447_v33 }
  0xc8   :  { %v385_v38 = vpop.f32.mrf.mxu0  ;;  %v513_v39 = vpop.f32.mrf.mxu1 }
  0xc9   :  { %v1097_v40 = vpack.c.bf16 %v394_v36, %v394_v36  ;;  %v1129_v41 = vpack.c.bf16 %v522_v37, %v522_v37  ;;  %v386_v42 = vadd.f32 %v1447_v33, %v385_v38  ;;  %v514_v43 = vadd.f32 %v1447_v33, %v513_v39 }
  0xca   :  { %v1197_v44 = vpop.f32.mrf.mxu0  ;;  %v1229_v45 = vpop.f32.mrf.mxu1 }
  0xcb   :  { %899 = vst.msk [vmem:[%s1772_s3 + $0x8] sm:$0xf] %vm896_vm1, %v1097_v40  ;;  %931 = vst.msk [vmem:[%s1772_s3 + $0x88] sm:$0xf] %vm896_vm1, %v1129_v41  ;;  %v1095_v46 = vpack.c.bf16 %v386_v42, %v386_v42  ;;  %v1127_v47 = vpack.c.bf16 %v514_v43, %v514_v43  ;;  %v397_v48 = vadd.f32 %v1197_v44, %v1447_v33 }
  0xcc   :  { %v525_v49 = vadd.f32 %v1229_v45, %v1447_v33  ;;  %v388_v50 = vpop.f32.mrf.mxu0  ;;  %v516_v51 = vpop.f32.mrf.mxu1 }
  0xcd   :  { %897 = vst.msk [vmem:[%s1772_s3] sm:$0xf] %vm896_vm1, %v1095_v46  ;;  %929 = vst.msk [vmem:[%s1772_s3 + $0x80] sm:$0xf] %vm896_vm1, %v1127_v47  ;;  %v1098_v52 = vpack.c.bf16 %v397_v48, %v397_v48  ;;  %v389_v54 = vadd.f32 %v1447_v33, %v388_v50  ;;  %v517_v55 = vadd.f32 %v1447_v33, %v516_v51 }
  0xce   :  { %v1130_v53 = vpack.c.bf16 %v525_v49, %v525_v49  ;;  %v1200_v56 = vpop.f32.mrf.mxu0  ;;  %v1232_v57 = vpop.f32.mrf.mxu1 }
  0xcf   :  { %900 = vst.msk [vmem:[%s1772_s3 + $0xc] sm:$0xf] %vm896_vm1, %v1098_v52  ;;  %v1096_v58 = vpack.c.bf16 %v389_v54, %v389_v54  ;;  %v1128_v59 = vpack.c.bf16 %v517_v55, %v517_v55  ;;  %v410_v60 = vadd.f32 %v1200_v56, %v1447_v33  ;;  %v538_v61 = vadd.f32 %v1232_v57, %v1447_v33 }
  0xd0   :  { %932 = vst.msk [vmem:[%s1772_s3 + $0x8c] sm:$0xf] %vm896_vm1, %v1130_v53  ;;  %v401_v62 = vpop.f32.mrf.mxu0  ;;  %v529_v63 = vpop.f32.mrf.mxu1 }
  0xd1   :  { %898 = vst.msk [vmem:[%s1772_s3 + $0x4] sm:$0xf] %vm896_vm1, %v1096_v58  ;;  %930 = vst.msk [vmem:[%s1772_s3 + $0x84] sm:$0xf] %vm896_vm1, %v1128_v59  ;;  %v1101_v0 = vpack.c.bf16 %v410_v60, %v410_v60  ;;  %v1133_v1 = vpack.c.bf16 %v538_v61, %v538_v61  ;;  %v402_v2 = vadd.f32 %v1447_v33, %v401_v62 }
  0xd2   :  { %v530_v3 = vadd.f32 %v1447_v33, %v529_v63  ;;  %v1201_v4 = vpop.f32.mrf.mxu0  ;;  %v1233_v5 = vpop.f32.mrf.mxu1 }
  0xd3   :  { %903 = vst.msk [vmem:[%s1772_s3 + $0x18] sm:$0xf] %vm896_vm1, %v1101_v0  ;;  %935 = vst.msk [vmem:[%s1772_s3 + $0x98] sm:$0xf] %vm896_vm1, %v1133_v1  ;;  %v1099_v6 = vpack.c.bf16 %v402_v2, %v402_v2  ;;  %v413_v8 = vadd.f32 %v1201_v4, %v1447_v33  ;;  %v541_v9 = vadd.f32 %v1233_v5, %v1447_v33 }
  0xd4   :  { %v1131_v7 = vpack.c.bf16 %v530_v3, %v530_v3  ;;  %v404_v10 = vpop.f32.mrf.mxu0  ;;  %v532_v11 = vpop.f32.mrf.mxu1 }
  0xd5   :  { %901 = vst.msk [vmem:[%s1772_s3 + $0x10] sm:$0xf] %vm896_vm1, %v1099_v6  ;;  %v1102_v12 = vpack.c.bf16 %v413_v8, %v413_v8  ;;  %v1134_v13 = vpack.c.bf16 %v541_v9, %v541_v9  ;;  %v405_v14 = vadd.f32 %v1447_v33, %v404_v10  ;;  %v533_v15 = vadd.f32 %v1447_v33, %v532_v11 }
  0xd6   :  { %933 = vst.msk [vmem:[%s1772_s3 + $0x90] sm:$0xf] %vm896_vm1, %v1131_v7  ;;  %v1204_v16 = vpop.f32.mrf.mxu0  ;;  %v1236_v17 = vpop.f32.mrf.mxu1 }
  0xd7   :  { %904 = vst.msk [vmem:[%s1772_s3 + $0x1c] sm:$0xf] %vm896_vm1, %v1102_v12  ;;  %936 = vst.msk [vmem:[%s1772_s3 + $0x9c] sm:$0xf] %vm896_vm1, %v1134_v13  ;;  %v1100_v18 = vpack.c.bf16 %v405_v14, %v405_v14  ;;  %v1132_v19 = vpack.c.bf16 %v533_v15, %v533_v15  ;;  %v426_v20 = vadd.f32 %v1204_v16, %v1447_v33 }
  0xd8   :  { %v554_v21 = vadd.f32 %v1236_v17, %v1447_v33  ;;  %v417_v22 = vpop.f32.mrf.mxu0  ;;  %v545_v23 = vpop.f32.mrf.mxu1 }
  0xd9   :  { %902 = vst.msk [vmem:[%s1772_s3 + $0x14] sm:$0xf] %vm896_vm1, %v1100_v18  ;;  %934 = vst.msk [vmem:[%s1772_s3 + $0x94] sm:$0xf] %vm896_vm1, %v1132_v19  ;;  %v1105_v24 = vpack.c.bf16 %v426_v20, %v426_v20  ;;  %v418_v26 = vadd.f32 %v1447_v33, %v417_v22  ;;  %v546_v27 = vadd.f32 %v1447_v33, %v545_v23 }
  0xda   :  { %v1137_v25 = vpack.c.bf16 %v554_v21, %v554_v21  ;;  %v1205_v28 = vpop.f32.mrf.mxu0  ;;  %v1237_v29 = vpop.f32.mrf.mxu1 }
  0xdb   :  { %907 = vst.msk [vmem:[%s1772_s3 + $0x28] sm:$0xf] %vm896_vm1, %v1105_v24  ;;  %v1103_v30 = vpack.c.bf16 %v418_v26, %v418_v26  ;;  %v1135_v31 = vpack.c.bf16 %v546_v27, %v546_v27  ;;  %v429_v32 = vadd.f32 %v1205_v28, %v1447_v33  ;;  %v557_v34 = vadd.f32 %v1237_v29, %v1447_v33 }
  0xdc   :  { %939 = vst.msk [vmem:[%s1772_s3 + $0xa8] sm:$0xf] %vm896_vm1, %v1137_v25  ;;  %v420_v35 = vpop.f32.mrf.mxu0  ;;  %v548_v36 = vpop.f32.mrf.mxu1 }
  0xdd   :  { %905 = vst.msk [vmem:[%s1772_s3 + $0x20] sm:$0xf] %vm896_vm1, %v1103_v30  ;;  %937 = vst.msk [vmem:[%s1772_s3 + $0xa0] sm:$0xf] %vm896_vm1, %v1135_v31  ;;  %v1106_v37 = vpack.c.bf16 %v429_v32, %v429_v32  ;;  %v1138_v38 = vpack.c.bf16 %v557_v34, %v557_v34  ;;  %v421_v39 = vadd.f32 %v1447_v33, %v420_v35 }
  0xde   :  { %v549_v40 = vadd.f32 %v1447_v33, %v548_v36  ;;  %v1208_v41 = vpop.f32.mrf.mxu0  ;;  %v1240_v42 = vpop.f32.mrf.mxu1 }
  0xdf   :  { %908 = vst.msk [vmem:[%s1772_s3 + $0x2c] sm:$0xf] %vm896_vm1, %v1106_v37  ;;  %940 = vst.msk [vmem:[%s1772_s3 + $0xac] sm:$0xf] %vm896_vm1, %v1138_v38  ;;  %v1104_v43 = vpack.c.bf16 %v421_v39, %v421_v39  ;;  %v442_v45 = vadd.f32 %v1208_v41, %v1447_v33  ;;  %v570_v46 = vadd.f32 %v1240_v42, %v1447_v33 }
  0xe0   :  { %v1136_v44 = vpack.c.bf16 %v549_v40, %v549_v40  ;;  %v433_v47 = vpop.f32.mrf.mxu0  ;;  %v561_v48 = vpop.f32.mrf.mxu1 }
  0xe1   :  { %906 = vst.msk [vmem:[%s1772_s3 + $0x24] sm:$0xf] %vm896_vm1, %v1104_v43  ;;  %v1109_v49 = vpack.c.bf16 %v442_v45, %v442_v45  ;;  %v1141_v50 = vpack.c.bf16 %v570_v46, %v570_v46  ;;  %v434_v51 = vadd.f32 %v1447_v33, %v433_v47  ;;  %v562_v52 = vadd.f32 %v1447_v33, %v561_v48 }
  0xe2   :  { %938 = vst.msk [vmem:[%s1772_s3 + $0xa4] sm:$0xf] %vm896_vm1, %v1136_v44  ;;  %v1209_v53 = vpop.f32.mrf.mxu0  ;;  %v1241_v54 = vpop.f32.mrf.mxu1 }
  0xe3   :  { %911 = vst.msk [vmem:[%s1772_s3 + $0x38] sm:$0xf] %vm896_vm1, %v1109_v49  ;;  %943 = vst.msk [vmem:[%s1772_s3 + $0xb8] sm:$0xf] %vm896_vm1, %v1141_v50  ;;  %v1107_v55 = vpack.c.bf16 %v434_v51, %v434_v51  ;;  %v1139_v56 = vpack.c.bf16 %v562_v52, %v562_v52  ;;  %v445_v57 = vadd.f32 %v1209_v53, %v1447_v33 }
  0xe4   :  { %v573_v58 = vadd.f32 %v1241_v54, %v1447_v33  ;;  %v436_v59 = vpop.f32.mrf.mxu0  ;;  %v564_v60 = vpop.f32.mrf.mxu1 }
  0xe5   :  { %909 = vst.msk [vmem:[%s1772_s3 + $0x30] sm:$0xf] %vm896_vm1, %v1107_v55  ;;  %941 = vst.msk [vmem:[%s1772_s3 + $0xb0] sm:$0xf] %vm896_vm1, %v1139_v56  ;;  %v1110_v61 = vpack.c.bf16 %v445_v57, %v445_v57  ;;  %v437_v63 = vadd.f32 %v1447_v33, %v436_v59  ;;  %v565_v0 = vadd.f32 %v1447_v33, %v564_v60 }
  0xe6   :  { %v1142_v62 = vpack.c.bf16 %v573_v58, %v573_v58  ;;  %v1212_v1 = vpop.f32.mrf.mxu0  ;;  %v1244_v2 = vpop.f32.mrf.mxu1 }
  0xe7   :  { %912 = vst.msk [vmem:[%s1772_s3 + $0x3c] sm:$0xf] %vm896_vm1, %v1110_v61  ;;  %v1108_v3 = vpack.c.bf16 %v437_v63, %v437_v63  ;;  %v1140_v4 = vpack.c.bf16 %v565_v0, %v565_v0  ;;  %v458_v5 = vadd.f32 %v1212_v1, %v1447_v33  ;;  %v586_v6 = vadd.f32 %v1244_v2, %v1447_v33 }
  0xe8   :  { %944 = vst.msk [vmem:[%s1772_s3 + $0xbc] sm:$0xf] %vm896_vm1, %v1142_v62  ;;  %v449_v7 = vpop.f32.mrf.mxu0  ;;  %v577_v8 = vpop.f32.mrf.mxu1 }
  0xe9   :  { %910 = vst.msk [vmem:[%s1772_s3 + $0x34] sm:$0xf] %vm896_vm1, %v1108_v3  ;;  %942 = vst.msk [vmem:[%s1772_s3 + $0xb4] sm:$0xf] %vm896_vm1, %v1140_v4  ;;  %v1113_v9 = vpack.c.bf16 %v458_v5, %v458_v5  ;;  %v1145_v10 = vpack.c.bf16 %v586_v6, %v586_v6  ;;  %v450_v11 = vadd.f32 %v1447_v33, %v449_v7 }
  0xea   :  { %v578_v12 = vadd.f32 %v1447_v33, %v577_v8  ;;  %v1213_v13 = vpop.f32.mrf.mxu0  ;;  %v1245_v14 = vpop.f32.mrf.mxu1 }
  0xeb   :  { %915 = vst.msk [vmem:[%s1772_s3 + $0x48] sm:$0xf] %vm896_vm1, %v1113_v9  ;;  %947 = vst.msk [vmem:[%s1772_s3 + $0xc8] sm:$0xf] %vm896_vm1, %v1145_v10  ;;  %v1111_v15 = vpack.c.bf16 %v450_v11, %v450_v11  ;;  %v461_v17 = vadd.f32 %v1213_v13, %v1447_v33  ;;  %v589_v18 = vadd.f32 %v1245_v14, %v1447_v33 }
  0xec   :  { %v1143_v16 = vpack.c.bf16 %v578_v12, %v578_v12  ;;  %v452_v19 = vpop.f32.mrf.mxu0  ;;  %v580_v20 = vpop.f32.mrf.mxu1 }
  0xed   :  { %913 = vst.msk [vmem:[%s1772_s3 + $0x40] sm:$0xf] %vm896_vm1, %v1111_v15  ;;  %v1114_v21 = vpack.c.bf16 %v461_v17, %v461_v17  ;;  %v1146_v22 = vpack.c.bf16 %v589_v18, %v589_v18  ;;  %v453_v23 = vadd.f32 %v1447_v33, %v452_v19  ;;  %v581_v24 = vadd.f32 %v1447_v33, %v580_v20 }
  0xee   :  { %945 = vst.msk [vmem:[%s1772_s3 + $0xc0] sm:$0xf] %vm896_vm1, %v1143_v16  ;;  %v1216_v25 = vpop.f32.mrf.mxu0  ;;  %v1248_v26 = vpop.f32.mrf.mxu1 }
  0xef   :  { %916 = vst.msk [vmem:[%s1772_s3 + $0x4c] sm:$0xf] %vm896_vm1, %v1114_v21  ;;  %948 = vst.msk [vmem:[%s1772_s3 + $0xcc] sm:$0xf] %vm896_vm1, %v1146_v22  ;;  %v1112_v27 = vpack.c.bf16 %v453_v23, %v453_v23  ;;  %v1144_v28 = vpack.c.bf16 %v581_v24, %v581_v24  ;;  %v474_v29 = vadd.f32 %v1216_v25, %v1447_v33 }
  0xf0   :  { %v602_v30 = vadd.f32 %v1248_v26, %v1447_v33  ;;  %v465_v31 = vpop.f32.mrf.mxu0  ;;  %v593_v32 = vpop.f32.mrf.mxu1 }
  0xf1   :  { %914 = vst.msk [vmem:[%s1772_s3 + $0x44] sm:$0xf] %vm896_vm1, %v1112_v27  ;;  %946 = vst.msk [vmem:[%s1772_s3 + $0xc4] sm:$0xf] %vm896_vm1, %v1144_v28  ;;  %v1117_v34 = vpack.c.bf16 %v474_v29, %v474_v29  ;;  %v466_v36 = vadd.f32 %v1447_v33, %v465_v31  ;;  %v594_v37 = vadd.f32 %v1447_v33, %v593_v32 }
  0xf2   :  { %v1149_v35 = vpack.c.bf16 %v602_v30, %v602_v30  ;;  %v1217_v38 = vpop.f32.mrf.mxu0  ;;  %v1249_v39 = vpop.f32.mrf.mxu1 }
  0xf3   :  { %919 = vst.msk [vmem:[%s1772_s3 + $0x58] sm:$0xf] %vm896_vm1, %v1117_v34  ;;  %v1115_v40 = vpack.c.bf16 %v466_v36, %v466_v36  ;;  %v1147_v41 = vpack.c.bf16 %v594_v37, %v594_v37  ;;  %v477_v42 = vadd.f32 %v1217_v38, %v1447_v33  ;;  %v605_v43 = vadd.f32 %v1249_v39, %v1447_v33 }
  0xf4   :  { %951 = vst.msk [vmem:[%s1772_s3 + $0xd8] sm:$0xf] %vm896_vm1, %v1149_v35  ;;  %v468_v44 = vpop.f32.mrf.mxu0  ;;  %v596_v45 = vpop.f32.mrf.mxu1 }
  0xf5   :  { %917 = vst.msk [vmem:[%s1772_s3 + $0x50] sm:$0xf] %vm896_vm1, %v1115_v40  ;;  %949 = vst.msk [vmem:[%s1772_s3 + $0xd0] sm:$0xf] %vm896_vm1, %v1147_v41  ;;  %v1118_v46 = vpack.c.bf16 %v477_v42, %v477_v42  ;;  %v1150_v47 = vpack.c.bf16 %v605_v43, %v605_v43  ;;  %v469_v48 = vadd.f32 %v1447_v33, %v468_v44 }
  0xf6   :  { %v597_v49 = vadd.f32 %v1447_v33, %v596_v45  ;;  %v1220_v50 = vpop.f32.mrf.mxu0  ;;  %v1252_v51 = vpop.f32.mrf.mxu1 }
  0xf7   :  { %920 = vst.msk [vmem:[%s1772_s3 + $0x5c] sm:$0xf] %vm896_vm1, %v1118_v46  ;;  %952 = vst.msk [vmem:[%s1772_s3 + $0xdc] sm:$0xf] %vm896_vm1, %v1150_v47  ;;  %v1116_v52 = vpack.c.bf16 %v469_v48, %v469_v48  ;;  %v490_v54 = vadd.f32 %v1220_v50, %v1447_v33  ;;  %v618_v55 = vadd.f32 %v1252_v51, %v1447_v33 }
  0xf8   :  { %v1148_v53 = vpack.c.bf16 %v597_v49, %v597_v49  ;;  %v481_v56 = vpop.f32.mrf.mxu0  ;;  %v609_v57 = vpop.f32.mrf.mxu1 }
  0xf9   :  { %918 = vst.msk [vmem:[%s1772_s3 + $0x54] sm:$0xf] %vm896_vm1, %v1116_v52  ;;  %v1121_v58 = vpack.c.bf16 %v490_v54, %v490_v54  ;;  %v1153_v59 = vpack.c.bf16 %v618_v55, %v618_v55  ;;  %v482_v60 = vadd.f32 %v1447_v33, %v481_v56  ;;  %v610_v61 = vadd.f32 %v1447_v33, %v609_v57 }
  0xfa   :  { %950 = vst.msk [vmem:[%s1772_s3 + $0xd4] sm:$0xf] %vm896_vm1, %v1148_v53  ;;  %v1221_v62 = vpop.f32.mrf.mxu0  ;;  %v1253_v63 = vpop.f32.mrf.mxu1 }
  0xfb   :  { %923 = vst.msk [vmem:[%s1772_s3 + $0x68] sm:$0xf] %vm896_vm1, %v1121_v58  ;;  %955 = vst.msk [vmem:[%s1772_s3 + $0xe8] sm:$0xf] %vm896_vm1, %v1153_v59  ;;  %v1119_v0 = vpack.c.bf16 %v482_v60, %v482_v60  ;;  %v1151_v1 = vpack.c.bf16 %v610_v61, %v610_v61  ;;  %v493_v2 = vadd.f32 %v1221_v62, %v1447_v33 }
  0xfc   :  { %v621_v3 = vadd.f32 %v1253_v63, %v1447_v33  ;;  %v484_v4 = vpop.f32.mrf.mxu0  ;;  %v612_v5 = vpop.f32.mrf.mxu1 }
  0xfd   :  { %921 = vst.msk [vmem:[%s1772_s3 + $0x60] sm:$0xf] %vm896_vm1, %v1119_v0  ;;  %953 = vst.msk [vmem:[%s1772_s3 + $0xe0] sm:$0xf] %vm896_vm1, %v1151_v1  ;;  %v1122_v6 = vpack.c.bf16 %v493_v2, %v493_v2  ;;  %v485_v8 = vadd.f32 %v1447_v33, %v484_v4  ;;  %v613_v9 = vadd.f32 %v1447_v33, %v612_v5 }
  0xfe   :  { %v1154_v7 = vpack.c.bf16 %v621_v3, %v621_v3  ;;  %v1224_v10 = vpop.f32.mrf.mxu0  ;;  %v1256_v11 = vpop.f32.mrf.mxu1 }
  0xff   :  { %924 = vst.msk [vmem:[%s1772_s3 + $0x6c] sm:$0xf] %vm896_vm1, %v1122_v6  ;;  %v1120_v12 = vpack.c.bf16 %v485_v8, %v485_v8  ;;  %v1152_v13 = vpack.c.bf16 %v613_v9, %v613_v9  ;;  %v506_v14 = vadd.f32 %v1224_v10, %v1447_v33  ;;  %v634_v15 = vadd.f32 %v1256_v11, %v1447_v33 }
 0x100   :  { %956 = vst.msk [vmem:[%s1772_s3 + $0xec] sm:$0xf] %vm896_vm1, %v1154_v7  ;;  %v497_v16 = vpop.f32.mrf.mxu0  ;;  %v625_v17 = vpop.f32.mrf.mxu1 }
 0x101   :  { %922 = vst.msk [vmem:[%s1772_s3 + $0x64] sm:$0xf] %vm896_vm1, %v1120_v12  ;;  %954 = vst.msk [vmem:[%s1772_s3 + $0xe4] sm:$0xf] %vm896_vm1, %v1152_v13  ;;  %v1125_v18 = vpack.c.bf16 %v506_v14, %v506_v14  ;;  %v1157_v19 = vpack.c.bf16 %v634_v15, %v634_v15  ;;  %v498_v20 = vadd.f32 %v1447_v33, %v497_v16 }
 0x102   :  { %v626_v21 = vadd.f32 %v1447_v33, %v625_v17  ;;  %v1225_v22 = vpop.f32.mrf.mxu0  ;;  %v1257_v23 = vpop.f32.mrf.mxu1 }
 0x103   :  { %927 = vst.msk [vmem:[%s1772_s3 + $0x78] sm:$0xf] %vm896_vm1, %v1125_v18  ;;  %959 = vst.msk [vmem:[%s1772_s3 + $0xf8] sm:$0xf] %vm896_vm1, %v1157_v19  ;;  %v1123_v24 = vpack.c.bf16 %v498_v20, %v498_v20  ;;  %v509_v26 = vadd.f32 %v1225_v22, %v1447_v33  ;;  %v637_v27 = vadd.f32 %v1257_v23, %v1447_v33 }
 0x104   :  { %v1155_v25 = vpack.c.bf16 %v626_v21, %v626_v21  ;;  %v500_v28 = vpop.f32.mrf.mxu0  ;;  %v628_v29 = vpop.f32.mrf.mxu1 }
 0x105   :  { %925 = vst.msk [vmem:[%s1772_s3 + $0x70] sm:$0xf] %vm896_vm1, %v1123_v24  ;;  %v1126_v30 = vpack.c.bf16 %v509_v26, %v509_v26  ;;  %v1158_v31 = vpack.c.bf16 %v637_v27, %v637_v27  ;;  %v501_v32 = vadd.f32 %v1447_v33, %v500_v28  ;;  %v629_v34 = vadd.f32 %v1447_v33, %v628_v29 }
 0x106   :  { %957 = vst.msk [vmem:[%s1772_s3 + $0xf0] sm:$0xf] %vm896_vm1, %v1155_v25 }
 0x107   :  { %928 = vst.msk [vmem:[%s1772_s3 + $0x7c] sm:$0xf] %vm896_vm1, %v1126_v30  ;;  %960 = vst.msk [vmem:[%s1772_s3 + $0xfc] sm:$0xf] %vm896_vm1, %v1158_v31  ;;  %v1124_v35 = vpack.c.bf16 %v501_v32, %v501_v32  ;;  %v1156_v36 = vpack.c.bf16 %v629_v34, %v629_v34 }
 0x109   :  { %926 = vst.msk [vmem:[%s1772_s3 + $0x74] sm:$0xf] %vm896_vm1, %v1124_v35  ;;  %958 = vst.msk [vmem:[%s1772_s3 + $0xf4] sm:$0xf] %vm896_vm1, %v1156_v36 }

// kernel: _lambda_.13
= control target key start
LH: loop header
LB: loop body
LE: loop exit
PB: predicated region body
PF: predicated region fallthrough
CT: control target
= control target key end

     0   :  { %v1579_v0 = vmov 0   ;;  %vm446_vm0 = vcmask 130048   ;;  %vm1152_vm1 = vcmask 257024   ;;  %s2176_s1 = inlined_call_operand.vmem [shape: bf16[144,32], index: 1, kind: input, shape index: {}]   ;;  %s2177_s0 = inlined_call_operand.vmem [shape: bf16[512,144], index: 0, kind: input, shape index: {}]   ;;  %s2178_s2 = inlined_call_operand.vmem [shape: f32[1,32], index: 2, kind: input, shape index: {}]   ;;  %s2179_s3 = inlined_call_operand.vmem [shape: bf16[512,32], index: 3, kind: output, shape index: {}]  }
   0x1   :  { %543 = vmatprep.subr.bf16.mxu0 %v1579_v0  ;;  %1455 = vmatprep.subr.bf16.mxu1 %v1579_v0  ;;  %v1474_v1 = vld [vmem:[%s2176_s1 + $0x38] sm:$0xff]   ;;  %v1475_v2 = vld [vmem:[%s2176_s1 + $0x30] sm:$0xff]   ;;  %v1476_v3 = vld [vmem:[%s2176_s1 + $0x28] sm:$0xff]  }
   0x2   :  { %544 = vmatpush1.bf16.msra.mxu0 %v1474_v1  ;;  %1464 = vmatpush1.bf16.msra.mxu1 %v1474_v1  ;;  %v1477_v4 = vld [vmem:[%s2176_s1 + $0x20] sm:$0xff]   ;;  %v1478_v7 = vld [vmem:[%s2176_s1 + $0x18] sm:$0xff]   ;;  %v1479_v8 = vld [vmem:[%s2176_s1 + $0x10] sm:$0xff]  }
   0x3   :  { %545 = vmatprep.subr.bf16.mxu0 %v1579_v0  ;;  %1456 = vmatprep.subr.bf16.mxu1 %v1579_v0  ;;  %v1485_v5 = vld [vmem:[%s2177_s0 + $0x4] ss:$8 sps:$4 sm:$0xff]   ;;  %v1483_v12 = vld [vmem:[%s2177_s0] ss:$8 sps:$4 sm:$0xff]   ;;  %v1489_v14 = vld [vmem:[%s2177_s0 + $0x14] ss:$8 sps:$4 sm:$0xff]  }
   0x4   :  { %v1488_v6 = vld [vmem:[%s2177_s0 + $0x104] ss:$8 sps:$4 sm:$0xff]   ;;  %1295 = vmatprep.mubr.msk.bf16.mxu0 %vm446_vm0, %v1485_v5  ;;  %v1486_v13 = vld [vmem:[%s2177_s0 + $0x100] ss:$8 sps:$4 sm:$0xff]   ;;  %v1491_v15 = vld [vmem:[%s2177_s0 + $0x114] ss:$8 sps:$4 sm:$0xff]  }
   0x5   :  { %1311 = vmatprep.mubr.msk.bf16.mxu1 %vm446_vm0, %v1488_v6  ;;  %v1480_v9 = vld [vmem:[%s2176_s1 + $0x8] sm:$0xff]   ;;  %v1481_v10 = vld [vmem:[%s2176_s1] sm:$0xff]   ;;  %v1493_v16 = vld [vmem:[%s2177_s0 + $0x10] ss:$8 sps:$4 sm:$0xff]  }
   0x6   :  { %546 = vmatpush1.bf16.msra.mxu0 %v1475_v2  ;;  %1465 = vmatpush1.bf16.msra.mxu1 %v1475_v2  ;;  %v1482_v11 = vld [vmem:[%s2176_s1 + $0x40] sm:$0xff]   ;;  %v1494_v17 = vld [vmem:[%s2177_s0 + $0x110] ss:$8 sps:$4 sm:$0xff]   ;;  %v1501_v22 = vld [vmem:[%s2177_s0 + $0x34] ss:$8 sps:$4 sm:$0xff]  }
   0x7   :  { %547 = vmatprep.subr.bf16.mxu0 %v1579_v0  ;;  %1457 = vmatprep.subr.bf16.mxu1 %v1579_v0  ;;  %v1495_v18 = vld [vmem:[%s2177_s0 + $0x24] ss:$8 sps:$4 sm:$0xff]   ;;  %v1499_v20 = vld [vmem:[%s2177_s0 + $0x20] ss:$8 sps:$4 sm:$0xff]   ;;  %v1503_v23 = vld [vmem:[%s2177_s0 + $0x134] ss:$8 sps:$4 sm:$0xff]  }
   0x8   :  { %v1497_v19 = vld [vmem:[%s2177_s0 + $0x124] ss:$8 sps:$4 sm:$0xff]   ;;  %v1500_v21 = vld [vmem:[%s2177_s0 + $0x120] ss:$8 sps:$4 sm:$0xff]   ;;  %v1505_v24 = vld [vmem:[%s2177_s0 + $0x30] ss:$8 sps:$4 sm:$0xff]  }
   0x9   :  { %v1506_v25 = vld [vmem:[%s2177_s0 + $0x130] ss:$8 sps:$4 sm:$0xff]   ;;  %v1507_v26 = vld [vmem:[%s2177_s0 + $0x44] ss:$8 sps:$4 sm:$0xff]   ;;  %v1511_v28 = vld [vmem:[%s2177_s0 + $0x40] ss:$8 sps:$4 sm:$0xff]  }
   0xa   :  { %548 = vmatpush1.bf16.msra.mxu0 %v1476_v3  ;;  %1466 = vmatpush1.bf16.msra.mxu1 %v1476_v3  ;;  %v1509_v27 = vld [vmem:[%s2177_s0 + $0x144] ss:$8 sps:$4 sm:$0xff]   ;;  %v1512_v29 = vld [vmem:[%s2177_s0 + $0x140] ss:$8 sps:$4 sm:$0xff]   ;;  %v1513_v30 = vld [vmem:[%s2177_s0 + $0x54] ss:$8 sps:$4 sm:$0xff]  }
   0xb   :  { %549 = vmatprep.subr.bf16.mxu0 %v1579_v0  ;;  %1458 = vmatprep.subr.bf16.mxu1 %v1579_v0  ;;  %v1515_v31 = vld [vmem:[%s2177_s0 + $0x154] ss:$8 sps:$4 sm:$0xff]   ;;  %v1517_v32 = vld [vmem:[%s2177_s0 + $0x50] ss:$8 sps:$4 sm:$0xff]   ;;  %v1519_v34 = vld [vmem:[%s2177_s0 + $0x64] ss:$8 sps:$4 sm:$0xff]  }
   0xc   :  { %v1518_v33 = vld [vmem:[%s2177_s0 + $0x150] ss:$8 sps:$4 sm:$0xff]   ;;  %v1521_v35 = vld [vmem:[%s2177_s0 + $0x164] ss:$8 sps:$4 sm:$0xff]   ;;  %v1523_v36 = vld [vmem:[%s2177_s0 + $0x60] ss:$8 sps:$4 sm:$0xff]  }
   0xd   :  { %v1524_v37 = vld [vmem:[%s2177_s0 + $0x160] ss:$8 sps:$4 sm:$0xff]   ;;  %v1525_v38 = vld [vmem:[%s2177_s0 + $0x74] ss:$8 sps:$4 sm:$0xff]   ;;  %v1529_v40 = vld [vmem:[%s2177_s0 + $0x70] ss:$8 sps:$4 sm:$0xff]  }
   0xe   :  { %550 = vmatpush1.bf16.msra.mxu0 %v1477_v4  ;;  %1467 = vmatpush1.bf16.msra.mxu1 %v1477_v4  ;;  %v1527_v39 = vld [vmem:[%s2177_s0 + $0x174] ss:$8 sps:$4 sm:$0xff]   ;;  %v1530_v41 = vld [vmem:[%s2177_s0 + $0x170] ss:$8 sps:$4 sm:$0xff]   ;;  %v1531_v42 = vld [vmem:[%s2177_s0 + $0x84] ss:$8 sps:$4 sm:$0xff]  }
   0xf   :  { %551 = vmatprep.subr.bf16.mxu0 %v1579_v0  ;;  %1459 = vmatprep.subr.bf16.mxu1 %v1579_v0  ;;  %v1533_v43 = vld [vmem:[%s2177_s0 + $0x184] ss:$8 sps:$4 sm:$0xff]   ;;  %v1535_v44 = vld [vmem:[%s2177_s0 + $0x80] ss:$8 sps:$4 sm:$0xff]   ;;  %v1537_v46 = vld [vmem:[%s2177_s0 + $0x94] ss:$8 sps:$4 sm:$0xff]  }
  0x10   :  { %v1536_v45 = vld [vmem:[%s2177_s0 + $0x180] ss:$8 sps:$4 sm:$0xff]   ;;  %v1539_v47 = vld [vmem:[%s2177_s0 + $0x194] ss:$8 sps:$4 sm:$0xff]   ;;  %v1541_v48 = vld [vmem:[%s2177_s0 + $0x90] ss:$8 sps:$4 sm:$0xff]  }
  0x11   :  { %v1542_v49 = vld [vmem:[%s2177_s0 + $0x190] ss:$8 sps:$4 sm:$0xff]   ;;  %v1543_v50 = vld [vmem:[%s2177_s0 + $0xa4] ss:$8 sps:$4 sm:$0xff]   ;;  %v1547_v52 = vld [vmem:[%s2177_s0 + $0xa0] ss:$8 sps:$4 sm:$0xff]  }
  0x12   :  { %552 = vmatpush1.bf16.msra.mxu0 %v1478_v7  ;;  %1468 = vmatpush1.bf16.msra.mxu1 %v1478_v7  ;;  %v1545_v51 = vld [vmem:[%s2177_s0 + $0x1a4] ss:$8 sps:$4 sm:$0xff]   ;;  %v1548_v53 = vld [vmem:[%s2177_s0 + $0x1a0] ss:$8 sps:$4 sm:$0xff]   ;;  %v1549_v54 = vld [vmem:[%s2177_s0 + $0xb4] ss:$8 sps:$4 sm:$0xff]  }
  0x13   :  { %553 = vmatprep.subr.bf16.mxu0 %v1579_v0  ;;  %1460 = vmatprep.subr.bf16.mxu1 %v1579_v0  ;;  %v1551_v55 = vld [vmem:[%s2177_s0 + $0x1b4] ss:$8 sps:$4 sm:$0xff]   ;;  %v1553_v56 = vld [vmem:[%s2177_s0 + $0xb0] ss:$8 sps:$4 sm:$0xff]   ;;  %v1555_v58 = vld [vmem:[%s2177_s0 + $0xc4] ss:$8 sps:$4 sm:$0xff]  }
  0x14   :  { %v1554_v57 = vld [vmem:[%s2177_s0 + $0x1b0] ss:$8 sps:$4 sm:$0xff]   ;;  %v1557_v59 = vld [vmem:[%s2177_s0 + $0x1c4] ss:$8 sps:$4 sm:$0xff]   ;;  %v1559_v60 = vld [vmem:[%s2177_s0 + $0xc0] ss:$8 sps:$4 sm:$0xff]  }
  0x15   :  { %v1560_v61 = vld [vmem:[%s2177_s0 + $0x1c0] ss:$8 sps:$4 sm:$0xff]   ;;  %v1561_v62 = vld [vmem:[%s2177_s0 + $0xd4] ss:$8 sps:$4 sm:$0xff]   ;;  %v1566_v1 = vld [vmem:[%s2177_s0 + $0x1d0] ss:$8 sps:$4 sm:$0xff]  }
  0x16   :  { %554 = vmatpush1.bf16.msra.mxu0 %v1479_v8  ;;  %1469 = vmatpush1.bf16.msra.mxu1 %v1479_v8  ;;  %v1563_v63 = vld [vmem:[%s2177_s0 + $0x1d4] ss:$8 sps:$4 sm:$0xff]   ;;  %v1567_v2 = vld [vmem:[%s2177_s0 + $0xe4] ss:$8 sps:$4 sm:$0xff]   ;;  %v1571_v4 = vld [vmem:[%s2177_s0 + $0xe0] ss:$8 sps:$4 sm:$0xff]  }
  0x17   :  { %555 = vmatprep.subr.bf16.mxu0 %v1579_v0  ;;  %1461 = vmatprep.subr.bf16.mxu1 %v1579_v0  ;;  %v1569_v3 = vld [vmem:[%s2177_s0 + $0x1e4] ss:$8 sps:$4 sm:$0xff]   ;;  %v1572_v5 = vld [vmem:[%s2177_s0 + $0x1e0] ss:$8 sps:$4 sm:$0xff]   ;;  %v1573_v6 = vld [vmem:[%s2177_s0 + $0xf4] ss:$8 sps:$4 sm:$0xff]  }
  0x18   :  { %v1575_v7 = vld [vmem:[%s2177_s0 + $0x1f4] ss:$8 sps:$4 sm:$0xff]   ;;  %v1577_v8 = vld [vmem:[%s2177_s0 + $0xf0] ss:$8 sps:$4 sm:$0xff]  }
  0x1a   :  { %556 = vmatpush1.bf16.msra.mxu0 %v1480_v9  ;;  %1470 = vmatpush1.bf16.msra.mxu1 %v1480_v9  ;;  %v1578_v9 = vld [vmem:[%s2177_s0 + $0x1f0] ss:$8 sps:$4 sm:$0xff]  }
  0x1b   :  { %557 = vmatprep.subr.bf16.mxu0 %v1579_v0  ;;  %1462 = vmatprep.subr.bf16.mxu1 %v1579_v0 }
  0x1e   :  { %558 = vmatpush1.bf16.msra.mxu0 %v1481_v10  ;;  %1471 = vmatpush1.bf16.msra.mxu1 %v1481_v10  ;;  %v1854_v10 = vld [vmem:[%s2178_s2] ss:$0 sm:$0xff] }
  0x1f   :  { %573 = vmatprep.subr.bf16.mxu0 %v1579_v0  ;;  %1463 = vmatprep.subr.bf16.mxu1 %v1579_v0  ;;  %v1565_v0 = vld [vmem:[%s2177_s0 + $0xd0] ss:$8 sps:$4 sm:$0xff]  }
  0x22   :  { %574 = vmatpush2.bf16.msra.mxu0 %v1482_v11  ;;  %1472 = vmatpush2.bf16.msra.mxu1 %v1482_v11 }
  0x25   :  { %576 = vmatmul.mubr.bf16.vlgmr.msra.gmra.mxu0 %v1483_v12  ;;  %704 = vmatmul.mubr.bf16.vlgmr.msra.gmra.mxu1 %v1486_v13 }
  0x26   :  { %1296 = vmatprep.mubr.msk.bf16.mxu0 %vm446_vm0, %v1489_v14  ;;  %1312 = vmatprep.mubr.msk.bf16.mxu1 %vm446_vm0, %v1491_v15 }
  0x2d   :  { %584 = vmatmul.mubr.bf16.gmra.mxu0 %v1493_v16  ;;  %712 = vmatmul.mubr.bf16.gmra.mxu1 %v1494_v17 }
  0x2e   :  { %1297 = vmatprep.mubr.msk.bf16.mxu0 %vm446_vm0, %v1495_v18  ;;  %1313 = vmatprep.mubr.msk.bf16.mxu1 %vm446_vm0, %v1497_v19 }
  0x35   :  { %592 = vmatmul.mubr.bf16.gmra.mxu0 %v1499_v20  ;;  %720 = vmatmul.mubr.bf16.gmra.mxu1 %v1500_v21 }
  0x36   :  { %1298 = vmatprep.mubr.msk.bf16.mxu0 %vm446_vm0, %v1501_v22  ;;  %1314 = vmatprep.mubr.msk.bf16.mxu1 %vm446_vm0, %v1503_v23 }
  0x3d   :  { %600 = vmatmul.mubr.bf16.gmra.mxu0 %v1505_v24  ;;  %728 = vmatmul.mubr.bf16.gmra.mxu1 %v1506_v25 }
  0x3e   :  { %1299 = vmatprep.mubr.msk.bf16.mxu0 %vm446_vm0, %v1507_v26  ;;  %1315 = vmatprep.mubr.msk.bf16.mxu1 %vm446_vm0, %v1509_v27 }
  0x45   :  { %608 = vmatmul.mubr.bf16.gmra.mxu0 %v1511_v28  ;;  %736 = vmatmul.mubr.bf16.gmra.mxu1 %v1512_v29 }
  0x46   :  { %1300 = vmatprep.mubr.msk.bf16.mxu0 %vm446_vm0, %v1513_v30  ;;  %1316 = vmatprep.mubr.msk.bf16.mxu1 %vm446_vm0, %v1515_v31 }
  0x4d   :  { %616 = vmatmul.mubr.bf16.gmra.mxu0 %v1517_v32  ;;  %744 = vmatmul.mubr.bf16.gmra.mxu1 %v1518_v33 }
  0x4e   :  { %1301 = vmatprep.mubr.msk.bf16.mxu0 %vm446_vm0, %v1519_v34  ;;  %1317 = vmatprep.mubr.msk.bf16.mxu1 %vm446_vm0, %v1521_v35 }
  0x55   :  { %624 = vmatmul.mubr.bf16.gmra.mxu0 %v1523_v36  ;;  %752 = vmatmul.mubr.bf16.gmra.mxu1 %v1524_v37 }
  0x56   :  { %1302 = vmatprep.mubr.msk.bf16.mxu0 %vm446_vm0, %v1525_v38  ;;  %1318 = vmatprep.mubr.msk.bf16.mxu1 %vm446_vm0, %v1527_v39 }
  0x5d   :  { %632 = vmatmul.mubr.bf16.gmra.mxu0 %v1529_v40  ;;  %760 = vmatmul.mubr.bf16.gmra.mxu1 %v1530_v41 }
  0x5e   :  { %1303 = vmatprep.mubr.msk.bf16.mxu0 %vm446_vm0, %v1531_v42  ;;  %1319 = vmatprep.mubr.msk.bf16.mxu1 %vm446_vm0, %v1533_v43 }
  0x65   :  { %640 = vmatmul.mubr.bf16.gmra.mxu0 %v1535_v44  ;;  %768 = vmatmul.mubr.bf16.gmra.mxu1 %v1536_v45 }
  0x66   :  { %1304 = vmatprep.mubr.msk.bf16.mxu0 %vm446_vm0, %v1537_v46  ;;  %1320 = vmatprep.mubr.msk.bf16.mxu1 %vm446_vm0, %v1539_v47 }
  0x6d   :  { %648 = vmatmul.mubr.bf16.gmra.mxu0 %v1541_v48  ;;  %776 = vmatmul.mubr.bf16.gmra.mxu1 %v1542_v49 }
  0x6e   :  { %1305 = vmatprep.mubr.msk.bf16.mxu0 %vm446_vm0, %v1543_v50  ;;  %1321 = vmatprep.mubr.msk.bf16.mxu1 %vm446_vm0, %v1545_v51 }
  0x75   :  { %656 = vmatmul.mubr.bf16.gmra.mxu0 %v1547_v52  ;;  %784 = vmatmul.mubr.bf16.gmra.mxu1 %v1548_v53 }
  0x76   :  { %1306 = vmatprep.mubr.msk.bf16.mxu0 %vm446_vm0, %v1549_v54  ;;  %1322 = vmatprep.mubr.msk.bf16.mxu1 %vm446_vm0, %v1551_v55 }
  0x7d   :  { %664 = vmatmul.mubr.bf16.gmra.mxu0 %v1553_v56  ;;  %792 = vmatmul.mubr.bf16.gmra.mxu1 %v1554_v57 }
  0x7e   :  { %1307 = vmatprep.mubr.msk.bf16.mxu0 %vm446_vm0, %v1555_v58  ;;  %1323 = vmatprep.mubr.msk.bf16.mxu1 %vm446_vm0, %v1557_v59 }
  0x85   :  { %672 = vmatmul.mubr.bf16.gmra.mxu0 %v1559_v60  ;;  %800 = vmatmul.mubr.bf16.gmra.mxu1 %v1560_v61 }
  0x86   :  { %1308 = vmatprep.mubr.msk.bf16.mxu0 %vm446_vm0, %v1561_v62  ;;  %1324 = vmatprep.mubr.msk.bf16.mxu1 %vm446_vm0, %v1563_v63 }
  0x8d   :  { %680 = vmatmul.mubr.bf16.gmra.mxu0 %v1565_v0  ;;  %808 = vmatmul.mubr.bf16.gmra.mxu1 %v1566_v1 }
  0x8e   :  { %1309 = vmatprep.mubr.msk.bf16.mxu0 %vm446_vm0, %v1567_v2  ;;  %1325 = vmatprep.mubr.msk.bf16.mxu1 %vm446_vm0, %v1569_v3 }
  0x95   :  { %688 = vmatmul.mubr.bf16.gmra.mxu0 %v1571_v4  ;;  %816 = vmatmul.mubr.bf16.gmra.mxu1 %v1572_v5 }
  0x96   :  { %1310 = vmatprep.mubr.msk.bf16.mxu0 %vm446_vm0, %v1573_v6  ;;  %1326 = vmatprep.mubr.msk.bf16.mxu1 %vm446_vm0, %v1575_v7 }
  0x9d   :  { %696 = vmatmul.mubr.bf16.gmra.mxu0 %v1577_v8  ;;  %824 = vmatmul.mubr.bf16.gmra.mxu1 %v1578_v9 }
  0xe5   :  { %v577_v11 = vpop.f32.mrf.mxu0  ;;  %v705_v12 = vpop.f32.mrf.mxu1 }
  0xe6   :  { %v578_v13 = vadd.f32 %v1854_v10, %v577_v11  ;;  %v706_v14 = vadd.f32 %v1854_v10, %v705_v12 }
  0xe7   :  { %v579_v15 = vpop.f32.mrf.mxu0  ;;  %v707_v16 = vpop.f32.mrf.mxu1 }
  0xe8   :  { %v832_v17 = vmax.f32 %v578_v13, 0.0  ;;  %v864_v18 = vmax.f32 %v706_v14, 0.0 }
  0xe9   :  { %v580_v19 = vpop.f32.mrf.mxu0  ;;  %v708_v20 = vpop.f32.mrf.mxu1 }
  0xea   :  { %v1391_v21 = vpack.c.bf16 %v832_v17, %v832_v17  ;;  %v1423_v22 = vpack.c.bf16 %v864_v18, %v864_v18  ;;  %v581_v23 = vadd.f32 %v1854_v10, %v580_v19  ;;  %v709_v24 = vadd.f32 %v1854_v10, %v708_v20 }
  0xeb   :  { %v582_v25 = vpop.f32.mrf.mxu0  ;;  %v710_v26 = vpop.f32.mrf.mxu1 }
  0xec   :  { %1153 = vst.msk [vmem:[%s2179_s3] sm:$0xf] %vm1152_vm1, %v1391_v21  ;;  %1185 = vst.msk [vmem:[%s2179_s3 + $0x80] sm:$0xf] %vm1152_vm1, %v1423_v22  ;;  %v833_v27 = vmax.f32 %v581_v23, 0.0  ;;  %v865_v28 = vmax.f32 %v709_v24, 0.0 }
  0xed   :  { %v585_v29 = vpop.f32.mrf.mxu0  ;;  %v713_v30 = vpop.f32.mrf.mxu1 }
  0xee   :  { %v1392_v31 = vpack.c.bf16 %v833_v27, %v833_v27  ;;  %v1424_v32 = vpack.c.bf16 %v865_v28, %v865_v28  ;;  %v586_v33 = vadd.f32 %v1854_v10, %v585_v29  ;;  %v714_v34 = vadd.f32 %v1854_v10, %v713_v30 }
  0xef   :  { %v587_v35 = vpop.f32.mrf.mxu0  ;;  %v715_v36 = vpop.f32.mrf.mxu1 }
  0xf0   :  { %1154 = vst.msk [vmem:[%s2179_s3 + $0x4] sm:$0xf] %vm1152_vm1, %v1392_v31  ;;  %1186 = vst.msk [vmem:[%s2179_s3 + $0x84] sm:$0xf] %vm1152_vm1, %v1424_v32  ;;  %v834_v37 = vmax.f32 %v586_v33, 0.0  ;;  %v866_v38 = vmax.f32 %v714_v34, 0.0 }
  0xf1   :  { %v588_v39 = vpop.f32.mrf.mxu0  ;;  %v716_v40 = vpop.f32.mrf.mxu1 }
  0xf2   :  { %v1393_v41 = vpack.c.bf16 %v834_v37, %v834_v37  ;;  %v1425_v42 = vpack.c.bf16 %v866_v38, %v866_v38  ;;  %v589_v43 = vadd.f32 %v1854_v10, %v588_v39  ;;  %v717_v44 = vadd.f32 %v1854_v10, %v716_v40 }
  0xf3   :  { %v590_v45 = vpop.f32.mrf.mxu0  ;;  %v718_v46 = vpop.f32.mrf.mxu1 }
  0xf4   :  { %1155 = vst.msk [vmem:[%s2179_s3 + $0x8] sm:$0xf] %vm1152_vm1, %v1393_v41  ;;  %1187 = vst.msk [vmem:[%s2179_s3 + $0x88] sm:$0xf] %vm1152_vm1, %v1425_v42  ;;  %v835_v47 = vmax.f32 %v589_v43, 0.0  ;;  %v867_v48 = vmax.f32 %v717_v44, 0.0 }
  0xf5   :  { %v593_v49 = vpop.f32.mrf.mxu0  ;;  %v721_v50 = vpop.f32.mrf.mxu1 }
  0xf6   :  { %v1394_v51 = vpack.c.bf16 %v835_v47, %v835_v47  ;;  %v1426_v52 = vpack.c.bf16 %v867_v48, %v867_v48  ;;  %v594_v53 = vadd.f32 %v1854_v10, %v593_v49  ;;  %v722_v54 = vadd.f32 %v1854_v10, %v721_v50 }
  0xf7   :  { %v595_v55 = vpop.f32.mrf.mxu0  ;;  %v723_v56 = vpop.f32.mrf.mxu1 }
  0xf8   :  { %1156 = vst.msk [vmem:[%s2179_s3 + $0xc] sm:$0xf] %vm1152_vm1, %v1394_v51  ;;  %1188 = vst.msk [vmem:[%s2179_s3 + $0x8c] sm:$0xf] %vm1152_vm1, %v1426_v52  ;;  %v836_v57 = vmax.f32 %v594_v53, 0.0  ;;  %v868_v58 = vmax.f32 %v722_v54, 0.0 }
  0xf9   :  { %v596_v59 = vpop.f32.mrf.mxu0  ;;  %v724_v60 = vpop.f32.mrf.mxu1 }
  0xfa   :  { %v1395_v61 = vpack.c.bf16 %v836_v57, %v836_v57  ;;  %v1427_v62 = vpack.c.bf16 %v868_v58, %v868_v58  ;;  %v597_v63 = vadd.f32 %v1854_v10, %v596_v59  ;;  %v725_v0 = vadd.f32 %v1854_v10, %v724_v60 }
  0xfb   :  { %v598_v1 = vpop.f32.mrf.mxu0  ;;  %v726_v2 = vpop.f32.mrf.mxu1 }
  0xfc   :  { %1157 = vst.msk [vmem:[%s2179_s3 + $0x10] sm:$0xf] %vm1152_vm1, %v1395_v61  ;;  %1189 = vst.msk [vmem:[%s2179_s3 + $0x90] sm:$0xf] %vm1152_vm1, %v1427_v62  ;;  %v837_v3 = vmax.f32 %v597_v63, 0.0  ;;  %v869_v4 = vmax.f32 %v725_v0, 0.0 }
  0xfd   :  { %v601_v5 = vpop.f32.mrf.mxu0  ;;  %v729_v6 = vpop.f32.mrf.mxu1 }
  0xfe   :  { %v1396_v7 = vpack.c.bf16 %v837_v3, %v837_v3  ;;  %v1428_v8 = vpack.c.bf16 %v869_v4, %v869_v4  ;;  %v602_v9 = vadd.f32 %v1854_v10, %v601_v5  ;;  %v730_v11 = vadd.f32 %v1854_v10, %v729_v6 }
  0xff   :  { %v603_v12 = vpop.f32.mrf.mxu0  ;;  %v731_v13 = vpop.f32.mrf.mxu1 }
 0x100   :  { %1158 = vst.msk [vmem:[%s2179_s3 + $0x14] sm:$0xf] %vm1152_vm1, %v1396_v7  ;;  %1190 = vst.msk [vmem:[%s2179_s3 + $0x94] sm:$0xf] %vm1152_vm1, %v1428_v8  ;;  %v838_v14 = vmax.f32 %v602_v9, 0.0  ;;  %v870_v15 = vmax.f32 %v730_v11, 0.0 }
 0x101   :  { %v604_v16 = vpop.f32.mrf.mxu0  ;;  %v732_v17 = vpop.f32.mrf.mxu1 }
 0x102   :  { %v1397_v18 = vpack.c.bf16 %v838_v14, %v838_v14  ;;  %v1429_v19 = vpack.c.bf16 %v870_v15, %v870_v15  ;;  %v605_v20 = vadd.f32 %v1854_v10, %v604_v16  ;;  %v733_v21 = vadd.f32 %v1854_v10, %v732_v17 }
 0x103   :  { %v606_v22 = vpop.f32.mrf.mxu0  ;;  %v734_v23 = vpop.f32.mrf.mxu1 }
 0x104   :  { %1159 = vst.msk [vmem:[%s2179_s3 + $0x18] sm:$0xf] %vm1152_vm1, %v1397_v18  ;;  %1191 = vst.msk [vmem:[%s2179_s3 + $0x98] sm:$0xf] %vm1152_vm1, %v1429_v19  ;;  %v839_v24 = vmax.f32 %v605_v20, 0.0  ;;  %v871_v25 = vmax.f32 %v733_v21, 0.0 }
 0x105   :  { %v609_v26 = vpop.f32.mrf.mxu0  ;;  %v737_v27 = vpop.f32.mrf.mxu1 }
 0x106   :  { %v1398_v28 = vpack.c.bf16 %v839_v24, %v839_v24  ;;  %v1430_v29 = vpack.c.bf16 %v871_v25, %v871_v25  ;;  %v610_v30 = vadd.f32 %v1854_v10, %v609_v26  ;;  %v738_v31 = vadd.f32 %v1854_v10, %v737_v27 }
 0x107   :  { %v611_v32 = vpop.f32.mrf.mxu0  ;;  %v739_v33 = vpop.f32.mrf.mxu1 }
 0x108   :  { %1160 = vst.msk [vmem:[%s2179_s3 + $0x1c] sm:$0xf] %vm1152_vm1, %v1398_v28  ;;  %1192 = vst.msk [vmem:[%s2179_s3 + $0x9c] sm:$0xf] %vm1152_vm1, %v1430_v29  ;;  %v840_v34 = vmax.f32 %v610_v30, 0.0  ;;  %v872_v35 = vmax.f32 %v738_v31, 0.0 }
 0x109   :  { %v612_v36 = vpop.f32.mrf.mxu0  ;;  %v740_v37 = vpop.f32.mrf.mxu1 }
 0x10a   :  { %v1399_v38 = vpack.c.bf16 %v840_v34, %v840_v34  ;;  %v1431_v39 = vpack.c.bf16 %v872_v35, %v872_v35  ;;  %v613_v40 = vadd.f32 %v1854_v10, %v612_v36  ;;  %v741_v41 = vadd.f32 %v1854_v10, %v740_v37 }
 0x10b   :  { %v614_v42 = vpop.f32.mrf.mxu0  ;;  %v742_v43 = vpop.f32.mrf.mxu1 }
 0x10c   :  { %1161 = vst.msk [vmem:[%s2179_s3 + $0x20] sm:$0xf] %vm1152_vm1, %v1399_v38  ;;  %1193 = vst.msk [vmem:[%s2179_s3 + $0xa0] sm:$0xf] %vm1152_vm1, %v1431_v39  ;;  %v841_v44 = vmax.f32 %v613_v40, 0.0  ;;  %v873_v45 = vmax.f32 %v741_v41, 0.0 }
 0x10d   :  { %v617_v46 = vpop.f32.mrf.mxu0  ;;  %v745_v47 = vpop.f32.mrf.mxu1 }
 0x10e   :  { %v1400_v48 = vpack.c.bf16 %v841_v44, %v841_v44  ;;  %v1432_v49 = vpack.c.bf16 %v873_v45, %v873_v45  ;;  %v618_v50 = vadd.f32 %v1854_v10, %v617_v46  ;;  %v746_v51 = vadd.f32 %v1854_v10, %v745_v47 }
 0x10f   :  { %v619_v52 = vpop.f32.mrf.mxu0  ;;  %v747_v53 = vpop.f32.mrf.mxu1 }
 0x110   :  { %1162 = vst.msk [vmem:[%s2179_s3 + $0x24] sm:$0xf] %vm1152_vm1, %v1400_v48  ;;  %1194 = vst.msk [vmem:[%s2179_s3 + $0xa4] sm:$0xf] %vm1152_vm1, %v1432_v49  ;;  %v842_v54 = vmax.f32 %v618_v50, 0.0  ;;  %v874_v55 = vmax.f32 %v746_v51, 0.0 }
 0x111   :  { %v620_v56 = vpop.f32.mrf.mxu0  ;;  %v748_v57 = vpop.f32.mrf.mxu1 }
 0x112   :  { %v1401_v58 = vpack.c.bf16 %v842_v54, %v842_v54  ;;  %v1433_v59 = vpack.c.bf16 %v874_v55, %v874_v55  ;;  %v621_v60 = vadd.f32 %v1854_v10, %v620_v56  ;;  %v749_v61 = vadd.f32 %v1854_v10, %v748_v57 }
 0x113   :  { %v622_v62 = vpop.f32.mrf.mxu0  ;;  %v750_v63 = vpop.f32.mrf.mxu1 }
 0x114   :  { %1163 = vst.msk [vmem:[%s2179_s3 + $0x28] sm:$0xf] %vm1152_vm1, %v1401_v58  ;;  %1195 = vst.msk [vmem:[%s2179_s3 + $0xa8] sm:$0xf] %vm1152_vm1, %v1433_v59  ;;  %v843_v0 = vmax.f32 %v621_v60, 0.0  ;;  %v875_v1 = vmax.f32 %v749_v61, 0.0 }
 0x115   :  { %v625_v2 = vpop.f32.mrf.mxu0  ;;  %v753_v3 = vpop.f32.mrf.mxu1 }
 0x116   :  { %v1402_v4 = vpack.c.bf16 %v843_v0, %v843_v0  ;;  %v1434_v5 = vpack.c.bf16 %v875_v1, %v875_v1  ;;  %v626_v6 = vadd.f32 %v1854_v10, %v625_v2  ;;  %v754_v7 = vadd.f32 %v1854_v10, %v753_v3 }
 0x117   :  { %v627_v8 = vpop.f32.mrf.mxu0  ;;  %v755_v9 = vpop.f32.mrf.mxu1 }
 0x118   :  { %1164 = vst.msk [vmem:[%s2179_s3 + $0x2c] sm:$0xf] %vm1152_vm1, %v1402_v4  ;;  %1196 = vst.msk [vmem:[%s2179_s3 + $0xac] sm:$0xf] %vm1152_vm1, %v1434_v5  ;;  %v844_v11 = vmax.f32 %v626_v6, 0.0  ;;  %v876_v12 = vmax.f32 %v754_v7, 0.0 }
 0x119   :  { %v628_v13 = vpop.f32.mrf.mxu0  ;;  %v756_v14 = vpop.f32.mrf.mxu1 }
 0x11a   :  { %v1403_v15 = vpack.c.bf16 %v844_v11, %v844_v11  ;;  %v1435_v16 = vpack.c.bf16 %v876_v12, %v876_v12  ;;  %v629_v17 = vadd.f32 %v1854_v10, %v628_v13  ;;  %v757_v18 = vadd.f32 %v1854_v10, %v756_v14 }
 0x11b   :  { %v630_v19 = vpop.f32.mrf.mxu0  ;;  %v758_v20 = vpop.f32.mrf.mxu1 }
 0x11c   :  { %1165 = vst.msk [vmem:[%s2179_s3 + $0x30] sm:$0xf] %vm1152_vm1, %v1403_v15  ;;  %1197 = vst.msk [vmem:[%s2179_s3 + $0xb0] sm:$0xf] %vm1152_vm1, %v1435_v16  ;;  %v845_v21 = vmax.f32 %v629_v17, 0.0  ;;  %v877_v22 = vmax.f32 %v757_v18, 0.0 }
 0x11d   :  { %v633_v23 = vpop.f32.mrf.mxu0  ;;  %v761_v24 = vpop.f32.mrf.mxu1 }
 0x11e   :  { %v1404_v25 = vpack.c.bf16 %v845_v21, %v845_v21  ;;  %v1436_v26 = vpack.c.bf16 %v877_v22, %v877_v22  ;;  %v634_v27 = vadd.f32 %v1854_v10, %v633_v23  ;;  %v762_v28 = vadd.f32 %v1854_v10, %v761_v24 }
 0x11f   :  { %v635_v29 = vpop.f32.mrf.mxu0  ;;  %v763_v30 = vpop.f32.mrf.mxu1 }
 0x120   :  { %1166 = vst.msk [vmem:[%s2179_s3 + $0x34] sm:$0xf] %vm1152_vm1, %v1404_v25  ;;  %1198 = vst.msk [vmem:[%s2179_s3 + $0xb4] sm:$0xf] %vm1152_vm1, %v1436_v26  ;;  %v846_v31 = vmax.f32 %v634_v27, 0.0  ;;  %v878_v32 = vmax.f32 %v762_v28, 0.0 }
 0x121   :  { %v636_v33 = vpop.f32.mrf.mxu0  ;;  %v764_v34 = vpop.f32.mrf.mxu1 }
 0x122   :  { %v1405_v35 = vpack.c.bf16 %v846_v31, %v846_v31  ;;  %v1437_v36 = vpack.c.bf16 %v878_v32, %v878_v32  ;;  %v637_v37 = vadd.f32 %v1854_v10, %v636_v33  ;;  %v765_v38 = vadd.f32 %v1854_v10, %v764_v34 }
 0x123   :  { %v638_v39 = vpop.f32.mrf.mxu0  ;;  %v766_v40 = vpop.f32.mrf.mxu1 }
 0x124   :  { %1167 = vst.msk [vmem:[%s2179_s3 + $0x38] sm:$0xf] %vm1152_vm1, %v1405_v35  ;;  %1199 = vst.msk [vmem:[%s2179_s3 + $0xb8] sm:$0xf] %vm1152_vm1, %v1437_v36  ;;  %v847_v41 = vmax.f32 %v637_v37, 0.0  ;;  %v879_v42 = vmax.f32 %v765_v38, 0.0 }
 0x125   :  { %v641_v43 = vpop.f32.mrf.mxu0  ;;  %v769_v44 = vpop.f32.mrf.mxu1 }
 0x126   :  { %v1406_v45 = vpack.c.bf16 %v847_v41, %v847_v41  ;;  %v1438_v46 = vpack.c.bf16 %v879_v42, %v879_v42  ;;  %v642_v47 = vadd.f32 %v1854_v10, %v641_v43  ;;  %v770_v48 = vadd.f32 %v1854_v10, %v769_v44 }
 0x127   :  { %v643_v49 = vpop.f32.mrf.mxu0  ;;  %v771_v50 = vpop.f32.mrf.mxu1 }
 0x128   :  { %1168 = vst.msk [vmem:[%s2179_s3 + $0x3c] sm:$0xf] %vm1152_vm1, %v1406_v45  ;;  %1200 = vst.msk [vmem:[%s2179_s3 + $0xbc] sm:$0xf] %vm1152_vm1, %v1438_v46  ;;  %v848_v51 = vmax.f32 %v642_v47, 0.0  ;;  %v880_v52 = vmax.f32 %v770_v48, 0.0 }
 0x129   :  { %v644_v53 = vpop.f32.mrf.mxu0  ;;  %v772_v54 = vpop.f32.mrf.mxu1 }
 0x12a   :  { %v1407_v55 = vpack.c.bf16 %v848_v51, %v848_v51  ;;  %v1439_v56 = vpack.c.bf16 %v880_v52, %v880_v52  ;;  %v645_v57 = vadd.f32 %v1854_v10, %v644_v53  ;;  %v773_v58 = vadd.f32 %v1854_v10, %v772_v54 }
 0x12b   :  { %v646_v59 = vpop.f32.mrf.mxu0  ;;  %v774_v60 = vpop.f32.mrf.mxu1 }
 0x12c   :  { %1169 = vst.msk [vmem:[%s2179_s3 + $0x40] sm:$0xf] %vm1152_vm1, %v1407_v55  ;;  %1201 = vst.msk [vmem:[%s2179_s3 + $0xc0] sm:$0xf] %vm1152_vm1, %v1439_v56  ;;  %v849_v61 = vmax.f32 %v645_v57, 0.0  ;;  %v881_v62 = vmax.f32 %v773_v58, 0.0 }
 0x12d   :  { %v649_v63 = vpop.f32.mrf.mxu0  ;;  %v777_v0 = vpop.f32.mrf.mxu1 }
 0x12e   :  { %v1408_v1 = vpack.c.bf16 %v849_v61, %v849_v61  ;;  %v1440_v2 = vpack.c.bf16 %v881_v62, %v881_v62  ;;  %v650_v3 = vadd.f32 %v1854_v10, %v649_v63  ;;  %v778_v4 = vadd.f32 %v1854_v10, %v777_v0 }
 0x12f   :  { %v651_v5 = vpop.f32.mrf.mxu0  ;;  %v779_v6 = vpop.f32.mrf.mxu1 }
 0x130   :  { %1170 = vst.msk [vmem:[%s2179_s3 + $0x44] sm:$0xf] %vm1152_vm1, %v1408_v1  ;;  %1202 = vst.msk [vmem:[%s2179_s3 + $0xc4] sm:$0xf] %vm1152_vm1, %v1440_v2  ;;  %v850_v7 = vmax.f32 %v650_v3, 0.0  ;;  %v882_v8 = vmax.f32 %v778_v4, 0.0 }
 0x131   :  { %v652_v9 = vpop.f32.mrf.mxu0  ;;  %v780_v11 = vpop.f32.mrf.mxu1 }
 0x132   :  { %v1409_v12 = vpack.c.bf16 %v850_v7, %v850_v7  ;;  %v1441_v13 = vpack.c.bf16 %v882_v8, %v882_v8  ;;  %v653_v14 = vadd.f32 %v1854_v10, %v652_v9  ;;  %v781_v15 = vadd.f32 %v1854_v10, %v780_v11 }
 0x133   :  { %v654_v16 = vpop.f32.mrf.mxu0  ;;  %v782_v17 = vpop.f32.mrf.mxu1 }
 0x134   :  { %1171 = vst.msk [vmem:[%s2179_s3 + $0x48] sm:$0xf] %vm1152_vm1, %v1409_v12  ;;  %1203 = vst.msk [vmem:[%s2179_s3 + $0xc8] sm:$0xf] %vm1152_vm1, %v1441_v13  ;;  %v851_v18 = vmax.f32 %v653_v14, 0.0  ;;  %v883_v19 = vmax.f32 %v781_v15, 0.0 }
 0x135   :  { %v657_v20 = vpop.f32.mrf.mxu0  ;;  %v785_v21 = vpop.f32.mrf.mxu1 }
 0x136   :  { %v1410_v22 = vpack.c.bf16 %v851_v18, %v851_v18  ;;  %v1442_v23 = vpack.c.bf16 %v883_v19, %v883_v19  ;;  %v658_v24 = vadd.f32 %v1854_v10, %v657_v20  ;;  %v786_v25 = vadd.f32 %v1854_v10, %v785_v21 }
 0x137   :  { %v659_v26 = vpop.f32.mrf.mxu0  ;;  %v787_v27 = vpop.f32.mrf.mxu1 }
 0x138   :  { %1172 = vst.msk [vmem:[%s2179_s3 + $0x4c] sm:$0xf] %vm1152_vm1, %v1410_v22  ;;  %1204 = vst.msk [vmem:[%s2179_s3 + $0xcc] sm:$0xf] %vm1152_vm1, %v1442_v23  ;;  %v852_v28 = vmax.f32 %v658_v24, 0.0  ;;  %v884_v29 = vmax.f32 %v786_v25, 0.0 }
 0x139   :  { %v660_v30 = vpop.f32.mrf.mxu0  ;;  %v788_v31 = vpop.f32.mrf.mxu1 }
 0x13a   :  { %v1411_v32 = vpack.c.bf16 %v852_v28, %v852_v28  ;;  %v1443_v33 = vpack.c.bf16 %v884_v29, %v884_v29  ;;  %v661_v34 = vadd.f32 %v1854_v10, %v660_v30  ;;  %v789_v35 = vadd.f32 %v1854_v10, %v788_v31 }
 0x13b   :  { %v662_v36 = vpop.f32.mrf.mxu0  ;;  %v790_v37 = vpop.f32.mrf.mxu1 }
 0x13c   :  { %1173 = vst.msk [vmem:[%s2179_s3 + $0x50] sm:$0xf] %vm1152_vm1, %v1411_v32  ;;  %1205 = vst.msk [vmem:[%s2179_s3 + $0xd0] sm:$0xf] %vm1152_vm1, %v1443_v33  ;;  %v853_v38 = vmax.f32 %v661_v34, 0.0  ;;  %v885_v39 = vmax.f32 %v789_v35, 0.0 }
 0x13d   :  { %v665_v40 = vpop.f32.mrf.mxu0  ;;  %v793_v41 = vpop.f32.mrf.mxu1 }
 0x13e   :  { %v1412_v42 = vpack.c.bf16 %v853_v38, %v853_v38  ;;  %v1444_v43 = vpack.c.bf16 %v885_v39, %v885_v39  ;;  %v666_v44 = vadd.f32 %v1854_v10, %v665_v40  ;;  %v794_v45 = vadd.f32 %v1854_v10, %v793_v41 }
 0x13f   :  { %v667_v46 = vpop.f32.mrf.mxu0  ;;  %v795_v47 = vpop.f32.mrf.mxu1 }
 0x140   :  { %1174 = vst.msk [vmem:[%s2179_s3 + $0x54] sm:$0xf] %vm1152_vm1, %v1412_v42  ;;  %1206 = vst.msk [vmem:[%s2179_s3 + $0xd4] sm:$0xf] %vm1152_vm1, %v1444_v43  ;;  %v854_v48 = vmax.f32 %v666_v44, 0.0  ;;  %v886_v49 = vmax.f32 %v794_v45, 0.0 }
 0x141   :  { %v668_v50 = vpop.f32.mrf.mxu0  ;;  %v796_v51 = vpop.f32.mrf.mxu1 }
 0x142   :  { %v1413_v52 = vpack.c.bf16 %v854_v48, %v854_v48  ;;  %v1445_v53 = vpack.c.bf16 %v886_v49, %v886_v49  ;;  %v669_v54 = vadd.f32 %v1854_v10, %v668_v50  ;;  %v797_v55 = vadd.f32 %v1854_v10, %v796_v51 }
 0x143   :  { %v670_v56 = vpop.f32.mrf.mxu0  ;;  %v798_v57 = vpop.f32.mrf.mxu1 }
 0x144   :  { %1175 = vst.msk [vmem:[%s2179_s3 + $0x58] sm:$0xf] %vm1152_vm1, %v1413_v52  ;;  %1207 = vst.msk [vmem:[%s2179_s3 + $0xd8] sm:$0xf] %vm1152_vm1, %v1445_v53  ;;  %v855_v58 = vmax.f32 %v669_v54, 0.0  ;;  %v887_v59 = vmax.f32 %v797_v55, 0.0 }
 0x145   :  { %v673_v60 = vpop.f32.mrf.mxu0  ;;  %v801_v61 = vpop.f32.mrf.mxu1 }
 0x146   :  { %v1414_v62 = vpack.c.bf16 %v855_v58, %v855_v58  ;;  %v1446_v63 = vpack.c.bf16 %v887_v59, %v887_v59  ;;  %v674_v0 = vadd.f32 %v1854_v10, %v673_v60  ;;  %v802_v1 = vadd.f32 %v1854_v10, %v801_v61 }
 0x147   :  { %v675_v2 = vpop.f32.mrf.mxu0  ;;  %v803_v3 = vpop.f32.mrf.mxu1 }
 0x148   :  { %1176 = vst.msk [vmem:[%s2179_s3 + $0x5c] sm:$0xf] %vm1152_vm1, %v1414_v62  ;;  %1208 = vst.msk [vmem:[%s2179_s3 + $0xdc] sm:$0xf] %vm1152_vm1, %v1446_v63  ;;  %v856_v4 = vmax.f32 %v674_v0, 0.0  ;;  %v888_v5 = vmax.f32 %v802_v1, 0.0 }
 0x149   :  { %v676_v6 = vpop.f32.mrf.mxu0  ;;  %v804_v7 = vpop.f32.mrf.mxu1 }
 0x14a   :  { %v1415_v8 = vpack.c.bf16 %v856_v4, %v856_v4  ;;  %v1447_v9 = vpack.c.bf16 %v888_v5, %v888_v5  ;;  %v677_v11 = vadd.f32 %v1854_v10, %v676_v6  ;;  %v805_v12 = vadd.f32 %v1854_v10, %v804_v7 }
 0x14b   :  { %v678_v13 = vpop.f32.mrf.mxu0  ;;  %v806_v14 = vpop.f32.mrf.mxu1 }
 0x14c   :  { %1177 = vst.msk [vmem:[%s2179_s3 + $0x60] sm:$0xf] %vm1152_vm1, %v1415_v8  ;;  %1209 = vst.msk [vmem:[%s2179_s3 + $0xe0] sm:$0xf] %vm1152_vm1, %v1447_v9  ;;  %v857_v15 = vmax.f32 %v677_v11, 0.0  ;;  %v889_v16 = vmax.f32 %v805_v12, 0.0 }
 0x14d   :  { %v681_v17 = vpop.f32.mrf.mxu0  ;;  %v809_v18 = vpop.f32.mrf.mxu1 }
 0x14e   :  { %v1416_v19 = vpack.c.bf16 %v857_v15, %v857_v15  ;;  %v1448_v20 = vpack.c.bf16 %v889_v16, %v889_v16  ;;  %v682_v21 = vadd.f32 %v1854_v10, %v681_v17  ;;  %v810_v22 = vadd.f32 %v1854_v10, %v809_v18 }
 0x14f   :  { %v683_v23 = vpop.f32.mrf.mxu0  ;;  %v811_v24 = vpop.f32.mrf.mxu1 }
 0x150   :  { %1178 = vst.msk [vmem:[%s2179_s3 + $0x64] sm:$0xf] %vm1152_vm1, %v1416_v19  ;;  %1210 = vst.msk [vmem:[%s2179_s3 + $0xe4] sm:$0xf] %vm1152_vm1, %v1448_v20  ;;  %v858_v25 = vmax.f32 %v682_v21, 0.0  ;;  %v890_v26 = vmax.f32 %v810_v22, 0.0 }
 0x151   :  { %v684_v27 = vpop.f32.mrf.mxu0  ;;  %v812_v28 = vpop.f32.mrf.mxu1 }
 0x152   :  { %v1417_v29 = vpack.c.bf16 %v858_v25, %v858_v25  ;;  %v1449_v30 = vpack.c.bf16 %v890_v26, %v890_v26  ;;  %v685_v31 = vadd.f32 %v1854_v10, %v684_v27  ;;  %v813_v32 = vadd.f32 %v1854_v10, %v812_v28 }
 0x153   :  { %v686_v33 = vpop.f32.mrf.mxu0  ;;  %v814_v34 = vpop.f32.mrf.mxu1 }
 0x154   :  { %1179 = vst.msk [vmem:[%s2179_s3 + $0x68] sm:$0xf] %vm1152_vm1, %v1417_v29  ;;  %1211 = vst.msk [vmem:[%s2179_s3 + $0xe8] sm:$0xf] %vm1152_vm1, %v1449_v30  ;;  %v859_v35 = vmax.f32 %v685_v31, 0.0  ;;  %v891_v36 = vmax.f32 %v813_v32, 0.0 }
 0x155   :  { %v689_v37 = vpop.f32.mrf.mxu0  ;;  %v817_v38 = vpop.f32.mrf.mxu1 }
 0x156   :  { %v1418_v39 = vpack.c.bf16 %v859_v35, %v859_v35  ;;  %v1450_v40 = vpack.c.bf16 %v891_v36, %v891_v36  ;;  %v690_v41 = vadd.f32 %v1854_v10, %v689_v37  ;;  %v818_v42 = vadd.f32 %v1854_v10, %v817_v38 }
 0x157   :  { %v691_v43 = vpop.f32.mrf.mxu0  ;;  %v819_v44 = vpop.f32.mrf.mxu1 }
 0x158   :  { %1180 = vst.msk [vmem:[%s2179_s3 + $0x6c] sm:$0xf] %vm1152_vm1, %v1418_v39  ;;  %1212 = vst.msk [vmem:[%s2179_s3 + $0xec] sm:$0xf] %vm1152_vm1, %v1450_v40  ;;  %v860_v45 = vmax.f32 %v690_v41, 0.0  ;;  %v892_v46 = vmax.f32 %v818_v42, 0.0 }
 0x159   :  { %v692_v47 = vpop.f32.mrf.mxu0  ;;  %v820_v48 = vpop.f32.mrf.mxu1 }
 0x15a   :  { %v1419_v49 = vpack.c.bf16 %v860_v45, %v860_v45  ;;  %v1451_v50 = vpack.c.bf16 %v892_v46, %v892_v46  ;;  %v693_v51 = vadd.f32 %v1854_v10, %v692_v47  ;;  %v821_v52 = vadd.f32 %v1854_v10, %v820_v48 }
 0x15b   :  { %v694_v53 = vpop.f32.mrf.mxu0  ;;  %v822_v54 = vpop.f32.mrf.mxu1 }
 0x15c   :  { %1181 = vst.msk [vmem:[%s2179_s3 + $0x70] sm:$0xf] %vm1152_vm1, %v1419_v49  ;;  %1213 = vst.msk [vmem:[%s2179_s3 + $0xf0] sm:$0xf] %vm1152_vm1, %v1451_v50  ;;  %v861_v55 = vmax.f32 %v693_v51, 0.0  ;;  %v893_v56 = vmax.f32 %v821_v52, 0.0 }
 0x15d   :  { %v697_v57 = vpop.f32.mrf.mxu0  ;;  %v825_v58 = vpop.f32.mrf.mxu1 }
 0x15e   :  { %v1420_v59 = vpack.c.bf16 %v861_v55, %v861_v55  ;;  %v1452_v60 = vpack.c.bf16 %v893_v56, %v893_v56  ;;  %v698_v61 = vadd.f32 %v1854_v10, %v697_v57  ;;  %v826_v62 = vadd.f32 %v1854_v10, %v825_v58 }
 0x15f   :  { %v699_v63 = vpop.f32.mrf.mxu0  ;;  %v827_v0 = vpop.f32.mrf.mxu1 }
 0x160   :  { %1182 = vst.msk [vmem:[%s2179_s3 + $0x74] sm:$0xf] %vm1152_vm1, %v1420_v59  ;;  %1214 = vst.msk [vmem:[%s2179_s3 + $0xf4] sm:$0xf] %vm1152_vm1, %v1452_v60  ;;  %v862_v1 = vmax.f32 %v698_v61, 0.0  ;;  %v894_v2 = vmax.f32 %v826_v62, 0.0 }
 0x161   :  { %v700_v3 = vpop.f32.mrf.mxu0  ;;  %v828_v4 = vpop.f32.mrf.mxu1 }
 0x162   :  { %v1421_v5 = vpack.c.bf16 %v862_v1, %v862_v1  ;;  %v1453_v6 = vpack.c.bf16 %v894_v2, %v894_v2  ;;  %v701_v7 = vadd.f32 %v1854_v10, %v700_v3  ;;  %v829_v8 = vadd.f32 %v1854_v10, %v828_v4 }
 0x163   :  { %v702_v9 = vpop.f32.mrf.mxu0  ;;  %v830_v11 = vpop.f32.mrf.mxu1 }
 0x164   :  { %1183 = vst.msk [vmem:[%s2179_s3 + $0x78] sm:$0xf] %vm1152_vm1, %v1421_v5  ;;  %1215 = vst.msk [vmem:[%s2179_s3 + $0xf8] sm:$0xf] %vm1152_vm1, %v1453_v6  ;;  %v863_v12 = vmax.f32 %v701_v7, 0.0  ;;  %v895_v13 = vmax.f32 %v829_v8, 0.0 }
 0x166   :  { %v1422_v14 = vpack.c.bf16 %v863_v12, %v863_v12  ;;  %v1454_v15 = vpack.c.bf16 %v895_v13, %v895_v13 }
 0x168   :  { %1184 = vst.msk [vmem:[%s2179_s3 + $0x7c] sm:$0xf] %vm1152_vm1, %v1422_v14  ;;  %1216 = vst.msk [vmem:[%s2179_s3 + $0xfc] sm:$0xf] %vm1152_vm1, %v1454_v15 }

// kernel: _lambda_.15
= control target key start
LH: loop header
LB: loop body
LE: loop exit
PB: predicated region body
PF: predicated region fallthrough
CT: control target
= control target key end

     0   :  { %v2749_v0 = vmov 0   ;;  %vm777_vm0 = vcmask 261120   ;;  %vm1964_vm1 = vcmask 257024   ;;  %s3831_s1 = inlined_call_operand.vmem [shape: bf16[288,32], index: 1, kind: input, shape index: {}]   ;;  %s3832_s0 = inlined_call_operand.vmem [shape: bf16[512,288], index: 0, kind: input, shape index: {}]   ;;  %s3833_s3 = inlined_call_operand.vmem [shape: bf16[512,32], index: 3, kind: input, shape index: {}]   ;;  %s3834_s2 = inlined_call_operand.vmem [shape: f32[1,32], index: 2, kind: input, shape index: {}]   ;;  %s3835_s4 = inlined_call_operand.vmem [shape: bf16[512,32], index: 4, kind: output, shape index: {}]  }
   0x1   :  { %874 = vmatprep.subr.bf16.mxu0 %v2749_v0  ;;  %2569 = vmatprep.subr.bf16.mxu1 %v2749_v0  ;;  %v2602_v1 = vld [vmem:[%s3831_s1 + $0x38] sm:$0xff]   ;;  %v2603_v2 = vld [vmem:[%s3831_s1 + $0x30] sm:$0xff]   ;;  %v2604_v3 = vld [vmem:[%s3831_s1 + $0x28] sm:$0xff]  }
   0x2   :  { %875 = vmatpush1.bf16.msra.mxu0 %v2602_v1  ;;  %2585 = vmatpush1.bf16.msra.mxu1 %v2602_v1  ;;  %v2605_v4 = vld [vmem:[%s3831_s1 + $0x20] sm:$0xff]   ;;  %v2606_v5 = vld [vmem:[%s3831_s1 + $0x18] sm:$0xff]   ;;  %v2607_v7 = vld [vmem:[%s3831_s1 + $0x10] sm:$0xff]  }
   0x3   :  { %876 = vmatprep.subr.bf16.mxu0 %v2749_v0  ;;  %2570 = vmatprep.subr.bf16.mxu1 %v2749_v0  ;;  %v2620_v6 = vld [vmem:[%s3832_s0 + $0x4] ss:$12 sps:$4 sm:$0xff]   ;;  %v2608_v9 = vld [vmem:[%s3831_s1 + $0x8] sm:$0xff]   ;;  %v2610_v11 = vld [vmem:[%s3831_s1 + $0x78] sm:$0xff]  }
   0x4   :  { %v2623_v8 = vld [vmem:[%s3832_s0 + $0x244] ss:$12 sps:$4 sm:$0xff]   ;;  %906 = vmatprep.mubr.bf16.mxu0 %v2620_v6  ;;  %v2612_v13 = vld [vmem:[%s3831_s1 + $0x68] sm:$0xff]   ;;  %v2614_v15 = vld [vmem:[%s3831_s1 + $0x58] sm:$0xff]  }
   0x5   :  { %1098 = vmatprep.mubr.bf16.mxu1 %v2623_v8  ;;  %v2609_v10 = vld [vmem:[%s3831_s1] sm:$0xff]   ;;  %v2611_v12 = vld [vmem:[%s3831_s1 + $0x70] sm:$0xff]   ;;  %v2616_v17 = vld [vmem:[%s3831_s1 + $0x48] sm:$0xff]  }
   0x6   :  { %877 = vmatpush1.bf16.msra.mxu0 %v2603_v2  ;;  %2586 = vmatpush1.bf16.msra.mxu1 %v2603_v2  ;;  %v2613_v14 = vld [vmem:[%s3831_s1 + $0x60] sm:$0xff]   ;;  %v2615_v16 = vld [vmem:[%s3831_s1 + $0x50] sm:$0xff]   ;;  %v2624_v19 = vld [vmem:[%s3831_s1 + $0x88] sm:$0xff]  }
   0x7   :  { %878 = vmatprep.subr.bf16.mxu0 %v2749_v0  ;;  %2571 = vmatprep.subr.bf16.mxu1 %v2749_v0  ;;  %v2617_v18 = vld [vmem:[%s3831_s1 + $0x40] sm:$0xff]   ;;  %v2625_v22 = vld [vmem:[%s3832_s0 + $0x1c] ss:$12 sps:$4 sm:$0xff]   ;;  %v2637_v31 = vld [vmem:[%s3832_s0 + $0x4c] ss:$12 sps:$4 sm:$0xff]  }
   0x8   :  { %v2618_v20 = vld [vmem:[%s3832_s0] ss:$12 sps:$4 sm:$0xff]   ;;  %v2627_v23 = vld [vmem:[%s3832_s0 + $0x25c] ss:$12 sps:$4 sm:$0xff]   ;;  %v2629_v25 = vld [vmem:[%s3832_s0 + $0x18] ss:$12 sps:$4 sm:$0xff]  }
   0x9   :  { %v2621_v21 = vld [vmem:[%s3832_s0 + $0x240] ss:$12 sps:$4 sm:$0xff]   ;;  %v2630_v26 = vld [vmem:[%s3832_s0 + $0x258] ss:$12 sps:$4 sm:$0xff]   ;;  %v2635_v29 = vld [vmem:[%s3832_s0 + $0x30] ss:$12 sps:$4 sm:$0xff]  }
   0xa   :  { %879 = vmatpush1.bf16.msra.mxu0 %v2604_v3  ;;  %2587 = vmatpush1.bf16.msra.mxu1 %v2604_v3  ;;  %v2649_v24 = vld [vmem:[%s3831_s1 + $0x80] sm:$0xff]   ;;  %v2636_v30 = vld [vmem:[%s3832_s0 + $0x270] ss:$12 sps:$4 sm:$0xff]   ;;  %v2639_v32 = vld [vmem:[%s3832_s0 + $0x28c] ss:$12 sps:$4 sm:$0xff]  }
   0xb   :  { %880 = vmatprep.subr.bf16.mxu0 %v2749_v0  ;;  %2572 = vmatprep.subr.bf16.mxu1 %v2749_v0  ;;  %v2631_v27 = vld [vmem:[%s3832_s0 + $0x34] ss:$12 sps:$4 sm:$0xff]   ;;  %v2643_v35 = vld [vmem:[%s3832_s0 + $0x64] ss:$12 sps:$4 sm:$0xff]   ;;  %v2650_v39 = vld [vmem:[%s3832_s0 + $0x7c] ss:$12 sps:$4 sm:$0xff]  }
   0xc   :  { %v2633_v28 = vld [vmem:[%s3832_s0 + $0x274] ss:$12 sps:$4 sm:$0xff]   ;;  %v2645_v36 = vld [vmem:[%s3832_s0 + $0x2a4] ss:$12 sps:$4 sm:$0xff]   ;;  %v2652_v40 = vld [vmem:[%s3832_s0 + $0x2bc] ss:$12 sps:$4 sm:$0xff]  }
   0xd   :  { %v2641_v33 = vld [vmem:[%s3832_s0 + $0x48] ss:$12 sps:$4 sm:$0xff]   ;;  %v2647_v37 = vld [vmem:[%s3832_s0 + $0x60] ss:$12 sps:$4 sm:$0xff]   ;;  %v2654_v41 = vld [vmem:[%s3832_s0 + $0x78] ss:$12 sps:$4 sm:$0xff]  }
   0xe   :  { %881 = vmatpush1.bf16.msra.mxu0 %v2605_v4  ;;  %2588 = vmatpush1.bf16.msra.mxu1 %v2605_v4  ;;  %v2642_v34 = vld [vmem:[%s3832_s0 + $0x288] ss:$12 sps:$4 sm:$0xff]   ;;  %v2648_v38 = vld [vmem:[%s3832_s0 + $0x2a0] ss:$12 sps:$4 sm:$0xff]   ;;  %v2655_v42 = vld [vmem:[%s3832_s0 + $0x2b8] ss:$12 sps:$4 sm:$0xff]  }
   0xf   :  { %882 = vmatprep.subr.bf16.mxu0 %v2749_v0  ;;  %2573 = vmatprep.subr.bf16.mxu1 %v2749_v0  ;;  %v2656_v43 = vld [vmem:[%s3832_s0 + $0x94] ss:$12 sps:$4 sm:$0xff]   ;;  %v2660_v45 = vld [vmem:[%s3832_s0 + $0x90] ss:$12 sps:$4 sm:$0xff]   ;;  %v2662_v47 = vld [vmem:[%s3832_s0 + $0xac] ss:$12 sps:$4 sm:$0xff]  }
  0x10   :  { %v2658_v44 = vld [vmem:[%s3832_s0 + $0x2d4] ss:$12 sps:$4 sm:$0xff]   ;;  %v2661_v46 = vld [vmem:[%s3832_s0 + $0x2d0] ss:$12 sps:$4 sm:$0xff]   ;;  %v2664_v48 = vld [vmem:[%s3832_s0 + $0x2ec] ss:$12 sps:$4 sm:$0xff]  }
  0x11   :  { %v2666_v49 = vld [vmem:[%s3832_s0 + $0xa8] ss:$12 sps:$4 sm:$0xff]   ;;  %v2668_v51 = vld [vmem:[%s3832_s0 + $0xc4] ss:$12 sps:$4 sm:$0xff]   ;;  %v2671_v53 = vld [vmem:[%s3832_s0 + $0xc0] ss:$12 sps:$4 sm:$0xff]  }
  0x12   :  { %883 = vmatpush1.bf16.msra.mxu0 %v2606_v5  ;;  %2589 = vmatpush1.bf16.msra.mxu1 %v2606_v5  ;;  %v2667_v50 = vld [vmem:[%s3832_s0 + $0x2e8] ss:$12 sps:$4 sm:$0xff]   ;;  %v2672_v54 = vld [vmem:[%s3832_s0 + $0x20] ss:$12 sps:$4 sm:$0xff]   ;;  %v2675_v56 = vld [vmem:[%s3832_s0 + $0x38] ss:$12 sps:$4 sm:$0xff]  }
  0x13   :  { %884 = vmatprep.subr.bf16.mxu0 %v2749_v0  ;;  %2574 = vmatprep.subr.bf16.mxu1 %v2749_v0  ;;  %v2670_v52 = vld [vmem:[%s3832_s0 + $0x8] ss:$12 sps:$4 sm:$0xff]   ;;  %v2676_v57 = vld [vmem:[%s3832_s0 + $0xd8] ss:$12 sps:$4 sm:$0xff]   ;;  %v2677_v58 = vld [vmem:[%s3832_s0 + $0x50] ss:$12 sps:$4 sm:$0xff]  }
  0x14   :  { %v2673_v55 = vld [vmem:[%s3832_s0 + $0xdc] ss:$12 sps:$4 sm:$0xff]   ;;  %v2678_v59 = vld [vmem:[%s3832_s0 + $0xf4] ss:$12 sps:$4 sm:$0xff]   ;;  %v2683_v63 = vld [vmem:[%s3832_s0 + $0x10c] ss:$12 sps:$4 sm:$0xff]  }
  0x15   :  { %v2680_v60 = vld [vmem:[%s3832_s0 + $0x68] ss:$12 sps:$4 sm:$0xff]   ;;  %v2681_v61 = vld [vmem:[%s3832_s0 + $0xf0] ss:$12 sps:$4 sm:$0xff]   ;;  %v2682_v62 = vld [vmem:[%s3832_s0 + $0x80] ss:$12 sps:$4 sm:$0xff]  }
  0x16   :  { %885 = vmatpush1.bf16.msra.mxu0 %v2607_v7  ;;  %2590 = vmatpush1.bf16.msra.mxu1 %v2607_v7  ;;  %v2686_v1 = vld [vmem:[%s3832_s0 + $0x108] ss:$12 sps:$4 sm:$0xff]   ;;  %v2687_v2 = vld [vmem:[%s3832_s0 + $0xb0] ss:$12 sps:$4 sm:$0xff]   ;;  %v2691_v5 = vld [vmem:[%s3832_s0 + $0x120] ss:$12 sps:$4 sm:$0xff]  }
  0x17   :  { %886 = vmatprep.subr.bf16.mxu0 %v2749_v0  ;;  %2575 = vmatprep.subr.bf16.mxu1 %v2749_v0  ;;  %v2688_v3 = vld [vmem:[%s3832_s0 + $0x124] ss:$12 sps:$4 sm:$0xff]   ;;  %v2690_v4 = vld [vmem:[%s3832_s0 + $0xc8] ss:$12 sps:$4 sm:$0xff]   ;;  %v2692_v6 = vld [vmem:[%s3832_s0 + $0xe0] ss:$12 sps:$4 sm:$0xff]  }
  0x18   :  { %v2693_v7 = vld [vmem:[%s3832_s0 + $0x13c] ss:$12 sps:$4 sm:$0xff]   ;;  %v2695_v8 = vld [vmem:[%s3832_s0 + $0xf8] ss:$12 sps:$4 sm:$0xff]  }
  0x1a   :  { %887 = vmatpush1.bf16.msra.mxu0 %v2608_v9  ;;  %2591 = vmatpush1.bf16.msra.mxu1 %v2608_v9  ;;  %v2696_v9 = vld [vmem:[%s3832_s0 + $0x138] ss:$12 sps:$4 sm:$0xff]  }
  0x1b   :  { %888 = vmatprep.subr.bf16.mxu0 %v2749_v0  ;;  %2576 = vmatprep.subr.bf16.mxu1 %v2749_v0 }
  0x1e   :  { %889 = vmatpush1.bf16.msra.mxu0 %v2609_v10  ;;  %2592 = vmatpush1.bf16.msra.mxu1 %v2609_v10  ;;  %v2697_v10 = vld [vmem:[%s3832_s0 + $0x110] ss:$12 sps:$4 sm:$0xff]  }
  0x1f   :  { %890 = vmatprep.subr.bf16.mxu0 %v2749_v0  ;;  %2577 = vmatprep.subr.bf16.mxu1 %v2749_v0 }
  0x22   :  { %891 = vmatpush2.bf16.msra.mxu0 %v2610_v11  ;;  %2593 = vmatpush2.bf16.msra.mxu1 %v2610_v11  ;;  %v2698_v11 = vld [vmem:[%s3832_s0 + $0x154] ss:$12 sps:$4 sm:$0xff]  }
  0x23   :  { %892 = vmatprep.subr.bf16.mxu0 %v2749_v0  ;;  %2578 = vmatprep.subr.bf16.mxu1 %v2749_v0 }
  0x26   :  { %893 = vmatpush2.bf16.msra.mxu0 %v2611_v12  ;;  %2594 = vmatpush2.bf16.msra.mxu1 %v2611_v12  ;;  %v2700_v12 = vld [vmem:[%s3832_s0 + $0x128] ss:$12 sps:$4 sm:$0xff]  }
  0x27   :  { %894 = vmatprep.subr.bf16.mxu0 %v2749_v0  ;;  %2579 = vmatprep.subr.bf16.mxu1 %v2749_v0 }
  0x2a   :  { %895 = vmatpush2.bf16.msra.mxu0 %v2612_v13  ;;  %2595 = vmatpush2.bf16.msra.mxu1 %v2612_v13  ;;  %v2701_v13 = vld [vmem:[%s3832_s0 + $0x150] ss:$12 sps:$4 sm:$0xff]  }
  0x2b   :  { %896 = vmatprep.subr.bf16.mxu0 %v2749_v0  ;;  %2580 = vmatprep.subr.bf16.mxu1 %v2749_v0 }
  0x2e   :  { %897 = vmatpush2.bf16.msra.mxu0 %v2613_v14  ;;  %2596 = vmatpush2.bf16.msra.mxu1 %v2613_v14  ;;  %v2702_v14 = vld [vmem:[%s3832_s0 + $0x140] ss:$12 sps:$4 sm:$0xff]  }
  0x2f   :  { %898 = vmatprep.subr.bf16.mxu0 %v2749_v0  ;;  %2581 = vmatprep.subr.bf16.mxu1 %v2749_v0 }
  0x32   :  { %899 = vmatpush2.bf16.msra.mxu0 %v2614_v15  ;;  %2597 = vmatpush2.bf16.msra.mxu1 %v2614_v15  ;;  %v2703_v15 = vld [vmem:[%s3832_s0 + $0x16c] ss:$12 sps:$4 sm:$0xff]  }
  0x33   :  { %900 = vmatprep.subr.bf16.mxu0 %v2749_v0  ;;  %2582 = vmatprep.subr.bf16.mxu1 %v2749_v0 }
  0x36   :  { %901 = vmatpush2.bf16.msra.mxu0 %v2615_v16  ;;  %2598 = vmatpush2.bf16.msra.mxu1 %v2615_v16  ;;  %v2705_v16 = vld [vmem:[%s3832_s0 + $0x158] ss:$12 sps:$4 sm:$0xff]  }
  0x37   :  { %902 = vmatprep.subr.bf16.mxu0 %v2749_v0  ;;  %2583 = vmatprep.subr.bf16.mxu1 %v2749_v0 }
  0x3a   :  { %903 = vmatpush2.bf16.msra.mxu0 %v2616_v17  ;;  %2599 = vmatpush2.bf16.msra.mxu1 %v2616_v17  ;;  %v2706_v17 = vld [vmem:[%s3832_s0 + $0x168] ss:$12 sps:$4 sm:$0xff]  }
  0x3b   :  { %904 = vmatprep.subr.bf16.mxu0 %v2749_v0  ;;  %2584 = vmatprep.subr.bf16.mxu1 %v2749_v0  ;;  %v2685_v0 = vld [vmem:[%s3832_s0 + $0x98] ss:$12 sps:$4 sm:$0xff]  }
  0x3e   :  { %905 = vmatpush2.bf16.msra.mxu0 %v2617_v18  ;;  %2600 = vmatpush2.bf16.msra.mxu1 %v2617_v18  ;;  %v2707_v18 = vld [vmem:[%s3832_s0 + $0x170] ss:$12 sps:$4 sm:$0xff]  }
  0x3f   :  { %2501 = vmatprep.subr.bf16.mxu1 %v2624_v19 }
  0x41   :  { %907 = vmatmul.mubr.bf16.vlgmr.msra.gmra.mxu0 %v2618_v20  ;;  %1099 = vmatmul.mubr.bf16.vlgmr.msra.gmra.mxu1 %v2621_v21  ;;  %v2710_v20 = vld [vmem:[%s3832_s0 + $0x188] ss:$12 sps:$4 sm:$0xff]   ;;  %v2711_v21 = vld [vmem:[%s3832_s0 + $0x180] ss:$12 sps:$4 sm:$0xff]  }
  0x42   :  { %2502 = vmatpush3.bf16.msra.mxu1 %v2624_v19  ;;  %914 = vmatprep.mubr.bf16.mxu0 %v2625_v22  ;;  %v2708_v19 = vld [vmem:[%s3832_s0 + $0x184] ss:$12 sps:$4 sm:$0xff]   ;;  %v2712_v22 = vld [vmem:[%s3832_s0 + $0x1a0] ss:$12 sps:$4 sm:$0xff]  }
  0x43   :  { %1106 = vmatprep.mubr.bf16.mxu1 %v2627_v23  ;;  %2503 = vmatprep.subr.bf16.mxu1 %v2649_v24  ;;  %v2713_v23 = vld [vmem:[%s3832_s0 + $0x19c] ss:$12 sps:$4 sm:$0xff]  }
  0x46   :  { %2504 = vmatpush3.bf16.msra.mxu1 %v2649_v24  ;;  %v2715_v24 = vld [vmem:[%s3832_s0 + $0x1b8] ss:$12 sps:$4 sm:$0xff]  }
  0x49   :  { %915 = vmatmul.mubr.bf16.gmra.mxu0 %v2629_v25  ;;  %1107 = vmatmul.mubr.bf16.gmra.mxu1 %v2630_v26  ;;  %v2716_v25 = vld [vmem:[%s3832_s0 + $0x198] ss:$12 sps:$4 sm:$0xff]   ;;  %v2717_v26 = vld [vmem:[%s3832_s0 + $0x1d0] ss:$12 sps:$4 sm:$0xff]  }
  0x4a   :  { %922 = vmatprep.mubr.bf16.mxu0 %v2631_v27  ;;  %1114 = vmatprep.mubr.bf16.mxu1 %v2633_v28  ;;  %v2718_v27 = vld [vmem:[%s3832_s0 + $0x1b4] ss:$12 sps:$4 sm:$0xff]  }
  0x4b   :  { %v2720_v28 = vld [vmem:[%s3832_s0 + $0x1e8] ss:$12 sps:$4 sm:$0xff]  }
  0x51   :  { %923 = vmatmul.mubr.bf16.gmra.mxu0 %v2635_v29  ;;  %1115 = vmatmul.mubr.bf16.gmra.mxu1 %v2636_v30  ;;  %v2721_v29 = vld [vmem:[%s3832_s0 + $0x1b0] ss:$12 sps:$4 sm:$0xff]   ;;  %v2722_v30 = vld [vmem:[%s3832_s0 + $0x200] ss:$12 sps:$4 sm:$0xff]  }
  0x52   :  { %930 = vmatprep.mubr.bf16.mxu0 %v2637_v31  ;;  %1122 = vmatprep.mubr.bf16.mxu1 %v2639_v32  ;;  %v2723_v31 = vld [vmem:[%s3832_s0 + $0x1cc] ss:$12 sps:$4 sm:$0xff]  }
  0x53   :  { %v2725_v32 = vld [vmem:[%s3832_s0 + $0x218] ss:$12 sps:$4 sm:$0xff]  }
  0x59   :  { %931 = vmatmul.mubr.bf16.gmra.mxu0 %v2641_v33  ;;  %1123 = vmatmul.mubr.bf16.gmra.mxu1 %v2642_v34  ;;  %v2726_v33 = vld [vmem:[%s3832_s0 + $0x1c8] ss:$12 sps:$4 sm:$0xff]   ;;  %v2727_v34 = vld [vmem:[%s3832_s0 + $0x230] ss:$12 sps:$4 sm:$0xff]  }
  0x5a   :  { %938 = vmatprep.mubr.bf16.mxu0 %v2643_v35  ;;  %1130 = vmatprep.mubr.bf16.mxu1 %v2645_v36  ;;  %v2728_v35 = vld [vmem:[%s3832_s0 + $0x1e4] ss:$12 sps:$4 sm:$0xff]   ;;  %v2730_v36 = vld [vmem:[%s3832_s0 + $0x248] ss:$12 sps:$4 sm:$0xff]  }
  0x61   :  { %939 = vmatmul.mubr.bf16.gmra.mxu0 %v2647_v37  ;;  %1131 = vmatmul.mubr.bf16.gmra.mxu1 %v2648_v38  ;;  %v2731_v37 = vld [vmem:[%s3832_s0 + $0x1e0] ss:$12 sps:$4 sm:$0xff]  }
  0x62   :  { %946 = vmatprep.mubr.bf16.mxu0 %v2650_v39  ;;  %1138 = vmatprep.mubr.bf16.mxu1 %v2652_v40  ;;  %v2732_v38 = vld [vmem:[%s3832_s0 + $0x260] ss:$12 sps:$4 sm:$0xff]   ;;  %v2733_v39 = vld [vmem:[%s3832_s0 + $0x1fc] ss:$12 sps:$4 sm:$0xff]   ;;  %v2735_v40 = vld [vmem:[%s3832_s0 + $0x278] ss:$12 sps:$4 sm:$0xff]  }
  0x69   :  { %947 = vmatmul.mubr.bf16.gmra.mxu0 %v2654_v41  ;;  %1139 = vmatmul.mubr.bf16.gmra.mxu1 %v2655_v42  ;;  %v2736_v41 = vld [vmem:[%s3832_s0 + $0x1f8] ss:$12 sps:$4 sm:$0xff]   ;;  %v2737_v42 = vld [vmem:[%s3832_s0 + $0x290] ss:$12 sps:$4 sm:$0xff]  }
  0x6a   :  { %954 = vmatprep.mubr.bf16.mxu0 %v2656_v43  ;;  %1146 = vmatprep.mubr.bf16.mxu1 %v2658_v44  ;;  %v2738_v43 = vld [vmem:[%s3832_s0 + $0x214] ss:$12 sps:$4 sm:$0xff]  }
  0x6b   :  { %v2740_v44 = vld [vmem:[%s3832_s0 + $0x2a8] ss:$12 sps:$4 sm:$0xff]  }
  0x71   :  { %955 = vmatmul.mubr.bf16.gmra.mxu0 %v2660_v45  ;;  %1147 = vmatmul.mubr.bf16.gmra.mxu1 %v2661_v46  ;;  %v2741_v45 = vld [vmem:[%s3832_s0 + $0x210] ss:$12 sps:$4 sm:$0xff]   ;;  %v2742_v46 = vld [vmem:[%s3832_s0 + $0x2c0] ss:$12 sps:$4 sm:$0xff]  }
  0x72   :  { %962 = vmatprep.mubr.bf16.mxu0 %v2662_v47  ;;  %1154 = vmatprep.mubr.bf16.mxu1 %v2664_v48  ;;  %v2743_v47 = vld [vmem:[%s3832_s0 + $0x22c] ss:$12 sps:$4 sm:$0xff]  }
  0x73   :  { %v2745_v48 = vld [vmem:[%s3832_s0 + $0x2d8] ss:$12 sps:$4 sm:$0xff]  }
  0x79   :  { %963 = vmatmul.mubr.bf16.gmra.mxu0 %v2666_v49  ;;  %1155 = vmatmul.mubr.bf16.gmra.mxu1 %v2667_v50  ;;  %v2746_v49 = vld [vmem:[%s3832_s0 + $0x228] ss:$12 sps:$4 sm:$0xff]   ;;  %v2747_v50 = vld [vmem:[%s3832_s0 + $0x2f0] ss:$12 sps:$4 sm:$0xff]  }
  0x7a   :  { %970 = vmatprep.mubr.bf16.mxu0 %v2668_v51  ;;  %2505 = vmatprep.mubr.msk.bf16.mxu1 %vm777_vm0, %v2670_v52 }
  0x81   :  { %971 = vmatmul.mubr.bf16.gmra.mxu0 %v2671_v53  ;;  %2506 = vmatmul.mubr.msk.bf16.vlgmr.msra.gmra.mxu1 %vm777_vm0, %v2672_v54 }
  0x82   :  { %978 = vmatprep.mubr.bf16.mxu0 %v2673_v55  ;;  %2509 = vmatprep.mubr.msk.bf16.mxu1 %vm777_vm0, %v2675_v56 }
  0x89   :  { %979 = vmatmul.mubr.bf16.gmra.mxu0 %v2676_v57  ;;  %2510 = vmatmul.mubr.msk.bf16.gmra.mxu1 %vm777_vm0, %v2677_v58 }
  0x8a   :  { %986 = vmatprep.mubr.bf16.mxu0 %v2678_v59  ;;  %2513 = vmatprep.mubr.msk.bf16.mxu1 %vm777_vm0, %v2680_v60 }
  0x91   :  { %987 = vmatmul.mubr.bf16.gmra.mxu0 %v2681_v61  ;;  %2514 = vmatmul.mubr.msk.bf16.gmra.mxu1 %vm777_vm0, %v2682_v62 }
  0x92   :  { %994 = vmatprep.mubr.bf16.mxu0 %v2683_v63  ;;  %2517 = vmatprep.mubr.msk.bf16.mxu1 %vm777_vm0, %v2685_v0 }
  0x99   :  { %995 = vmatmul.mubr.bf16.gmra.mxu0 %v2686_v1  ;;  %2518 = vmatmul.mubr.msk.bf16.gmra.mxu1 %vm777_vm0, %v2687_v2 }
  0x9a   :  { %1002 = vmatprep.mubr.bf16.mxu0 %v2688_v3  ;;  %2521 = vmatprep.mubr.msk.bf16.mxu1 %vm777_vm0, %v2690_v4 }
  0xa1   :  { %1003 = vmatmul.mubr.bf16.gmra.mxu0 %v2691_v5  ;;  %2522 = vmatmul.mubr.msk.bf16.gmra.mxu1 %vm777_vm0, %v2692_v6 }
  0xa2   :  { %1010 = vmatprep.mubr.bf16.mxu0 %v2693_v7  ;;  %2525 = vmatprep.mubr.msk.bf16.mxu1 %vm777_vm0, %v2695_v8 }
  0xa9   :  { %1011 = vmatmul.mubr.bf16.gmra.mxu0 %v2696_v9  ;;  %2526 = vmatmul.mubr.msk.bf16.gmra.mxu1 %vm777_vm0, %v2697_v10 }
  0xaa   :  { %1018 = vmatprep.mubr.bf16.mxu0 %v2698_v11  ;;  %2529 = vmatprep.mubr.msk.bf16.mxu1 %vm777_vm0, %v2700_v12 }
  0xb1   :  { %1019 = vmatmul.mubr.bf16.gmra.mxu0 %v2701_v13  ;;  %2530 = vmatmul.mubr.msk.bf16.gmra.mxu1 %vm777_vm0, %v2702_v14 }
  0xb2   :  { %1026 = vmatprep.mubr.bf16.mxu0 %v2703_v15  ;;  %2533 = vmatprep.mubr.msk.bf16.mxu1 %vm777_vm0, %v2705_v16 }
  0xb9   :  { %1027 = vmatmul.mubr.bf16.gmra.mxu0 %v2706_v17  ;;  %2534 = vmatmul.mubr.msk.bf16.gmra.mxu1 %vm777_vm0, %v2707_v18 }
  0xba   :  { %1034 = vmatprep.mubr.bf16.mxu0 %v2708_v19  ;;  %2537 = vmatprep.mubr.msk.bf16.mxu1 %vm777_vm0, %v2710_v20 }
  0xc1   :  { %1035 = vmatmul.mubr.bf16.gmra.mxu0 %v2711_v21  ;;  %2538 = vmatmul.mubr.msk.bf16.gmra.mxu1 %vm777_vm0, %v2712_v22 }
  0xc2   :  { %1042 = vmatprep.mubr.bf16.mxu0 %v2713_v23  ;;  %2541 = vmatprep.mubr.msk.bf16.mxu1 %vm777_vm0, %v2715_v24 }
  0xc9   :  { %1043 = vmatmul.mubr.bf16.gmra.mxu0 %v2716_v25  ;;  %2542 = vmatmul.mubr.msk.bf16.gmra.mxu1 %vm777_vm0, %v2717_v26 }
  0xca   :  { %1050 = vmatprep.mubr.bf16.mxu0 %v2718_v27  ;;  %2545 = vmatprep.mubr.msk.bf16.mxu1 %vm777_vm0, %v2720_v28 }
  0xd1   :  { %1051 = vmatmul.mubr.bf16.gmra.mxu0 %v2721_v29  ;;  %2546 = vmatmul.mubr.msk.bf16.gmra.mxu1 %vm777_vm0, %v2722_v30 }
  0xd2   :  { %1058 = vmatprep.mubr.bf16.mxu0 %v2723_v31  ;;  %2549 = vmatprep.mubr.msk.bf16.mxu1 %vm777_vm0, %v2725_v32 }
  0xd9   :  { %1059 = vmatmul.mubr.bf16.gmra.mxu0 %v2726_v33  ;;  %2550 = vmatmul.mubr.msk.bf16.gmra.mxu1 %vm777_vm0, %v2727_v34 }
  0xda   :  { %1066 = vmatprep.mubr.bf16.mxu0 %v2728_v35  ;;  %2553 = vmatprep.mubr.msk.bf16.mxu1 %vm777_vm0, %v2730_v36 }
  0xe1   :  { %1067 = vmatmul.mubr.bf16.gmra.mxu0 %v2731_v37  ;;  %2554 = vmatmul.mubr.msk.bf16.gmra.mxu1 %vm777_vm0, %v2732_v38 }
  0xe2   :  { %1074 = vmatprep.mubr.bf16.mxu0 %v2733_v39  ;;  %2557 = vmatprep.mubr.msk.bf16.mxu1 %vm777_vm0, %v2735_v40 }
  0xe9   :  { %1075 = vmatmul.mubr.bf16.gmra.mxu0 %v2736_v41  ;;  %2558 = vmatmul.mubr.msk.bf16.gmra.mxu1 %vm777_vm0, %v2737_v42 }
  0xea   :  { %1082 = vmatprep.mubr.bf16.mxu0 %v2738_v43  ;;  %2561 = vmatprep.mubr.msk.bf16.mxu1 %vm777_vm0, %v2740_v44 }
  0xf1   :  { %1083 = vmatmul.mubr.bf16.gmra.mxu0 %v2741_v45  ;;  %2562 = vmatmul.mubr.msk.bf16.gmra.mxu1 %vm777_vm0, %v2742_v46 }
  0xf2   :  { %1090 = vmatprep.mubr.bf16.mxu0 %v2743_v47  ;;  %2565 = vmatprep.mubr.msk.bf16.mxu1 %vm777_vm0, %v2745_v48 }
  0xf9   :  { %1091 = vmatmul.mubr.bf16.gmra.mxu0 %v2746_v49  ;;  %2566 = vmatmul.mubr.msk.bf16.gmra.mxu1 %vm777_vm0, %v2747_v50  ;;  %v2436_v49 = vld [vmem:[%s3833_s3 + $0x8] sm:$0xff]   ;;  %v3249_v50 = vld [vmem:[%s3834_s2] ss:$0 sm:$0xff] }
 0x101   :  { %v3181_v51 = vpop.f32.mrf.mxu0  ;;  %v3183_v52 = vpop.f32.mrf.mxu1 }
 0x103   :  { %v910_v53 = vpop.f32.mrf.mxu0  ;;  %v1102_v54 = vpop.f32.mrf.mxu1 }
 0x105   :  { %v3185_v55 = vpop.f32.mrf.mxu0  ;;  %v3187_v56 = vpop.f32.mrf.mxu1 }
 0x107   :  { %v913_v57 = vpop.f32.mrf.mxu0  ;;  %v1105_v58 = vpop.f32.mrf.mxu1 }
 0x108   :  { %v2309_v57 = vld [vmem:[%s3833_s3] sm:$0xff]  }
 0x109   :  { %v916_v59 = vpop.f32.mrf.mxu0  ;;  %v3189_v60 = vpop.f32.mrf.mxu1 }
 0x10a   :  { %v917_v58 = vadd.f32 %v3249_v50, %v916_v59 }
 0x10b   :  { %v918_v61 = vpop.f32.mrf.mxu0  ;;  %v1110_v62 = vpop.f32.mrf.mxu1 }
 0x10c   :  { %v2314_v61 = vunpack.c.l.bf16 %v2436_v49 }
 0x10d   :  { %v3191_v63 = vpop.f32.mrf.mxu0  ;;  %v3193_v0 = vpop.f32.mrf.mxu1 }
 0x10f   :  { %v921_v1 = vpop.f32.mrf.mxu0  ;;  %v1113_v2 = vpop.f32.mrf.mxu1 }
 0x110   :  { %v909_v2 = vadd.f32 %v3249_v50, %v3181_v51 }
 0x111   :  { %v3195_v3 = vpop.f32.mrf.mxu0  ;;  %v3197_v4 = vpop.f32.mrf.mxu1 }
 0x113   :  { %v926_v5 = vpop.f32.mrf.mxu0  ;;  %v1118_v6 = vpop.f32.mrf.mxu1 }
 0x114   :  { %v2310_v6 = vunpack.c.l.bf16 %v2309_v57 }
 0x115   :  { %v3199_v7 = vpop.f32.mrf.mxu0  ;;  %v3201_v8 = vpop.f32.mrf.mxu1 }
 0x117   :  { %v929_v9 = vpop.f32.mrf.mxu0  ;;  %v1121_v10 = vpop.f32.mrf.mxu1 }
 0x119   :  { %v3203_v11 = vpop.f32.mrf.mxu0  ;;  %v3205_v12 = vpop.f32.mrf.mxu1 }
 0x11b   :  { %v934_v13 = vpop.f32.mrf.mxu0  ;;  %v1126_v14 = vpop.f32.mrf.mxu1 }
 0x11c   :  { %v920_v13 = vadd.f32 %v3249_v50, %v3191_v63  ;;  %v2437_v63 = vld [vmem:[%s3833_s3 + $0x10] sm:$0xff]  }
 0x11d   :  { %v3207_v15 = vpop.f32.mrf.mxu0  ;;  %v3209_v16 = vpop.f32.mrf.mxu1 }
 0x11f   :  { %v937_v17 = vpop.f32.mrf.mxu0  ;;  %v1129_v18 = vpop.f32.mrf.mxu1 }
 0x120   :  { %v2315_v18 = vunpack.c.h.bf16 %v2436_v49 }
 0x121   :  { %v3211_v19 = vpop.f32.mrf.mxu0  ;;  %v3213_v20 = vpop.f32.mrf.mxu1 }
 0x123   :  { %v942_v21 = vpop.f32.mrf.mxu0  ;;  %v1134_v22 = vpop.f32.mrf.mxu1 }
 0x124   :  { %v2311_v22 = vunpack.c.h.bf16 %v2309_v57 }
 0x125   :  { %v3215_v23 = vpop.f32.mrf.mxu0  ;;  %v3217_v24 = vpop.f32.mrf.mxu1 }
 0x127   :  { %v945_v25 = vpop.f32.mrf.mxu0  ;;  %v1137_v26 = vpop.f32.mrf.mxu1 }
 0x128   :  { %v912_v25 = vadd.f32 %v3249_v50, %v3185_v55  ;;  %v933_v55 = vadd.f32 %v3249_v50, %v3203_v11 }
 0x129   :  { %v3219_v27 = vpop.f32.mrf.mxu0  ;;  %v3221_v28 = vpop.f32.mrf.mxu1 }
 0x12b   :  { %v950_v29 = vpop.f32.mrf.mxu0  ;;  %v1142_v30 = vpop.f32.mrf.mxu1 }
 0x12c   :  { %v2438_v30 = vld [vmem:[%s3833_s3 + $0x18] sm:$0xff]  }
 0x12d   :  { %v3223_v31 = vpop.f32.mrf.mxu0  ;;  %v3225_v32 = vpop.f32.mrf.mxu1  ;;  %v2322_v49 = vunpack.c.l.bf16 %v2438_v30  ;;  %v2323_v11 = vunpack.c.h.bf16 %v2438_v30 }
 0x12f   :  { %v953_v33 = vpop.f32.mrf.mxu0  ;;  %v1145_v34 = vpop.f32.mrf.mxu1 }
 0x131   :  { %v3227_v35 = vpop.f32.mrf.mxu0  ;;  %v3229_v36 = vpop.f32.mrf.mxu1 }
 0x133   :  { %v958_v37 = vpop.f32.mrf.mxu0  ;;  %v1150_v38 = vpop.f32.mrf.mxu1 }
 0x135   :  { %v3231_v39 = vpop.f32.mrf.mxu0  ;;  %v3233_v40 = vpop.f32.mrf.mxu1 }
 0x137   :  { %v961_v41 = vpop.f32.mrf.mxu0  ;;  %v1153_v42 = vpop.f32.mrf.mxu1 }
 0x139   :  { %v3235_v43 = vpop.f32.mrf.mxu0  ;;  %v3237_v44 = vpop.f32.mrf.mxu1 }
 0x13b   :  { %v966_v45 = vpop.f32.mrf.mxu0  ;;  %v1158_v46 = vpop.f32.mrf.mxu1 }
 0x13d   :  { %v3239_v47 = vpop.f32.mrf.mxu0  ;;  %v3241_v48 = vpop.f32.mrf.mxu1 }
 0x13f   :  { %v969_v53 = vpop.f32.mrf.mxu0  ;;  %v1161_v54 = vpop.f32.mrf.mxu1 }
 0x140   :  { %v2318_v53 = vunpack.c.l.bf16 %v2437_v63  ;;  %v925_v54 = vadd.f32 %v3249_v50, %v3195_v3 }
 0x141   :  { %v3255_v62 = vpop.f32.mrf.mxu0  ;;  %v2507_v1 = vpop.f32.mrf.mxu1 }
 0x142   :  { %v1206_v5 = vadd.f32 %v2507_v1, %v917_v58 }
 0x143   :  { %v974_v9 = vpop.f32.mrf.mxu0  ;;  %v1197_v10 = vpop.f32.mrf.mxu1 }
 0x144   :  { %v1582_v14 = vadd.f32 %v2314_v61, %v1206_v5  ;;  %v1198_v17 = vadd.f32 %v1197_v10, %v909_v2 }
 0x145   :  { %v3261_v21 = vpop.f32.mrf.mxu0  ;;  %v2508_v59 = vpop.f32.mrf.mxu1 }
 0x146   :  { %v1646_v26 = vmax.f32 %v1582_v14, 0.0  ;;  %v1580_v29 = vadd.f32 %v2310_v6, %v1198_v17  ;;  %v1209_v51 = vadd.f32 %v2508_v59, %v920_v13  ;;  %v936_v6 = vadd.f32 %v3249_v50, %v3207_v15 }
 0x147   :  { %v977_v33 = vpop.f32.mrf.mxu0  ;;  %v1200_v34 = vpop.f32.mrf.mxu1  ;;  %v928_v59 = vadd.f32 %v3249_v50, %v3199_v7 }
 0x148   :  { %v2246_v37 = vpack.c.bf16 %v1646_v26, %v1646_v26  ;;  %v1644_v38 = vmax.f32 %v1580_v29, 0.0  ;;  %v1583_v41 = vadd.f32 %v2315_v18, %v1209_v51  ;;  %v1201_v42 = vadd.f32 %v1200_v34, %v912_v25  ;;  %v2440_v26 = vld [vmem:[%s3833_s3 + $0x28] sm:$0xff]   ;;  %v2439_v29 = vld [vmem:[%s3833_s3 + $0x20] sm:$0xff]  }
 0x149   :  { %v3273_v45 = vpop.f32.mrf.mxu0  ;;  %v2511_v46 = vpop.f32.mrf.mxu1  ;;  %v2319_v18 = vunpack.c.h.bf16 %v2437_v63 }
 0x14a   :  { %1967 = vst.msk [vmem:[%s3835_s4 + $0x8] sm:$0xf] %vm1964_vm1, %v2246_v37  ;;  %v2244_v57 = vpack.c.bf16 %v1644_v38, %v1644_v38  ;;  %v1647_v58 = vmax.f32 %v1583_v41, 0.0  ;;  %v1581_v61 = vadd.f32 %v2311_v22, %v1201_v42  ;;  %v1222_v1 = vadd.f32 %v2511_v46, %v933_v55 }
 0x14b   :  { %v982_v2 = vpop.f32.mrf.mxu0  ;;  %v1213_v5 = vpop.f32.mrf.mxu1  ;;  %v949_v37 = vadd.f32 %v3249_v50, %v3219_v27  ;;  %v2330_v55 = vunpack.c.l.bf16 %v2440_v26  ;;  %v2326_v46 = vunpack.c.l.bf16 %v2439_v29 }
 0x14c   :  { %1965 = vst.msk [vmem:[%s3835_s4] sm:$0xf] %vm1964_vm1, %v2244_v57  ;;  %v2247_v3 = vpack.c.bf16 %v1647_v58, %v1647_v58  ;;  %v1645_v9 = vmax.f32 %v1581_v61, 0.0  ;;  %v1214_v10 = vadd.f32 %v1213_v5, %v925_v54  ;;  %v1586_v13 = vadd.f32 %v2322_v49, %v1222_v1 }
 0x14d   :  { %v3287_v14 = vpop.f32.mrf.mxu0  ;;  %v2512_v17 = vpop.f32.mrf.mxu1  ;;  %v941_v49 = vadd.f32 %v3249_v50, %v3211_v19  ;;  %v2331_v1 = vunpack.c.h.bf16 %v2440_v26  ;;  %v952_v2 = vadd.f32 %v3249_v50, %v3223_v31 }
 0x14e   :  { %1968 = vst.msk [vmem:[%s3835_s4 + $0xc] sm:$0xf] %vm1964_vm1, %v2247_v3  ;;  %v2245_v15 = vpack.c.bf16 %v1645_v9, %v1645_v9  ;;  %v1584_v22 = vadd.f32 %v2318_v53, %v1214_v10  ;;  %v1225_v25 = vadd.f32 %v2512_v17, %v936_v6  ;;  %v1650_v51 = vmax.f32 %v1586_v13, 0.0 }
 0x14f   :  { %v985_v30 = vpop.f32.mrf.mxu0  ;;  %v1216_v63 = vpop.f32.mrf.mxu1  ;;  %v2327_v10 = vunpack.c.h.bf16 %v2439_v29  ;;  %v944_v13 = vadd.f32 %v3249_v50, %v3215_v23 }
 0x150   :  { %1966 = vst.msk [vmem:[%s3835_s4 + $0x4] sm:$0xf] %vm1964_vm1, %v2245_v15  ;;  %v1648_v7 = vmax.f32 %v1584_v22, 0.0  ;;  %v1587_v33 = vadd.f32 %v2323_v11, %v1225_v25  ;;  %v1217_v34 = vadd.f32 %v1216_v63, %v928_v59  ;;  %v2250_v38 = vpack.c.bf16 %v1650_v51, %v1650_v51  ;;  %v2442_v59 = vld [vmem:[%s3833_s3 + $0x38] sm:$0xff]   ;;  %v2441_v15 = vld [vmem:[%s3833_s3 + $0x30] sm:$0xff]  }
 0x151   :  { %v3307_v41 = vpop.f32.mrf.mxu0  ;;  %v2515_v42 = vpop.f32.mrf.mxu1  ;;  %v965_v30 = vadd.f32 %v3249_v50, %v3235_v43 }
 0x152   :  { %v2248_v53 = vpack.c.bf16 %v1648_v7, %v1648_v7  ;;  %v1651_v54 = vmax.f32 %v1587_v33, 0.0  ;;  %v1585_v57 = vadd.f32 %v2319_v18, %v1217_v34  ;;  %1971 = vst.msk [vmem:[%s3835_s4 + $0x18] sm:$0xf] %vm1964_vm1, %v2250_v38  ;;  %v1238_v58 = vadd.f32 %v2515_v42, %v949_v37 }
 0x153   :  { %v990_v61 = vpop.f32.mrf.mxu0  ;;  %v1229_v27 = vpop.f32.mrf.mxu1  ;;  %v2338_v34 = vunpack.c.l.bf16 %v2442_v59  ;;  %v2334_v37 = vunpack.c.l.bf16 %v2441_v15  ;;  %v957_v38 = vadd.f32 %v3249_v50, %v3227_v35 }
 0x154   :  { %1969 = vst.msk [vmem:[%s3835_s4 + $0x10] sm:$0xf] %vm1964_vm1, %v2248_v53  ;;  %v2251_v19 = vpack.c.bf16 %v1651_v54, %v1651_v54  ;;  %v1649_v5 = vmax.f32 %v1585_v57, 0.0  ;;  %v1230_v11 = vadd.f32 %v1229_v27, %v941_v49  ;;  %v1590_v6 = vadd.f32 %v2330_v55, %v1238_v58 }
 0x155   :  { %v3321_v3 = vpop.f32.mrf.mxu0  ;;  %v2516_v9 = vpop.f32.mrf.mxu1  ;;  %v2339_v54 = vunpack.c.h.bf16 %v2442_v59  ;;  %v968_v57 = vadd.f32 %v3249_v50, %v3239_v47 }
 0x156   :  { %1972 = vst.msk [vmem:[%s3835_s4 + $0x1c] sm:$0xf] %vm1964_vm1, %v2251_v19  ;;  %v2249_v31 = vpack.c.bf16 %v1649_v5, %v1649_v5  ;;  %v1588_v17 = vadd.f32 %v2326_v46, %v1230_v11  ;;  %v1241_v18 = vadd.f32 %v2516_v9, %v952_v2  ;;  %v1654_v22 = vmax.f32 %v1590_v6, 0.0  ;;  %v2444_v9 = vld [vmem:[%s3833_s3 + $0x48] sm:$0xff]  }
 0x157   :  { %v993_v25 = vpop.f32.mrf.mxu0  ;;  %v1232_v26 = vpop.f32.mrf.mxu1  ;;  %v2335_v19 = vunpack.c.h.bf16 %v2441_v15  ;;  %v960_v5 = vadd.f32 %v3249_v50, %v3231_v39  ;;  %v981_v15 = vadd.f32 %v3249_v50, %v3273_v45 }
 0x158   :  { %1970 = vst.msk [vmem:[%s3835_s4 + $0x14] sm:$0xf] %vm1964_vm1, %v2249_v31  ;;  %v1652_v23 = vmax.f32 %v1588_v17, 0.0  ;;  %v1591_v29 = vadd.f32 %v2331_v1, %v1241_v18  ;;  %v1233_v51 = vadd.f32 %v1232_v26, %v944_v13  ;;  %v2254_v63 = vpack.c.bf16 %v1654_v22, %v1654_v22 }
 0x159   :  { %v3341_v7 = vpop.f32.mrf.mxu0  ;;  %v2519_v33 = vpop.f32.mrf.mxu1 }
 0x15a   :  { %v2252_v42 = vpack.c.bf16 %v1652_v23, %v1652_v23  ;;  %v1655_v55 = vmax.f32 %v1591_v29, 0.0  ;;  %v1589_v46 = vadd.f32 %v2327_v10, %v1233_v51  ;;  %1975 = vst.msk [vmem:[%s3835_s4 + $0x28] sm:$0xf] %vm1964_vm1, %v2254_v63  ;;  %v1254_v49 = vadd.f32 %v2519_v33, %v965_v30  ;;  %v2443_v10 = vld [vmem:[%s3833_s3 + $0x40] sm:$0xff]  }
 0x15b   :  { %v998_v53 = vpop.f32.mrf.mxu0  ;;  %v1245_v43 = vpop.f32.mrf.mxu1  ;;  %v2346_v23 = vunpack.c.l.bf16 %v2444_v9  ;;  %v2342_v29 = vunpack.c.l.bf16 %v2443_v10  ;;  %v973_v51 = vadd.f32 %v3249_v50, %v3255_v62 }
 0x15c   :  { %1973 = vst.msk [vmem:[%s3835_s4 + $0x20] sm:$0xf] %vm1964_vm1, %v2252_v42  ;;  %v2255_v35 = vpack.c.bf16 %v1655_v55, %v1655_v55  ;;  %v1653_v58 = vmax.f32 %v1589_v46, 0.0  ;;  %v1246_v61 = vadd.f32 %v1245_v43, %v957_v38  ;;  %v1594_v27 = vadd.f32 %v2338_v34, %v1254_v49 }
 0x15d   :  { %v3355_v1 = vpop.f32.mrf.mxu0  ;;  %v2520_v2 = vpop.f32.mrf.mxu1  ;;  %v2347_v38 = vunpack.c.h.bf16 %v2444_v9  ;;  %v984_v42 = vadd.f32 %v3249_v50, %v3287_v14 }
 0x15e   :  { %1976 = vst.msk [vmem:[%s3835_s4 + $0x2c] sm:$0xf] %vm1964_vm1, %v2255_v35  ;;  %v2253_v47 = vpack.c.bf16 %v1653_v58, %v1653_v58  ;;  %v1592_v11 = vadd.f32 %v2334_v37, %v1246_v61  ;;  %v1257_v6 = vadd.f32 %v2520_v2, %v968_v57  ;;  %v1658_v13 = vmax.f32 %v1594_v27, 0.0  ;;  %v2446_v61 = vld [vmem:[%s3833_s3 + $0x58] sm:$0xff]   ;;  %v2445_v27 = vld [vmem:[%s3833_s3 + $0x50] sm:$0xff]  }
 0x15f   :  { %v1001_v31 = vpop.f32.mrf.mxu0  ;;  %v1248_v17 = vpop.f32.mrf.mxu1  ;;  %v976_v57 = vadd.f32 %v3249_v50, %v3261_v21 }
 0x160   :  { %1974 = vst.msk [vmem:[%s3835_s4 + $0x24] sm:$0xf] %vm1964_vm1, %v2253_v47  ;;  %v1656_v39 = vmax.f32 %v1592_v11, 0.0  ;;  %v1595_v18 = vadd.f32 %v2339_v54, %v1257_v6  ;;  %v1249_v59 = vadd.f32 %v1248_v17, %v960_v5  ;;  %v2258_v22 = vpack.c.bf16 %v1658_v13, %v1658_v13 }
 0x161   :  { %v3375_v25 = vpop.f32.mrf.mxu0  ;;  %v2523_v26 = vpop.f32.mrf.mxu1  ;;  %v2343_v54 = vunpack.c.h.bf16 %v2443_v10  ;;  %v997_v6 = vadd.f32 %v3249_v50, %v3341_v7  ;;  %v2354_v31 = vunpack.c.l.bf16 %v2446_v61  ;;  %v2350_v17 = vunpack.c.l.bf16 %v2445_v27 }
 0x162   :  { %v2256_v30 = vpack.c.bf16 %v1656_v39, %v1656_v39  ;;  %v1659_v63 = vmax.f32 %v1595_v18, 0.0  ;;  %v1593_v33 = vadd.f32 %v2335_v19, %v1249_v59  ;;  %1979 = vst.msk [vmem:[%s3835_s4 + $0x38] sm:$0xf] %vm1964_vm1, %v2258_v22  ;;  %v1270_v34 = vadd.f32 %v2523_v26, %v981_v15 }
 0x163   :  { %v1006_v37 = vpop.f32.mrf.mxu0  ;;  %v1261_v45 = vpop.f32.mrf.mxu1  ;;  %v989_v39 = vadd.f32 %v3249_v50, %v3307_v41  ;;  %v2355_v7 = vunpack.c.h.bf16 %v2446_v61 }
 0x164   :  { %1977 = vst.msk [vmem:[%s3835_s4 + $0x30] sm:$0xf] %vm1964_vm1, %v2256_v30  ;;  %v2259_v62 = vpack.c.bf16 %v1659_v63, %v1659_v63  ;;  %v1657_v55 = vmax.f32 %v1593_v33, 0.0  ;;  %v1262_v46 = vadd.f32 %v1261_v45, %v973_v51  ;;  %v1598_v49 = vadd.f32 %v2346_v23, %v1270_v34 }
 0x165   :  { %v3389_v53 = vpop.f32.mrf.mxu0  ;;  %v2524_v43 = vpop.f32.mrf.mxu1  ;;  %v2351_v37 = vunpack.c.h.bf16 %v2445_v27  ;;  %v992_v45 = vadd.f32 %v3249_v50, %v3321_v3 }
 0x166   :  { %1980 = vst.msk [vmem:[%s3835_s4 + $0x3c] sm:$0xf] %vm1964_vm1, %v2259_v62  ;;  %v2257_v14 = vpack.c.bf16 %v1657_v55, %v1657_v55  ;;  %v1596_v35 = vadd.f32 %v2342_v29, %v1262_v46  ;;  %v1273_v58 = vadd.f32 %v2524_v43, %v984_v42  ;;  %v1662_v2 = vmax.f32 %v1598_v49, 0.0  ;;  %v2448_v62 = vld [vmem:[%s3833_s3 + $0x68] sm:$0xff]   ;;  %v2447_v55 = vld [vmem:[%s3833_s3 + $0x60] sm:$0xff]  }
 0x167   :  { %v1009_v19 = vpop.f32.mrf.mxu0  ;;  %v1264_v5 = vpop.f32.mrf.mxu1  ;;  %v1000_v29 = vadd.f32 %v3249_v50, %v3355_v1  ;;  %v2362_v27 = vunpack.c.l.bf16 %v2448_v62 }
 0x168   :  { %1978 = vst.msk [vmem:[%s3835_s4 + $0x34] sm:$0xf] %vm1964_vm1, %v2257_v14  ;;  %v1660_v21 = vmax.f32 %v1596_v35, 0.0  ;;  %v1599_v47 = vadd.f32 %v2347_v38, %v1273_v58  ;;  %v1265_v11 = vadd.f32 %v1264_v5, %v976_v57  ;;  %v2262_v9 = vpack.c.bf16 %v1662_v2, %v1662_v2 }
 0x169   :  { %v1012_v10 = vpop.f32.mrf.mxu0  ;;  %v2527_v13 = vpop.f32.mrf.mxu1  ;;  %v2358_v2 = vunpack.c.l.bf16 %v2447_v55  ;;  %v1005_v19 = vadd.f32 %v3249_v50, %v3375_v25 }
 0x16a   :  { %v2260_v18 = vpack.c.bf16 %v1660_v21, %v1660_v21  ;;  %v1663_v59 = vmax.f32 %v1599_v47, 0.0  ;;  %v1597_v15 = vadd.f32 %v2343_v54, %v1265_v11  ;;  %1983 = vst.msk [vmem:[%s3835_s4 + $0x48] sm:$0xf] %vm1964_vm1, %v2262_v9  ;;  %v1286_v22 = vadd.f32 %v2527_v13, %v997_v6 }
 0x16b   :  { %v1014_v26 = vpop.f32.mrf.mxu0  ;;  %v1277_v23 = vpop.f32.mrf.mxu1  ;;  %v1013_v14 = vadd.f32 %v3249_v50, %v1012_v10  ;;  %v2363_v10 = vunpack.c.h.bf16 %v2448_v62 }
 0x16c   :  { %1981 = vst.msk [vmem:[%s3835_s4 + $0x40] sm:$0xf] %vm1964_vm1, %v2260_v18  ;;  %v2263_v41 = vpack.c.bf16 %v1663_v59, %v1663_v59  ;;  %v1661_v51 = vmax.f32 %v1597_v15, 0.0  ;;  %v1278_v30 = vadd.f32 %v1277_v23, %v989_v39  ;;  %v1602_v63 = vadd.f32 %v2354_v31, %v1286_v22 }
 0x16d   :  { %v1015_v33 = vpop.f32.mrf.mxu0  ;;  %v2528_v34 = vpop.f32.mrf.mxu1  ;;  %v2359_v15 = vunpack.c.h.bf16 %v2447_v55  ;;  %v1008_v22 = vadd.f32 %v3249_v50, %v3389_v53 }
 0x16e   :  { %1984 = vst.msk [vmem:[%s3835_s4 + $0x4c] sm:$0xf] %vm1964_vm1, %v2263_v41  ;;  %v2261_v1 = vpack.c.bf16 %v1661_v51, %v1661_v51  ;;  %v1600_v38 = vadd.f32 %v2350_v17, %v1278_v30  ;;  %v1289_v42 = vadd.f32 %v2528_v34, %v1000_v29  ;;  %v1666_v46 = vmax.f32 %v1602_v63, 0.0  ;;  %v2450_v29 = vld [vmem:[%s3833_s3 + $0x78] sm:$0xff]   ;;  %v2449_v41 = vld [vmem:[%s3833_s3 + $0x70] sm:$0xff]  }
 0x16f   :  { %v1017_v49 = vpop.f32.mrf.mxu0  ;;  %v1280_v43 = vpop.f32.mrf.mxu1  ;;  %v1016_v13 = vadd.f32 %v3249_v50, %v1015_v33  ;;  %v2366_v62 = vunpack.c.l.bf16 %v2449_v41 }
 0x170   :  { %1982 = vst.msk [vmem:[%s3835_s4 + $0x44] sm:$0xf] %vm1964_vm1, %v2261_v1  ;;  %v1664_v3 = vmax.f32 %v1600_v38, 0.0  ;;  %v1603_v54 = vadd.f32 %v2355_v7, %v1289_v42  ;;  %v1281_v57 = vadd.f32 %v1280_v43, %v992_v45  ;;  %v2266_v35 = vpack.c.bf16 %v1666_v46, %v1666_v46 }
 0x171   :  { %v1020_v58 = vpop.f32.mrf.mxu0  ;;  %v2531_v61 = vpop.f32.mrf.mxu1  ;;  %v2370_v42 = vunpack.c.l.bf16 %v2450_v29 }
 0x172   :  { %v2264_v5 = vpack.c.bf16 %v1664_v3, %v1664_v3  ;;  %v1667_v21 = vmax.f32 %v1603_v54, 0.0  ;;  %v1601_v47 = vadd.f32 %v2351_v37, %v1281_v57  ;;  %1987 = vst.msk [vmem:[%s3835_s4 + $0x58] sm:$0xf] %vm1964_vm1, %v2266_v35  ;;  %v1302_v11 = vadd.f32 %v2531_v61, %v1013_v14 }
 0x173   :  { %v1022_v6 = vpop.f32.mrf.mxu0  ;;  %v1293_v9 = vpop.f32.mrf.mxu1  ;;  %v1021_v37 = vadd.f32 %v3249_v50, %v1020_v58 }
 0x174   :  { %1985 = vst.msk [vmem:[%s3835_s4 + $0x50] sm:$0xf] %vm1964_vm1, %v2264_v5  ;;  %v2267_v25 = vpack.c.bf16 %v1667_v21, %v1667_v21  ;;  %v1665_v31 = vmax.f32 %v1601_v47, 0.0  ;;  %v1294_v17 = vadd.f32 %v1293_v9, %v1005_v19  ;;  %v1606_v39 = vadd.f32 %v2362_v27, %v1302_v11 }
 0x175   :  { %v1023_v18 = vpop.f32.mrf.mxu0  ;;  %v2532_v59 = vpop.f32.mrf.mxu1  ;;  %v2371_v19 = vunpack.c.h.bf16 %v2450_v29  ;;  %v2367_v5 = vunpack.c.h.bf16 %v2449_v41 }
 0x176   :  { %1988 = vst.msk [vmem:[%s3835_s4 + $0x5c] sm:$0xf] %vm1964_vm1, %v2267_v25  ;;  %v2265_v26 = vpack.c.bf16 %v1665_v31, %v1665_v31  ;;  %v1604_v23 = vadd.f32 %v2358_v2, %v1294_v17  ;;  %v1305_v7 = vadd.f32 %v2532_v59, %v1016_v13  ;;  %v1670_v51 = vmax.f32 %v1606_v39, 0.0  ;;  %v2451_v39 = vld [vmem:[%s3833_s3 + $0x80] sm:$0xff]  }
 0x177   :  { %v1025_v30 = vpop.f32.mrf.mxu0  ;;  %v1296_v63 = vpop.f32.mrf.mxu1  ;;  %v1024_v61 = vadd.f32 %v3249_v50, %v1023_v18 }
 0x178   :  { %1986 = vst.msk [vmem:[%s3835_s4 + $0x54] sm:$0xf] %vm1964_vm1, %v2265_v26  ;;  %v1668_v53 = vmax.f32 %v1604_v23, 0.0  ;;  %v1607_v33 = vadd.f32 %v2363_v10, %v1305_v7  ;;  %v1297_v34 = vadd.f32 %v1296_v63, %v1008_v22  ;;  %v2270_v45 = vpack.c.bf16 %v1670_v51, %v1670_v51 }
 0x179   :  { %v1028_v1 = vpop.f32.mrf.mxu0  ;;  %v2535_v38 = vpop.f32.mrf.mxu1  ;;  %v2374_v51 = vunpack.c.l.bf16 %v2451_v39 }
 0x17a   :  { %v2268_v55 = vpack.c.bf16 %v1668_v53, %v1668_v53  ;;  %v1671_v46 = vmax.f32 %v1607_v33, 0.0  ;;  %v1605_v49 = vadd.f32 %v2359_v15, %v1297_v34  ;;  %v1029_v43 = vadd.f32 %v3249_v50, %v1028_v1  ;;  %1991 = vst.msk [vmem:[%s3835_s4 + $0x68] sm:$0xf] %vm1964_vm1, %v2270_v45 }
 0x17b   :  { %v1030_v3 = vpop.f32.mrf.mxu0  ;;  %v1309_v54 = vpop.f32.mrf.mxu1 }
 0x17c   :  { %1989 = vst.msk [vmem:[%s3835_s4 + $0x60] sm:$0xf] %vm1964_vm1, %v2268_v55  ;;  %v2271_v57 = vpack.c.bf16 %v1671_v46, %v1671_v46  ;;  %v1669_v14 = vmax.f32 %v1605_v49, 0.0  ;;  %v1318_v35 = vadd.f32 %v2535_v38, %v1029_v43  ;;  %v1310_v58 = vadd.f32 %v1309_v54, %v1021_v37  ;;  %v2452_v46 = vld [vmem:[%s3833_s3 + $0x88] sm:$0xff]  }
 0x17d   :  { %v1031_v27 = vpop.f32.mrf.mxu0  ;;  %v2536_v2 = vpop.f32.mrf.mxu1  ;;  %v2375_v38 = vunpack.c.h.bf16 %v2451_v39 }
 0x17e   :  { %1992 = vst.msk [vmem:[%s3835_s4 + $0x6c] sm:$0xf] %vm1964_vm1, %v2271_v57  ;;  %v2269_v21 = vpack.c.bf16 %v1669_v14, %v1669_v14  ;;  %v1610_v47 = vadd.f32 %v2370_v42, %v1318_v35  ;;  %v1608_v11 = vadd.f32 %v2366_v62, %v1310_v58  ;;  %v1032_v6 = vadd.f32 %v3249_v50, %v1031_v27 }
 0x17f   :  { %v1033_v9 = vpop.f32.mrf.mxu0  ;;  %v1312_v10 = vpop.f32.mrf.mxu1  ;;  %v2378_v35 = vunpack.c.l.bf16 %v2452_v46 }
 0x180   :  { %1990 = vst.msk [vmem:[%s3835_s4 + $0x64] sm:$0xf] %vm1964_vm1, %v2269_v21  ;;  %v1674_v13 = vmax.f32 %v1610_v47, 0.0  ;;  %v1672_v25 = vmax.f32 %v1608_v11, 0.0  ;;  %v1321_v31 = vadd.f32 %v2536_v2, %v1032_v6  ;;  %v1313_v17 = vadd.f32 %v1312_v10, %v1024_v61 }
 0x181   :  { %v1036_v18 = vpop.f32.mrf.mxu0  ;;  %v2539_v59 = vpop.f32.mrf.mxu1  ;;  %v2379_v9 = vunpack.c.h.bf16 %v2452_v46 }
 0x182   :  { %v2274_v15 = vpack.c.bf16 %v1674_v13, %v1674_v13  ;;  %v2272_v22 = vpack.c.bf16 %v1672_v25, %v1672_v25  ;;  %v1611_v26 = vadd.f32 %v2371_v19, %v1321_v31  ;;  %v1609_v23 = vadd.f32 %v2367_v5, %v1313_v17  ;;  %v2453_v25 = vld [vmem:[%s3833_s3 + $0x90] sm:$0xff]  }
 0x183   :  { %v1037_v7 = vadd.f32 %v3249_v50, %v1036_v18  ;;  %v1038_v29 = vpop.f32.mrf.mxu0  ;;  %v1325_v41 = vpop.f32.mrf.mxu1 }
 0x184   :  { %1995 = vst.msk [vmem:[%s3835_s4 + $0x78] sm:$0xf] %vm1964_vm1, %v2274_v15  ;;  %1993 = vst.msk [vmem:[%s3835_s4 + $0x70] sm:$0xf] %vm1964_vm1, %v2272_v22  ;;  %v1675_v30 = vmax.f32 %v1611_v26, 0.0  ;;  %v1673_v63 = vmax.f32 %v1609_v23, 0.0  ;;  %v2382_v26 = vunpack.c.l.bf16 %v2453_v25 }
 0x185   :  { %v1326_v53 = vadd.f32 %v1325_v41, %v1037_v7  ;;  %v1039_v33 = vpop.f32.mrf.mxu0  ;;  %v2540_v34 = vpop.f32.mrf.mxu1 }
 0x186   :  { %v2275_v37 = vpack.c.bf16 %v1675_v30, %v1675_v30  ;;  %v2273_v45 = vpack.c.bf16 %v1673_v63, %v1673_v63  ;;  %v1040_v1 = vadd.f32 %v3249_v50, %v1039_v33 }
 0x187   :  { %v1612_v42 = vadd.f32 %v2374_v51, %v1326_v53  ;;  %v1041_v62 = vpop.f32.mrf.mxu0  ;;  %v1328_v55 = vpop.f32.mrf.mxu1 }
 0x188   :  { %1996 = vst.msk [vmem:[%s3835_s4 + $0x7c] sm:$0xf] %vm1964_vm1, %v2275_v37  ;;  %1994 = vst.msk [vmem:[%s3835_s4 + $0x74] sm:$0xf] %vm1964_vm1, %v2273_v45  ;;  %v1329_v49 = vadd.f32 %v1328_v55, %v1040_v1  ;;  %v2454_v1 = vld [vmem:[%s3833_s3 + $0x98] sm:$0xff]  }
 0x189   :  { %v1676_v43 = vmax.f32 %v1612_v42, 0.0  ;;  %v1044_v3 = vpop.f32.mrf.mxu0  ;;  %v2543_v54 = vpop.f32.mrf.mxu1 }
 0x18a   :  { %v1613_v57 = vadd.f32 %v2375_v38, %v1329_v49  ;;  %v1045_v14 = vadd.f32 %v3249_v50, %v1044_v3  ;;  %v2386_v3 = vunpack.c.l.bf16 %v2454_v1 }
 0x18b   :  { %v2276_v58 = vpack.c.bf16 %v1676_v43, %v1676_v43  ;;  %v1046_v61 = vpop.f32.mrf.mxu0  ;;  %v1341_v27 = vpop.f32.mrf.mxu1 }
 0x18c   :  { %v1677_v2 = vmax.f32 %v1613_v57, 0.0  ;;  %v1334_v19 = vadd.f32 %v2539_v59, %v1045_v14  ;;  %v1101_v61 = vadd.f32 %v3249_v50, %v3183_v52  ;;  %v3571_v52 = vld [vmem:[%s3833_s3 + $0xa0] sm:$0xff]  }
 0x18d   :  { %1997 = vst.msk [vmem:[%s3835_s4 + $0x80] sm:$0xf] %vm1964_vm1, %v2276_v58  ;;  %v1047_v5 = vpop.f32.mrf.mxu0  ;;  %v3514_v21 = vpop.f32.mrf.mxu1 }
 0x18e   :  { %v2277_v47 = vpack.c.bf16 %v1677_v2, %v1677_v2  ;;  %v1614_v11 = vadd.f32 %v2378_v35, %v1334_v19  ;;  %v1048_v6 = vadd.f32 %v3249_v50, %v1047_v5  ;;  %v3565_v5 = vld [vmem:[%s3833_s3 + $0xc8] sm:$0xff]  }
 0x18f   :  { %v1049_v10 = vpop.f32.mrf.mxu0  ;;  %v1344_v13 = vpop.f32.mrf.mxu1 }
 0x190   :  { %1998 = vst.msk [vmem:[%s3835_s4 + $0x84] sm:$0xf] %vm1964_vm1, %v2277_v47  ;;  %v1678_v31 = vmax.f32 %v1614_v11, 0.0  ;;  %v1337_v17 = vadd.f32 %v2540_v34, %v1048_v6  ;;  %v2383_v34 = vunpack.c.h.bf16 %v2453_v25  ;;  %v1112_v10 = vadd.f32 %v3249_v50, %v3193_v0 }
 0x191   :  { %v1052_v39 = vpop.f32.mrf.mxu0  ;;  %v3524_v18 = vpop.f32.mrf.mxu1  ;;  %v3588_v25 = vadd.f32 %v3249_v50, %v3201_v8  ;;  %v3604_v8 = vadd.f32 %v3249_v50, %v3209_v16  ;;  %v3616_v16 = vld [vmem:[%s3833_s3 + $0xa8] sm:$0xff]  }
 0x192   :  { %v2278_v59 = vpack.c.bf16 %v1678_v31, %v1678_v31  ;;  %v1615_v15 = vadd.f32 %v2379_v9, %v1337_v17  ;;  %v1053_v22 = vadd.f32 %v3249_v50, %v1052_v39  ;;  %v1109_v9 = vadd.f32 %v3249_v50, %v3189_v60 }
 0x193   :  { %v1054_v23 = vpop.f32.mrf.mxu0  ;;  %v3527_v7 = vpop.f32.mrf.mxu1  ;;  %v3594_v39 = vadd.f32 %v3249_v50, %v3205_v12 }
 0x194   :  { %1999 = vst.msk [vmem:[%s3835_s4 + $0x88] sm:$0xf] %vm1964_vm1, %v2278_v59  ;;  %v1679_v29 = vmax.f32 %v1615_v15, 0.0  ;;  %v1342_v41 = vadd.f32 %v1341_v27, %v1053_v22  ;;  %v3558_v27 = vadd.f32 %v3249_v50, %v3187_v56  ;;  %v3576_v56 = vld [vmem:[%s3833_s3 + $0xc0] sm:$0xff]   ;;  %v3608_v59 = vadd.f32 %v3249_v50, %v3213_v20  ;;  %v3621_v20 = vld [vmem:[%s3833_s3 + $0xd8] sm:$0xff]  }
 0x195   :  { %v1055_v51 = vpop.f32.mrf.mxu0  ;;  %v3533_v30 = vpop.f32.mrf.mxu1  ;;  %v2390_v15 = vunpack.c.l.bf16 %v3571_v52 }
 0x196   :  { %v2279_v63 = vpack.c.bf16 %v1679_v29, %v1679_v29  ;;  %v1616_v53 = vadd.f32 %v2382_v26, %v1342_v41  ;;  %v1056_v33 = vadd.f32 %v3249_v50, %v1055_v51  ;;  %v2406_v26 = vunpack.c.l.bf16 %v3576_v56  ;;  %v3626_v51 = vld [vmem:[%s3833_s3 + $0xd0] sm:$0xff]  }
 0x197   :  { %v1057_v37 = vpop.f32.mrf.mxu0  ;;  %v3536_v45 = vpop.f32.mrf.mxu1 }
 0x198   :  { %2000 = vst.msk [vmem:[%s3835_s4 + $0x8c] sm:$0xf] %vm1964_vm1, %v2279_v63  ;;  %v1680_v38 = vmax.f32 %v1616_v53, 0.0  ;;  %v1345_v42 = vadd.f32 %v1344_v13, %v1056_v33  ;;  %v3584_v13 = vadd.f32 %v3249_v50, %v3197_v4  ;;  %v2410_v4 = vunpack.c.l.bf16 %v3565_v5 }
 0x199   :  { %v1060_v62 = vpop.f32.mrf.mxu0  ;;  %v3545_v55 = vpop.f32.mrf.mxu1  ;;  %v3630_v63 = vadd.f32 %v3249_v50, %v3217_v24  ;;  %v2411_v37 = vunpack.c.h.bf16 %v3565_v5  ;;  %v3642_v24 = vadd.f32 %v3249_v50, %v3221_v28 }
 0x19a   :  { %v2280_v46 = vpack.c.bf16 %v1680_v38, %v1680_v38  ;;  %v1617_v49 = vadd.f32 %v2383_v34, %v1345_v42  ;;  %v1061_v43 = vadd.f32 %v3249_v50, %v1060_v62  ;;  %v2391_v34 = vunpack.c.h.bf16 %v3571_v52 }
 0x19b   :  { %v1062_v57 = vpop.f32.mrf.mxu0  ;;  %v3548_v14 = vpop.f32.mrf.mxu1 }
 0x19c   :  { %2001 = vst.msk [vmem:[%s3835_s4 + $0x90] sm:$0xf] %vm1964_vm1, %v2280_v46  ;;  %v1681_v35 = vmax.f32 %v1617_v49, 0.0  ;;  %v1350_v58 = vadd.f32 %v2543_v54, %v1061_v43  ;;  %v2387_v54 = vunpack.c.h.bf16 %v2454_v1  ;;  %v2407_v1 = vunpack.c.h.bf16 %v3576_v56 }
 0x19d   :  { %v1063_v2 = vpop.f32.mrf.mxu0  ;;  %v3560_v19 = vpop.f32.mrf.mxu1  ;;  %v2418_v57 = vunpack.c.l.bf16 %v3621_v20 }
 0x19e   :  { %v2281_v47 = vpack.c.bf16 %v1681_v35, %v1681_v35  ;;  %v1618_v11 = vadd.f32 %v2386_v3, %v1350_v58  ;;  %v1064_v6 = vadd.f32 %v3249_v50, %v1063_v2  ;;  %v2394_v3 = vunpack.c.l.bf16 %v3616_v16 }
 0x19f   :  { %v1065_v31 = vpop.f32.mrf.mxu0  ;;  %v3590_v17 = vpop.f32.mrf.mxu1  ;;  %v2414_v35 = vunpack.c.l.bf16 %v3626_v51 }
 0x1a0   :  { %2002 = vst.msk [vmem:[%s3835_s4 + $0x94] sm:$0xf] %vm1964_vm1, %v2281_v47  ;;  %v1682_v60 = vmax.f32 %v1618_v11, 0.0  ;;  %v1353_v0 = vadd.f32 %v3514_v21, %v1064_v6 }
 0x1a1   :  { %v1068_v12 = vpop.f32.mrf.mxu0  ;;  %v2555_v22 = vpop.f32.mrf.mxu1 }
 0x1a2   :  { %v2282_v23 = vpack.c.bf16 %v1682_v60, %v1682_v60  ;;  %v1619_v29 = vadd.f32 %v2387_v54, %v1353_v0  ;;  %v1069_v21 = vadd.f32 %v3249_v50, %v1068_v12  ;;  %v1398_v41 = vadd.f32 %v2555_v22, %v1109_v9 }
 0x1a3   :  { %v1070_v53 = vpop.f32.mrf.mxu0  ;;  %v1389_v33 = vpop.f32.mrf.mxu1  ;;  %v2419_v54 = vunpack.c.h.bf16 %v3621_v20  ;;  %v2415_v12 = vunpack.c.h.bf16 %v3626_v51 }
 0x1a4   :  { %2003 = vst.msk [vmem:[%s3835_s4 + $0x98] sm:$0xf] %vm1964_vm1, %v2282_v23  ;;  %v1683_v38 = vmax.f32 %v1619_v29, 0.0  ;;  %v1358_v42 = vadd.f32 %v3527_v7, %v1069_v21  ;;  %v1630_v62 = vadd.f32 %v2410_v4, %v1398_v41  ;;  %v1390_v46 = vadd.f32 %v1389_v33, %v1101_v61  ;;  %v3674_v23 = vld [vmem:[%s3833_s3 + $0xb0] sm:$0xff]  }
 0x1a5   :  { %v1071_v49 = vpop.f32.mrf.mxu0  ;;  %v2556_v43 = vpop.f32.mrf.mxu1  ;;  %v3649_v7 = vadd.f32 %v3249_v50, %v3225_v32  ;;  %v3678_v29 = vadd.f32 %v3249_v50, %v3229_v36 }
 0x1a6   :  { %v2283_v58 = vpack.c.bf16 %v1683_v38, %v1683_v38  ;;  %v1620_v2 = vadd.f32 %v2390_v15, %v1358_v42  ;;  %v1694_v5 = vmax.f32 %v1630_v62, 0.0  ;;  %v1628_v47 = vadd.f32 %v2406_v26, %v1390_v46  ;;  %v3664_v15 = vld [vmem:[%s3833_s3 + $0xe8] sm:$0xff]  }
 0x1a7   :  { %v1072_v61 = vadd.f32 %v3249_v50, %v1071_v49  ;;  %v1401_v28 = vadd.f32 %v2556_v43, %v1112_v10  ;;  %v1073_v11 = vpop.f32.mrf.mxu0  ;;  %v1392_v6 = vpop.f32.mrf.mxu1  ;;  %v2395_v10 = vunpack.c.h.bf16 %v3616_v16  ;;  %v2398_v46 = vunpack.c.l.bf16 %v3674_v23 }
 0x1a8   :  { %2004 = vst.msk [vmem:[%s3835_s4 + $0x9c] sm:$0xf] %vm1964_vm1, %v2283_v58  ;;  %v1684_v52 = vmax.f32 %v1620_v2, 0.0  ;;  %v2294_v56 = vpack.c.bf16 %v1694_v5, %v1694_v5  ;;  %v1692_v9 = vmax.f32 %v1628_v47, 0.0  ;;  %v1393_v31 = vadd.f32 %v1392_v6, %v3558_v27 }
 0x1a9   :  { %v1361_v32 = vadd.f32 %v3536_v45, %v1072_v61  ;;  %v1631_v60 = vadd.f32 %v2411_v37, %v1401_v28  ;;  %v1076_v0 = vpop.f32.mrf.mxu0  ;;  %v2559_v4 = vpop.f32.mrf.mxu1  ;;  %v3713_v6 = vadd.f32 %v3249_v50, %v3233_v40 }
 0x1aa   :  { %v2284_v22 = vpack.c.bf16 %v1684_v52, %v1684_v52  ;;  %2015 = vst.msk [vmem:[%s3835_s4 + $0xc8] sm:$0xf] %vm1964_vm1, %v2294_v56  ;;  %v2292_v27 = vpack.c.bf16 %v1692_v9, %v1692_v9  ;;  %v1629_v45 = vadd.f32 %v2407_v1, %v1393_v31  ;;  %v1077_v26 = vadd.f32 %v3249_v50, %v1076_v0 }
 0x1ab   :  { %v1621_v21 = vadd.f32 %v2391_v34, %v1361_v32  ;;  %v1695_v41 = vmax.f32 %v1631_v60, 0.0  ;;  %v1414_v16 = vadd.f32 %v2559_v4, %v3594_v39  ;;  %v1078_v20 = vpop.f32.mrf.mxu0  ;;  %v1405_v51 = vpop.f32.mrf.mxu1  ;;  %v2426_v34 = vunpack.c.l.bf16 %v3664_v15  ;;  %v3695_v39 = vld [vmem:[%s3833_s3 + $0xe0] sm:$0xff]  }
 0x1ac   :  { %2005 = vst.msk [vmem:[%s3835_s4 + $0xa0] sm:$0xf] %vm1964_vm1, %v2284_v22  ;;  %2013 = vst.msk [vmem:[%s3835_s4 + $0xc0] sm:$0xf] %vm1964_vm1, %v2292_v27  ;;  %v1693_v53 = vmax.f32 %v1629_v45, 0.0  ;;  %v1366_v36 = vadd.f32 %v3524_v18, %v1077_v26  ;;  %v1406_v33 = vadd.f32 %v1405_v51, %v3584_v13  ;;  %v2422_v61 = vunpack.c.l.bf16 %v3695_v39 }
 0x1ad   :  { %v1685_v37 = vmax.f32 %v1621_v21, 0.0  ;;  %v2295_v1 = vpack.c.bf16 %v1695_v41, %v1695_v41  ;;  %v1634_v38 = vadd.f32 %v2418_v57, %v1414_v16  ;;  %v1079_v42 = vpop.f32.mrf.mxu0  ;;  %v2560_v62 = vpop.f32.mrf.mxu1  ;;  %v2427_v31 = vunpack.c.h.bf16 %v3664_v15  ;;  %v3740_v15 = vld [vmem:[%s3833_s3 + $0xf8] sm:$0xff]   ;;  %v2748_v45 = vld [vmem:[%s3834_s2] ss:$0 sm:$0xff] }
 0x1ae   :  { %v2293_v49 = vpack.c.bf16 %v1693_v53, %v1693_v53  ;;  %v1622_v43 = vadd.f32 %v2394_v3, %v1366_v36  ;;  %v1632_v58 = vadd.f32 %v2414_v35, %v1406_v33  ;;  %v1080_v18 = vadd.f32 %v3249_v50, %v1079_v42 }
 0x1af   :  { %v2285_v13 = vpack.c.bf16 %v1685_v37, %v1685_v37  ;;  %2016 = vst.msk [vmem:[%s3835_s4 + $0xcc] sm:$0xf] %vm1964_vm1, %v2295_v1  ;;  %v1698_v2 = vmax.f32 %v1634_v38, 0.0  ;;  %v1417_v5 = vadd.f32 %v2560_v62, %v3604_v8  ;;  %v1081_v47 = vpop.f32.mrf.mxu0  ;;  %v1408_v57 = vpop.f32.mrf.mxu1  ;;  %v2399_v27 = vunpack.c.h.bf16 %v3674_v23 }
 0x1b0   :  { %2014 = vst.msk [vmem:[%s3835_s4 + $0xc4] sm:$0xf] %vm1964_vm1, %v2293_v49  ;;  %v1686_v3 = vmax.f32 %v1622_v43, 0.0  ;;  %v1696_v35 = vmax.f32 %v1632_v58, 0.0  ;;  %v1369_v28 = vadd.f32 %v3533_v30, %v1080_v18  ;;  %v1409_v11 = vadd.f32 %v1408_v57, %v3588_v25 }
 0x1b1   :  { %2006 = vst.msk [vmem:[%s3835_s4 + $0xa4] sm:$0xf] %vm1964_vm1, %v2285_v13  ;;  %v2298_v8 = vpack.c.bf16 %v1698_v2, %v1698_v2  ;;  %v1635_v52 = vadd.f32 %v2419_v54, %v1417_v5  ;;  %v1084_v56 = vpop.f32.mrf.mxu0  ;;  %v2563_v9 = vpop.f32.mrf.mxu1  ;;  %v1157_v26 = vadd.f32 %v2748_v45, %v3237_v44  ;;  %v2434_v38 = vunpack.c.l.bf16 %v3740_v15 }
 0x1b2   :  { %v2286_v32 = vpack.c.bf16 %v1686_v3, %v1686_v3  ;;  %v2296_v60 = vpack.c.bf16 %v1696_v35, %v1696_v35  ;;  %v1623_v30 = vadd.f32 %v2395_v10, %v1369_v28  ;;  %v1633_v0 = vadd.f32 %v2415_v12, %v1409_v11 }
 0x1b3   :  { %2019 = vst.msk [vmem:[%s3835_s4 + $0xd8] sm:$0xf] %vm1964_vm1, %v2298_v8  ;;  %v1699_v40 = vmax.f32 %v1635_v52, 0.0  ;;  %v1085_v25 = vadd.f32 %v3249_v50, %v1084_v56  ;;  %v1430_v4 = vadd.f32 %v2563_v9, %v3642_v24  ;;  %v1086_v22 = vpop.f32.mrf.mxu0  ;;  %v1421_v54 = vpop.f32.mrf.mxu1  ;;  %v2423_v24 = vunpack.c.h.bf16 %v3695_v39  ;;  %v3755_v39 = vld [vmem:[%s3833_s3 + $0xf0] sm:$0xff]  }
 0x1b4   :  { %2007 = vst.msk [vmem:[%s3835_s4 + $0xa8] sm:$0xf] %vm1964_vm1, %v2286_v32  ;;  %2017 = vst.msk [vmem:[%s3835_s4 + $0xd0] sm:$0xf] %vm1964_vm1, %v2296_v60  ;;  %v1687_v10 = vmax.f32 %v1623_v30, 0.0  ;;  %v1697_v12 = vmax.f32 %v1633_v0, 0.0  ;;  %v1422_v50 = vadd.f32 %v1421_v54, %v3608_v59  ;;  %v2430_v2 = vunpack.c.l.bf16 %v3755_v39 }
 0x1b5   :  { %v2299_v23 = vpack.c.bf16 %v1699_v40, %v1699_v40  ;;  %v1374_v21 = vadd.f32 %v3548_v14, %v1085_v25  ;;  %v1638_v41 = vadd.f32 %v2426_v34, %v1430_v4  ;;  %v1087_v16 = vpop.f32.mrf.mxu0  ;;  %v2564_v20 = vpop.f32.mrf.mxu1  ;;  %v3750_v59 = vld [vmem:[%s3833_s3 + $0xb8] sm:$0xff]   ;;  %v1160_v3 = vadd.f32 %v2748_v45, %v3241_v48 }
 0x1b6   :  { %v2287_v51 = vpack.c.bf16 %v1687_v10, %v1687_v10  ;;  %v2297_v53 = vpack.c.bf16 %v1697_v12, %v1697_v12  ;;  %v1636_v36 = vadd.f32 %v2422_v61, %v1422_v50  ;;  %v1088_v33 = vadd.f32 %v2748_v45, %v1087_v16 }
 0x1b7   :  { %2020 = vst.msk [vmem:[%s3835_s4 + $0xdc] sm:$0xf] %vm1964_vm1, %v2299_v23  ;;  %v1624_v44 = vadd.f32 %v2398_v46, %v1374_v21  ;;  %v1702_v14 = vmax.f32 %v1638_v41, 0.0  ;;  %v1433_v34 = vadd.f32 %v2564_v20, %v3649_v7  ;;  %v1089_v37 = vpop.f32.mrf.mxu0  ;;  %v1424_v1 = vpop.f32.mrf.mxu1  ;;  %v2402_v7 = vunpack.c.l.bf16 %v3750_v59 }
 0x1b8   :  { %2008 = vst.msk [vmem:[%s3835_s4 + $0xac] sm:$0xf] %vm1964_vm1, %v2287_v51  ;;  %2018 = vst.msk [vmem:[%s3835_s4 + $0xd4] sm:$0xf] %vm1964_vm1, %v2297_v53  ;;  %v1700_v42 = vmax.f32 %v1636_v36, 0.0  ;;  %v1377_v62 = vadd.f32 %v3590_v17, %v1088_v33  ;;  %v1425_v46 = vadd.f32 %v1424_v1, %v3630_v63  ;;  %v2435_v30 = vunpack.c.h.bf16 %v3740_v15 }
 0x1b9   :  { %v1688_v49 = vmax.f32 %v1624_v44, 0.0  ;;  %v2302_v43 = vpack.c.bf16 %v1702_v14, %v1702_v14  ;;  %v1639_v58 = vadd.f32 %v2427_v31, %v1433_v34  ;;  %v1092_v18 = vpop.f32.mrf.mxu0  ;;  %v2567_v13 = vpop.f32.mrf.mxu1  ;;  %v2431_v0 = vunpack.c.h.bf16 %v3755_v39 }
 0x1ba   :  { %v2300_v5 = vpack.c.bf16 %v1700_v42, %v1700_v42  ;;  %v1625_v47 = vadd.f32 %v2399_v27, %v1377_v62  ;;  %v1637_v57 = vadd.f32 %v2423_v24, %v1425_v46  ;;  %v1093_v61 = vadd.f32 %v2748_v45, %v1092_v18 }
 0x1bb   :  { %v2288_v35 = vpack.c.bf16 %v1688_v49, %v1688_v49  ;;  %2023 = vst.msk [vmem:[%s3835_s4 + $0xe8] sm:$0xf] %vm1964_vm1, %v2302_v43  ;;  %v1703_v17 = vmax.f32 %v1639_v58, 0.0  ;;  %v1446_v63 = vadd.f32 %v2567_v13, %v1157_v26  ;;  %v1094_v28 = vpop.f32.mrf.mxu0  ;;  %v1437_v11 = vpop.f32.mrf.mxu1  ;;  %v2403_v54 = vunpack.c.h.bf16 %v3750_v59 }
 0x1bc   :  { %2021 = vst.msk [vmem:[%s3835_s4 + $0xe0] sm:$0xf] %vm1964_vm1, %v2300_v5  ;;  %v1689_v8 = vmax.f32 %v1625_v47, 0.0  ;;  %v1701_v52 = vmax.f32 %v1637_v57, 0.0  ;;  %v1382_v56 = vadd.f32 %v3545_v55, %v1093_v61  ;;  %v1438_v48 = vadd.f32 %v1437_v11, %v3678_v29 }
 0x1bd   :  { %2009 = vst.msk [vmem:[%s3835_s4 + $0xb0] sm:$0xf] %vm1964_vm1, %v2288_v35  ;;  %v2303_v9 = vpack.c.bf16 %v1703_v17, %v1703_v17  ;;  %v1642_v31 = vadd.f32 %v2434_v38, %v1446_v63  ;;  %v1095_v32 = vpop.f32.mrf.mxu0  ;;  %v2568_v60 = vpop.f32.mrf.mxu1 }
 0x1be   :  { %v2289_v40 = vpack.c.bf16 %v1689_v8, %v1689_v8  ;;  %v2301_v25 = vpack.c.bf16 %v1701_v52, %v1701_v52  ;;  %v1626_v4 = vadd.f32 %v2402_v7, %v1382_v56  ;;  %v1640_v22 = vadd.f32 %v2430_v2, %v1438_v48 }
 0x1bf   :  { %2024 = vst.msk [vmem:[%s3835_s4 + $0xec] sm:$0xf] %vm1964_vm1, %v2303_v9  ;;  %v1706_v55 = vmax.f32 %v1642_v31, 0.0  ;;  %v1096_v29 = vadd.f32 %v2748_v45, %v1095_v32  ;;  %v1449_v27 = vadd.f32 %v2568_v60, %v1160_v3  ;;  %v1097_v10 = vpop.f32.mrf.mxu0  ;;  %v1440_v12 = vpop.f32.mrf.mxu1 }
 0x1c0   :  { %2010 = vst.msk [vmem:[%s3835_s4 + $0xb4] sm:$0xf] %vm1964_vm1, %v2289_v40  ;;  %2022 = vst.msk [vmem:[%s3835_s4 + $0xe4] sm:$0xf] %vm1964_vm1, %v2301_v25  ;;  %v1690_v50 = vmax.f32 %v1626_v4, 0.0  ;;  %v1704_v24 = vmax.f32 %v1640_v22, 0.0  ;;  %v1441_v15 = vadd.f32 %v1440_v12, %v3713_v6 }
 0x1c1   :  { %v2306_v45 = vpack.c.bf16 %v1706_v55, %v1706_v55  ;;  %v1385_v26 = vadd.f32 %v3560_v19, %v1096_v29  ;;  %v1643_v23 = vadd.f32 %v2435_v30, %v1449_v27 }
 0x1c2   :  { %v2290_v21 = vpack.c.bf16 %v1690_v50, %v1690_v50  ;;  %v2304_v41 = vpack.c.bf16 %v1704_v24, %v1704_v24  ;;  %v1641_v16 = vadd.f32 %v2431_v0, %v1441_v15 }
 0x1c3   :  { %2027 = vst.msk [vmem:[%s3835_s4 + $0xf8] sm:$0xf] %vm1964_vm1, %v2306_v45  ;;  %v1627_v20 = vadd.f32 %v2403_v54, %v1385_v26  ;;  %v1707_v59 = vmax.f32 %v1643_v23, 0.0 }
 0x1c4   :  { %2011 = vst.msk [vmem:[%s3835_s4 + $0xb8] sm:$0xf] %vm1964_vm1, %v2290_v21  ;;  %2025 = vst.msk [vmem:[%s3835_s4 + $0xf0] sm:$0xf] %vm1964_vm1, %v2304_v41  ;;  %v1705_v19 = vmax.f32 %v1641_v16, 0.0 }
 0x1c5   :  { %v1691_v6 = vmax.f32 %v1627_v20, 0.0  ;;  %v2307_v51 = vpack.c.bf16 %v1707_v59, %v1707_v59 }
 0x1c6   :  { %v2305_v53 = vpack.c.bf16 %v1705_v19, %v1705_v19 }
 0x1c7   :  { %v2291_v36 = vpack.c.bf16 %v1691_v6, %v1691_v6  ;;  %2028 = vst.msk [vmem:[%s3835_s4 + $0xfc] sm:$0xf] %vm1964_vm1, %v2307_v51 }
 0x1c8   :  { %2026 = vst.msk [vmem:[%s3835_s4 + $0xf4] sm:$0xf] %vm1964_vm1, %v2305_v53 }
 0x1c9   :  { %2012 = vst.msk [vmem:[%s3835_s4 + $0xbc] sm:$0xf] %vm1964_vm1, %v2291_v36 }

// kernel: _lambda_.17
= control target key start
LH: loop header
LB: loop body
LE: loop exit
PB: predicated region body
PF: predicated region fallthrough
CT: control target
= control target key end

     0   :  { %vm94_vm0 = vcmask 261120   ;;  %vm280_vm1 = vcmask 519168   ;;  %s521_s1 = inlined_call_operand.vmem [shape: bf16[32,64], index: 1, kind: input, shape index: {}]   ;;  %s522_s0 = inlined_call_operand.vmem [shape: bf16[128,32], index: 0, kind: input, shape index: {}]   ;;  %s523_s2 = inlined_call_operand.vmem [shape: f32[1,64], index: 2, kind: input, shape index: {}]   ;;  %s524_s3 = inlined_call_operand.vmem [shape: bf16[128,64], index: 3, kind: output, shape index: {}]  }
   0x1   :  { %v386_v0 = vld [vmem:[%s521_s1 + $0x8] sm:$0xff]   ;;  %v387_v1 = vld [vmem:[%s521_s1] sm:$0xff]   ;;  %v392_v6 = vld [vmem:[%s522_s0 + $0x10] sm:$0xff]  }
   0x2   :  { %362 = vmatprep.subr.bf16.mxu0 %v386_v0  ;;  %382 = vmatprep.subr.bf16.mxu1 %v386_v0  ;;  %v388_v2 = vld [vmem:[%s522_s0] sm:$0xff]   ;;  %v390_v4 = vld [vmem:[%s522_s0 + $0x8] sm:$0xff]   ;;  %v393_v7 = vld [vmem:[%s522_s0 + $0x30] sm:$0xff]  }
   0x3   :  { %363 = vmatpush3.bf16.msra.mxu0 %v386_v0  ;;  %384 = vmatpush3.bf16.msra.mxu1 %v386_v0  ;;  %v389_v3 = vld [vmem:[%s522_s0 + $0x20] sm:$0xff]   ;;  %v391_v5 = vld [vmem:[%s522_s0 + $0x28] sm:$0xff]   ;;  %v394_v8 = vld [vmem:[%s522_s0 + $0x18] sm:$0xff]  }
   0x4   :  { %364 = vmatprep.subr.bf16.mxu0 %v387_v1  ;;  %383 = vmatprep.subr.bf16.mxu1 %v387_v1  ;;  %v395_v9 = vld [vmem:[%s522_s0 + $0x38] sm:$0xff]   ;;  %v301_v10 = vld [vmem:[%s523_s2] ss:$0 sm:$0xff] }
   0x5   :  { %366 = vmatprep.mubr.msk.bf16.mxu0 %vm94_vm0, %v388_v2  ;;  %374 = vmatprep.mubr.msk.bf16.mxu1 %vm94_vm0, %v389_v3 }
   0x7   :  { %365 = vmatpush3.bf16.msra.mxu0 %v387_v1  ;;  %385 = vmatpush3.bf16.msra.mxu1 %v387_v1 }
   0xa   :  { %367 = vmatmul.mubr.msk.bf16.vlgmr.msra.gmra.mxu0 %vm94_vm0, %v390_v4  ;;  %375 = vmatmul.mubr.msk.bf16.vlgmr.msra.gmra.mxu1 %vm94_vm0, %v391_v5 }
   0xb   :  { %370 = vmatprep.mubr.msk.bf16.mxu0 %vm94_vm0, %v392_v6  ;;  %378 = vmatprep.mubr.msk.bf16.mxu1 %vm94_vm0, %v393_v7 }
  0x12   :  { %371 = vmatmul.mubr.msk.bf16.gmra.mxu0 %vm94_vm0, %v394_v8  ;;  %379 = vmatmul.mubr.msk.bf16.gmra.mxu1 %vm94_vm0, %v395_v9 }
  0xca   :  { %v368_v11 = vpop.f32.mrf.mxu0  ;;  %v376_v12 = vpop.f32.mrf.mxu1 }
  0xcb   :  { %v162_v13 = vadd.f32 %v368_v11, %v301_v10  ;;  %v194_v14 = vadd.f32 %v376_v12, %v301_v10 }
  0xcc   :  { %v153_v15 = vpop.f32.mrf.mxu0  ;;  %v185_v16 = vpop.f32.mrf.mxu1 }
  0xcd   :  { %v338_v17 = vpack.c.bf16 %v162_v13, %v162_v13  ;;  %v346_v18 = vpack.c.bf16 %v194_v14, %v194_v14  ;;  %v154_v19 = vadd.f32 %v301_v10, %v153_v15  ;;  %v186_v20 = vadd.f32 %v301_v10, %v185_v16 }
  0xce   :  { %v369_v21 = vpop.f32.mrf.mxu0  ;;  %v377_v22 = vpop.f32.mrf.mxu1 }
  0xcf   :  { %283 = vst.msk [vmem:[%s524_s3 + $0x8] sm:$0xf] %vm280_vm1, %v338_v17  ;;  %291 = vst.msk [vmem:[%s524_s3 + $0x28] sm:$0xf] %vm280_vm1, %v346_v18  ;;  %v336_v23 = vpack.c.bf16 %v154_v19, %v154_v19  ;;  %v344_v24 = vpack.c.bf16 %v186_v20, %v186_v20  ;;  %v165_v25 = vadd.f32 %v369_v21, %v301_v10 }
  0xd0   :  { %v197_v26 = vadd.f32 %v377_v22, %v301_v10  ;;  %v156_v27 = vpop.f32.mrf.mxu0  ;;  %v188_v28 = vpop.f32.mrf.mxu1 }
  0xd1   :  { %281 = vst.msk [vmem:[%s524_s3] sm:$0xf] %vm280_vm1, %v336_v23  ;;  %289 = vst.msk [vmem:[%s524_s3 + $0x20] sm:$0xf] %vm280_vm1, %v344_v24  ;;  %v339_v29 = vpack.c.bf16 %v165_v25, %v165_v25  ;;  %v157_v31 = vadd.f32 %v301_v10, %v156_v27  ;;  %v189_v32 = vadd.f32 %v301_v10, %v188_v28 }
  0xd2   :  { %v347_v30 = vpack.c.bf16 %v197_v26, %v197_v26  ;;  %v372_v33 = vpop.f32.mrf.mxu0  ;;  %v380_v34 = vpop.f32.mrf.mxu1 }
  0xd3   :  { %284 = vst.msk [vmem:[%s524_s3 + $0xc] sm:$0xf] %vm280_vm1, %v339_v29  ;;  %v337_v35 = vpack.c.bf16 %v157_v31, %v157_v31  ;;  %v345_v36 = vpack.c.bf16 %v189_v32, %v189_v32  ;;  %v178_v37 = vadd.f32 %v372_v33, %v301_v10  ;;  %v210_v38 = vadd.f32 %v380_v34, %v301_v10 }
  0xd4   :  { %292 = vst.msk [vmem:[%s524_s3 + $0x2c] sm:$0xf] %vm280_vm1, %v347_v30  ;;  %v169_v39 = vpop.f32.mrf.mxu0  ;;  %v201_v40 = vpop.f32.mrf.mxu1 }
  0xd5   :  { %282 = vst.msk [vmem:[%s524_s3 + $0x4] sm:$0xf] %vm280_vm1, %v337_v35  ;;  %290 = vst.msk [vmem:[%s524_s3 + $0x24] sm:$0xf] %vm280_vm1, %v345_v36  ;;  %v342_v41 = vpack.c.bf16 %v178_v37, %v178_v37  ;;  %v350_v42 = vpack.c.bf16 %v210_v38, %v210_v38  ;;  %v170_v43 = vadd.f32 %v301_v10, %v169_v39 }
  0xd6   :  { %v202_v44 = vadd.f32 %v301_v10, %v201_v40  ;;  %v373_v45 = vpop.f32.mrf.mxu0  ;;  %v381_v46 = vpop.f32.mrf.mxu1 }
  0xd7   :  { %287 = vst.msk [vmem:[%s524_s3 + $0x18] sm:$0xf] %vm280_vm1, %v342_v41  ;;  %295 = vst.msk [vmem:[%s524_s3 + $0x38] sm:$0xf] %vm280_vm1, %v350_v42  ;;  %v340_v47 = vpack.c.bf16 %v170_v43, %v170_v43  ;;  %v181_v49 = vadd.f32 %v373_v45, %v301_v10  ;;  %v213_v50 = vadd.f32 %v381_v46, %v301_v10 }
  0xd8   :  { %v348_v48 = vpack.c.bf16 %v202_v44, %v202_v44  ;;  %v172_v51 = vpop.f32.mrf.mxu0  ;;  %v204_v52 = vpop.f32.mrf.mxu1 }
  0xd9   :  { %285 = vst.msk [vmem:[%s524_s3 + $0x10] sm:$0xf] %vm280_vm1, %v340_v47  ;;  %v343_v53 = vpack.c.bf16 %v181_v49, %v181_v49  ;;  %v351_v54 = vpack.c.bf16 %v213_v50, %v213_v50  ;;  %v173_v55 = vadd.f32 %v301_v10, %v172_v51  ;;  %v205_v56 = vadd.f32 %v301_v10, %v204_v52 }
  0xda   :  { %293 = vst.msk [vmem:[%s524_s3 + $0x30] sm:$0xf] %vm280_vm1, %v348_v48 }
  0xdb   :  { %288 = vst.msk [vmem:[%s524_s3 + $0x1c] sm:$0xf] %vm280_vm1, %v343_v53  ;;  %296 = vst.msk [vmem:[%s524_s3 + $0x3c] sm:$0xf] %vm280_vm1, %v351_v54  ;;  %v341_v57 = vpack.c.bf16 %v173_v55, %v173_v55  ;;  %v349_v58 = vpack.c.bf16 %v205_v56, %v205_v56 }
  0xdd   :  { %286 = vst.msk [vmem:[%s524_s3 + $0x14] sm:$0xf] %vm280_vm1, %v341_v57  ;;  %294 = vst.msk [vmem:[%s524_s3 + $0x34] sm:$0xf] %vm280_vm1, %v349_v58 }

// kernel: _lambda_.16
= control target key start
LH: loop header
LB: loop body
LE: loop exit
PB: predicated region body
PF: predicated region fallthrough
CT: control target
= control target key end

     0   :  { %vm318_vm0 = vcmask 261120   ;;  %vm617_vm1 = vcmask 519168   ;;  %s1144_s1 = inlined_call_operand.vmem [shape: bf16[288,64], index: 1, kind: input, shape index: {}]   ;;  %s1145_s0 = inlined_call_operand.vmem [shape: bf16[128,288], index: 0, kind: input, shape index: {}]   ;;  %s1146_s2 = inlined_call_operand.vmem [shape: f32[1,64], index: 2, kind: input, shape index: {}]   ;;  %s1147_s3 = inlined_call_operand.vmem [shape: bf16[128,64], index: 3, kind: output, shape index: {}]  }
   0x1   :  { %v831_v0 = vld [vmem:[%s1144_s1 + $0x78] sm:$0xff]   ;;  %v833_v2 = vld [vmem:[%s1144_s1 + $0x70] sm:$0xff]   ;;  %v835_v4 = vld [vmem:[%s1144_s1 + $0x68] sm:$0xff]  }
   0x2   :  { %v832_v1 = vld [vmem:[%s1144_s1 + $0x38] sm:$0xff]   ;;  %721 = vmatprep.subr.bf16.mxu0 %v831_v0  ;;  %815 = vmatprep.subr.bf16.mxu1 %v831_v0  ;;  %v834_v3 = vld [vmem:[%s1144_s1 + $0x30] sm:$0xff]   ;;  %v836_v5 = vld [vmem:[%s1144_s1 + $0x28] sm:$0xff]  }
   0x3   :  { %722 = vmatpush3.bf16.msra.mxu0 %v832_v1  ;;  %823 = vmatpush3.bf16.msra.mxu1 %v832_v1  ;;  %v837_v6 = vld [vmem:[%s1144_s1 + $0x60] sm:$0xff]   ;;  %v839_v8 = vld [vmem:[%s1144_s1 + $0x58] sm:$0xff]   ;;  %v841_v10 = vld [vmem:[%s1144_s1 + $0x50] sm:$0xff]  }
   0x4   :  { %723 = vmatprep.subr.bf16.mxu0 %v833_v2  ;;  %816 = vmatprep.subr.bf16.mxu1 %v833_v2  ;;  %v838_v7 = vld [vmem:[%s1144_s1 + $0x20] sm:$0xff]   ;;  %v840_v9 = vld [vmem:[%s1144_s1 + $0x18] sm:$0xff]   ;;  %v842_v13 = vld [vmem:[%s1144_s1 + $0x10] sm:$0xff]  }
   0x5   :  { %v849_v11 = vld [vmem:[%s1145_s0 + $0x4] ss:$12 sps:$4 sm:$0xff]   ;;  %v852_v12 = vld [vmem:[%s1145_s0 + $0x94] ss:$12 sps:$4 sm:$0xff]   ;;  %v843_v14 = vld [vmem:[%s1144_s1 + $0x48] sm:$0xff]  }
   0x6   :  { %375 = vmatprep.mubr.bf16.mxu0 %v849_v11  ;;  %423 = vmatprep.mubr.bf16.mxu1 %v852_v12  ;;  %v844_v15 = vld [vmem:[%s1144_s1 + $0x8] sm:$0xff]   ;;  %v845_v16 = vld [vmem:[%s1144_s1 + $0x40] sm:$0xff]   ;;  %v850_v20 = vld [vmem:[%s1145_s0 + $0x90] ss:$12 sps:$4 sm:$0xff]  }
   0x7   :  { %724 = vmatpush3.bf16.msra.mxu0 %v834_v3  ;;  %824 = vmatpush3.bf16.msra.mxu1 %v834_v3  ;;  %v846_v17 = vld [vmem:[%s1144_s1] sm:$0xff]   ;;  %v853_v19 = vld [vmem:[%s1144_s1 + $0x88] sm:$0xff]   ;;  %v864_v28 = vld [vmem:[%s1145_s0 + $0x30] ss:$12 sps:$4 sm:$0xff]  }
   0x8   :  { %725 = vmatprep.subr.bf16.mxu0 %v835_v4  ;;  %817 = vmatprep.subr.bf16.mxu1 %v835_v4  ;;  %v847_v18 = vld [vmem:[%s1145_s0] ss:$12 sps:$4 sm:$0xff]   ;;  %v854_v21 = vld [vmem:[%s1145_s0 + $0x1c] ss:$12 sps:$4 sm:$0xff]   ;;  %v858_v24 = vld [vmem:[%s1145_s0 + $0x18] ss:$12 sps:$4 sm:$0xff]  }
   0x9   :  { %v856_v22 = vld [vmem:[%s1145_s0 + $0xac] ss:$12 sps:$4 sm:$0xff]   ;;  %v860_v23 = vld [vmem:[%s1144_s1 + $0x80] sm:$0xff]   ;;  %v859_v25 = vld [vmem:[%s1145_s0 + $0xa8] ss:$12 sps:$4 sm:$0xff]  }
   0xa   :  { %v861_v26 = vld [vmem:[%s1145_s0 + $0x34] ss:$12 sps:$4 sm:$0xff]   ;;  %v866_v30 = vld [vmem:[%s1145_s0 + $0x4c] ss:$12 sps:$4 sm:$0xff]   ;;  %v870_v33 = vld [vmem:[%s1145_s0 + $0x50] ss:$12 sps:$4 sm:$0xff]  }
   0xb   :  { %726 = vmatpush3.bf16.msra.mxu0 %v836_v5  ;;  %825 = vmatpush3.bf16.msra.mxu1 %v836_v5  ;;  %v863_v27 = vld [vmem:[%s1145_s0 + $0x8] ss:$12 sps:$4 sm:$0xff]   ;;  %v865_v29 = vld [vmem:[%s1145_s0 + $0x20] ss:$12 sps:$4 sm:$0xff]   ;;  %v868_v31 = vld [vmem:[%s1145_s0 + $0x38] ss:$12 sps:$4 sm:$0xff]  }
   0xc   :  { %727 = vmatprep.subr.bf16.mxu0 %v837_v6  ;;  %818 = vmatprep.subr.bf16.mxu1 %v837_v6  ;;  %v869_v32 = vld [vmem:[%s1145_s0 + $0x48] ss:$12 sps:$4 sm:$0xff]   ;;  %v871_v34 = vld [vmem:[%s1145_s0 + $0x64] ss:$12 sps:$4 sm:$0xff]   ;;  %v874_v36 = vld [vmem:[%s1145_s0 + $0x60] ss:$12 sps:$4 sm:$0xff]  }
   0xd   :  { %v873_v35 = vld [vmem:[%s1145_s0 + $0x68] ss:$12 sps:$4 sm:$0xff]   ;;  %v875_v37 = vld [vmem:[%s1145_s0 + $0x80] ss:$12 sps:$4 sm:$0xff]   ;;  %v878_v39 = vld [vmem:[%s1145_s0 + $0x98] ss:$12 sps:$4 sm:$0xff]  }
   0xe   :  { %v876_v38 = vld [vmem:[%s1145_s0 + $0x7c] ss:$12 sps:$4 sm:$0xff]   ;;  %v879_v40 = vld [vmem:[%s1145_s0 + $0x78] ss:$12 sps:$4 sm:$0xff]   ;;  %v1054_v60 = vld [vmem:[%s1146_s2] ss:$0 sm:$0xff] }
   0xf   :  { %728 = vmatpush3.bf16.msra.mxu0 %v838_v7  ;;  %826 = vmatpush3.bf16.msra.mxu1 %v838_v7  ;;  %v880_v41 = vld [vmem:[%s1145_s0 + $0xb0] ss:$12 sps:$4 sm:$0xff]  }
  0x10   :  { %729 = vmatprep.subr.bf16.mxu0 %v839_v8  ;;  %819 = vmatprep.subr.bf16.mxu1 %v839_v8 }
  0x13   :  { %730 = vmatpush3.bf16.msra.mxu0 %v840_v9  ;;  %827 = vmatpush3.bf16.msra.mxu1 %v840_v9 }
  0x14   :  { %731 = vmatprep.subr.bf16.mxu0 %v841_v10  ;;  %820 = vmatprep.subr.bf16.mxu1 %v841_v10 }
  0x17   :  { %732 = vmatpush3.bf16.msra.mxu0 %v842_v13  ;;  %828 = vmatpush3.bf16.msra.mxu1 %v842_v13 }
  0x18   :  { %733 = vmatprep.subr.bf16.mxu0 %v843_v14  ;;  %821 = vmatprep.subr.bf16.mxu1 %v843_v14 }
  0x1b   :  { %734 = vmatpush3.bf16.msra.mxu0 %v844_v15  ;;  %829 = vmatpush3.bf16.msra.mxu1 %v844_v15 }
  0x1c   :  { %735 = vmatprep.subr.bf16.mxu0 %v845_v16  ;;  %822 = vmatprep.subr.bf16.mxu1 %v845_v16 }
  0x1f   :  { %736 = vmatpush3.bf16.msra.mxu0 %v846_v17  ;;  %830 = vmatpush3.bf16.msra.mxu1 %v846_v17 }
  0x20   :  { %795 = vmatprep.subr.bf16.mxu1 %v853_v19 }
  0x22   :  { %376 = vmatmul.mubr.bf16.vlgmr.msra.gmra.mxu0 %v847_v18  ;;  %424 = vmatmul.mubr.bf16.vlgmr.msra.gmra.mxu1 %v850_v20 }
  0x23   :  { %796 = vmatpush3.bf16.msra.mxu1 %v853_v19  ;;  %383 = vmatprep.mubr.bf16.mxu0 %v854_v21 }
  0x24   :  { %431 = vmatprep.mubr.bf16.mxu1 %v856_v22  ;;  %797 = vmatprep.subr.bf16.mxu1 %v860_v23 }
  0x27   :  { %798 = vmatpush3.bf16.msra.mxu1 %v860_v23 }
  0x2a   :  { %384 = vmatmul.mubr.bf16.gmra.mxu0 %v858_v24  ;;  %432 = vmatmul.mubr.bf16.gmra.mxu1 %v859_v25 }
  0x2b   :  { %391 = vmatprep.mubr.bf16.mxu0 %v861_v26  ;;  %799 = vmatprep.mubr.msk.bf16.mxu1 %vm318_vm0, %v863_v27 }
  0x32   :  { %392 = vmatmul.mubr.bf16.gmra.mxu0 %v864_v28  ;;  %800 = vmatmul.mubr.msk.bf16.vlgmr.msra.gmra.mxu1 %vm318_vm0, %v865_v29 }
  0x33   :  { %399 = vmatprep.mubr.bf16.mxu0 %v866_v30  ;;  %803 = vmatprep.mubr.msk.bf16.mxu1 %vm318_vm0, %v868_v31 }
  0x3a   :  { %400 = vmatmul.mubr.bf16.gmra.mxu0 %v869_v32  ;;  %804 = vmatmul.mubr.msk.bf16.gmra.mxu1 %vm318_vm0, %v870_v33 }
  0x3b   :  { %407 = vmatprep.mubr.bf16.mxu0 %v871_v34  ;;  %807 = vmatprep.mubr.msk.bf16.mxu1 %vm318_vm0, %v873_v35 }
  0x42   :  { %408 = vmatmul.mubr.bf16.gmra.mxu0 %v874_v36  ;;  %808 = vmatmul.mubr.msk.bf16.gmra.mxu1 %vm318_vm0, %v875_v37 }
  0x43   :  { %415 = vmatprep.mubr.bf16.mxu0 %v876_v38  ;;  %811 = vmatprep.mubr.msk.bf16.mxu1 %vm318_vm0, %v878_v39 }
  0x4a   :  { %416 = vmatmul.mubr.bf16.gmra.mxu0 %v879_v40  ;;  %812 = vmatmul.mubr.msk.bf16.gmra.mxu1 %vm318_vm0, %v880_v41 }
  0xe2   :  { %v737_v42 = vpop.f32.mrf.mxu0  ;;  %v1035_v43 = vpop.f32.mrf.mxu1 }
  0xe4   :  { %v738_v44 = vpop.f32.mrf.mxu0  ;;  %v1037_v45 = vpop.f32.mrf.mxu1 }
  0xe5   :  { %v739_v57 = vadd.f32 %v738_v44, %v737_v42 }
  0xe6   :  { %v740_v46 = vpop.f32.mrf.mxu0  ;;  %v1039_v47 = vpop.f32.mrf.mxu1 }
  0xe7   :  { %v378_v3 = vadd.f32 %v739_v57, %v1054_v60 }
  0xe8   :  { %v741_v48 = vpop.f32.mrf.mxu0  ;;  %v1041_v49 = vpop.f32.mrf.mxu1 }
  0xe9   :  { %v742_v63 = vadd.f32 %v741_v48, %v740_v46 }
  0xea   :  { %v743_v50 = vpop.f32.mrf.mxu0  ;;  %v1043_v51 = vpop.f32.mrf.mxu1 }
  0xeb   :  { %v381_v11 = vadd.f32 %v742_v63, %v1054_v60 }
  0xec   :  { %v744_v52 = vpop.f32.mrf.mxu0  ;;  %v1045_v53 = vpop.f32.mrf.mxu1 }
  0xed   :  { %v745_v54 = vadd.f32 %v744_v52, %v743_v50 }
  0xee   :  { %v746_v55 = vpop.f32.mrf.mxu0  ;;  %v1047_v56 = vpop.f32.mrf.mxu1 }
  0xef   :  { %v386_v62 = vadd.f32 %v745_v54, %v1054_v60  ;;  %v781_v54 = vadd.f32 %v1045_v53, %v1043_v51  ;;  %v775_v53 = vadd.f32 %v1037_v45, %v1035_v43 }
  0xf0   :  { %v747_v58 = vpop.f32.mrf.mxu0  ;;  %v1049_v59 = vpop.f32.mrf.mxu1 }
  0xf1   :  { %v748_v61 = vadd.f32 %v747_v58, %v746_v55 }
  0xf2   :  { %v749_v0 = vpop.f32.mrf.mxu0  ;;  %v801_v1 = vpop.f32.mrf.mxu1 }
  0xf3   :  { %v483_v2 = vadd.f32 %v801_v1, %v386_v62  ;;  %v389_v8 = vadd.f32 %v748_v61, %v1054_v60 }
  0xf4   :  { %v750_v4 = vpop.f32.mrf.mxu0  ;;  %v474_v5 = vpop.f32.mrf.mxu1 }
  0xf5   :  { %v539_v6 = vmax.f32 %v483_v2, 0.0  ;;  %v475_v7 = vadd.f32 %v474_v5, %v378_v3  ;;  %v751_v13 = vadd.f32 %v750_v4, %v749_v0  ;;  %v784_v3 = vadd.f32 %v1049_v59, %v1047_v56 }
  0xf6   :  { %v752_v9 = vpop.f32.mrf.mxu0  ;;  %v802_v10 = vpop.f32.mrf.mxu1  ;;  %v778_v56 = vadd.f32 %v1041_v49, %v1039_v47 }
  0xf7   :  { %v707_v12 = vpack.c.bf16 %v539_v6, %v539_v6  ;;  %v537_v14 = vmax.f32 %v475_v7, 0.0  ;;  %v486_v15 = vadd.f32 %v802_v10, %v389_v8  ;;  %v394_v26 = vadd.f32 %v751_v13, %v1054_v60 }
  0xf8   :  { %v753_v16 = vpop.f32.mrf.mxu0  ;;  %v477_v17 = vpop.f32.mrf.mxu1  ;;  %v426_v13 = vadd.f32 %v775_v53, %v1054_v60 }
  0xf9   :  { %620 = vst.msk [vmem:[%s1147_s3 + $0x8] sm:$0xf] %vm617_vm1, %v707_v12  ;;  %v705_v18 = vpack.c.bf16 %v537_v14, %v537_v14  ;;  %v540_v19 = vmax.f32 %v486_v15, 0.0  ;;  %v478_v20 = vadd.f32 %v477_v17, %v381_v11  ;;  %v754_v24 = vadd.f32 %v753_v16, %v752_v9 }
  0xfa   :  { %v755_v21 = vpop.f32.mrf.mxu0  ;;  %v805_v22 = vpop.f32.mrf.mxu1  ;;  %v434_v9 = vadd.f32 %v781_v54, %v1054_v60  ;;  %v437_v15 = vadd.f32 %v784_v3, %v1054_v60 }
  0xfb   :  { %618 = vst.msk [vmem:[%s1147_s3] sm:$0xf] %vm617_vm1, %v705_v18  ;;  %v708_v23 = vpack.c.bf16 %v540_v19, %v540_v19  ;;  %v538_v25 = vmax.f32 %v478_v20, 0.0  ;;  %v397_v36 = vadd.f32 %v754_v24, %v1054_v60 }
  0xfc   :  { %v756_v27 = vpop.f32.mrf.mxu0  ;;  %v490_v28 = vpop.f32.mrf.mxu1 }
  0xfd   :  { %621 = vst.msk [vmem:[%s1147_s3 + $0xc] sm:$0xf] %vm617_vm1, %v708_v23  ;;  %v706_v29 = vpack.c.bf16 %v538_v25, %v538_v25  ;;  %v757_v30 = vadd.f32 %v756_v27, %v755_v21  ;;  %v491_v31 = vadd.f32 %v490_v28, %v394_v26  ;;  %v429_v27 = vadd.f32 %v778_v56, %v1054_v60 }
  0xfe   :  { %v758_v32 = vpop.f32.mrf.mxu0  ;;  %v806_v33 = vpop.f32.mrf.mxu1 }
  0xff   :  { %619 = vst.msk [vmem:[%s1147_s3 + $0x4] sm:$0xf] %vm617_vm1, %v706_v29  ;;  %v402_v34 = vadd.f32 %v757_v30, %v1054_v60  ;;  %v541_v35 = vmax.f32 %v491_v31, 0.0 }
 0x100   :  { %v759_v37 = vpop.f32.mrf.mxu0  ;;  %v493_v38 = vpop.f32.mrf.mxu1 }
 0x101   :  { %v499_v39 = vadd.f32 %v805_v22, %v402_v34  ;;  %v709_v40 = vpack.c.bf16 %v541_v35, %v541_v35  ;;  %v760_v41 = vadd.f32 %v759_v37, %v758_v32  ;;  %v494_v42 = vadd.f32 %v493_v38, %v397_v36 }
 0x102   :  { %v761_v44 = vpop.f32.mrf.mxu0  ;;  %v809_v46 = vpop.f32.mrf.mxu1 }
 0x103   :  { %v543_v48 = vmax.f32 %v499_v39, 0.0  ;;  %622 = vst.msk [vmem:[%s1147_s3 + $0x10] sm:$0xf] %vm617_vm1, %v709_v40  ;;  %v405_v50 = vadd.f32 %v760_v41, %v1054_v60  ;;  %v542_v52 = vmax.f32 %v494_v42, 0.0 }
 0x104   :  { %v762_v55 = vpop.f32.mrf.mxu0  ;;  %v506_v57 = vpop.f32.mrf.mxu1 }
 0x105   :  { %v711_v58 = vpack.c.bf16 %v543_v48, %v543_v48  ;;  %v502_v61 = vadd.f32 %v806_v33, %v405_v50  ;;  %v710_v62 = vpack.c.bf16 %v542_v52, %v542_v52  ;;  %v763_v63 = vadd.f32 %v762_v55, %v761_v44 }
 0x106   :  { %v764_v0 = vpop.f32.mrf.mxu0  ;;  %v810_v1 = vpop.f32.mrf.mxu1 }
 0x107   :  { %624 = vst.msk [vmem:[%s1147_s3 + $0x18] sm:$0xf] %vm617_vm1, %v711_v58  ;;  %v544_v2 = vmax.f32 %v502_v61, 0.0  ;;  %623 = vst.msk [vmem:[%s1147_s3 + $0x14] sm:$0xf] %vm617_vm1, %v710_v62  ;;  %v410_v51 = vadd.f32 %v763_v63, %v1054_v60 }
 0x108   :  { %v765_v4 = vpop.f32.mrf.mxu0  ;;  %v509_v5 = vpop.f32.mrf.mxu1 }
 0x109   :  { %v712_v6 = vpack.c.bf16 %v544_v2, %v544_v2  ;;  %v507_v7 = vadd.f32 %v506_v57, %v410_v51  ;;  %v766_v8 = vadd.f32 %v765_v4, %v764_v0 }
 0x10a   :  { %v767_v10 = vpop.f32.mrf.mxu0  ;;  %v813_v11 = vpop.f32.mrf.mxu1 }
 0x10b   :  { %625 = vst.msk [vmem:[%s1147_s3 + $0x1c] sm:$0xf] %vm617_vm1, %v712_v6  ;;  %v545_v12 = vmax.f32 %v507_v7, 0.0  ;;  %v413_v43 = vadd.f32 %v766_v8, %v1054_v60  ;;  %v531_v45 = vadd.f32 %v813_v11, %v434_v9 }
 0x10c   :  { %v768_v59 = vpop.f32.mrf.mxu0  ;;  %v522_v14 = vpop.f32.mrf.mxu1 }
 0x10d   :  { %v713_v16 = vpack.c.bf16 %v545_v12, %v545_v12  ;;  %v510_v17 = vadd.f32 %v509_v5, %v413_v43  ;;  %v551_v18 = vmax.f32 %v531_v45, 0.0  ;;  %v769_v19 = vadd.f32 %v768_v59, %v767_v10 }
 0x10e   :  { %v523_v20 = vadd.f32 %v522_v14, %v426_v13  ;;  %v770_v21 = vpop.f32.mrf.mxu0  ;;  %v814_v22 = vpop.f32.mrf.mxu1 }
 0x10f   :  { %626 = vst.msk [vmem:[%s1147_s3 + $0x20] sm:$0xf] %vm617_vm1, %v713_v16  ;;  %v546_v23 = vmax.f32 %v510_v17, 0.0  ;;  %v719_v47 = vpack.c.bf16 %v551_v18, %v551_v18  ;;  %v418_v49 = vadd.f32 %v769_v19, %v1054_v60  ;;  %v534_v24 = vadd.f32 %v814_v22, %v437_v15 }
 0x110   :  { %v549_v25 = vmax.f32 %v523_v20, 0.0  ;;  %v771_v26 = vpop.f32.mrf.mxu0  ;;  %v525_v28 = vpop.f32.mrf.mxu1 }
 0x111   :  { %v714_v29 = vpack.c.bf16 %v546_v23, %v546_v23  ;;  %632 = vst.msk [vmem:[%s1147_s3 + $0x38] sm:$0xf] %vm617_vm1, %v719_v47  ;;  %v515_v30 = vadd.f32 %v809_v46, %v418_v49  ;;  %v552_v31 = vmax.f32 %v534_v24, 0.0  ;;  %v772_v32 = vadd.f32 %v771_v26, %v770_v21 }
 0x112   :  { %v717_v33 = vpack.c.bf16 %v549_v25, %v549_v25  ;;  %v526_v34 = vadd.f32 %v525_v28, %v429_v27 }
 0x113   :  { %627 = vst.msk [vmem:[%s1147_s3 + $0x24] sm:$0xf] %vm617_vm1, %v714_v29  ;;  %v547_v35 = vmax.f32 %v515_v30, 0.0  ;;  %v720_v36 = vpack.c.bf16 %v552_v31, %v552_v31  ;;  %v421_v37 = vadd.f32 %v772_v32, %v1054_v60 }
 0x114   :  { %630 = vst.msk [vmem:[%s1147_s3 + $0x30] sm:$0xf] %vm617_vm1, %v717_v33  ;;  %v550_v38 = vmax.f32 %v526_v34, 0.0 }
 0x115   :  { %v715_v39 = vpack.c.bf16 %v547_v35, %v547_v35  ;;  %633 = vst.msk [vmem:[%s1147_s3 + $0x3c] sm:$0xf] %vm617_vm1, %v720_v36  ;;  %v518_v40 = vadd.f32 %v810_v1, %v421_v37 }
 0x116   :  { %v718_v41 = vpack.c.bf16 %v550_v38, %v550_v38 }
 0x117   :  { %628 = vst.msk [vmem:[%s1147_s3 + $0x28] sm:$0xf] %vm617_vm1, %v715_v39  ;;  %v548_v60 = vmax.f32 %v518_v40, 0.0 }
 0x118   :  { %631 = vst.msk [vmem:[%s1147_s3 + $0x34] sm:$0xf] %vm617_vm1, %v718_v41 }
 0x119   :  { %v716_v42 = vpack.c.bf16 %v548_v60, %v548_v60 }
 0x11b   :  { %629 = vst.msk [vmem:[%s1147_s3 + $0x2c] sm:$0xf] %vm617_vm1, %v716_v42 }

// kernel: _lambda_.18
= control target key start
LH: loop header
LB: loop body
LE: loop exit
PB: predicated region body
PF: predicated region fallthrough
CT: control target
= control target key end

     0   :  { %vm561_vm0 = vcmask 523264   ;;  %vm1005_vm1 = vcmask 519168   ;;  %s2009_s1 = inlined_call_operand.vmem [shape: bf16[576,64], index: 1, kind: input, shape index: {}]   ;;  %s2010_s0 = inlined_call_operand.vmem [shape: bf16[128,576], index: 0, kind: input, shape index: {}]   ;;  %s2011_s3 = inlined_call_operand.vmem [shape: bf16[128,64], index: 3, kind: input, shape index: {}]   ;;  %s2012_s2 = inlined_call_operand.vmem [shape: f32[1,64], index: 2, kind: input, shape index: {}]   ;;  %s2013_s4 = inlined_call_operand.vmem [shape: bf16[128,64], index: 4, kind: output, shape index: {}]  }
   0x1   :  { %v1354_v0 = vld [vmem:[%s2009_s1 + $0x78] sm:$0xff]   ;;  %v1358_v4 = vld [vmem:[%s2009_s1 + $0x70] sm:$0xff]   ;;  %v1362_v8 = vld [vmem:[%s2009_s1 + $0x68] sm:$0xff]  }
   0x2   :  { %v1355_v1 = vld [vmem:[%s2009_s1 + $0xf8] sm:$0xff]   ;;  %1182 = vmatprep.subr.bf16.mxu0 %v1354_v0  ;;  %v1359_v5 = vld [vmem:[%s2009_s1 + $0xf0] sm:$0xff]   ;;  %v1363_v9 = vld [vmem:[%s2009_s1 + $0xe8] sm:$0xff]  }
   0x3   :  { %v1356_v2 = vld [vmem:[%s2009_s1 + $0x38] sm:$0xff]   ;;  %1246 = vmatprep.subr.bf16.mxu1 %v1355_v1  ;;  %v1360_v6 = vld [vmem:[%s2009_s1 + $0x30] sm:$0xff]   ;;  %v1364_v10 = vld [vmem:[%s2009_s1 + $0x28] sm:$0xff]  }
   0x4   :  { %v1357_v3 = vld [vmem:[%s2009_s1 + $0xb8] sm:$0xff]   ;;  %1183 = vmatpush3.bf16.msra.mxu0 %v1356_v2  ;;  %v1361_v7 = vld [vmem:[%s2009_s1 + $0xb0] sm:$0xff]   ;;  %v1365_v11 = vld [vmem:[%s2009_s1 + $0xa8] sm:$0xff]  }
   0x5   :  { %1247 = vmatpush3.bf16.msra.mxu1 %v1357_v3  ;;  %1184 = vmatprep.subr.bf16.mxu0 %v1358_v4  ;;  %v1366_v12 = vld [vmem:[%s2009_s1 + $0x60] sm:$0xff]   ;;  %v1370_v16 = vld [vmem:[%s2009_s1 + $0x58] sm:$0xff]   ;;  %v1374_v20 = vld [vmem:[%s2009_s1 + $0x50] sm:$0xff]  }
   0x6   :  { %1248 = vmatprep.subr.bf16.mxu1 %v1359_v5  ;;  %v1367_v13 = vld [vmem:[%s2009_s1 + $0xe0] sm:$0xff]   ;;  %v1371_v17 = vld [vmem:[%s2009_s1 + $0xd8] sm:$0xff]   ;;  %v1375_v21 = vld [vmem:[%s2009_s1 + $0xd0] sm:$0xff]  }
   0x7   :  { %v1368_v14 = vld [vmem:[%s2009_s1 + $0x20] sm:$0xff]   ;;  %v1372_v18 = vld [vmem:[%s2009_s1 + $0x18] sm:$0xff]   ;;  %v1376_v22 = vld [vmem:[%s2009_s1 + $0x10] sm:$0xff]  }
   0x8   :  { %1185 = vmatpush3.bf16.msra.mxu0 %v1360_v6  ;;  %v1369_v15 = vld [vmem:[%s2009_s1 + $0xa0] sm:$0xff]   ;;  %v1373_v19 = vld [vmem:[%s2009_s1 + $0x98] sm:$0xff]   ;;  %v1377_v23 = vld [vmem:[%s2009_s1 + $0x90] sm:$0xff]  }
   0x9   :  { %1249 = vmatpush3.bf16.msra.mxu1 %v1361_v7  ;;  %1186 = vmatprep.subr.bf16.mxu0 %v1362_v8  ;;  %v1378_v24 = vld [vmem:[%s2009_s1 + $0x48] sm:$0xff]   ;;  %v1382_v28 = vld [vmem:[%s2009_s1 + $0x40] sm:$0xff]   ;;  %v1392_v36 = vld [vmem:[%s2009_s1 + $0x118] sm:$0xff]  }
   0xa   :  { %1250 = vmatprep.subr.bf16.mxu1 %v1363_v9  ;;  %v1379_v25 = vld [vmem:[%s2009_s1 + $0xc8] sm:$0xff]   ;;  %v1383_v29 = vld [vmem:[%s2009_s1 + $0xc0] sm:$0xff]   ;;  %v1405_v42 = vld [vmem:[%s2009_s1 + $0x110] sm:$0xff]  }
   0xb   :  { %v1380_v26 = vld [vmem:[%s2009_s1 + $0x8] sm:$0xff]   ;;  %v1384_v30 = vld [vmem:[%s2009_s1] sm:$0xff]   ;;  %v1401_v43 = vld [vmem:[%s2010_s0 + $0x5c] ss:$20 sps:$4 sm:$0xff]  }
   0xc   :  { %1187 = vmatpush3.bf16.msra.mxu0 %v1364_v10  ;;  %v1381_v27 = vld [vmem:[%s2009_s1 + $0x88] sm:$0xff]   ;;  %v1385_v31 = vld [vmem:[%s2009_s1 + $0x80] sm:$0xff]   ;;  %v1406_v47 = vld [vmem:[%s2010_s0 + $0x7c] ss:$20 sps:$4 sm:$0xff]  }
   0xd   :  { %1251 = vmatpush3.bf16.msra.mxu1 %v1365_v11  ;;  %1188 = vmatprep.subr.bf16.mxu0 %v1366_v12  ;;  %v1386_v32 = vld [vmem:[%s2010_s0] ss:$20 sps:$4 sm:$0xff]   ;;  %v1388_v33 = vld [vmem:[%s2010_s0 + $0x4] ss:$20 sps:$4 sm:$0xff]   ;;  %v1389_v34 = vld [vmem:[%s2010_s0 + $0x8] ss:$20 sps:$4 sm:$0xff]  }
   0xe   :  { %1252 = vmatprep.subr.bf16.mxu1 %v1367_v13  ;;  %v1391_v35 = vld [vmem:[%s2010_s0 + $0xc] ss:$20 sps:$4 sm:$0xff]   ;;  %618 = vmatprep.mubr.bf16.mxu0 %v1388_v33  ;;  %v1395_v38 = vld [vmem:[%s2010_s0 + $0x34] ss:$20 sps:$4 sm:$0xff]   ;;  %v1398_v40 = vld [vmem:[%s2010_s0 + $0x30] ss:$20 sps:$4 sm:$0xff]  }
   0xf   :  { %715 = vmatprep.mubr.bf16.mxu1 %v1391_v35  ;;  %v1393_v37 = vld [vmem:[%s2010_s0 + $0x2c] ss:$20 sps:$4 sm:$0xff]   ;;  %v1397_v39 = vld [vmem:[%s2010_s0 + $0x28] ss:$20 sps:$4 sm:$0xff]   ;;  %v1403_v44 = vld [vmem:[%s2010_s0 + $0x50] ss:$20 sps:$4 sm:$0xff]  }
  0x10   :  { %1189 = vmatpush3.bf16.msra.mxu0 %v1368_v14  ;;  %v1399_v41 = vld [vmem:[%s2010_s0 + $0x54] ss:$20 sps:$4 sm:$0xff]   ;;  %v1404_v45 = vld [vmem:[%s2010_s0 + $0x58] ss:$20 sps:$4 sm:$0xff]   ;;  %v1431_v49 = vld [vmem:[%s2009_s1 + $0x100] sm:$0xff]  }
  0x11   :  { %1253 = vmatpush3.bf16.msra.mxu1 %v1369_v15  ;;  %1190 = vmatprep.subr.bf16.mxu0 %v1370_v16  ;;  %v1418_v46 = vld [vmem:[%s2009_s1 + $0x108] sm:$0xff]   ;;  %v1408_v48 = vld [vmem:[%s2010_s0 + $0x84] ss:$20 sps:$4 sm:$0xff]   ;;  %v1411_v51 = vld [vmem:[%s2010_s0 + $0x80] ss:$20 sps:$4 sm:$0xff]  }
  0x12   :  { %1254 = vmatprep.subr.bf16.mxu1 %v1371_v17  ;;  %v1410_v50 = vld [vmem:[%s2010_s0 + $0x78] ss:$20 sps:$4 sm:$0xff]   ;;  %v1416_v54 = vld [vmem:[%s2010_s0 + $0xa0] ss:$20 sps:$4 sm:$0xff]   ;;  %v1417_v55 = vld [vmem:[%s2010_s0 + $0xa8] ss:$20 sps:$4 sm:$0xff]  }
  0x13   :  { %v1412_v52 = vld [vmem:[%s2010_s0 + $0xa4] ss:$20 sps:$4 sm:$0xff]   ;;  %v1414_v53 = vld [vmem:[%s2010_s0 + $0xac] ss:$20 sps:$4 sm:$0xff]   ;;  %v1421_v57 = vld [vmem:[%s2010_s0 + $0xd4] ss:$20 sps:$4 sm:$0xff]  }
  0x14   :  { %1191 = vmatpush3.bf16.msra.mxu0 %v1372_v18  ;;  %v1419_v56 = vld [vmem:[%s2010_s0 + $0xcc] ss:$20 sps:$4 sm:$0xff]   ;;  %v1423_v58 = vld [vmem:[%s2010_s0 + $0xc8] ss:$20 sps:$4 sm:$0xff]   ;;  %v1424_v59 = vld [vmem:[%s2010_s0 + $0xd0] ss:$20 sps:$4 sm:$0xff]  }
  0x15   :  { %1255 = vmatpush3.bf16.msra.mxu1 %v1373_v19  ;;  %1192 = vmatprep.subr.bf16.mxu0 %v1374_v20  ;;  %v1425_v60 = vld [vmem:[%s2010_s0 + $0xf4] ss:$20 sps:$4 sm:$0xff]   ;;  %v1427_v61 = vld [vmem:[%s2010_s0 + $0xfc] ss:$20 sps:$4 sm:$0xff]   ;;  %v1430_v63 = vld [vmem:[%s2010_s0 + $0xf8] ss:$20 sps:$4 sm:$0xff]  }
  0x16   :  { %1256 = vmatprep.subr.bf16.mxu1 %v1375_v21  ;;  %v1429_v62 = vld [vmem:[%s2010_s0 + $0xf0] ss:$20 sps:$4 sm:$0xff]   ;;  %v1436_v2 = vld [vmem:[%s2010_s0 + $0x118] ss:$20 sps:$4 sm:$0xff]   ;;  %v1437_v3 = vld [vmem:[%s2010_s0 + $0x120] ss:$20 sps:$4 sm:$0xff]  }
  0x17   :  { %v1432_v0 = vld [vmem:[%s2010_s0 + $0x11c] ss:$20 sps:$4 sm:$0xff]   ;;  %v1434_v1 = vld [vmem:[%s2010_s0 + $0x124] ss:$20 sps:$4 sm:$0xff]   ;;  %v1442_v8 = vld [vmem:[%s2010_s0 + $0x60] ss:$20 sps:$4 sm:$0xff]  }
  0x18   :  { %1193 = vmatpush3.bf16.msra.mxu0 %v1376_v22  ;;  %v1438_v4 = vld [vmem:[%s2010_s0 + $0x10] ss:$20 sps:$4 sm:$0xff]   ;;  %v1440_v6 = vld [vmem:[%s2010_s0 + $0x38] ss:$20 sps:$4 sm:$0xff]   ;;  %v1443_v9 = vld [vmem:[%s2010_s0 + $0x100] ss:$20 sps:$4 sm:$0xff]  }
  0x19   :  { %1257 = vmatpush3.bf16.msra.mxu1 %v1377_v23  ;;  %1194 = vmatprep.subr.bf16.mxu0 %v1378_v24  ;;  %v1439_v5 = vld [vmem:[%s2010_s0 + $0xb0] ss:$20 sps:$4 sm:$0xff]   ;;  %v1441_v7 = vld [vmem:[%s2010_s0 + $0xd8] ss:$20 sps:$4 sm:$0xff]   ;;  %v1444_v10 = vld [vmem:[%s2010_s0 + $0x88] ss:$20 sps:$4 sm:$0xff]  }
  0x1a   :  { %1258 = vmatprep.subr.bf16.mxu1 %v1379_v25  ;;  %v1445_v11 = vld [vmem:[%s2010_s0 + $0x128] ss:$20 sps:$4 sm:$0xff]  }
  0x1c   :  { %1195 = vmatpush3.bf16.msra.mxu0 %v1380_v26 }
  0x1d   :  { %1259 = vmatpush3.bf16.msra.mxu1 %v1381_v27  ;;  %1196 = vmatprep.subr.bf16.mxu0 %v1382_v28 }
  0x1e   :  { %1260 = vmatprep.subr.bf16.mxu1 %v1383_v29 }
  0x20   :  { %1197 = vmatpush3.bf16.msra.mxu0 %v1384_v30 }
  0x21   :  { %1261 = vmatpush3.bf16.msra.mxu1 %v1385_v31  ;;  %1322 = vmatprep.subr.bf16.mxu0 %v1392_v36 }
  0x22   :  { %1346 = vmatprep.subr.bf16.mxu1 %v1392_v36 }
  0x23   :  { %619 = vmatmul.mubr.bf16.vlgmr.msra.gmra.mxu0 %v1386_v32 }
  0x24   :  { %716 = vmatmul.mubr.bf16.vlgmr.msra.gmra.mxu1 %v1389_v34  ;;  %1323 = vmatpush3.bf16.msra.mxu0 %v1392_v36 }
  0x25   :  { %1350 = vmatpush3.bf16.msra.mxu1 %v1392_v36  ;;  %626 = vmatprep.mubr.bf16.mxu0 %v1393_v37 }
  0x26   :  { %723 = vmatprep.mubr.bf16.mxu1 %v1395_v38  ;;  %1324 = vmatprep.subr.bf16.mxu0 %v1405_v42 }
  0x27   :  { %1347 = vmatprep.subr.bf16.mxu1 %v1405_v42 }
  0x28   :  { %1325 = vmatpush3.bf16.msra.mxu0 %v1405_v42 }
  0x29   :  { %1351 = vmatpush3.bf16.msra.mxu1 %v1405_v42  ;;  %1326 = vmatprep.subr.bf16.mxu0 %v1418_v46 }
  0x2a   :  { %1348 = vmatprep.subr.bf16.mxu1 %v1418_v46 }
  0x2b   :  { %627 = vmatmul.mubr.bf16.gmra.mxu0 %v1397_v39 }
  0x2c   :  { %724 = vmatmul.mubr.bf16.gmra.mxu1 %v1398_v40  ;;  %634 = vmatprep.mubr.bf16.mxu0 %v1399_v41 }
  0x2d   :  { %731 = vmatprep.mubr.bf16.mxu1 %v1401_v43  ;;  %1327 = vmatpush3.bf16.msra.mxu0 %v1418_v46 }
  0x2e   :  { %1352 = vmatpush3.bf16.msra.mxu1 %v1418_v46  ;;  %1328 = vmatprep.subr.bf16.mxu0 %v1431_v49 }
  0x2f   :  { %1349 = vmatprep.subr.bf16.mxu1 %v1431_v49 }
  0x31   :  { %1329 = vmatpush3.bf16.msra.mxu0 %v1431_v49 }
  0x32   :  { %1353 = vmatpush3.bf16.msra.mxu1 %v1431_v49 }
  0x33   :  { %635 = vmatmul.mubr.bf16.gmra.mxu0 %v1403_v44 }
  0x34   :  { %732 = vmatmul.mubr.bf16.gmra.mxu1 %v1404_v45  ;;  %642 = vmatprep.mubr.bf16.mxu0 %v1406_v47 }
  0x35   :  { %739 = vmatprep.mubr.bf16.mxu1 %v1408_v48 }
  0x3b   :  { %643 = vmatmul.mubr.bf16.gmra.mxu0 %v1410_v50 }
  0x3c   :  { %740 = vmatmul.mubr.bf16.gmra.mxu1 %v1411_v51  ;;  %650 = vmatprep.mubr.bf16.mxu0 %v1412_v52 }
  0x3d   :  { %747 = vmatprep.mubr.bf16.mxu1 %v1414_v53 }
  0x43   :  { %651 = vmatmul.mubr.bf16.gmra.mxu0 %v1416_v54 }
  0x44   :  { %748 = vmatmul.mubr.bf16.gmra.mxu1 %v1417_v55  ;;  %658 = vmatprep.mubr.bf16.mxu0 %v1419_v56 }
  0x45   :  { %755 = vmatprep.mubr.bf16.mxu1 %v1421_v57 }
  0x4b   :  { %659 = vmatmul.mubr.bf16.gmra.mxu0 %v1423_v58  ;;  %v1778_v58 = vld [vmem:[%s2011_s3 + $0x8] sm:$0xff]  }
  0x4c   :  { %756 = vmatmul.mubr.bf16.gmra.mxu1 %v1424_v59  ;;  %666 = vmatprep.mubr.bf16.mxu0 %v1425_v60  ;;  %2019 = vst [vmem:[#allocation3_spill] sm:$0xff] %v1778_v58  ;;  %v1783_v59 = vld [vmem:[%s2011_s3 + $0x28] sm:$0xff]   ;;  %v1788_v60 = vld [vmem:[%s2011_s3] sm:$0xff]  }
  0x4d   :  { %763 = vmatprep.mubr.bf16.mxu1 %v1427_v61  ;;  %2020 = vst [vmem:[#allocation4_spill] sm:$0xff] %v1783_v59 }
  0x53   :  { %667 = vmatmul.mubr.bf16.gmra.mxu0 %v1429_v62  ;;  %v1793_v62 = vld [vmem:[%s2011_s3 + $0x20] sm:$0xff]  }
  0x54   :  { %764 = vmatmul.mubr.bf16.gmra.mxu1 %v1430_v63  ;;  %674 = vmatprep.mubr.bf16.mxu0 %v1432_v0 }
  0x55   :  { %771 = vmatprep.mubr.bf16.mxu1 %v1434_v1  ;;  %v1800_v1 = vld [vmem:[%s2012_s2] ss:$0 sm:$0xff] }
  0x5b   :  { %675 = vmatmul.mubr.bf16.gmra.mxu0 %v1436_v2 }
  0x5c   :  { %772 = vmatmul.mubr.bf16.gmra.mxu1 %v1437_v3  ;;  %1330 = vmatprep.mubr.msk.bf16.mxu0 %vm561_vm0, %v1438_v4  ;;  %v1146_v3 = vunpack.c.h.bf16 %v1788_v60 }
  0x5d   :  { %1338 = vmatprep.mubr.msk.bf16.mxu1 %vm561_vm0, %v1439_v5  ;;  %v1828_v5 = vld [vmem:[%s2011_s3 + $0x30] sm:$0xff]  }
  0x63   :  { %1331 = vmatmul.mubr.msk.bf16.vlgmr.msra.gmra.mxu0 %vm561_vm0, %v1440_v6  ;;  %v1808_v6 = vld [vmem:[%s2011_s3 + $0x18] sm:$0xff]  }
  0x64   :  { %1339 = vmatmul.mubr.msk.bf16.vlgmr.msra.gmra.mxu1 %vm561_vm0, %v1441_v7  ;;  %1334 = vmatprep.mubr.msk.bf16.mxu0 %vm561_vm0, %v1442_v8  ;;  %v1813_v7 = vld [vmem:[%s2011_s3 + $0x38] sm:$0xff]  }
  0x65   :  { %1342 = vmatprep.mubr.msk.bf16.mxu1 %vm561_vm0, %v1443_v9 }
  0x6b   :  { %1335 = vmatmul.mubr.msk.bf16.gmra.mxu0 %vm561_vm0, %v1444_v10  ;;  %v1162_v10 = vunpack.c.h.bf16 %v1793_v62 }
  0x6c   :  { %1343 = vmatmul.mubr.msk.bf16.gmra.mxu1 %vm561_vm0, %v1445_v11 }
  0xe3   :  { %v1198_v12 = vpop.f32.mrf.mxu0 }
  0xe4   :  { %v1707_v13 = vpop.f32.mrf.mxu1 }
  0xe5   :  { %v1199_v14 = vpop.f32.mrf.mxu0 }
  0xe6   :  { %v1709_v15 = vpop.f32.mrf.mxu1  ;;  %v1200_v63 = vadd.f32 %v1199_v14, %v1198_v12  ;;  %v1823_v14 = vld [vmem:[%s2011_s3 + $0x10] sm:$0xff]  }
  0xe7   :  { %v1201_v16 = vpop.f32.mrf.mxu0 }
  0xe8   :  { %v1711_v17 = vpop.f32.mrf.mxu1  ;;  %v621_v11 = vadd.f32 %v1200_v63, %v1800_v1 }
  0xe9   :  { %v1202_v18 = vpop.f32.mrf.mxu0 }
  0xea   :  { %v1713_v19 = vpop.f32.mrf.mxu1  ;;  %v1203_v8 = vadd.f32 %v1202_v18, %v1201_v16 }
  0xeb   :  { %v1204_v20 = vpop.f32.mrf.mxu0 }
  0xec   :  { %v1715_v21 = vpop.f32.mrf.mxu1 }
  0xed   :  { %v1205_v22 = vpop.f32.mrf.mxu0 }
  0xee   :  { %v1717_v23 = vpop.f32.mrf.mxu1  ;;  %v1206_v4 = vadd.f32 %v1205_v22, %v1204_v20 }
  0xef   :  { %v1207_v24 = vpop.f32.mrf.mxu0 }
  0xf0   :  { %v1719_v25 = vpop.f32.mrf.mxu1 }
  0xf1   :  { %v1208_v26 = vpop.f32.mrf.mxu0 }
  0xf2   :  { %v1721_v27 = vpop.f32.mrf.mxu1  ;;  %v1209_v16 = vadd.f32 %v1208_v26, %v1207_v24  ;;  %v1264_v26 = vadd.f32 %v1709_v15, %v1707_v13  ;;  %v1267_v13 = vadd.f32 %v1713_v19, %v1711_v17 }
  0xf3   :  { %v1210_v28 = vpop.f32.mrf.mxu0 }
  0xf4   :  { %v1723_v29 = vpop.f32.mrf.mxu1  ;;  %v632_v20 = vadd.f32 %v1209_v16, %v1800_v1  ;;  %v1273_v16 = vadd.f32 %v1721_v27, %v1719_v25 }
  0xf5   :  { %v1211_v30 = vpop.f32.mrf.mxu0 }
  0xf6   :  { %v1725_v31 = vpop.f32.mrf.mxu1  ;;  %v1212_v12 = vadd.f32 %v1211_v30, %v1210_v28  ;;  %v624_v28 = vadd.f32 %v1203_v8, %v1800_v1  ;;  %v718_v8 = vadd.f32 %v1264_v26, %v621_v11 }
  0xf7   :  { %v1727_v32 = vpop.f32.mrf.mxu0  ;;  %v1276_v17 = vadd.f32 %v1725_v31, %v1723_v29 }
  0xf8   :  { %v1729_v33 = vpop.f32.mrf.mxu1  ;;  %v637_v15 = vadd.f32 %v1212_v12, %v1800_v1  ;;  %v1870_v11 = vadd.f32 %v1267_v13, %v624_v28 }
  0xf9   :  { %v1731_v34 = vpop.f32.mrf.mxu0 }
  0xfa   :  { %v1733_v35 = vpop.f32.mrf.mxu1  ;;  %v1215_v30 = vadd.f32 %v1731_v34, %v1727_v32 }
  0xfb   :  { %v1735_v36 = vpop.f32.mrf.mxu0 }
  0xfc   :  { %v1737_v37 = vpop.f32.mrf.mxu1  ;;  %v640_v19 = vadd.f32 %v1215_v30, %v1800_v1 }
  0xfd   :  { %v1739_v38 = vpop.f32.mrf.mxu0 }
  0xfe   :  { %v1741_v39 = vpop.f32.mrf.mxu1  ;;  %v1218_v22 = vadd.f32 %v1739_v38, %v1735_v36 }
  0xff   :  { %v1743_v40 = vpop.f32.mrf.mxu0 }
 0x100   :  { %v1745_v41 = vpop.f32.mrf.mxu1 }
 0x101   :  { %v1747_v42 = vpop.f32.mrf.mxu0 }
 0x102   :  { %v1749_v43 = vpop.f32.mrf.mxu1  ;;  %v1221_v32 = vadd.f32 %v1747_v42, %v1743_v40 }
 0x103   :  { %v1751_v44 = vpop.f32.mrf.mxu0 }
 0x104   :  { %v1753_v45 = vpop.f32.mrf.mxu1  ;;  %v648_v29 = vadd.f32 %v1221_v32, %v1800_v1 }
 0x105   :  { %v1755_v46 = vpop.f32.mrf.mxu0 }
 0x106   :  { %v1757_v47 = vpop.f32.mrf.mxu1  ;;  %v1224_v36 = vadd.f32 %v1755_v46, %v1751_v44  ;;  %v729_v44 = vadd.f32 %v1273_v16, %v632_v20  ;;  %v1279_v46 = vadd.f32 %v1733_v35, %v1729_v33 }
 0x107   :  { %v1759_v48 = vpop.f32.mrf.mxu0 }
 0x108   :  { %v1761_v49 = vpop.f32.mrf.mxu1 }
 0x109   :  { %v1763_v50 = vpop.f32.mrf.mxu0 }
 0x10a   :  { %v1765_v51 = vpop.f32.mrf.mxu1  ;;  %v1227_v40 = vadd.f32 %v1763_v50, %v1759_v48  ;;  %v1282_v48 = vadd.f32 %v1741_v39, %v1737_v37  ;;  %v653_v50 = vadd.f32 %v1224_v36, %v1800_v1 }
 0x10b   :  { %v1228_v52 = vpop.f32.mrf.mxu0 }
 0x10c   :  { %v1767_v53 = vpop.f32.mrf.mxu1  ;;  %v656_v33 = vadd.f32 %v1227_v40, %v1800_v1 }
 0x10d   :  { %v1229_v54 = vpop.f32.mrf.mxu0 }
 0x10e   :  { %v1769_v55 = vpop.f32.mrf.mxu1  ;;  %v1230_v38 = vadd.f32 %v1229_v54, %v1228_v52  ;;  %v1877_v54 = vadd.f32 %v1276_v17, %v637_v15 }
 0x10f   :  { %v1771_v56 = vpop.f32.mrf.mxu0  ;;  %v1294_v37 = vadd.f32 %v1769_v55, %v1767_v53 }
 0x110   :  { %v1773_v57 = vpop.f32.mrf.mxu1  ;;  %v661_v12 = vadd.f32 %v1230_v38, %v1800_v1 }
 0x111   :  { %2018 = vst [vmem:[#allocation2_spill] sm:$0xff] %v1773_v57  ;;  %v1232_v61 = vpop.f32.mrf.mxu0  ;;  %v629_v57 = vadd.f32 %v1206_v4, %v1800_v1  ;;  %v1270_v4 = vadd.f32 %v1717_v23, %v1715_v21  ;;  %v645_v21 = vadd.f32 %v1218_v22, %v1800_v1 }
 0x112   :  { %v1795_v0 = vpop.f32.mrf.mxu1  ;;  %v1233_v23 = vadd.f32 %v1232_v61, %v1771_v56  ;;  %v758_v55 = vadd.f32 %v1294_v37, %v661_v12 }
 0x113   :  { %2021 = vst [vmem:[#allocation5_spill] sm:$0xff] %v1795_v0  ;;  %v1234_v2 = vpop.f32.mrf.mxu0  ;;  %v726_v27 = vadd.f32 %v1270_v4, %v629_v57  ;;  %v1285_v57 = vadd.f32 %v1749_v43, %v1745_v41  ;;  %v1291_v41 = vadd.f32 %v1765_v51, %v1761_v49 }
 0x114   :  { %v1815_v9 = vpop.f32.mrf.mxu1  ;;  %v664_v39 = vadd.f32 %v1233_v23, %v1800_v1  ;;  %v2026_v23 = vld [vmem:[#allocation3_spill] sm:$0xff] }
 0x115   :  { %2022 = vst [vmem:[#allocation6_spill] sm:$0xff] %v1815_v9  ;;  %v1235_v18 = vpop.f32.mrf.mxu0  ;;  %v1154_v9 = vunpack.c.h.bf16 %v1823_v14  ;;  %v1896_v26 = vadd.f32 %v1285_v57, %v648_v29  ;;  %v753_v16 = vadd.f32 %v1291_v41, %v656_v33 }
 0x116   :  { %v1833_v59 = vpop.f32.mrf.mxu1  ;;  %v1236_v31 = vadd.f32 %v1235_v18, %v1234_v2  ;;  %v1886_v2 = vadd.f32 %v1279_v46, %v640_v19  ;;  %v1288_v18 = vadd.f32 %v1757_v47, %v1753_v45 }
 0x117   :  { %v1237_v0 = vpop.f32.mrf.mxu0 }
 0x118   :  { %v1846_v63 = vpop.f32.mrf.mxu1  ;;  %v669_v43 = vadd.f32 %v1236_v31, %v1800_v1  ;;  %v2023_v28 = vld [vmem:[#allocation2_spill] sm:$0xff]  ;;  %v750_v13 = vadd.f32 %v1288_v18, %v653_v50  ;;  %v2028_v50 = vld [vmem:[#allocation4_spill] sm:$0xff] }
 0x119   :  { %v1238_v24 = vpop.f32.mrf.mxu0  ;;  %v2029_v12 = vunpack.c.l.bf16 %v2028_v50 }
 0x11a   :  { %v1302_v34 = vpop.f32.mrf.mxu1  ;;  %v1239_v56 = vadd.f32 %v1238_v24, %v1237_v0  ;;  %v742_v0 = vadd.f32 %v1282_v48, %v645_v21  ;;  %v2024_v30 = vld [vmem:[#allocation5_spill] sm:$0xff] }
 0x11b   :  { %v1240_v58 = vpop.f32.mrf.mxu0  ;;  %v1297_v45 = vadd.f32 %v2024_v30, %v2023_v28  ;;  %v1303_v36 = vadd.f32 %v1302_v34, %v1846_v63 }
 0x11c   :  { %v1304_v42 = vpop.f32.mrf.mxu1  ;;  %v672_v47 = vadd.f32 %v1239_v56, %v1800_v1  ;;  %v2025_v15 = vld [vmem:[#allocation6_spill] sm:$0xff] }
 0x11d   :  { %v1241_v25 = vpop.f32.mrf.mxu0  ;;  %v1300_v32 = vadd.f32 %v1833_v59, %v2025_v15  ;;  %v761_v40 = vadd.f32 %v1297_v45, %v664_v39 }
 0x11e   :  { %v1305_v52 = vpop.f32.mrf.mxu1  ;;  %v1242_v35 = vadd.f32 %v1241_v25, %v1240_v58  ;;  %v2027_v25 = vunpack.c.l.bf16 %v2026_v23  ;;  %v1910_v57 = vadd.f32 %v1303_v36, %v672_v47 }
 0x11f   :  { %v1243_v61 = vpop.f32.mrf.mxu0  ;;  %v1306_v21 = vadd.f32 %v1305_v52, %v1304_v42  ;;  %v766_v48 = vadd.f32 %v1300_v32, %v669_v43  ;;  %v2032_v43 = vunpack.c.h.bf16 %v2026_v23 }
 0x120   :  { %v1307_v20 = vpop.f32.mrf.mxu1  ;;  %v677_v4 = vadd.f32 %v1242_v35, %v1800_v1 }
 0x121   :  { %v1244_v22 = vpop.f32.mrf.mxu0 }
 0x122   :  { %v1245_v58 = vadd.f32 %v1244_v22, %v1243_v61  ;;  %v1308_v24 = vpop.f32.mrf.mxu1  ;;  %v774_v52 = vadd.f32 %v1306_v21, %v677_v4  ;;  %v2035_v21 = vunpack.c.l.bf16 %v1813_v7 }
 0x123   :  { %v1332_v53 = vpop.f32.mrf.mxu0  ;;  %v1309_v59 = vadd.f32 %v1308_v24, %v1307_v20 }
 0x124   :  { %v823_v49 = vadd.f32 %v1332_v53, %v726_v27  ;;  %v1340_v51 = vpop.f32.mrf.mxu1  ;;  %v680_v38 = vadd.f32 %v1245_v58, %v1800_v1  ;;  %v2030_v1 = vunpack.c.l.bf16 %v1788_v60 }
 0x125   :  { %v855_v17 = vadd.f32 %v1340_v51, %v758_v55  ;;  %v814_v19 = vpop.f32.mrf.mxu0 }
 0x126   :  { %v911_v46 = vadd.f32 %v2027_v25, %v823_v49  ;;  %v815_v29 = vadd.f32 %v814_v19, %v718_v8  ;;  %v846_v31 = vpop.f32.mrf.mxu1  ;;  %v2031_v8 = vunpack.c.l.bf16 %v1793_v62  ;;  %v777_v39 = vadd.f32 %v1309_v59, %v680_v38 }
 0x127   :  { %v919_v27 = vadd.f32 %v2029_v12, %v855_v17  ;;  %v847_v56 = vadd.f32 %v846_v31, %v750_v13  ;;  %v1333_v61 = vpop.f32.mrf.mxu0  ;;  %v2036_v31 = vunpack.c.l.bf16 %v1823_v14 }
 0x128   :  { %v927_v63 = vmax.f32 %v911_v46, 0.0  ;;  %v909_v34 = vadd.f32 %v2030_v1, %v815_v29  ;;  %v826_v33 = vadd.f32 %v1333_v61, %v729_v44  ;;  %v1341_v42 = vpop.f32.mrf.mxu1  ;;  %v2033_v44 = vunpack.c.h.bf16 %v2028_v50 }
 0x129   :  { %v935_v35 = vmax.f32 %v919_v27, 0.0  ;;  %v917_v18 = vadd.f32 %v2031_v8, %v847_v56  ;;  %v858_v37 = vadd.f32 %v1341_v42, %v761_v40  ;;  %v817_v20 = vpop.f32.mrf.mxu0  ;;  %v2037_v56 = vunpack.c.l.bf16 %v1828_v5 }
 0x12a   :  { %v1129_v22 = vpack.c.bf16 %v927_v63, %v927_v63  ;;  %v925_v41 = vmax.f32 %v909_v34, 0.0  ;;  %v912_v58 = vadd.f32 %v2032_v43, %v826_v33  ;;  %v818_v24 = vadd.f32 %v817_v20, %v1870_v11  ;;  %v849_v28 = vpop.f32.mrf.mxu1 }
 0x12b   :  { %v1137_v30 = vpack.c.bf16 %v935_v35, %v935_v35  ;;  %v933_v45 = vmax.f32 %v917_v18, 0.0  ;;  %v920_v47 = vadd.f32 %v2033_v44, %v858_v37  ;;  %v850_v53 = vadd.f32 %v849_v28, %v753_v16  ;;  %v1336_v55 = vpop.f32.mrf.mxu0 }
 0x12c   :  { %1008 = vst.msk [vmem:[%s2013_s4 + $0x8] sm:$0xf] %vm1005_vm1, %v1129_v22  ;;  %v1127_v13 = vpack.c.bf16 %v925_v41, %v925_v41  ;;  %v928_v15 = vmax.f32 %v912_v58, 0.0  ;;  %v910_v32 = vadd.f32 %v1146_v3, %v818_v24  ;;  %v839_v4 = vadd.f32 %v1336_v55, %v742_v0  ;;  %v1344_v11 = vpop.f32.mrf.mxu1 }
 0x12d   :  { %1016 = vst.msk [vmem:[%s2013_s4 + $0x28] sm:$0xf] %vm1005_vm1, %v1137_v30  ;;  %v1135_v49 = vpack.c.bf16 %v933_v45, %v933_v45  ;;  %v936_v51 = vmax.f32 %v920_v47, 0.0  ;;  %v918_v16 = vadd.f32 %v1162_v10, %v850_v53  ;;  %v871_v36 = vadd.f32 %v1344_v11, %v774_v52  ;;  %v830_v38 = vpop.f32.mrf.mxu0 }
 0x12e   :  { %1006 = vst.msk [vmem:[%s2013_s4] sm:$0xf] %vm1005_vm1, %v1127_v13  ;;  %v1130_v60 = vpack.c.bf16 %v928_v15, %v928_v15  ;;  %v926_v3 = vmax.f32 %v910_v32, 0.0  ;;  %v2034_v0 = vunpack.c.l.bf16 %v1808_v6  ;;  %v831_v19 = vadd.f32 %v830_v38, %v1877_v54  ;;  %v862_v40 = vpop.f32.mrf.mxu1 }
 0x12f   :  { %1014 = vst.msk [vmem:[%s2013_s4 + $0x20] sm:$0xf] %vm1005_vm1, %v1135_v49  ;;  %v1138_v62 = vpack.c.bf16 %v936_v51, %v936_v51  ;;  %v934_v10 = vmax.f32 %v918_v16, 0.0  ;;  %v923_v23 = vadd.f32 %v2035_v21, %v871_v36  ;;  %v863_v25 = vadd.f32 %v862_v40, %v766_v48  ;;  %v1337_v46 = vpop.f32.mrf.mxu0 }
 0x130   :  { %v915_v17 = vadd.f32 %v2034_v0, %v839_v4  ;;  %1009 = vst.msk [vmem:[%s2013_s4 + $0xc] sm:$0xf] %vm1005_vm1, %v1130_v60  ;;  %v1128_v29 = vpack.c.bf16 %v926_v3, %v926_v3  ;;  %v913_v59 = vadd.f32 %v2036_v31, %v831_v19  ;;  %v842_v50 = vadd.f32 %v1337_v46, %v1896_v26  ;;  %v1345_v12 = vpop.f32.mrf.mxu1 }
 0x131   :  { %1017 = vst.msk [vmem:[%s2013_s4 + $0x2c] sm:$0xf] %vm1005_vm1, %v1138_v62  ;;  %v1136_v48 = vpack.c.bf16 %v934_v10, %v934_v10  ;;  %v939_v27 = vmax.f32 %v923_v23, 0.0  ;;  %v921_v61 = vadd.f32 %v2037_v56, %v863_v25  ;;  %v874_v63 = vadd.f32 %v1345_v12, %v777_v39  ;;  %v833_v1 = vpop.f32.mrf.mxu0 }
 0x132   :  { %v931_v54 = vmax.f32 %v915_v17, 0.0  ;;  %1007 = vst.msk [vmem:[%s2013_s4 + $0x4] sm:$0xf] %vm1005_vm1, %v1128_v29  ;;  %v929_v26 = vmax.f32 %v913_v59, 0.0  ;;  %v2038_v33 = vunpack.c.h.bf16 %v1808_v6  ;;  %v834_v52 = vadd.f32 %v833_v1, %v1886_v2  ;;  %v865_v35 = vpop.f32.mrf.mxu1 }
 0x133   :  { %1015 = vst.msk [vmem:[%s2013_s4 + $0x24] sm:$0xf] %vm1005_vm1, %v1136_v48  ;;  %v1141_v8 = vpack.c.bf16 %v939_v27, %v939_v27  ;;  %v937_v18 = vmax.f32 %v921_v61, 0.0  ;;  %v2039_v37 = vunpack.c.h.bf16 %v1813_v7  ;;  %v866_v39 = vadd.f32 %v865_v35, %v1910_v57 }
 0x134   :  { %v1133_v34 = vpack.c.bf16 %v931_v54, %v931_v54  ;;  %v916_v42 = vadd.f32 %v2038_v33, %v842_v50  ;;  %v1131_v6 = vpack.c.bf16 %v929_v26, %v929_v26  ;;  %v914_v22 = vadd.f32 %v1154_v9, %v834_v52 }
 0x135   :  { %v924_v20 = vadd.f32 %v2039_v37, %v874_v63  ;;  %1020 = vst.msk [vmem:[%s2013_s4 + $0x38] sm:$0xf] %vm1005_vm1, %v1141_v8  ;;  %v1139_v41 = vpack.c.bf16 %v937_v18, %v937_v18  ;;  %v2040_v43 = vunpack.c.h.bf16 %v1828_v5 }
 0x136   :  { %1012 = vst.msk [vmem:[%s2013_s4 + $0x18] sm:$0xf] %vm1005_vm1, %v1133_v34  ;;  %v932_v2 = vmax.f32 %v916_v42, 0.0  ;;  %1010 = vst.msk [vmem:[%s2013_s4 + $0x10] sm:$0xf] %vm1005_vm1, %v1131_v6  ;;  %v930_v24 = vmax.f32 %v914_v22, 0.0 }
 0x137   :  { %v940_v7 = vmax.f32 %v924_v20, 0.0  ;;  %v922_v57 = vadd.f32 %v2040_v43, %v866_v39  ;;  %1018 = vst.msk [vmem:[%s2013_s4 + $0x30] sm:$0xf] %vm1005_vm1, %v1139_v41 }
 0x138   :  { %v1134_v58 = vpack.c.bf16 %v932_v2, %v932_v2  ;;  %v1132_v5 = vpack.c.bf16 %v930_v24, %v930_v24 }
 0x139   :  { %v1142_v9 = vpack.c.bf16 %v940_v7, %v940_v7  ;;  %v938_v14 = vmax.f32 %v922_v57, 0.0 }
 0x13a   :  { %1013 = vst.msk [vmem:[%s2013_s4 + $0x1c] sm:$0xf] %vm1005_vm1, %v1134_v58  ;;  %1011 = vst.msk [vmem:[%s2013_s4 + $0x14] sm:$0xf] %vm1005_vm1, %v1132_v5 }
 0x13b   :  { %1021 = vst.msk [vmem:[%s2013_s4 + $0x3c] sm:$0xf] %vm1005_vm1, %v1142_v9  ;;  %v1140_v28 = vpack.c.bf16 %v938_v14, %v938_v14 }
 0x13d   :  { %1019 = vst.msk [vmem:[%s2013_s4 + $0x34] sm:$0xf] %vm1005_vm1, %v1140_v28 }

// kernel: _lambda_.19
= control target key start
LH: loop header
LB: loop body
LE: loop exit
PB: predicated region body
PF: predicated region fallthrough
CT: control target
= control target key end

     0   :  { %v294_v1 = vmov 0.0   ;;  %vm295_vm0 = vmmov 0   ;;  %vm47_vm1 = vcmask 523264   ;;  %s397_s0 = inlined_call_operand.vmem [shape: bf16[2,64,64], index: 0, kind: input, shape index: {}]   ;;  %s398_s1 = inlined_call_operand.vmem [shape: f32[64,10], index: 1, kind: input, shape index: {}]   ;;  %s399_s2 = inlined_call_operand.vmem [shape: f32[1,10], index: 2, kind: input, shape index: {}]   ;;  %s400_s3 = inlined_call_operand.hbm [shape: f32[2,10], index: 3, kind: output, shape index: {}]  }
   0x1   :  { %v100_v0 = vld [vmem:[%s398_s1 + $0x38] sm:$0xff]  ;;  %250 = vmatprep.subr.mxu0 %v294_v1  ;;  %v99_v2 = vld [vmem:[%s398_s1 + $0x30] sm:$0xff]  ;;  %266 = vmatprep.mubr.msk.f32.mxu0 %vm295_vm0, %v294_v1  ;;  %v203_v3 = vld [vmem:[%s397_s0] sm:$0xff]  }
   0x2   :  { %251 = vmatpush3.msra.mxu0 %v100_v0  ;;  %v98_v4 = vld [vmem:[%s398_s1 + $0x28] sm:$0xff]  ;;  %v204_v5 = vunpack.c.l.bf16 %v203_v3  ;;  %v205_v6 = vunpack.c.h.bf16 %v203_v3  ;;  %v235_v9 = vld [vmem:[%s397_s0 + $0x10] sm:$0xff]   ;;  %v237_v10 = vld [vmem:[%s397_s0 + $0x20] sm:$0xff]  }
   0x3   :  { %252 = vmatprep.subr.mxu0 %v294_v1  ;;  %v234_v7 = vld [vmem:[%s397_s0 + $0x8] sm:$0xff]   ;;  %v97_v12 = vld [vmem:[%s398_s1 + $0x20] sm:$0xff]  ;;  %v220_v14 = vunpack.c.l.bf16 %v237_v10 }
   0x4   :  { %253 = vmatpush3.msra.mxu0 %v99_v2  ;;  %v208_v8 = vunpack.c.l.bf16 %v234_v7  ;;  %v238_v11 = vld [vmem:[%s397_s0 + $0x28] sm:$0xff]   ;;  %v209_v13 = vunpack.c.h.bf16 %v234_v7 }
   0x5   :  { %254 = vmatprep.subr.mxu0 %v294_v1 }
   0x6   :  { %8 = vsyncpa [#allocation3], 0  ;;  %255 = vmatpush3.msra.mxu0 %v98_v4  ;;  %v221_v15 = vunpack.c.h.bf16 %v237_v10  ;;  %v224_v16 = vunpack.c.l.bf16 %v238_v11  ;;  %v96_v17 = vld [vmem:[%s398_s1 + $0x18] sm:$0xff]  ;;  %v212_v18 = vunpack.c.l.bf16 %v235_v9  ;;  %v239_v19 = vld [vmem:[%s397_s0 + $0x30] sm:$0xff]   ;;  %v48_v20 = vsel %vm47_vm1, %v204_v5, 0.0  ;;  %s296_s17 = smov [#allocation2]  }
   0x7   :  { %256 = vmatprep.subr.mxu0 %v294_v1  ;;  %v49_v21 = vsel %vm47_vm1, %v205_v6, 0.0  ;;  %v236_v22 = vld [vmem:[%s397_s0 + $0x18] sm:$0xff]   ;;  %v225_v23 = vunpack.c.h.bf16 %v238_v11  ;;  %v51_v25 = vsel %vm47_vm1, %v208_v8, 0.0  ;;  %v95_v26 = vld [vmem:[%s398_s1 + $0x10] sm:$0xff]  ;;  %v213_v27 = vunpack.c.h.bf16 %v235_v9  ;;  %v94_v34 = vld [vmem:[%s398_s1 + $0x8] sm:$0xff]  ;;  %s192_s18 = sshll.u32 %s296_s17, 4  ;;  %s193_s18 = int_to_ptr.vmem [resolvable:$true] %s192_s18 }
   0x8   :  { %257 = vmatpush3.msra.mxu0 %v97_v12  ;;  %v50_v24 = vadd.f32 %v49_v21, %v48_v20  ;;  %v53_v28 = vsel %vm47_vm1, %v209_v13, 0.0  ;;  %v69_v29 = vsel %vm47_vm1, %v220_v14, 0.0  ;;  %v228_v30 = vunpack.c.l.bf16 %v239_v19  ;;  %v240_v36 = vld [vmem:[%s397_s0 + $0x38] sm:$0xff]   ;;  %v93_v42 = vld [vmem:[%s398_s1] sm:$0xff]  ;;  %s272_s19 = scalar_lea.vmem %s193_s18, 32  ;;  %p277_p1 = scmp.lt.s32.totalorder %s193_s18, %s193_s18 }
   0x9   :  { %258 = vmatprep.subr.mxu0 %v294_v1  ;;  %v70_v32 = vsel %vm47_vm1, %v221_v15, 0.0  ;;  %v72_v33 = vsel %vm47_vm1, %v224_v16, 0.0  ;;  %v216_v35 = vunpack.c.l.bf16 %v236_v22  ;;  %v55_v37 = vsel %vm47_vm1, %v212_v18, 0.0  ;;  %v200_v14 = vld [vmem:[%s399_s2] ss:$0 sm:$0xff]  ;;  %p273_p0 = scmp.ne.s32.totalorder %s193_s18, %s272_s19  ;;  %p278_p2 = scmp.lt.s32.totalorder %s272_s19, %s272_s19 }
   0xa   :  { %259 = vmatpush3.msra.mxu0 %v96_v17  ;;  %v52_v31 = vadd.f32 %v51_v25, %v50_v24  ;;  %v71_v38 = vadd.f32 %v70_v32, %v69_v29  ;;  %v229_v39 = vunpack.c.h.bf16 %v239_v19  ;;  %v74_v41 = vsel %vm47_vm1, %v225_v23, 0.0 }
   0xb   :  { %260 = vmatprep.subr.mxu0 %v294_v1  ;;  %v217_v43 = vunpack.c.h.bf16 %v236_v22  ;;  %v57_v44 = vsel %vm47_vm1, %v213_v27, 0.0  ;;  %v232_v46 = vunpack.c.l.bf16 %v240_v36  ;;  %v76_v48 = vsel %vm47_vm1, %v228_v30, 0.0  ;;  %p279_p3 = por %p278_p2, %p277_p1 }
   0xc   :  { %261 = vmatpush3.msra.mxu0 %v95_v26  ;;  %v54_v40 = vadd.f32 %v53_v28, %v52_v31  ;;  %v73_v45 = vadd.f32 %v72_v33, %v71_v38  ;;  %v59_v49 = vsel %vm47_vm1, %v216_v35, 0.0  ;;  %v233_v51 = vunpack.c.h.bf16 %v240_v36 }
   0xd   :  { %262 = vmatprep.subr.mxu0 %v294_v1  ;;  %v78_v53 = vsel %vm47_vm1, %v229_v39, 0.0  ;;  %v61_v54 = vsel %vm47_vm1, %v217_v43, 0.0  ;;  %v80_v57 = vsel %vm47_vm1, %v232_v46, 0.0  ;;  %vm110_vm2 = vcmask 1041409   ;;  %p280_p4 = pnand %p279_p3, %p273_p0 }
   0xe   :  { %263 = vmatpush3.msra.mxu0 %v94_v34  ;;  %v56_v47 = vadd.f32 %v55_v37, %v54_v40  ;;  %v75_v50 = vadd.f32 %v74_v41, %v73_v45  ;;  %v82_v60 = vsel %vm47_vm1, %v233_v51, 0.0  ;;  %vm184_vm3 = vcmask 74752  }
   0xf   :  { %264 = vmatprep.subr.mxu0 %v294_v1 }
  0x10   :  { %265 = vmatpush3.msra.mxu0 %v93_v42  ;;  %v58_v52 = vadd.f32 %v57_v44, %v56_v47  ;;  %v77_v55 = vadd.f32 %v76_v48, %v75_v50 }
  0x12   :  { %v60_v56 = vadd.f32 %v59_v49, %v58_v52  ;;  %v79_v58 = vadd.f32 %v78_v53, %v77_v55 }
  0x14   :  { %v62_v59 = vadd.f32 %v61_v54, %v60_v56  ;;  %v81_v61 = vadd.f32 %v80_v57, %v79_v58 }
  0x16   :  { %v63_v62 = vrot.slane %v62_v59, 4  ;;  %v83_v63 = vadd.f32 %v82_v60, %v81_v61 }
  0x18   :  { %v64_v0 = vadd.f32 %v63_v62, %v62_v59  ;;  %v84_v1 = vrot.slane %v83_v63, 4 }
  0x1a   :  { %v65_v2 = vrot.slane %v64_v0, 2  ;;  %v85_v3 = vadd.f32 %v84_v1, %v83_v63 }
  0x1c   :  { %v66_v4 = vadd.f32 %v65_v2, %v64_v0  ;;  %v86_v5 = vrot.slane %v85_v3, 2 }
  0x1e   :  { %v67_v6 = vrot.slane %v66_v4, 1  ;;  %v87_v7 = vadd.f32 %v86_v5, %v85_v3 }
  0x20   :  { %v68_v8 = vadd.f32 %v67_v6, %v66_v4  ;;  %v88_v9 = vrot.slane %v87_v7, 1 }
  0x22   :  { %v89_v10 = vadd.f32 %v88_v9, %v87_v7  ;;  %v91_v11 = vmul.f32 0.015625, %v68_v8 }
  0x24   :  { %v92_v12 = vmul.f32 0.015625, %v89_v10 }
  0x26   :  { %v111_v13 = vsel %vm110_vm2, %v92_v12, %v91_v11 }
  0x27   :  { %267 = vmatmul.mubr.msk.f32.vlgmr.msra.gmra.mxu0 %vm47_vm1, %v111_v13 }
  0xe7   :  { %v180_v15 = vpop.f32.mrf.mxu0 }
  0xe8   :  { %v181_v16 = vadd.f32 %v200_v14, %v180_v15 }
  0xe9   :  { %v268_v17 = vpop.f32.mrf.mxu0 }
  0xea   :  { %185 = vst.msk [vmem:[#allocation2] sm:$0x3] %vm184_vm3, %v181_v16 }
  0xeb   :  { %283 = shalt.err (!%p280_p4)
}
  0xec   :  { %195 = dma.vmem_to_hbm [thread:$0]  %s193_s18, 32, %s400_s3, [#allocation3]  }
  0xed   :  { %292 = dma.done.wait [#allocation3], 32  }
  0xee   :  { %293 = vsyncadd [#allocation3], 4294967264 }
  0xef   :  { %199 = vsyncpa [#allocation3], 1 }

</bundles_post_ra>
